<compile_context>
chip_gen: v5e
topology: v5e:2x2
jax: 0.10.0
libtpu: 0.0.40
codegen_flags: <defaults>
</compile_context>

<pallas_src>
import math
import functools

import jax
import jax.numpy as jnp
from jax.experimental import pallas as pl
from jax.experimental.pallas import tpu as pltpu

# ---------------- model hyperparameters (small, consistent with the module) ------------
TIME_DIM = 32                            # FourierFeatures output_size
HALF_DIM = TIME_DIM // 2
OBS_DIM = 32                             # obs_enc feature dim
ACT_DIM = 16                             # actions feature dim
IN_DIM = TIME_DIM + OBS_DIM + ACT_DIM    # MLPResNet in_dim = 80
HIDDEN_DIM = 32                          # MLPResNet hidden_dim
OUT_DIM = 16                             # MLPResNet out_dim
NUM_BLOCKS = 2

# lane-packed per-batch input layout: [ time | actions | obs | pad ]  (obs columns are
# zero on the broadcast-obs path and its contribution is hoisted to the wrapper)
COL_TIME = 0
COL_ACT = 1
COL_OBS = COL_ACT + ACT_DIM
IN_PACK = 64

OUT_PAD = 128                            # lane-dense output width (wrapper slices :OUT_DIM)

# Max batch tile: multiple of 256 (v6e/v7x MXU M-fill, also multiple of 128 for v5e).
# At TB_MAX=1024 total live activations + double-buffered I/O are ~2-3 MiB -> fine even
# against v7x's 64 MiB VMEM / 32 MiB default scoped limit.
TB_MAX = 1024

# "vector pack": one padded f32 row per small parameter vector.
VEC_COLS = 128                           # >= 4*HIDDEN_DIM (=128), 2*TIME_DIM, OUT_PAD
_VEC_FFK = 0                             # 2*pi * Fourier kernel     (HALF_DIM)
_VEC_CE_B1 = 1                           # cond_encoder L1 bias      (2*TIME_DIM)
_VEC_BLK0 = 2                            # per block: ln_g, ln_b, b1, b2
_VEC_OP_B = _VEC_BLK0 + 4 * NUM_BLOCKS   # output_proj bias (padded to OUT_PAD)
VEC_ROWS = ((_VEC_OP_B + 1 + 7) // 8) * 8


# ----------------------------- Pallas kernel --------------------------------------------
def _score_actor_kernel(num_blocks, xin_ref, xbase_ref,
                        ce_w1_ref, wfu_ref, win_ref,
                        blk_w1_ref, blk_w2_ref, op_w_ref,
                        vec_ref, out_ref):
    def vrow(r, n):                       # (1, n) f32 row of the vector pack
        return vec_ref[r:r + 1, :n]

    def dot(a, w_bf16):                   # bf16 MXU operands, f32 accumulation
        return jnp.dot(a.astype(jnp.bfloat16), w_bf16,
                       preferred_element_type=jnp.float32)

    xin = xin_ref[...]                                                   # (tb, IN_PACK) f32

    # FourierFeatures (learnable); 2*pi is pre-folded into the packed kernel row.
    f = xin[:, COL_TIME:COL_TIME + 1] * vrow(_VEC_FFK, HALF_DIM)         # (tb, half)
    cos_f = jnp.cos(f)
    sin_f = jnp.sin(f)

    # cond_encoder Linear1 on concat([cos, sin]) as two partial dots (no lane concat).
    h = dot(cos_f, ce_w1_ref[0]) + dot(sin_f, ce_w1_ref[1]) + vrow(_VEC_CE_B1, 2 * TIME_DIM)
    h = h * jax.nn.sigmoid(h)                                            # SiLU

    # cond_encoder Linear2 folded into input_proj (W_fused = ce_w2 @ ip_w_cond, f32 fold).
    # Actions (+ per-row obs) arrive via ONE packed-input dot against a zero-row-padded
    # weight (time/pad rows are zero, so no column slicing is needed).  The loop-invariant
    # pieces (ip_b + ce_b2 @ ip_w_cond [+ hoisted broadcast-obs product]) are in xbase.
    x = dot(h, wfu_ref[...]) + dot(xin, win_ref[...]) + xbase_ref[...]   # (tb, HIDDEN)

    # MLPResNet blocks
    for b in range(num_blocks):
        r0 = _VEC_BLK0 + 4 * b
        res = x
        # TODO(synk): dropout is identity in eval mode; no in-kernel RNG path implemented.
        # LayerNorm(features, eps=1e-6) -- biased variance, same as torch.
        mu = jnp.mean(x, axis=-1, keepdims=True)
        var = jnp.mean(jnp.square(x - mu), axis=-1, keepdims=True)
        xn = (x - mu) * jax.lax.rsqrt(var + 1e-6)
        xn = xn * vrow(r0, HIDDEN_DIM) + vrow(r0 + 1, HIDDEN_DIM)
        h1 = dot(xn, blk_w1_ref[b]) + vrow(r0 + 2, 4 * HIDDEN_DIM)
        h1 = h1 * jax.nn.sigmoid(h1)                                     # SiLU
        x = res + dot(h1, blk_w2_ref[b]) + vrow(r0 + 3, HIDDEN_DIM)

    # final activation + output_proj (lane-dense 128-wide store; op_w zero-padded)
    x = x * jax.nn.sigmoid(x)
    out_ref[...] = dot(x, op_w_ref[...]) + vrow(_VEC_OP_B, OUT_PAD)


# ----------------------------- wrapper ---------------------------------------------------
def _round_up(x, m):
    return (int(x) + m - 1) // m * m


def _choose_tile(batch, tb_max=TB_MAX):
    """Pick (tile, padded_batch).  Keeps grid >= 2 whenever the batch is big enough so
    v7x's two TensorCores both get a step; uses full-size tiles for large batches."""
    bp8 = _round_up(max(batch, 1), 8)
    if bp8 <= 128:
        return bp8, bp8                            # tiny batch: single grid step
    if bp8 <= 2 * tb_max:
        tb = _round_up((bp8 + 1) // 2, 8)          # two steps -> both v7x TCs busy
        return tb, 2 * tb
    return tb_max, _round_up(bp8, 2 * tb_max)      # even number of full-size tiles


def score_actor_forward(obs_enc, actions, time, packed, num_blocks=NUM_BLOCKS,
                        tb_max=TB_MAX):
    B = time.shape[0]
    tb, Bp = _choose_tile(B, tb_max)

    # per-call constant row: fused input_proj bias (+ hoisted broadcast-obs product)
    x_base = packed["x_base"]
    cols = [time.astype(jnp.float32), actions.astype(jnp.float32)]
    if obs_enc.shape[0] == B:
        cols.append(obs_enc.astype(jnp.float32))
    elif obs_enc.shape[0] == 1:
        # torch .expand path: loop-invariant -> hoist the obs partial product (tiny f32 dot);
        # the obs columns of the packed input stay zero.
        x_base = x_base + jnp.dot(obs_enc.astype(jnp.float32), packed["ip_w_obs"])
    else:
        raise ValueError("obs_enc batch must equal the time batch or be 1")

    xin = jnp.concatenate(cols, axis=-1)
    xin = jnp.pad(xin, ((0, Bp - B), (0, IN_PACK - xin.shape[-1])))      # (Bp, IN_PACK)

    weights = [packed["ce_w1"], packed["w_fused"], packed["w_in"],
               packed["blk_w1"], packed["blk_w2"], packed["op_w"], packed["vec"]]

    def const_spec(arr):
        zeros = (0,) * arr.ndim
        return pl.BlockSpec(arr.shape, lambda i, _z=zeros: _z)

    in_specs = [pl.BlockSpec((tb, IN_PACK), lambda i: (i, 0)),           # packed inputs
                pl.BlockSpec((1, HIDDEN_DIM), lambda i: (0, 0))]         # x_base row
    in_specs += [const_spec(w) for w in weights]

    out = pl.pallas_call(
        functools.partial(_score_actor_kernel, num_blocks),
        out_shape=jax.ShapeDtypeStruct((Bp, OUT_PAD), jnp.float32),
        grid=(Bp // tb,),
        in_specs=in_specs,
        out_specs=pl.BlockSpec((tb, OUT_PAD), lambda i: (i, 0)),
        compiler_params=pltpu.CompilerParams(dimension_semantics=("parallel",)),
    )(xin, x_base, *weights)
    return out[:B, :OUT_DIM]


# ----------------------------- params, packing, pure-JAX reference ----------------------
def init_params(key):
    ks = list(jax.random.split(key, 5 + 4 * NUM_BLOCKS + 4))
    ki = iter(ks)

    def lin(k, fan_in, fan_out):
        kw, kb = jax.random.split(k)
        w = jax.random.normal(kw, (fan_in, fan_out), jnp.float32) * (1.0 / math.sqrt(fan_in))
        b = jax.random.normal(kb, (1, fan_out), jnp.float32) * 0.02
        return w, b

    p = {}
    # FourierFeatures learnable kernel: torch shape (time_dim//2, 1); store transposed.
    p["ff_kernel_t"] = jax.random.normal(next(ki), (1, HALF_DIM), jnp.float32) * 0.2
    p["ce_w1"], p["ce_b1"] = lin(next(ki), TIME_DIM, 2 * TIME_DIM)
    p["ce_w2"], p["ce_b2"] = lin(next(ki), 2 * TIME_DIM, TIME_DIM)
    p["ip_w"], p["ip_b"] = lin(next(ki), IN_DIM, HIDDEN_DIM)
    p["blocks"] = []
    for _ in range(NUM_BLOCKS):
        w1, b1 = lin(next(ki), HIDDEN_DIM, 4 * HIDDEN_DIM)
        w2, b2 = lin(next(ki), 4 * HIDDEN_DIM, HIDDEN_DIM)
        ln_g = 1.0 + 0.1 * jax.random.normal(next(ki), (1, HIDDEN_DIM), jnp.float32)
        ln_b = 0.05 * jax.random.normal(next(ki), (1, HIDDEN_DIM), jnp.float32)
        p["blocks"].append({"ln_g": ln_g, "ln_b": ln_b, "w1": w1, "b1": b1, "w2": w2, "b2": b2})
    p["op_w"], p["op_b"] = lin(next(ki), HIDDEN_DIM, OUT_DIM)
    return p


def pack_params(p):
    """Pack the many small parameter arrays into a few stacked tensors for the kernel."""
    bf = jnp.bfloat16
    f32 = jnp.float32

    ip_w = p["ip_w"].astype(f32)
    ip_w_cond = ip_w[:TIME_DIM]
    ip_w_obs = ip_w[TIME_DIM:TIME_DIM + OBS_DIM]
    ip_w_act = ip_w[TIME_DIM + OBS_DIM:IN_DIM]

    # fold cond_encoder Linear2 into input_proj (done in f32, single bf16 cast)
    w_fused = jnp.dot(p["ce_w2"].astype(f32), ip_w_cond)                 # (2*TIME, HIDDEN)
    x_base = p["ip_b"].astype(f32) + jnp.dot(p["ce_b2"].astype(f32), ip_w_cond)

    # packed-input weight: rows laid out as [ time(zero) | actions | obs | pad(zero) ]
    w_in = jnp.zeros((IN_PACK, HIDDEN_DIM), f32)
    w_in = w_in.at[COL_ACT:COL_ACT + ACT_DIM].set(ip_w_act)
    w_in = w_in.at[COL_OBS:COL_OBS + OBS_DIM].set(ip_w_obs)

    # lane-dense output weight (zero-padded to OUT_PAD lanes)
    op_w = jnp.zeros((HIDDEN_DIM, OUT_PAD), f32).at[:, :OUT_DIM].set(p["op_w"])

    packed = {
        # cond_encoder Linear1 split into cos/sin row-halves, stacked: (2, half, 2*TIME)
        "ce_w1": jnp.stack([p["ce_w1"][:HALF_DIM], p["ce_w1"][HALF_DIM:]]).astype(bf),
        "w_fused": w_fused.astype(bf),
        "w_in": w_in.astype(bf),
        "blk_w1": jnp.stack([b["w1"] for b in p["blocks"]]).astype(bf),
        "blk_w2": jnp.stack([b["w2"] for b in p["blocks"]]).astype(bf),
        "op_w": op_w.astype(bf),
        "x_base": x_base,                       # (1, HIDDEN) f32 fused bias
        "ip_w_obs": ip_w_obs,                   # f32, for the broadcast-obs hoist
    }

    def row(v):
        v = jnp.reshape(v, (-1,)).astype(f32)
        return jnp.pad(v, (0, VEC_COLS - v.shape[0]))

    rows = [row(2.0 * math.pi * p["ff_kernel_t"]), row(p["ce_b1"])]
    for b in p["blocks"]:
        rows += [row(b["ln_g"]), row(b["ln_b"]), row(b["b1"]), row(b["b2"])]
    rows.append(row(p["op_b"]))
    while len(rows) < VEC_ROWS:
        rows.append(jnp.zeros((VEC_COLS,), f32))
    packed["vec"] = jnp.stack(rows)             # (VEC_ROWS, 128) f32
    return packed


def reference_forward(obs_enc, actions, time, p):
    """Pure-JAX f32 reference matching the PyTorch module's forward semantics."""
    silu = lambda x: x * jax.nn.sigmoid(x)
    f = 2.0 * math.pi * time * p["ff_kernel_t"]
    t_ff = jnp.concatenate([jnp.cos(f), jnp.sin(f)], axis=-1)
    h = silu(jnp.dot(t_ff, p["ce_w1"]) + p["ce_b1"])
    cond = jnp.dot(h, p["ce_w2"]) + p["ce_b2"]
    if obs_enc.shape[:-1] != cond.shape[:-1]:
        obs_enc = jnp.broadcast_to(obs_enc, cond.shape[:-1] + (obs_enc.shape[-1],))
    x = jnp.concatenate([cond, obs_enc, actions], axis=-1)
    x = jnp.dot(x, p["ip_w"]) + p["ip_b"]
    for bp in p["blocks"]:
        res = x
        mu = jnp.mean(x, -1, keepdims=True)
        var = jnp.mean(jnp.square(x - mu), -1, keepdims=True)
        xn = (x - mu) * jax.lax.rsqrt(var + 1e-6) * bp["ln_g"] + bp["ln_b"]
        x = res + jnp.dot(silu(jnp.dot(xn, bp["w1"]) + bp["b1"]), bp["w2"]) + bp["b2"]
    x = silu(x)
    return jnp.dot(x, p["op_w"]) + p["op_b"]


# ----------------------------- main ------------------------------------------------------
if __name__ == "__main__":
    key = jax.random.PRNGKey(0)
    k_p, k_o, k_a, k_t, k_o2, k_a2, k_t2 = jax.random.split(key, 7)

    params = init_params(k_p)
    packed = pack_params(params)

    # Config A: per-row obs_enc; batch pads to two grid steps (exercises padding + the
    # >=2-step grid so both v7x TensorCores get a tile).
    B = 200
    obs_enc = jax.random.normal(k_o, (B, OBS_DIM), jnp.float32)
    actions = jax.random.normal(k_a, (B, ACT_DIM), jnp.float32)
    time = jax.random.uniform(k_t, (B, 1), jnp.float32)

    out = jax.block_until_ready(score_actor_forward(obs_enc, actions, time, packed))
    assert out.shape == (B, OUT_DIM)
    ref = reference_forward(obs_enc, actions, time, params)
    assert jnp.allclose(out, ref, atol=5e-2, rtol=5e-2), "config A mismatch vs f32 reference"

    # Config B: broadcastable obs_enc (torch .expand path; constant product hoisted to the
    # wrapper), small batch (single grid step).
    B2 = 48
    obs_enc2 = jax.random.normal(k_o2, (1, OBS_DIM), jnp.float32)
    actions2 = jax.random.normal(k_a2, (B2, ACT_DIM), jnp.float32)
    time2 = jax.random.uniform(k_t2, (B2, 1), jnp.float32)

    out2 = jax.block_until_ready(score_actor_forward(obs_enc2, actions2, time2, packed))
    assert out2.shape == (B2, OUT_DIM)
    ref2 = reference_forward(obs_enc2, actions2, time2, params)
    assert jnp.allclose(out2, ref2, atol=5e-2, rtol=5e-2), "config B mismatch vs f32 reference"

    print("KERNEL_OK")
</pallas_src>

<mosaic_0001>
module attributes {stable_mosaic.version = 11 : i64} {
  func.func @_score_actor_kernel(%arg0: i32, %arg1: memref<104x64xf32, #tpu.memory_space<vmem>>, %arg2: memref<1x32xf32, #tpu.memory_space<vmem>>, %arg3: memref<2x16x64xbf16, #tpu.memory_space<vmem>>, %arg4: memref<64x32xbf16, #tpu.memory_space<vmem>>, %arg5: memref<64x32xbf16, #tpu.memory_space<vmem>>, %arg6: memref<2x32x128xbf16, #tpu.memory_space<vmem>>, %arg7: memref<2x128x32xbf16, #tpu.memory_space<vmem>>, %arg8: memref<32x128xbf16, #tpu.memory_space<vmem>>, %arg9: memref<16x128xf32, #tpu.memory_space<vmem>>, %arg10: memref<104x128xf32, #tpu.memory_space<vmem>>) attributes {dimension_semantics = [#tpu.dimension_semantics<parallel>], iteration_bounds = array<i64: 2>, scalar_prefetch = 0 : i64, scratch_operands = 0 : i64, tpu.core_type = #tpu.core_type<tc>, window_params = [{transform_indices = @transform_0, window_bounds = array<i64: 104, 64>}, {pipeline_mode = #tpu.pipeline_mode<synchronous>, transform_indices = @transform_1, window_bounds = array<i64: 1, 32>}, {pipeline_mode = #tpu.pipeline_mode<synchronous>, transform_indices = @transform_2, window_bounds = array<i64: 2, 16, 64>}, {pipeline_mode = #tpu.pipeline_mode<synchronous>, transform_indices = @transform_3, window_bounds = array<i64: 64, 32>}, {pipeline_mode = #tpu.pipeline_mode<synchronous>, transform_indices = @transform_4, window_bounds = array<i64: 64, 32>}, {pipeline_mode = #tpu.pipeline_mode<synchronous>, transform_indices = @transform_5, window_bounds = array<i64: 2, 32, 128>}, {pipeline_mode = #tpu.pipeline_mode<synchronous>, transform_indices = @transform_6, window_bounds = array<i64: 2, 128, 32>}, {pipeline_mode = #tpu.pipeline_mode<synchronous>, transform_indices = @transform_7, window_bounds = array<i64: 32, 128>}, {pipeline_mode = #tpu.pipeline_mode<synchronous>, transform_indices = @transform_8, window_bounds = array<i64: 16, 128>}, {transform_indices = @transform_9, window_bounds = array<i64: 104, 128>}]} {
    %c0 = arith.constant 0 : index
    %c0_0 = arith.constant 0 : index
    %0 = vector.load %arg1[%c0, %c0_0] : memref<104x64xf32, #tpu.memory_space<vmem>>, vector<104x64xf32>
    %1 = vector.extract_strided_slice %0 {offsets = [0, 0], sizes = [104, 1], strides = [1, 1]} : vector<104x64xf32> to vector<104x1xf32>
    %c0_1 = arith.constant 0 : index
    %c0_2 = arith.constant 0 : index
    %2 = vector.load %arg9[%c0_1, %c0_2] : memref<16x128xf32, #tpu.memory_space<vmem>>, vector<1x16xf32>
    %3 = vector.broadcast %1 : vector<104x1xf32> to vector<104x16xf32>
    %4 = vector.broadcast %2 : vector<1x16xf32> to vector<104x16xf32>
    %5 = arith.mulf %3, %4 : vector<104x16xf32>
    %6 = math.cos %5 : vector<104x16xf32>
    %7 = math.sin %5 : vector<104x16xf32>
    %c0_3 = arith.constant 0 : index
    %c0_4 = arith.constant 0 : index
    %c0_5 = arith.constant 0 : index
    %8 = vector.load %arg3[%c0_3, %c0_4, %c0_5] : memref<2x16x64xbf16, #tpu.memory_space<vmem>>, vector<1x16x64xbf16>
    %9 = vector.shape_cast %8 : vector<1x16x64xbf16> to vector<16x64xbf16>
    %10 = arith.truncf %6 : vector<104x16xf32> to vector<104x16xbf16>
    %cst = arith.constant dense<0.000000e+00> : vector<104x64xf32>
    %11 = tpu.matmul %10, %9, %cst {dimension_numbers = #tpu.dot_dimension_numbers<[1], [0], [0], [1], [0, 0, 1, 1], [], []>} : vector<104x16xbf16>, vector<16x64xbf16>, vector<104x64xf32> -> vector<104x64xf32>
    %c1 = arith.constant 1 : index
    %c0_6 = arith.constant 0 : index
    %c0_7 = arith.constant 0 : index
    %12 = vector.load %arg3[%c1, %c0_6, %c0_7] : memref<2x16x64xbf16, #tpu.memory_space<vmem>>, vector<1x16x64xbf16>
    %13 = vector.shape_cast %12 : vector<1x16x64xbf16> to vector<16x64xbf16>
    %14 = arith.truncf %7 : vector<104x16xf32> to vector<104x16xbf16>
    %cst_8 = arith.constant dense<0.000000e+00> : vector<104x64xf32>
    %15 = tpu.matmul %14, %13, %cst_8 {dimension_numbers = #tpu.dot_dimension_numbers<[1], [0], [0], [1], [0, 0, 1, 1], [], []>} : vector<104x16xbf16>, vector<16x64xbf16>, vector<104x64xf32> -> vector<104x64xf32>
    %16 = arith.addf %11, %15 : vector<104x64xf32>
    %c1_9 = arith.constant 1 : index
    %c0_10 = arith.constant 0 : index
    %17 = vector.load %arg9[%c1_9, %c0_10] : memref<16x128xf32, #tpu.memory_space<vmem>>, vector<1x64xf32>
    %18 = vector.broadcast %17 : vector<1x64xf32> to vector<104x64xf32>
    %19 = arith.addf %16, %18 : vector<104x64xf32>
    %20 = arith.negf %19 : vector<104x64xf32>
    %21 = math.exp %20 : vector<104x64xf32>
    %cst_11 = arith.constant 1.000000e+00 : f32
    %22 = vector.broadcast %cst_11 : f32 to vector<104x64xf32>
    %23 = arith.addf %22, %21 : vector<104x64xf32>
    %24 = arith.divf %22, %23 : vector<104x64xf32>
    %25 = arith.mulf %19, %24 : vector<104x64xf32>
    %c0_12 = arith.constant 0 : index
    %c0_13 = arith.constant 0 : index
    %26 = vector.load %arg4[%c0_12, %c0_13] : memref<64x32xbf16, #tpu.memory_space<vmem>>, vector<64x32xbf16>
    %27 = arith.truncf %25 : vector<104x64xf32> to vector<104x64xbf16>
    %cst_14 = arith.constant dense<0.000000e+00> : vector<104x32xf32>
    %28 = tpu.matmul %27, %26, %cst_14 {dimension_numbers = #tpu.dot_dimension_numbers<[1], [0], [0], [1], [0, 0, 1, 1], [], []>} : vector<104x64xbf16>, vector<64x32xbf16>, vector<104x32xf32> -> vector<104x32xf32>
    %c0_15 = arith.constant 0 : index
    %c0_16 = arith.constant 0 : index
    %29 = vector.load %arg5[%c0_15, %c0_16] : memref<64x32xbf16, #tpu.memory_space<vmem>>, vector<64x32xbf16>
    %30 = arith.truncf %0 : vector<104x64xf32> to vector<104x64xbf16>
    %cst_17 = arith.constant dense<0.000000e+00> : vector<104x32xf32>
    %31 = tpu.matmul %30, %29, %cst_17 {dimension_numbers = #tpu.dot_dimension_numbers<[1], [0], [0], [1], [0, 0, 1, 1], [], []>} : vector<104x64xbf16>, vector<64x32xbf16>, vector<104x32xf32> -> vector<104x32xf32>
    %32 = arith.addf %28, %31 : vector<104x32xf32>
    %c0_18 = arith.constant 0 : index
    %c0_19 = arith.constant 0 : index
    %33 = vector.load %arg2[%c0_18, %c0_19] : memref<1x32xf32, #tpu.memory_space<vmem>>, vector<1x32xf32>
    %34 = vector.broadcast %33 : vector<1x32xf32> to vector<104x32xf32>
    %35 = arith.addf %32, %34 : vector<104x32xf32>
    %cst_20 = arith.constant dense<0.000000e+00> : vector<104xf32>
    %36 = vector.multi_reduction <add>, %35, %cst_20 [1] : vector<104x32xf32> to vector<104xf32>
    %37 = vector.shape_cast %36 : vector<104xf32> to vector<104x1xf32>
    %cst_21 = arith.constant 3.200000e+01 : f32
    %38 = vector.broadcast %cst_21 : f32 to vector<104x1xf32>
    %39 = arith.divf %37, %38 : vector<104x1xf32>
    %40 = vector.broadcast %39 : vector<104x1xf32> to vector<104x32xf32>
    %41 = arith.subf %35, %40 : vector<104x32xf32>
    %42 = arith.mulf %41, %41 : vector<104x32xf32>
    %cst_22 = arith.constant dense<0.000000e+00> : vector<104xf32>
    %43 = vector.multi_reduction <add>, %42, %cst_22 [1] : vector<104x32xf32> to vector<104xf32>
    %44 = vector.shape_cast %43 : vector<104xf32> to vector<104x1xf32>
    %cst_23 = arith.constant 3.200000e+01 : f32
    %45 = vector.broadcast %cst_23 : f32 to vector<104x1xf32>
    %46 = arith.divf %44, %45 : vector<104x1xf32>
    %47 = vector.broadcast %39 : vector<104x1xf32> to vector<104x32xf32>
    %48 = arith.subf %35, %47 : vector<104x32xf32>
    %cst_24 = arith.constant 9.99999997E-7 : f32
    %49 = vector.broadcast %cst_24 : f32 to vector<104x1xf32>
    %50 = arith.addf %46, %49 : vector<104x1xf32>
    %51 = math.rsqrt %50 : vector<104x1xf32>
    %52 = vector.broadcast %51 : vector<104x1xf32> to vector<104x32xf32>
    %53 = arith.mulf %48, %52 : vector<104x32xf32>
    %c2 = arith.constant 2 : index
    %c0_25 = arith.constant 0 : index
    %54 = vector.load %arg9[%c2, %c0_25] : memref<16x128xf32, #tpu.memory_space<vmem>>, vector<1x32xf32>
    %55 = vector.broadcast %54 : vector<1x32xf32> to vector<104x32xf32>
    %56 = arith.mulf %53, %55 : vector<104x32xf32>
    %c3 = arith.constant 3 : index
    %c0_26 = arith.constant 0 : index
    %57 = vector.load %arg9[%c3, %c0_26] : memref<16x128xf32, #tpu.memory_space<vmem>>, vector<1x32xf32>
    %58 = vector.broadcast %57 : vector<1x32xf32> to vector<104x32xf32>
    %59 = arith.addf %56, %58 : vector<104x32xf32>
    %c0_27 = arith.constant 0 : index
    %c0_28 = arith.constant 0 : index
    %c0_29 = arith.constant 0 : index
    %60 = vector.load %arg6[%c0_27, %c0_28, %c0_29] : memref<2x32x128xbf16, #tpu.memory_space<vmem>>, vector<1x32x128xbf16>
    %61 = vector.shape_cast %60 : vector<1x32x128xbf16> to vector<32x128xbf16>
    %62 = arith.truncf %59 : vector<104x32xf32> to vector<104x32xbf16>
    %cst_30 = arith.constant dense<0.000000e+00> : vector<104x128xf32>
    %63 = tpu.matmul %62, %61, %cst_30 {dimension_numbers = #tpu.dot_dimension_numbers<[1], [0], [0], [1], [0, 0, 1, 1], [], []>} : vector<104x32xbf16>, vector<32x128xbf16>, vector<104x128xf32> -> vector<104x128xf32>
    %c4 = arith.constant 4 : index
    %c0_31 = arith.constant 0 : index
    %64 = vector.load %arg9[%c4, %c0_31] : memref<16x128xf32, #tpu.memory_space<vmem>>, vector<1x128xf32>
    %65 = vector.broadcast %64 : vector<1x128xf32> to vector<104x128xf32>
    %66 = arith.addf %63, %65 : vector<104x128xf32>
    %67 = arith.negf %66 : vector<104x128xf32>
    %68 = math.exp %67 : vector<104x128xf32>
    %cst_32 = arith.constant 1.000000e+00 : f32
    %69 = vector.broadcast %cst_32 : f32 to vector<104x128xf32>
    %70 = arith.addf %69, %68 : vector<104x128xf32>
    %71 = arith.divf %69, %70 : vector<104x128xf32>
    %72 = arith.mulf %66, %71 : vector<104x128xf32>
    %c0_33 = arith.constant 0 : index
    %c0_34 = arith.constant 0 : index
    %c0_35 = arith.constant 0 : index
    %73 = vector.load %arg7[%c0_33, %c0_34, %c0_35] : memref<2x128x32xbf16, #tpu.memory_space<vmem>>, vector<1x128x32xbf16>
    %74 = vector.shape_cast %73 : vector<1x128x32xbf16> to vector<128x32xbf16>
    %75 = arith.truncf %72 : vector<104x128xf32> to vector<104x128xbf16>
    %cst_36 = arith.constant dense<0.000000e+00> : vector<104x32xf32>
    %76 = tpu.matmul %75, %74, %cst_36 {dimension_numbers = #tpu.dot_dimension_numbers<[1], [0], [0], [1], [0, 0, 1, 1], [], []>} : vector<104x128xbf16>, vector<128x32xbf16>, vector<104x32xf32> -> vector<104x32xf32>
    %77 = arith.addf %35, %76 : vector<104x32xf32>
    %c5 = arith.constant 5 : index
    %c0_37 = arith.constant 0 : index
    %78 = vector.load %arg9[%c5, %c0_37] : memref<16x128xf32, #tpu.memory_space<vmem>>, vector<1x32xf32>
    %79 = vector.broadcast %78 : vector<1x32xf32> to vector<104x32xf32>
    %80 = arith.addf %77, %79 : vector<104x32xf32>
    %cst_38 = arith.constant dense<0.000000e+00> : vector<104xf32>
    %81 = vector.multi_reduction <add>, %80, %cst_38 [1] : vector<104x32xf32> to vector<104xf32>
    %82 = vector.shape_cast %81 : vector<104xf32> to vector<104x1xf32>
    %cst_39 = arith.constant 3.200000e+01 : f32
    %83 = vector.broadcast %cst_39 : f32 to vector<104x1xf32>
    %84 = arith.divf %82, %83 : vector<104x1xf32>
    %85 = vector.broadcast %84 : vector<104x1xf32> to vector<104x32xf32>
    %86 = arith.subf %80, %85 : vector<104x32xf32>
    %87 = arith.mulf %86, %86 : vector<104x32xf32>
    %cst_40 = arith.constant dense<0.000000e+00> : vector<104xf32>
    %88 = vector.multi_reduction <add>, %87, %cst_40 [1] : vector<104x32xf32> to vector<104xf32>
    %89 = vector.shape_cast %88 : vector<104xf32> to vector<104x1xf32>
    %cst_41 = arith.constant 3.200000e+01 : f32
    %90 = vector.broadcast %cst_41 : f32 to vector<104x1xf32>
    %91 = arith.divf %89, %90 : vector<104x1xf32>
    %92 = vector.broadcast %84 : vector<104x1xf32> to vector<104x32xf32>
    %93 = arith.subf %80, %92 : vector<104x32xf32>
    %cst_42 = arith.constant 9.99999997E-7 : f32
    %94 = vector.broadcast %cst_42 : f32 to vector<104x1xf32>
    %95 = arith.addf %91, %94 : vector<104x1xf32>
    %96 = math.rsqrt %95 : vector<104x1xf32>
    %97 = vector.broadcast %96 : vector<104x1xf32> to vector<104x32xf32>
    %98 = arith.mulf %93, %97 : vector<104x32xf32>
    %c6 = arith.constant 6 : index
    %c0_43 = arith.constant 0 : index
    %99 = vector.load %arg9[%c6, %c0_43] : memref<16x128xf32, #tpu.memory_space<vmem>>, vector<1x32xf32>
    %100 = vector.broadcast %99 : vector<1x32xf32> to vector<104x32xf32>
    %101 = arith.mulf %98, %100 : vector<104x32xf32>
    %c7 = arith.constant 7 : index
    %c0_44 = arith.constant 0 : index
    %102 = vector.load %arg9[%c7, %c0_44] : memref<16x128xf32, #tpu.memory_space<vmem>>, vector<1x32xf32>
    %103 = vector.broadcast %102 : vector<1x32xf32> to vector<104x32xf32>
    %104 = arith.addf %101, %103 : vector<104x32xf32>
    %c1_45 = arith.constant 1 : index
    %c0_46 = arith.constant 0 : index
    %c0_47 = arith.constant 0 : index
    %105 = vector.load %arg6[%c1_45, %c0_46, %c0_47] : memref<2x32x128xbf16, #tpu.memory_space<vmem>>, vector<1x32x128xbf16>
    %106 = vector.shape_cast %105 : vector<1x32x128xbf16> to vector<32x128xbf16>
    %107 = arith.truncf %104 : vector<104x32xf32> to vector<104x32xbf16>
    %cst_48 = arith.constant dense<0.000000e+00> : vector<104x128xf32>
    %108 = tpu.matmul %107, %106, %cst_48 {dimension_numbers = #tpu.dot_dimension_numbers<[1], [0], [0], [1], [0, 0, 1, 1], [], []>} : vector<104x32xbf16>, vector<32x128xbf16>, vector<104x128xf32> -> vector<104x128xf32>
    %c8 = arith.constant 8 : index
    %c0_49 = arith.constant 0 : index
    %109 = vector.load %arg9[%c8, %c0_49] : memref<16x128xf32, #tpu.memory_space<vmem>>, vector<1x128xf32>
    %110 = vector.broadcast %109 : vector<1x128xf32> to vector<104x128xf32>
    %111 = arith.addf %108, %110 : vector<104x128xf32>
    %112 = arith.negf %111 : vector<104x128xf32>
    %113 = math.exp %112 : vector<104x128xf32>
    %cst_50 = arith.constant 1.000000e+00 : f32
    %114 = vector.broadcast %cst_50 : f32 to vector<104x128xf32>
    %115 = arith.addf %114, %113 : vector<104x128xf32>
    %116 = arith.divf %114, %115 : vector<104x128xf32>
    %117 = arith.mulf %111, %116 : vector<104x128xf32>
    %c1_51 = arith.constant 1 : index
    %c0_52 = arith.constant 0 : index
    %c0_53 = arith.constant 0 : index
    %118 = vector.load %arg7[%c1_51, %c0_52, %c0_53] : memref<2x128x32xbf16, #tpu.memory_space<vmem>>, vector<1x128x32xbf16>
    %119 = vector.shape_cast %118 : vector<1x128x32xbf16> to vector<128x32xbf16>
    %120 = arith.truncf %117 : vector<104x128xf32> to vector<104x128xbf16>
    %cst_54 = arith.constant dense<0.000000e+00> : vector<104x32xf32>
    %121 = tpu.matmul %120, %119, %cst_54 {dimension_numbers = #tpu.dot_dimension_numbers<[1], [0], [0], [1], [0, 0, 1, 1], [], []>} : vector<104x128xbf16>, vector<128x32xbf16>, vector<104x32xf32> -> vector<104x32xf32>
    %122 = arith.addf %80, %121 : vector<104x32xf32>
    %c9 = arith.constant 9 : index
    %c0_55 = arith.constant 0 : index
    %123 = vector.load %arg9[%c9, %c0_55] : memref<16x128xf32, #tpu.memory_space<vmem>>, vector<1x32xf32>
    %124 = vector.broadcast %123 : vector<1x32xf32> to vector<104x32xf32>
    %125 = arith.addf %122, %124 : vector<104x32xf32>
    %126 = arith.negf %125 : vector<104x32xf32>
    %127 = math.exp %126 : vector<104x32xf32>
    %cst_56 = arith.constant 1.000000e+00 : f32
    %128 = vector.broadcast %cst_56 : f32 to vector<104x32xf32>
    %129 = arith.addf %128, %127 : vector<104x32xf32>
    %130 = arith.divf %128, %129 : vector<104x32xf32>
    %131 = arith.mulf %125, %130 : vector<104x32xf32>
    %c0_57 = arith.constant 0 : index
    %c0_58 = arith.constant 0 : index
    %132 = vector.load %arg8[%c0_57, %c0_58] : memref<32x128xbf16, #tpu.memory_space<vmem>>, vector<32x128xbf16>
    %133 = arith.truncf %131 : vector<104x32xf32> to vector<104x32xbf16>
    %cst_59 = arith.constant dense<0.000000e+00> : vector<104x128xf32>
    %134 = tpu.matmul %133, %132, %cst_59 {dimension_numbers = #tpu.dot_dimension_numbers<[1], [0], [0], [1], [0, 0, 1, 1], [], []>} : vector<104x32xbf16>, vector<32x128xbf16>, vector<104x128xf32> -> vector<104x128xf32>
    %c10 = arith.constant 10 : index
    %c0_60 = arith.constant 0 : index
    %135 = vector.load %arg9[%c10, %c0_60] : memref<16x128xf32, #tpu.memory_space<vmem>>, vector<1x128xf32>
    %136 = vector.broadcast %135 : vector<1x128xf32> to vector<104x128xf32>
    %137 = arith.addf %134, %136 : vector<104x128xf32>
    %c0_61 = arith.constant 0 : index
    %c0_62 = arith.constant 0 : index
    %138 = vector.load %arg10[%c0_61, %c0_62] : memref<104x128xf32, #tpu.memory_space<vmem>>, vector<104x128xf32>
    tpu.vector_store %arg10[%c0_61, %c0_62], %137 {strides = array<i32>} : memref<104x128xf32, #tpu.memory_space<vmem>>, vector<104x128xf32>,
    return
  }
  func.func @transform_0(%arg0: i32) -> (i32, i32) {
    %c0_i32 = arith.constant 0 : i32
    %c0_i32_0 = arith.constant 0 : i32
    return %arg0, %c0_i32 : i32, i32
  }
  func.func @transform_1(%arg0: i32) -> (i32, i32) {
    %c0_i32 = arith.constant 0 : i32
    %c0_i32_0 = arith.constant 0 : i32
    %c0_i32_1 = arith.constant 0 : i32
    return %c0_i32, %c0_i32_0 : i32, i32
  }
  func.func @transform_2(%arg0: i32) -> (i32, i32, i32) {
    %c0_i32 = arith.constant 0 : i32
    %c0_i32_0 = arith.constant 0 : i32
    %c0_i32_1 = arith.constant 0 : i32
    %c0_i32_2 = arith.constant 0 : i32
    return %c0_i32, %c0_i32_0, %c0_i32_1 : i32, i32, i32
  }
  func.func @transform_3(%arg0: i32) -> (i32, i32) {
    %c0_i32 = arith.constant 0 : i32
    %c0_i32_0 = arith.constant 0 : i32
    %c0_i32_1 = arith.constant 0 : i32
    return %c0_i32, %c0_i32_0 : i32, i32
  }
  func.func @transform_4(%arg0: i32) -> (i32, i32) {
    %c0_i32 = arith.constant 0 : i32
    %c0_i32_0 = arith.constant 0 : i32
    %c0_i32_1 = arith.constant 0 : i32
    return %c0_i32, %c0_i32_0 : i32, i32
  }
  func.func @transform_5(%arg0: i32) -> (i32, i32, i32) {
    %c0_i32 = arith.constant 0 : i32
    %c0_i32_0 = arith.constant 0 : i32
    %c0_i32_1 = arith.constant 0 : i32
    %c0_i32_2 = arith.constant 0 : i32
    return %c0_i32, %c0_i32_0, %c0_i32_1 : i32, i32, i32
  }
  func.func @transform_6(%arg0: i32) -> (i32, i32, i32) {
    %c0_i32 = arith.constant 0 : i32
    %c0_i32_0 = arith.constant 0 : i32
    %c0_i32_1 = arith.constant 0 : i32
    %c0_i32_2 = arith.constant 0 : i32
    return %c0_i32, %c0_i32_0, %c0_i32_1 : i32, i32, i32
  }
  func.func @transform_7(%arg0: i32) -> (i32, i32) {
    %c0_i32 = arith.constant 0 : i32
    %c0_i32_0 = arith.constant 0 : i32
    %c0_i32_1 = arith.constant 0 : i32
    return %c0_i32, %c0_i32_0 : i32, i32
  }
  func.func @transform_8(%arg0: i32) -> (i32, i32) {
    %c0_i32 = arith.constant 0 : i32
    %c0_i32_0 = arith.constant 0 : i32
    %c0_i32_1 = arith.constant 0 : i32
    return %c0_i32, %c0_i32_0 : i32, i32
  }
  func.func @transform_9(%arg0: i32) -> (i32, i32) {
    %c0_i32 = arith.constant 0 : i32
    %c0_i32_0 = arith.constant 0 : i32
    return %arg0, %c0_i32 : i32, i32
  }
}

</mosaic_0001>

<bundles_post_ra>
// kernel: tpu_custom_call.1
= control target key start
LH: loop header
LB: loop body
LE: loop exit
PB: predicated region body
PF: predicated region fallthrough
CT: control target
= control target key end

     0   :  { %14 = vsyncpa [#allocation3], 0  ;;  %s11320_s0 = inlined_call_operand.vmem [shape: f32[208,64], index: 0, kind: input, shape index: {}]   ;;  %s11321_s1 = inlined_call_operand.vmem [shape: f32[1,32], index: 1, kind: input, shape index: {}]   ;;  %s11322_s2 = inlined_call_operand.vmem [shape: bf16[2,16,64], index: 2, kind: input, shape index: {}]   ;;  %s11323_s3 = inlined_call_operand.vmem [shape: bf16[64,32], index: 3, kind: input, shape index: {}]   ;;  %s11324_s4 = inlined_call_operand.vmem [shape: bf16[64,32], index: 4, kind: input, shape index: {}]   ;;  %s11325_s5 = inlined_call_operand.vmem [shape: bf16[2,32,128], index: 5, kind: input, shape index: {}]   ;;  %s11326_s6 = inlined_call_operand.vmem [shape: bf16[2,128,32], index: 6, kind: input, shape index: {}]   ;;  %s11327_s7 = inlined_call_operand.vmem [shape: bf16[32,128], index: 7, kind: input, shape index: {}]   ;;  %s11328_s8 = inlined_call_operand.vmem [shape: f32[16,128], index: 8, kind: input, shape index: {}]   ;;  %s11329_s9 = inlined_call_operand.hbm [shape: f32[208,128], index: 9, kind: output, shape index: {}]  }
   0x1   :  { %16 = vsyncpa [#allocation3 + $0x1], 0  ;;  %s7995_s30 = smov 0   ;;  %s7997_s10 = smov 0  }
   0x2   :  { %s7999_s11 = smov 0   ;;  %s8001_s12 = smov 0  }
   0x3 LB: > { %s8016_s13 = sadd.s32 4294967295, %s7933_s12   ;;  %s7168_s14 = sadd.s32 4294967294, %s7933_s12   ;;  %s7933_s12 = sphi %s8001_s12, %s11725_s12   ;;  %s7929_s11 = sphi %s7999_s11, %s11724_s11   ;;  %s7925_s10 = sphi %s7997_s10, %s11723_s10   ;;  %s7921_s30 = sphi %s7995_s30, %s11722_s30  }
   0x4   : > { %s8020_s15 = sadd.s32 1, %s7933_s12   ;;  %s223_s16 = sadd.s32 1, %s7929_s11 }
   0x5   : > { %s220_s17 = ssub.s32 %s7933_s12, %s8020_s15  ;;  %p233_p0 = scmp.ne.s32.totalorder %s7929_s11, %s7925_s10 }
   0x6   : > { %p221_p1 = scmp.eq.s32.totalorder %s220_s17, 0  ;;  %p234_p2 = scmp.eq.s32.totalorder %s8016_s13, 1 }
   0x7   : > { %p239_p3 = scmp.ne.s32.totalorder %s7925_s10, %s7921_s30  ;;  %p240_p4 = scmp.eq.s32.totalorder %s7168_s14, 1 }
   0x8   : > { %s8031_s18 = scalar_select %p221_p1, %s7929_s11, %s223_s16  }
   0x9   : > { %p8033_p5 = por %p234_p2, %p233_p0  ;;  %p8037_p6 = por %p240_p4, %p239_p3 }
   0xa   : > { %p7171_p7 = scmp.ge.s32.totalorder %s7933_s12, 1  ;;  %p291_p8 = scmp.lt.s32.totalorder %s7933_s12, 3 }
   0xc   : > { %p292_p9 = pnand %p7171_p7, %p291_p8 }
   0xe   : > { %295 = sbr.rel (%p292_p9) target bundleno = 2514 (0x9d2), region = 56 }
  0x13   : > { %s327_s21 = smul.u32 13, %s8016_s13  ;;  %v11345_v0 = vmov 0   ;;  %v8116_v20 = vld [vmem:[%s11328_s8] ss:$0 sm:$0xff]  ;;  %v11347_v39 = vmov 683565275  }
  0x14   : > { %7593 = vset.pattern.permute.xlu2 %v11345_v0  ;;  %7592 = vset.pattern.permute.xlu1 %v11345_v0  ;;  %v11342_v41 = vmov 2475754826   ;;  %v11340_v43 = vmov 2131351028   ;;  %v11338_v45 = vmov 2102212464  }
  0x15   : > { %7591 = vset.pattern.permute.xlu0 %v11345_v0  ;;  %p328_p10 = scmp.lt.s32.totalorder %s327_s21, 25  ;;  %v11336_v47 = vmov 920167782   ;;  %v11334_v55 = vmov 1326507024   ;;  %s7537_s27 = smul.u32 104, %s8016_s13 }
  0x17   : > { %s11727_s21 = smov (!%p328_p10, %s327_s21), 25  ;;  %s7102_s14 = scalar_lea.hbm %s11329_s9, %s7537_s27 }
  0x18   : > { %s7172_s22 = sshll.u32 %s11727_s21, 3  ;;  %s7105_s17 = sshll.u32 %s7102_s14, 4  ;;  %s7106_s17 = int_to_ptr.hbm [resolvable:$true] %s7105_s17 }
  0x19   : > { %s8050_s25 = scalar_lea.vmem %s11320_s0, %s7172_s22  ;;  %s7891_s27 = scalar_lea.hbm %s11329_s9, 208 }
  0x1a   : > { %v8053_v1 = vld [vmem:[%s8050_s25 + $0x20] sm:$0xff]  ;;  %v8056_v2 = vld [vmem:[%s8050_s25 + $0x28] sm:$0xff]  ;;  %v8059_v3 = vld [vmem:[%s8050_s25 + $0x10] sm:$0xff] }
  0x1b   : > { %11467 = vst [vmem:[#allocation5_spill] sm:$0xff] %v8053_v1  ;;  %371 = vperm.xlu1 %7592, %v8053_v1   ;;  %v8065_v5 = vld [vmem:[%s8050_s25 + $0x18] sm:$0xff]  ;;  %361 = vperm.xlu0 %7591, %v8059_v3   ;;  %v8069_v6 = vld [vmem:[%s8050_s25] sm:$0xff]  ;;  %v8072_v7 = vld [vmem:[%s8050_s25 + $0x8] sm:$0xff] }
  0x1c   : > { %11468 = vst [vmem:[#allocation6_spill] sm:$0xff] %v8056_v2  ;;  %351 = vperm.xlu2 %7593, %v8069_v6   ;;  %v8080_v10 = vld [vmem:[%s8050_s25 + $0x38] sm:$0xff]  ;;  %v8083_v11 = vld [vmem:[%s8050_s25 + $0x30] sm:$0xff]  ;;  %v8086_v12 = vld [vmem:[%s8050_s25 + $0x40] sm:$0xff] }
  0x1d   : > { %11469 = vst [vmem:[#allocation7_spill] sm:$0xff] %v8059_v3  ;;  %v8091_v14 = vld [vmem:[%s8050_s25 + $0x50] sm:$0xff]  ;;  %v8094_v15 = vld [vmem:[%s8050_s25 + $0x48] sm:$0xff]  ;;  %v8097_v16 = vld [vmem:[%s8050_s25 + $0x58] sm:$0xff] }
  0x1e   : > { %11470 = vst [vmem:[#allocation8_spill] sm:$0xff] %v8065_v5  ;;  %v347_v19 = vld [vmem:[%s8050_s25 + $0x60] sm:$0xff] }
  0x1f   : > { %11471 = vst [vmem:[#allocation9_spill] sm:$0xff] %v8069_v6 }
  0x20   : > { %11472 = vst [vmem:[#allocation10_spill] sm:$0xff] %v8072_v7 }
  0x21   : > { %11473 = vst [vmem:[#allocation11_spill] sm:$0xff] %v8080_v10 }
  0x22   : > { %11474 = vst [vmem:[#allocation12_spill] sm:$0xff] %v8083_v11 }
  0x23   : > { %11475 = vst [vmem:[#allocation13_spill] sm:$0xff] %v8086_v12  ;;  %376 = vperm.xlu1 %7592, %v8056_v2   ;;  %366 = vperm.xlu0 %7591, %v8065_v5  }
  0x24   : > { %11476 = vst [vmem:[#allocation14_spill] sm:$0xff] %v8091_v14  ;;  %356 = vperm.xlu2 %7593, %v8072_v7  }
  0x25   : > { %11477 = vst [vmem:[#allocation15_spill] sm:$0xff] %v8094_v15 }
  0x26   : > { %11478 = vst [vmem:[#allocation16_spill] sm:$0xff] %v8097_v16 }
  0x2b   : > { %386 = vperm.xlu1 %7592, %v8080_v10   ;;  %381 = vperm.xlu0 %7591, %v8083_v11  }
  0x2c   : > { %391 = vperm.xlu2 %7593, %v8086_v12  }
  0x33   : > { %401 = vperm.xlu1 %7592, %v8091_v14   ;;  %396 = vperm.xlu0 %7591, %v8094_v15  }
  0x34   : > { %406 = vperm.xlu2 %7593, %v8097_v16  }
  0x3b   : > { %411 = vperm.xlu0 %7591, %v347_v19  }
  0x76   : > { %v352_v21 = vpop.permute.xlu2 %351 }
  0x77   : > { %v8119_v22 = vmul.f32 %v8116_v20, %v352_v21 }
  0x79   : > { %v431_v23 = vand.u32 2139095040, %v8119_v22  ;;  %v11332_v24 = vand.u32 2147483647, %v8119_v22 }
  0x7b   : > { %v432_v25 = vshrl.u32 %v431_v23, 23  ;;  %v435_v27 = vand.u32 8388607, %v11332_v24 }
  0x7d   : > { %v7173_v26 = vadd.s32 4294967169, %v432_v25  ;;  %v436_v31 = vor.u32 8388608, %v435_v27 }
  0x7e   : > { %v357_v28 = vpop.permute.xlu2 %356 }
  0x7f   : > { %v438_v29 = vadd.s32 1, %v7173_v26  ;;  %v8126_v30 = vmul.f32 %v8116_v20, %v357_v28  ;;  %v8135_v49 = vshll.u32 %v436_v31, 8 }
  0x81   : > { %11479 = vst [vmem:[#allocation17_spill] sm:$0xff] %v8126_v30  ;;  %vm439_vm0 = vcmp.gt.s32.totalorder %v438_v29, 0  ;;  %v585_v33 = vand.u32 2139095040, %v8126_v30  ;;  %v11331_v35 = vand.u32 2147483647, %v8126_v30  ;;  %v477_v27 = vand.u32 65535, %v8135_v49 }
  0x82   : > { %v440_v32 = vsel %vm439_vm0, %v438_v29, 0 }
  0x83   : > { %v442_v34 = vand.u32 31, %v440_v32  ;;  %v441_v36 = vshrl.u32 %v440_v32, 5  ;;  %v586_v37 = vshrl.u32 %v585_v33, 23  ;;  %v589_v53 = vand.u32 8388607, %v11331_v35 }
  0x84   : > { %v478_v32 = vshrl.u32 %v8135_v49, 16 }
  0x85   : > { %v443_v38 = vsub.s32 32, %v442_v34  ;;  %v445_v40 = vshll.u32 %v11347_v39, %v442_v34  ;;  %v448_v42 = vshll.u32 %v11342_v41, %v442_v34  ;;  %v451_v44 = vshll.u32 %v11340_v43, %v442_v34 }
  0x86   : > { %v454_v46 = vshll.u32 %v11338_v45, %v442_v34  ;;  %v457_v48 = vshll.u32 %v11336_v47, %v442_v34  ;;  %vm460_vm1 = vcmp.lt.s32.totalorder %v441_v36, 1  ;;  %vm463_vm2 = vcmp.lt.s32.totalorder %v441_v36, 4 }
  0x87   : > { %v446_v50 = vshrl.u32 %v11342_v41, %v443_v38  ;;  %v449_v51 = vshrl.u32 %v11340_v43, %v443_v38  ;;  %v452_v52 = vshrl.u32 %v11338_v45, %v443_v38  ;;  %v455_v54 = vshrl.u32 %v11336_v47, %v443_v38 }
  0x88   : > { %v458_v56 = vshrl.u32 %v11334_v55, %v443_v38  ;;  %v7176_v60 = vadd.s32 4294967169, %v586_v37  ;;  %v444_v61 = vshrl.u32 %v11347_v39, %v443_v38  ;;  %vm462_vm3 = vcmp.lt.s32.totalorder %v441_v36, 3 }
  0x89   : > { %v447_v57 = vor.u32 %v446_v50, %v445_v40  ;;  %v450_v58 = vor.u32 %v449_v51, %v448_v42  ;;  %v453_v59 = vor.u32 %v452_v52, %v451_v44  ;;  %v456_v62 = vor.u32 %v455_v54, %v454_v46 }
  0x8a   : > { %v459_v63 = vor.u32 %v458_v56, %v457_v48  ;;  %vm461_vm4 = vcmp.lt.s32.totalorder %v441_v36, 2  ;;  %v592_v28 = vadd.s32 1, %v7176_v60  ;;  %v590_v33 = vor.u32 8388608, %v589_v53 }
  0x8b   : > { %v465_v19 = vsel %vm463_vm2, %v453_v59, 2102212464  ;;  %v468_v21 = vsel %vm460_vm1, %v447_v57, %v450_v58  ;;  %v472_v23 = vsel %vm460_vm1, %v450_v58, %v453_v59  ;;  %v469_v25 = vsel %vm463_vm2, %v456_v62, 920167782 }
  0x8c   : > { %v473_v26 = vsel %vm463_vm2, %v459_v63, 1326507024  ;;  %v470_v29 = vsel %vm462_vm3, %v453_v59, %v469_v25  ;;  %v464_v34 = vsel %vm460_vm1, %v444_v61, %v447_v57  ;;  %v466_v37 = vsel %vm462_vm3, %v450_v58, %v465_v19 }
  0x8d   : > { %v474_v31 = vsel %vm462_vm3, %v456_v62, %v473_v26  ;;  %v471_v38 = vsel %vm461_vm4, %v468_v21, %v470_v29  ;;  %vm593_vm5 = vcmp.gt.s32.totalorder %v592_v28, 0  ;;  %v8153_v50 = vsel %vm461_vm4, %v464_v34, %v466_v37 }
  0x8e   : > { %v475_v40 = vsel %vm461_vm4, %v472_v23, %v474_v31  ;;  %v501_v46 = vand.u32 65535, %v471_v38  ;;  %v502_v48 = vshrl.u32 %v471_v38, 16  ;;  %v8155_v57 = vshll.u32 %v590_v33, 8 }
  0x8f   : > { %v479_v42 = vand.u32 65535, %v475_v40  ;;  %v480_v44 = vshrl.u32 %v475_v40, 16  ;;  %v594_v62 = vsel %vm593_vm5, %v592_v28, 0 }
  0x90   : > { %v503_v56 = vmul.u32 %v501_v46, %v477_v27  ;;  %v504_v53 = vmul.u32 %v502_v48, %v477_v27  ;;  %v505_v59 = vmul.u32 %v501_v46, %v478_v32  ;;  %v506_v19 = vmul.u32 %v502_v48, %v478_v32 }
  0x91   : > { %v481_v51 = vmul.u32 %v479_v42, %v477_v27  ;;  %v482_v52 = vmul.u32 %v480_v44, %v477_v27  ;;  %v483_v54 = vmul.u32 %v479_v42, %v478_v32  ;;  %v484_v58 = vmul.u32 %v480_v44, %v478_v32 }
  0x92   : > { %v507_v21 = vshll.u32 %v504_v53, 16  ;;  %v509_v23 = vshll.u32 %v505_v59, 16  ;;  %v508_v26 = vshrl.u32 %v504_v53, 16  ;;  %v510_v31 = vshrl.u32 %v505_v59, 16 }
  0x93   : > { %v485_v60 = vshll.u32 %v482_v52, 16  ;;  %v487_v61 = vshll.u32 %v483_v54, 16  ;;  %v486_v63 = vshrl.u32 %v482_v52, 16  ;;  %v488_v25 = vshrl.u32 %v483_v54, 16 }
  0x94   : > { %vm511_vm7 = vc.u32 %v503_v56, %v507_v21  ;;  %v513_v27 = vadd.s32 %v507_v21, %v503_v56  ;;  %v596_v37 = vand.u32 31, %v594_v62  ;;  %v8160_v32 = vshrl.u32 %v594_v62, 5 }
  0x95   : > { %vm489_vm6 = vc.u32 %v481_v51, %v485_v60  ;;  %v491_v36 = vadd.s32 %v485_v60, %v481_v51  ;;  %v512_v33 = vsel %vm511_vm7, 1, %v11345_v0 }
  0x96   : > { %v490_v29 = vsel %vm489_vm6, 1, %v11345_v0  ;;  %v514_v38 = vadd.s32 %v512_v33, %v506_v19  ;;  %vm515_vm9 = vc.u32 %v513_v27, %v509_v23  ;;  %v8163_v44 = vsub.s32 32, %v596_v37 }
  0x97   : > { %v492_v34 = vadd.s32 %v490_v29, %v484_v58  ;;  %vm493_vm8 = vc.u32 %v491_v36, %v487_v61  ;;  %v516_v42 = vsel %vm515_vm9, 1, %v11345_v0  ;;  %v599_v46 = vshll.u32 %v11347_v39, %v596_v37 }
  0x98   : > { %v494_v28 = vsel %vm493_vm8, 1, %v11345_v0  ;;  %v518_v48 = vadd.s32 %v516_v42, %v514_v38  ;;  %v602_v51 = vshll.u32 %v11342_v41, %v596_v37  ;;  %v605_v52 = vshll.u32 %v11340_v43, %v596_v37 }
  0x99   : > { %v496_v40 = vadd.s32 %v494_v28, %v492_v34  ;;  %v608_v54 = vshll.u32 %v11338_v45, %v596_v37  ;;  %v8169_v53 = vadd.s32 %v513_v27, %v509_v23  ;;  %v600_v59 = vshrl.u32 %v11342_v41, %v8163_v44 }
  0x9a   : > { %v603_v58 = vshrl.u32 %v11340_v43, %v8163_v44  ;;  %v519_v60 = vadd.s32 %v518_v48, %v508_v26  ;;  %v606_v61 = vshrl.u32 %v11338_v45, %v8163_v44  ;;  %v609_v62 = vshrl.u32 %v11336_v47, %v8163_v44 }
  0x9b   : > { %v497_v56 = vadd.s32 %v496_v40, %v486_v63  ;;  %v611_v19 = vshll.u32 %v11336_v47, %v596_v37  ;;  %v8182_v63 = vor.u32 %v600_v59, %v599_v46  ;;  %v612_v36 = vshrl.u32 %v11334_v55, %v8163_v44 }
  0x9c   : > { %v8184_v23 = vor.u32 %v603_v58, %v602_v51  ;;  %v520_v29 = vadd.s32 %v519_v60, %v510_v31  ;;  %v8188_v27 = vor.u32 %v606_v61, %v605_v52  ;;  %v610_v26 = vor.u32 %v609_v62, %v608_v54 }
  0x9d   : > { %v8180_v21 = vadd.s32 %v497_v56, %v488_v25  ;;  %vm614_vm10 = vcmp.lt.s32.totalorder %v8160_v32, 1  ;;  %v521_v34 = vmul.u32 %v8135_v49, %v8153_v50  ;;  %v613_v25 = vor.u32 %v612_v36, %v611_v19 }
  0x9e   : > { %v524_v33 = vadd.s32 1, %v520_v29  ;;  %vm615_vm12 = vcmp.lt.s32.totalorder %v8160_v32, 2  ;;  %vm616_vm13 = vcmp.lt.s32.totalorder %v8160_v32, 3  ;;  %vm617_vm14 = vcmp.lt.s32.totalorder %v8160_v32, 4 }
  0x9f   : > { %vm523_vm11 = vc.u32 %v8180_v21, %v8169_v53  ;;  %v622_v31 = vsel %vm614_vm10, %v8182_v63, %v8184_v23  ;;  %v623_v37 = vsel %vm617_vm14, %v610_v26, 920167782  ;;  %v626_v49 = vsel %vm614_vm10, %v8184_v23, %v8188_v27 }
  0xa0   : > { %v631_v50 = vand.u32 65535, %v8155_v57  ;;  %v525_v28 = vsel %vm523_vm11, %v524_v33, %v520_v29  ;;  %v624_v38 = vsel %vm616_vm13, %v8188_v27, %v623_v37  ;;  %v627_v40 = vsel %vm617_vm14, %v613_v25, 1326507024  ;;  %v392_v25 = vpop.permute.xlu2 %391 }
  0xa1   : > { %v632_v42 = vshrl.u32 %v8155_v57, 16  ;;  %v526_v46 = vadd.s32 %v525_v28, %v521_v34  ;;  %v625_v48 = vsel %vm615_vm12, %v622_v31, %v624_v38  ;;  %v628_v51 = vsel %vm616_vm13, %v610_v26, %v627_v40 }
  0xa2   : > { %v629_v52 = vsel %vm615_vm12, %v626_v49, %v628_v51  ;;  %v655_v54 = vand.u32 65535, %v625_v48  ;;  %v656_v56 = vshrl.u32 %v625_v48, 16  ;;  %v8224_v48 = vmul.f32 %v8116_v20, %v392_v25 }
  0xa3   : > { %v633_v59 = vand.u32 65535, %v629_v52  ;;  %v634_v58 = vshrl.u32 %v629_v52, 16  ;;  %v527_v60 = vadd.s32 536870912, %v526_v46 }
  0xa4   : > { %v657_v61 = vmul.u32 %v655_v54, %v631_v50  ;;  %v658_v62 = vmul.u32 %v656_v56, %v631_v50  ;;  %v659_v19 = vmul.u32 %v655_v54, %v632_v42  ;;  %v660_v33 = vmul.u32 %v656_v56, %v632_v42  ;;  %11480 = vst [vmem:[#allocation18_spill] sm:$0xff] %v8224_v48 }
  0xa5   : > { %v635_v36 = vmul.u32 %v633_v59, %v631_v50  ;;  %v636_v29 = vmul.u32 %v634_v58, %v631_v50  ;;  %v637_v34 = vmul.u32 %v633_v59, %v632_v42  ;;  %v638_v28 = vmul.u32 %v634_v58, %v632_v42 }
  0xa6   : > { %v661_v31 = vshll.u32 %v658_v62, 16  ;;  %v663_v37 = vshll.u32 %v659_v19, 16  ;;  %v8221_v40 = vshrl.u32 %v527_v60, 30  ;;  %v598_v50 = vshrl.u32 %v11347_v39, %v8163_v44 }
  0xa7   : > { %v639_v26 = vshll.u32 %v636_v29, 16  ;;  %v641_v38 = vshll.u32 %v637_v34, 16  ;;  %v640_v42 = vshrl.u32 %v636_v29, 16  ;;  %v662_v58 = vshrl.u32 %v658_v62, 16 }
  0xa8   : > { %vm665_vm15 = vc.u32 %v657_v61, %v661_v31  ;;  %v667_v49 = vadd.s32 %v661_v31, %v657_v61  ;;  %v529_v60 = vshll.u32 %v8221_v40, 30  ;;  %v642_v31 = vshrl.u32 %v637_v34, 16 }
  0xa9   : > { %vm643_vm0 = vc.u32 %v635_v36, %v639_v26  ;;  %v645_v51 = vadd.s32 %v639_v26, %v635_v36  ;;  %v666_v52 = vsel %vm665_vm15, 1, %v11345_v0  ;;  %v1663_v36 = vand.u32 2139095040, %v8224_v48 }
  0xaa   : > { %v644_v54 = vsel %vm643_vm0, 1, %v11345_v0  ;;  %v668_v56 = vadd.s32 %v666_v52, %v660_v33  ;;  %vm669_vm1 = vc.u32 %v667_v49, %v663_v37  ;;  %v664_v18 = vshrl.u32 %v659_v19, 16 }
  0xab   : > { %v646_v59 = vadd.s32 %v644_v54, %v638_v28  ;;  %vm647_vm2 = vc.u32 %v645_v51, %v641_v38  ;;  %v670_v25 = vsel %vm669_vm1, 1, %v11345_v0  ;;  %v619_v33 = vsel %vm617_vm14, %v8188_v27, 2102212464 }
  0xac   : > { %v648_v61 = vsel %vm647_vm2, 1, %v11345_v0  ;;  %v672_v44 = vadd.s32 %v670_v25, %v668_v56  ;;  %v1664_v29 = vshrl.u32 %v1663_v36, 23  ;;  %v8237_v62 = vsub.s32 %v526_v46, %v529_v60 }
  0xad   : > { %v650_v26 = vadd.s32 %v648_v61, %v646_v59  ;;  %v618_v51 = vsel %vm614_vm10, %v598_v50, %v8182_v63  ;;  %v11330_v52 = vand.u32 2147483647, %v8224_v48  ;;  %v620_v19 = vsel %vm616_vm13, %v8184_v23, %v619_v33 }
  0xae   : > { %v673_v38 = vadd.s32 %v672_v44, %v662_v58  ;;  %v7197_v54 = vadd.s32 4294967169, %v1664_v29  ;;  %v8248_v56 = vadd.s32 %v667_v49, %v663_v37  ;;  %v532_v46 = vsub.s32 0, %v8237_v62  ;;  %v372_v49 = vpop.permute.xlu1 %371 }
  0xaf   : > { %v651_v28 = vadd.s32 %v650_v26, %v640_v42  ;;  %v621_v59 = vsel %vm615_vm12, %v618_v51, %v620_v19  ;;  %vm531_vm4 = vcmp.lt.s32.totalorder %v8237_v62, 0  ;;  %v1667_v63 = vand.u32 8388607, %v11330_v52 }
  0xb0   : > { %v674_v27 = vadd.s32 %v673_v38, %v664_v18  ;;  %v1670_v42 = vadd.s32 1, %v7197_v54  ;;  %v675_v37 = vmul.u32 %v8155_v57, %v621_v59  ;;  %v533_v50 = vsel %vm531_vm4, %v532_v46, %v8237_v62 }
  0xb1   : > { %v8246_v34 = vadd.s32 %v651_v28, %v642_v31  ;;  %v1668_v32 = vor.u32 8388608, %v1667_v63  ;;  %v8267_v33 = vmul.f32 %v8116_v20, %v372_v49  ;;  %v534_v51 = vclz %v533_v50 }
  0xb2   : > { %v678_v58 = vadd.s32 1, %v674_v27  ;;  %vm1671_vm3 = vcmp.gt.s32.totalorder %v1670_v42, 0 }
  0xb3   : > { %vm677_vm5 = vc.u32 %v8246_v34, %v8248_v56  ;;  %v1672_v23 = vsel %vm1671_vm3, %v1670_v42, 0  ;;  %v8277_v59 = vshll.u32 %v1668_v32, 8 }
  0xb4   : > { %v1674_v18 = vand.u32 31, %v1672_v23  ;;  %v679_v60 = vsel %vm677_vm5, %v678_v58, %v674_v27  ;;  %v8262_v31 = vshrl.u32 %v1672_v23, 5  ;;  %v1047_v23 = vand.u32 2139095040, %v8267_v33 }
  0xb5   : > { %v680_v57 = vadd.s32 %v679_v60, %v675_v37  ;;  %v7174_v60 = vadd.s32 4294967294, %v534_v51  ;;  %v1710_v51 = vshrl.u32 %v8277_v59, 16 }
  0xb6   : > { %v1675_v61 = vsub.s32 32, %v1674_v18  ;;  %v1677_v25 = vshll.u32 %v11347_v39, %v1674_v18  ;;  %v1680_v36 = vshll.u32 %v11342_v41, %v1674_v18  ;;  %v1683_v26 = vshll.u32 %v11340_v43, %v1674_v18 }
  0xb7   : > { %v1686_v44 = vshll.u32 %v11338_v45, %v1674_v18  ;;  %v1689_v19 = vshll.u32 %v11336_v47, %v1674_v18  ;;  %vm1692_vm6 = vcmp.lt.s32.totalorder %v8262_v31, 1  ;;  %v681_v37 = vadd.s32 536870912, %v680_v57 }
  0xb8   : > { %v1678_v29 = vshrl.u32 %v11342_v41, %v1675_v61  ;;  %v1681_v28 = vshrl.u32 %v11340_v43, %v1675_v61  ;;  %v1684_v38 = vshrl.u32 %v11338_v45, %v1675_v61  ;;  %v1687_v54 = vshrl.u32 %v11336_v47, %v1675_v61 }
  0xb9   : > { %v1690_v46 = vshrl.u32 %v11334_v55, %v1675_v61  ;;  %vm1694_vm7 = vcmp.lt.s32.totalorder %v8262_v31, 3  ;;  %vm1695_vm8 = vcmp.lt.s32.totalorder %v8262_v31, 4  ;;  %vm1693_vm9 = vcmp.lt.s32.totalorder %v8262_v31, 2  ;;  %v362_v55 = vpop.permute.xlu0 %361 }
  0xba   : > { %v1679_v27 = vor.u32 %v1678_v29, %v1677_v25  ;;  %v8274_v42 = vor.u32 %v1681_v28, %v1680_v36  ;;  %v1685_v58 = vor.u32 %v1684_v38, %v1683_v26  ;;  %v1688_v63 = vor.u32 %v1687_v54, %v1686_v44 }
  0xbb   : > { %v1691_v49 = vor.u32 %v1690_v46, %v1689_v19  ;;  %v1709_v36 = vand.u32 65535, %v8277_v59  ;;  %v8295_v26 = vshrl.u32 %v681_v37, 30  ;;  %v1048_v28 = vshrl.u32 %v1047_v23, 23 }
  0xbc   : > { %v1700_v18 = vsel %vm1692_vm6, %v1679_v27, %v8274_v42  ;;  %v1701_v50 = vsel %vm1695_vm8, %v1688_v63, 920167782  ;;  %v1704_v25 = vsel %vm1692_vm6, %v8274_v42, %v1685_v58  ;;  %v11333_v37 = vand.u32 2147483647, %v8267_v33 }
  0xbd   : > { %v1702_v32 = vsel %vm1694_vm7, %v1685_v58, %v1701_v50  ;;  %11481 = vst [vmem:[#allocation19_spill] sm:$0xff] %v8295_v26  ;;  %v1705_v29 = vsel %vm1695_vm8, %v1691_v49, 1326507024  ;;  %vm7175_vm10 = vcmp.lt.s32.totalorder %v7174_v60, 0  ;;  %v7185_v49 = vadd.s32 4294967169, %v1048_v28 }
  0xbe   : > { %v1703_v44 = vsel %vm1693_vm9, %v1700_v18, %v1702_v32  ;;  %v1706_v38 = vsel %vm1694_vm7, %v1688_v63, %v1705_v29  ;;  %v683_v18 = vshll.u32 %v8295_v26, 30  ;;  %v1676_v29 = vshrl.u32 %v11347_v39, %v1675_v61 }
  0xbf   : > { %v1733_v54 = vand.u32 65535, %v1703_v44  ;;  %v1734_v19 = vshrl.u32 %v1703_v44, 16  ;;  %v1707_v46 = vsel %vm1693_vm9, %v1704_v25, %v1706_v38  ;;  %v8311_v44 = vand.u32 8388607, %v11333_v37 }
  0xc0   : > { %v1711_v50 = vand.u32 65535, %v1707_v46  ;;  %v1712_v17 = vshrl.u32 %v1707_v46, 16  ;;  %v8313_v25 = vsel %vm7175_vm10, 0, %v7174_v60  ;;  %v8315_v52 = vsub.s32 %v680_v57, %v683_v18 }
  0xc1   : > { %v1736_v32 = vmul.u32 %v1734_v19, %v1709_v36  ;;  %v1737_v63 = vmul.u32 %v1733_v54, %v1710_v51  ;;  %v1735_v8 = vmul.u32 %v1733_v54, %v1709_v36  ;;  %v1697_v28 = vsel %vm1695_vm8, %v1685_v58, 2102212464 }
  0xc2   : > { %v1713_v23 = vmul.u32 %v1711_v50, %v1709_v36  ;;  %v1714_v13 = vmul.u32 %v1712_v17, %v1709_v36  ;;  %v1715_v4 = vmul.u32 %v1711_v50, %v1710_v51  ;;  %v1716_v38 = vmul.u32 %v1712_v17, %v1710_v51 }
  0xc3   : > { %v1738_v35 = vmul.u32 %v1734_v19, %v1710_v51  ;;  %v1739_v50 = vshll.u32 %v1736_v32, 16  ;;  %v1741_v61 = vshll.u32 %v1737_v63, 16  ;;  %v1054_v36 = vadd.s32 1, %v7185_v49 }
  0xc4   : > { %v1717_v46 = vshll.u32 %v1714_v13, 16  ;;  %v1719_v9 = vshll.u32 %v1715_v4, 16  ;;  %v1696_v54 = vsel %vm1692_vm6, %v1676_v29, %v1679_v27  ;;  %v1718_v37 = vshrl.u32 %v1714_v13, 16 }
  0xc5   : > { %vm1743_vm12 = vc.u32 %v1735_v8, %v1739_v50  ;;  %v1745_v18 = vadd.s32 %v1739_v50, %v1735_v8  ;;  %v1698_v58 = vsel %vm1694_vm7, %v8274_v42, %v1697_v28  ;;  %v1720_v51 = vshrl.u32 %v1715_v4, 16 }
  0xc6   : > { %vm1721_vm11 = vc.u32 %v1713_v23, %v1717_v46  ;;  %v1723_v24 = vadd.s32 %v1717_v46, %v1713_v23  ;;  %v1744_v57 = vsel %vm1743_vm12, 1, %v11345_v0  ;;  %v1740_v27 = vshrl.u32 %v1736_v32, 16 }
  0xc7   : > { %v1722_v60 = vsel %vm1721_vm11, 1, %v11345_v0  ;;  %v1746_v49 = vadd.s32 %v1744_v57, %v1738_v35  ;;  %vm1747_vm14 = vc.u32 %v1745_v18, %v1741_v61  ;;  %vm1055_vm15 = vcmp.gt.s32.totalorder %v1054_v36, 0 }
  0xc8   : > { %v1724_v17 = vadd.s32 %v1722_v60, %v1716_v38  ;;  %vm1725_vm13 = vc.u32 %v1723_v24, %v1719_v9  ;;  %v522_v13 = vadd.s32 %v8169_v53, %v8180_v21  ;;  %v1748_v9 = vsel %vm1747_vm14, 1, %v11345_v0 }
  0xc9   : > { %v1726_v19 = vsel %vm1725_vm13, 1, %v11345_v0  ;;  %v1056_v24 = vsel %vm1055_vm15, %v1054_v36, 0  ;;  %v8331_v8 = vmul.f32 %v8116_v20, %v362_v55  ;;  %v1742_v38 = vshrl.u32 %v1737_v63, 16 }
  0xca   : > { %v1728_v23 = vadd.s32 %v1726_v19, %v1724_v17  ;;  %v1750_v42 = vadd.s32 %v1748_v9, %v1746_v49  ;;  %v1058_v4 = vand.u32 31, %v1056_v24  ;;  %v542_v46 = vsub.s32 4294967266, %v8313_v25 }
  0xcb   : > { %v1699_v35 = vsel %vm1693_vm9, %v1696_v54, %v1698_v58  ;;  %v8336_v32 = vadd.s32 %v1745_v18, %v1741_v61  ;;  %v1052_v28 = vor.u32 8388608, %v8311_v44  ;;  %v686_v53 = vsub.s32 0, %v8315_v52 }
  0xcc   : > { %v1729_v29 = vadd.s32 %v1728_v23, %v1718_v37  ;;  %v1751_v50 = vadd.s32 %v1750_v42, %v1740_v27  ;;  %v8342_v55 = vsub.s32 32, %v1058_v4  ;;  %vm685_vm0 = vcmp.lt.s32.totalorder %v8315_v52, 0 }
  0xcd   : > { %v1061_v37 = vshll.u32 %v11347_v39, %v1058_v4  ;;  %v1064_v63 = vshll.u32 %v11342_v41, %v1058_v4  ;;  %v1067_v31 = vshll.u32 %v11340_v43, %v1058_v4  ;;  %v1753_v61 = vmul.u32 %v8277_v59, %v1699_v35 }
  0xce   : > { %v8340_v21 = vadd.s32 %v1729_v29, %v1720_v51  ;;  %v1752_v36 = vadd.s32 %v1751_v50, %v1742_v38  ;;  %v8349_v54 = vshrl.u32 %v1056_v24, 5  ;;  %v1070_v44 = vshll.u32 %v11338_v45, %v1058_v4 }
  0xcf   : > { %v1062_v60 = vshrl.u32 %v11342_v41, %v8342_v55  ;;  %v1065_v17 = vshrl.u32 %v11340_v43, %v8342_v55  ;;  %v1068_v57 = vshrl.u32 %v11338_v45, %v8342_v55  ;;  %v687_v18 = vsel %vm685_vm0, %v686_v53, %v8315_v52 }
  0xd0   : > { %vm1755_vm1 = vc.u32 %v8340_v21, %v8336_v32  ;;  %v1756_v58 = vadd.s32 1, %v1752_v36  ;;  %v1071_v59 = vshrl.u32 %v11336_v47, %v8342_v55  ;;  %v1073_v51 = vshll.u32 %v11336_v47, %v1058_v4 }
  0xd1   : > { %v8364_v19 = vor.u32 %v1062_v60, %v1061_v37  ;;  %v8366_v49 = vor.u32 %v1065_v17, %v1064_v63  ;;  %v8368_v23 = vor.u32 %v1068_v57, %v1067_v31  ;;  %v8370_v27 = vshll.u32 %v1052_v28, 8 }
  0xd2   : > { %v1757_v9 = vsel %vm1755_vm1, %v1756_v58, %v1752_v36  ;;  %v1072_v24 = vor.u32 %v1071_v59, %v1070_v44  ;;  %v11482_v29 = vmov 1326507024   ;;  %vm1076_vm2 = vcmp.lt.s32.totalorder %v8349_v54, 1 }
  0xd3   : > { %v1074_v38 = vshrl.u32 %v11482_v29, %v8342_v55  ;;  %v538_v42 = vsub.s32 32, %v8313_v25  ;;  %v1758_v35 = vadd.s32 %v1757_v9, %v1753_v61  ;;  %vm1078_vm3 = vcmp.lt.s32.totalorder %v8349_v54, 3 }
  0xd4   : > { %vm1079_vm4 = vcmp.lt.s32.totalorder %v8349_v54, 4  ;;  %v543_v4 = vadd.s32 127, %v542_v46  ;;  %vm1077_vm5 = vcmp.lt.s32.totalorder %v8349_v54, 2  ;;  %v1084_v28 = vsel %vm1076_vm2, %v8364_v19, %v8366_v49 }
  0xd5   : > { %v1075_v53 = vor.u32 %v1074_v38, %v1073_v51  ;;  %v688_v50 = vclz %v687_v18  ;;  %v1759_v37 = vadd.s32 536870912, %v1758_v35  ;;  %v1085_v63 = vsel %vm1079_vm4, %v1072_v24, 920167782 }
  0xd6   : > { %v1088_v31 = vsel %vm1076_vm2, %v8366_v49, %v8368_v23  ;;  %v1086_v46 = vsel %vm1078_vm3, %v8368_v23, %v1085_v63  ;;  %v1093_v61 = vand.u32 65535, %v8370_v27  ;;  %v1094_v44 = vshrl.u32 %v8370_v27, 16 }
  0xd7   : > { %v1089_v36 = vsel %vm1079_vm4, %v1075_v53, 1326507024  ;;  %v539_v60 = vshll.u32 %v8237_v62, %v8313_v25  ;;  %v8398_v17 = vshrl.u32 %v1759_v37, 30  ;;  %v1087_v57 = vsel %vm1077_vm5, %v1084_v28, %v1086_v46 }
  0xd8   : > { %v1090_v18 = vsel %vm1078_vm3, %v1072_v24, %v1089_v36  ;;  %v540_v58 = vshrl.u32 %v522_v13, %v538_v42  ;;  %v1117_v51 = vand.u32 65535, %v1087_v57  ;;  %v1118_v9 = vshrl.u32 %v1087_v57, 16 }
  0xd9   : > { %11483 = vst [vmem:[#allocation20_spill] sm:$0xff] %v8398_v17  ;;  %v1091_v59 = vsel %vm1077_vm5, %v1088_v31, %v1090_v18  ;;  %v544_v38 = vshll.u32 %v543_v4, 23  ;;  %v1761_v53 = vshll.u32 %v8398_v17, 30  ;;  %v7177_v62 = vadd.s32 4294967294, %v688_v50 }
  0xda   : > { %v1095_v63 = vand.u32 65535, %v1091_v59  ;;  %v1096_v47 = vshrl.u32 %v1091_v59, 16  ;;  %v1119_v25 = vmul.u32 %v1117_v51, %v1093_v61  ;;  %v1120_v37 = vmul.u32 %v1118_v9, %v1093_v61 }
  0xdb   : > { %v1121_v45 = vmul.u32 %v1117_v51, %v1094_v44  ;;  %v11344_v24 = vand.u32 2147483647, %v8331_v8  ;;  %v8408_v13 = vor.u32 %v540_v58, %v539_v60  ;;  %v8410_v42 = vsub.s32 %v1758_v35, %v1761_v53 }
  0xdc   : > { %v1097_v43 = vmul.u32 %v1095_v63, %v1093_v61  ;;  %v1098_v28 = vmul.u32 %v1096_v47, %v1093_v61  ;;  %v1099_v46 = vmul.u32 %v1095_v63, %v1094_v44  ;;  %v1122_v31 = vmul.u32 %v1118_v9, %v1094_v44 }
  0xdd   : > { %v1123_v36 = vshll.u32 %v1120_v37, 16  ;;  %v8412_v4 = vor.u32 4788187, %v544_v38  ;;  %v1100_v57 = vmul.u32 %v1096_v47, %v1094_v44  ;;  %v739_v50 = vand.u32 2139095040, %v8331_v8 }
  0xde   : > { %v1101_v18 = vshll.u32 %v1098_v28, 16  ;;  %vm7178_vm6 = vcmp.lt.s32.totalorder %v7177_v62, 0  ;;  %v1103_v59 = vshll.u32 %v1099_v46, 16  ;;  %v1125_v51 = vshll.u32 %v1121_v45, 16 }
  0xdf   : > { %vm1127_vm7 = vc.u32 %v1119_v25, %v1123_v36  ;;  %v1060_v61 = vshrl.u32 %v11347_v39, %v8342_v55  ;;  %v1764_v58 = vsub.s32 0, %v8410_v42  ;;  %v1129_v38 = vadd.s32 %v1123_v36, %v1119_v25 }
  0xe0   : > { %vm1105_vm8 = vc.u32 %v1097_v43, %v1101_v18  ;;  %v1107_v60 = vadd.s32 %v1101_v18, %v1097_v43  ;;  %v1128_v35 = vsel %vm1127_vm7, 1, %v11345_v0  ;;  %vm1763_vm9 = vcmp.lt.s32.totalorder %v8410_v42, 0 }
  0xe1   : > { %v1106_v9 = vsel %vm1105_vm8, 1, %v11345_v0  ;;  %v1130_v47 = vadd.s32 %v1128_v35, %v1122_v31  ;;  %v740_v53 = vshrl.u32 %v739_v50, 23  ;;  %v8422_v63 = vsel %vm7178_vm6, 0, %v7177_v62 }
  0xe2   : > { %v1108_v44 = vadd.s32 %v1106_v9, %v1100_v57  ;;  %vm1109_vm10 = vc.u32 %v1107_v60, %v1103_v59  ;;  %v1081_v43 = vsel %vm1079_vm4, %v8368_v23, 2102212464  ;;  %vm1131_vm11 = vc.u32 %v1129_v38, %v1125_v51 }
  0xe3   : > { %v1110_v55 = vsel %vm1109_vm10, 1, %v11345_v0  ;;  %v1102_v18 = vshrl.u32 %v1098_v28, 16  ;;  %v1132_v25 = vsel %vm1131_vm11, 1, %v11345_v0  ;;  %v7179_v31 = vadd.s32 4294967169, %v740_v53 }
  0xe4   : > { %v1112_v41 = vadd.s32 %v1110_v55, %v1108_v44  ;;  %v1765_v36 = vsel %vm1763_vm9, %v1764_v58, %v8410_v42  ;;  %v1080_v57 = vsel %vm1076_vm2, %v1060_v61, %v8364_v19  ;;  %v1124_v62 = vshrl.u32 %v1120_v37, 16 }
  0xe5   : > { %v1134_v50 = vadd.s32 %v1132_v25, %v1130_v47  ;;  %v1082_v23 = vsel %vm1078_vm3, %v8366_v49, %v1081_v43  ;;  %v1104_v59 = vshrl.u32 %v1099_v46, 16  ;;  %v746_v35 = vadd.s32 1, %v7179_v31 }
  0xe6   : > { %v1113_v60 = vadd.s32 %v1112_v41, %v1102_v18  ;;  %v696_v28 = vsub.s32 4294967266, %v8422_v63  ;;  %v1126_v9 = vshrl.u32 %v1121_v45, 16  ;;  %v743_v58 = vand.u32 8388607, %v11344_v24 }
  0xe7   : > { %v1135_v44 = vadd.s32 %v1134_v50, %v1124_v62  ;;  %v1766_v53 = vclz %v1765_v36  ;;  %v8441_v19 = vadd.s32 %v1129_v38, %v1125_v51  ;;  %vm747_vm12 = vcmp.gt.s32.totalorder %v746_v35, 0 }
  0xe8   : > { %v8439_v55 = vadd.s32 %v1113_v60, %v1104_v59  ;;  %v1083_v37 = vsel %vm1077_vm5, %v1080_v57, %v1082_v23  ;;  %v748_v46 = vsel %vm747_vm12, %v746_v35, 0  ;;  %v548_v41 = vcvt.s32.f32 %v8408_v13 }
  0xe9   : > { %v1136_v49 = vadd.s32 %v1135_v44, %v1126_v9  ;;  %v676_v45 = vadd.s32 %v8248_v56, %v8246_v34  ;;  %v750_v61 = vand.u32 31, %v748_v46  ;;  %v546_v47 = vand.u32 2147483647, %v8412_v4 }
  0xea   : > { %vm1139_vm13 = vc.u32 %v8439_v55, %v8441_v19  ;;  %v692_v51 = vsub.s32 32, %v8422_v63  ;;  %v697_v38 = vadd.s32 127, %v696_v28  ;;  %v7198_v18 = vadd.s32 4294967294, %v1766_v53 }
  0xeb   : > { %v1140_v43 = vadd.s32 1, %v1136_v49  ;;  %v1137_v54 = vmul.u32 %v8370_v27, %v1083_v37  ;;  %v744_v25 = vor.u32 8388608, %v743_v58  ;;  %v751_v31 = vsub.s32 32, %v750_v61 }
  0xec   : > { %v8453_v13 = vshrl.u32 %v748_v46, 5  ;;  %v753_v34 = vshll.u32 %v11347_v39, %v750_v61  ;;  %v11484_v56 = vmov 2475754826   ;;  %v11485_v4 = vmov 2131351028  }
  0xed   : > { %v1141_v36 = vsel %vm1139_vm13, %v1140_v43, %v1136_v49  ;;  %v756_v57 = vshll.u32 %v11484_v56, %v750_v61  ;;  %v754_v50 = vshrl.u32 %v11484_v56, %v751_v31  ;;  %v757_v23 = vshrl.u32 %v11485_v4, %v751_v31 }
  0xee   : > { %v1142_v62 = vadd.s32 %v1141_v36, %v1137_v54  ;;  %v759_v59 = vshll.u32 %v11485_v4, %v750_v61  ;;  %v11486_v60 = vmov 2102212464   ;;  %v11487_v28 = vmov 920167782  }
  0xef   : > { %v760_v35 = vshrl.u32 %v11486_v60, %v751_v31  ;;  %v762_v27 = vshll.u32 %v11486_v60, %v750_v61  ;;  %v763_v9 = vshrl.u32 %v11487_v28, %v751_v31  ;;  %v765_v44 = vshll.u32 %v11487_v28, %v750_v61 }
  0xf0   : > { %v1143_v58 = vadd.s32 536870912, %v1142_v62  ;;  %v8464_v53 = vor.u32 %v754_v50, %v753_v34  ;;  %v8466_v37 = vor.u32 %v757_v23, %v756_v57  ;;  %v766_v49 = vshrl.u32 %v11482_v29, %v751_v31 }
  0xf1   : > { %v693_v46 = vshll.u32 %v8315_v52, %v8422_v63  ;;  %v694_v43 = vshrl.u32 %v676_v45, %v692_v51  ;;  %v761_v54 = vor.u32 %v760_v35, %v759_v59  ;;  %v764_v36 = vor.u32 %v763_v9, %v762_v27 }
  0xf2   : > { %v698_v24 = vshll.u32 %v697_v38, 23  ;;  %v8471_v0 = vshrl.u32 %v1143_v58, 30  ;;  %v767_v39 = vor.u32 %v766_v49, %v765_v44  ;;  %vm768_vm14 = vcmp.lt.s32.totalorder %v8453_v13, 1 }
  0xf3   : > { %vm771_vm15 = vcmp.lt.s32.totalorder %v8453_v13, 4  ;;  %v776_v61 = vsel %vm768_vm14, %v8464_v53, %v8466_v37  ;;  %v8479_v34 = vshll.u32 %v744_v25, 8  ;;  %vm7199_vm0 = vcmp.lt.s32.totalorder %v7198_v18, 0 }
  0xf4   : > { %11488 = vst [vmem:[#allocation21_spill] sm:$0xff] %v8471_v0  ;;  %vm769_vm1 = vcmp.lt.s32.totalorder %v8453_v13, 2  ;;  %vm770_vm2 = vcmp.lt.s32.totalorder %v8453_v13, 3  ;;  %v777_v52 = vsel %vm771_vm15, %v764_v36, 920167782  ;;  %v1145_v63 = vshll.u32 %v8471_v0, 30 }
  0xf5   : > { %v778_v45 = vsel %vm770_vm2, %v761_v54, %v777_v52  ;;  %v780_v51 = vsel %vm768_vm14, %v8466_v37, %v761_v54  ;;  %v781_v38 = vsel %vm771_vm15, %v767_v39, 1326507024  ;;  %v8493_v25 = vmul.f32 %v548_v41, %v546_v47 }
  0xf6   : > { %v8495_v57 = vor.u32 %v694_v43, %v693_v46  ;;  %v8497_v50 = vor.u32 4788187, %v698_v24  ;;  %v779_v23 = vsel %vm769_vm1, %v776_v61, %v778_v45  ;;  %v782_v59 = vsel %vm770_vm2, %v764_v36, %v781_v38  ;;  %v407_v24 = vpop.permute.xlu2 %406 }
  0xf7   : > { %v785_v35 = vand.u32 65535, %v8479_v34  ;;  %v809_v27 = vand.u32 65535, %v779_v23  ;;  %v810_v9 = vshrl.u32 %v779_v23, 16  ;;  %v8505_v44 = vsel %vm7199_vm0, 0, %v7198_v18 }
  0xf8   : > { %v783_v39 = vsel %vm769_vm1, %v780_v51, %v782_v59  ;;  %v786_v41 = vshrl.u32 %v8479_v34, 16  ;;  %v8510_v47 = vsub.s32 %v1142_v62, %v1145_v63  ;;  %v700_v36 = vand.u32 2147483647, %v8497_v50 }
  0xf9   : > { %v787_v58 = vand.u32 65535, %v783_v39  ;;  %v788_v49 = vshrl.u32 %v783_v39, 16  ;;  %v812_v46 = vmul.u32 %v810_v9, %v785_v35  ;;  %v702_v61 = vcvt.s32.f32 %v8495_v57 }
  0xfa   : > { %v813_v52 = vmul.u32 %v809_v27, %v786_v41  ;;  %v1754_v18 = vadd.s32 %v8336_v32, %v8340_v21  ;;  %v1770_v45 = vsub.s32 32, %v8505_v44  ;;  %v8519_v38 = vmul.f32 %v8116_v20, %v407_v24 }
  0xfb   : > { %v790_v51 = vmul.u32 %v788_v49, %v785_v35  ;;  %v11490_v62 = vmov 683565275   ;;  %v791_v23 = vmul.u32 %v787_v58, %v786_v41  ;;  %v811_v59 = vmul.u32 %v809_v27, %v785_v35 }
  0xfc   : > { %11489 = vst [vmem:[#allocation22_spill] sm:$0xff] %v8519_v38  ;;  %v752_v63 = vshrl.u32 %v11490_v62, %v751_v31  ;;  %v815_v39 = vshll.u32 %v812_v46, 16  ;;  %v1148_v43 = vsub.s32 0, %v8510_v47  ;;  %v773_v57 = vsel %vm771_vm15, %v761_v54, 2102212464 }
  0xfd   : > { %v789_v50 = vmul.u32 %v787_v58, %v785_v35  ;;  %v793_v14 = vshll.u32 %v790_v51, 16  ;;  %v814_v16 = vmul.u32 %v810_v9, %v786_v41  ;;  %v817_v32 = vshll.u32 %v813_v52, 16 }
  0xfe   : > { %vm819_vm3 = vc.u32 %v811_v59, %v815_v39  ;;  %v821_v21 = vadd.s32 %v815_v39, %v811_v59  ;;  %v792_v12 = vmul.u32 %v788_v49, %v786_v41  ;;  %v11491_v24 = vmov 0  }
  0xff   : > { %vm797_vm4 = vc.u32 %v789_v50, %v793_v14  ;;  %v799_v20 = vadd.s32 %v793_v14, %v789_v50  ;;  %v820_v15 = vsel %vm819_vm3, 1, %v11491_v24  ;;  %v795_v31 = vshll.u32 %v791_v23, 16 }
 0x100   : > { %v798_v27 = vsel %vm797_vm4, 1, %v11491_v24  ;;  %v822_v11 = vadd.s32 %v820_v15, %v814_v16  ;;  %vm823_vm5 = vc.u32 %v821_v21, %v817_v32  ;;  %v1774_v10 = vsub.s32 4294967266, %v8505_v44 }
 0x101   : > { %vm1147_vm6 = vcmp.lt.s32.totalorder %v8510_v47, 0  ;;  %v800_v54 = vadd.s32 %v798_v27, %v792_v12  ;;  %v772_v9 = vsel %vm768_vm14, %v752_v63, %v8464_v53  ;;  %vm801_vm7 = vc.u32 %v799_v20, %v795_v31 }
 0x102   : > { %v824_v14 = vsel %vm823_vm5, 1, %v11491_v24  ;;  %v2125_v41 = vand.u32 2139095040, %v8519_v38  ;;  %v774_v15 = vsel %vm770_vm2, %v8466_v37, %v773_v57  ;;  %v802_v16 = vsel %vm801_vm7, 1, %v11491_v24 }
 0x103   : > { %v816_v58 = vshrl.u32 %v812_v46, 16  ;;  %v826_v49 = vadd.s32 %v824_v14, %v822_v11  ;;  %v1149_v12 = vsel %vm1147_vm6, %v1148_v43, %v8510_v47  ;;  %v794_v59 = vshrl.u32 %v790_v51, 16 }
 0x104   : > { %v804_v39 = vadd.s32 %v802_v16, %v800_v54  ;;  %v2126_v50 = vshrl.u32 %v2125_v41, 23  ;;  %v1772_v27 = vshrl.u32 %v1754_v18, %v1770_v45  ;;  %v1775_v53 = vadd.s32 127, %v1774_v10 }
 0x105   : > { %v818_v63 = vshrl.u32 %v813_v52, 16  ;;  %v827_v20 = vadd.s32 %v826_v49, %v816_v58  ;;  %v8540_v31 = vmul.f32 %v702_v61, %v700_v36  ;;  %v796_v35 = vshrl.u32 %v791_v23, 16 }
 0x106   : > { %v805_v1 = vadd.s32 %v804_v39, %v794_v59  ;;  %v7206_v2 = vadd.s32 4294967169, %v2126_v50  ;;  %v1771_v37 = vshll.u32 %v8410_v42, %v8505_v44  ;;  %v1150_v57 = vclz %v1149_v12 }
 0x107   : > { %v775_v11 = vsel %vm769_vm1, %v772_v9, %v774_v15  ;;  %v828_v46 = vadd.s32 %v827_v20, %v818_v63  ;;  %v8548_v51 = vadd.s32 %v821_v21, %v817_v32  ;;  %v11492_v10 = vand.u32 2147483647, %v8519_v38 }
 0x108   : > { %v8546_v43 = vadd.s32 %v805_v1, %v796_v35  ;;  %v2132_v36 = vadd.s32 1, %v7206_v2  ;;  %v8552_v61 = vor.u32 %v1772_v27, %v1771_v37  ;;  %v1776_v18 = vshll.u32 %v1775_v53, 23  ;;  %v377_v1 = vpop.permute.xlu1 %376 }
 0x109   : > { %v2129_v52 = vand.u32 8388607, %v11492_v10  ;;  %v832_v45 = vadd.s32 1, %v828_v46  ;;  %vm430_vm8 = vcmp.lt.s32.totalorder %v8119_v22, 0  ;;  %v829_v42 = vmul.u32 %v8479_v34, %v775_v11 }
 0x10a   : > { %vm831_vm9 = vc.u32 %v8546_v43, %v8548_v51  ;;  %vm2133_vm10 = vcmp.gt.s32.totalorder %v2132_v36, 0  ;;  %v11493_v13 = vxor.u32 2147483648, %v8493_v25  ;;  %v7186_v2 = vadd.s32 4294967294, %v1150_v57 }
 0x10b   : > { %v833_v23 = vsel %vm831_vm9, %v832_v45, %v828_v46  ;;  %v2134_v32 = vsel %vm2133_vm10, %v2132_v36, 0  ;;  %v2130_v35 = vor.u32 8388608, %v2129_v52  ;;  %v8566_v9 = vor.u32 4788187, %v1776_v18 }
 0x10c   : > { %v8563_v44 = vsel %vm430_vm8, %v11493_v13, %v8493_v25  ;;  %v834_v54 = vadd.s32 %v833_v23, %v829_v42  ;;  %v2136_v34 = vand.u32 31, %v2134_v32  ;;  %v8571_v41 = vadd.s32 %v8441_v19, %v8439_v55  ;;  %v8576_v25 = vld [vmem:[%s11328_s8] ss:$0 sm:$0xff] }
 0x10d   : > { %v8579_v15 = vmul.f32 %v8576_v25, %v377_v1  ;;  %v8581_v58 = vshrl.u32 %v2134_v32, 5  ;;  %vm7187_vm11 = vcmp.lt.s32.totalorder %v7186_v2, 0  ;;  %v8591_v53 = vshll.u32 %v2130_v35, 8 }
 0x10e   : > { %v835_v16 = vadd.s32 536870912, %v834_v54  ;;  %v2137_v49 = vsub.s32 32, %v2136_v34  ;;  %v2139_v12 = vshll.u32 %v11490_v62, %v2136_v34  ;;  %v2142_v59 = vshll.u32 %v11484_v56, %v2136_v34 }
 0x10f   : > { %v2145_v55 = vshll.u32 %v11485_v4, %v2136_v34  ;;  %v2148_v19 = vshll.u32 %v11486_v60, %v2136_v34  ;;  %v2151_v27 = vshll.u32 %v11487_v28, %v2136_v34  ;;  %v1201_v57 = vand.u32 2139095040, %v8579_v15 }
 0x110   : > { %v8587_v39 = vshrl.u32 %v835_v16, 30  ;;  %v2140_v50 = vshrl.u32 %v11484_v56, %v2137_v49  ;;  %v2143_v63 = vshrl.u32 %v11485_v4, %v2137_v49  ;;  %v2146_v20 = vshrl.u32 %v11486_v60, %v2137_v49 }
 0x111   : > { %v2149_v37 = vshrl.u32 %v11487_v28, %v2137_v49  ;;  %v2152_v10 = vshrl.u32 %v11482_v29, %v2137_v49  ;;  %vm2154_vm12 = vcmp.lt.s32.totalorder %v8581_v58, 1  ;;  %vm2155_vm13 = vcmp.lt.s32.totalorder %v8581_v58, 2 }
 0x112   : > { %11494 = vst [vmem:[#allocation23_spill] sm:$0xff] %v8587_v39  ;;  %v837_v11 = vshll.u32 %v8587_v39, 30  ;;  %v2141_v46 = vor.u32 %v2140_v50, %v2139_v12  ;;  %v2144_v52 = vor.u32 %v2143_v63, %v2142_v59  ;;  %v2147_v36 = vor.u32 %v2146_v20, %v2145_v55 }
 0x113   : > { %v2150_v18 = vor.u32 %v2149_v37, %v2148_v19  ;;  %v2153_v42 = vor.u32 %v2152_v10, %v2151_v27  ;;  %vm2156_vm14 = vcmp.lt.s32.totalorder %v8581_v58, 3  ;;  %vm2157_vm15 = vcmp.lt.s32.totalorder %v8581_v58, 4 }
 0x114   : > { %v8601_v45 = vsub.s32 %v834_v54, %v837_v11  ;;  %v8606_v1 = vsel %vm7187_vm11, 0, %v7186_v2  ;;  %v2162_v13 = vsel %vm2154_vm12, %v2141_v46, %v2144_v52  ;;  %v2171_v32 = vand.u32 65535, %v8591_v53 }
 0x115   : > { %v2163_v23 = vsel %vm2157_vm15, %v2150_v18, 920167782  ;;  %v2172_v34 = vshrl.u32 %v8591_v53, 16  ;;  %v2166_v16 = vsel %vm2154_vm12, %v2144_v52, %v2147_v36  ;;  %v2167_v12 = vsel %vm2157_vm15, %v2153_v42, 1326507024 }
 0x116   : > { %vm839_vm0 = vcmp.lt.s32.totalorder %v8601_v45, 0  ;;  %v840_v54 = vsub.s32 0, %v8601_v45  ;;  %v2164_v35 = vsel %vm2156_vm14, %v2147_v36, %v2163_v23  ;;  %v1202_v59 = vshrl.u32 %v1201_v57, 23 }
 0x117   : > { %v2165_v2 = vsel %vm2155_vm13, %v2162_v13, %v2164_v35  ;;  %v2168_v19 = vsel %vm2156_vm14, %v2150_v18, %v2167_v12  ;;  %v1158_v20 = vsub.s32 4294967266, %v8606_v1  ;;  %v2138_v10 = vshrl.u32 %v11490_v62, %v2137_v49 }
 0x118   : > { %v841_v55 = vsel %vm839_vm0, %v840_v54, %v8601_v45  ;;  %v2195_v50 = vand.u32 65535, %v2165_v2  ;;  %v2196_v27 = vshrl.u32 %v2165_v2, 16  ;;  %v2169_v11 = vsel %vm2155_vm13, %v2166_v16, %v2168_v19 }
 0x119   : > { %v842_v37 = vclz %v841_v55  ;;  %v2173_v13 = vand.u32 65535, %v2169_v11  ;;  %v2174_v42 = vshrl.u32 %v2169_v11, 16  ;;  %v2159_v54 = vsel %vm2157_vm15, %v2147_v36, 2102212464 }
 0x11a   : > { %v2198_v57 = vmul.u32 %v2196_v27, %v2171_v32  ;;  %v2197_v18 = vmul.u32 %v2195_v50, %v2171_v32  ;;  %v7188_v35 = vadd.s32 4294967169, %v1202_v59  ;;  %v2199_v14 = vmul.u32 %v2195_v50, %v2172_v34 }
 0x11b   : > { %v7180_v23 = vadd.s32 4294967294, %v842_v37  ;;  %v2175_v2 = vmul.u32 %v2173_v13, %v2171_v32  ;;  %v2176_v12 = vmul.u32 %v2174_v42, %v2171_v32  ;;  %v2177_v21 = vmul.u32 %v2173_v13, %v2172_v34 }
 0x11c   : > { %v1154_v55 = vsub.s32 32, %v8606_v1  ;;  %v8635_v63 = vadd.s32 127, %v1158_v20  ;;  %v2200_v16 = vmul.u32 %v2196_v27, %v2172_v34  ;;  %v2201_v19 = vshll.u32 %v2198_v57, 16 }
 0x11d   : > { %vm7181_vm1 = vcmp.lt.s32.totalorder %v7180_v23, 0  ;;  %v2178_v49 = vmul.u32 %v2174_v42, %v2172_v34  ;;  %v2179_v11 = vshll.u32 %v2176_v12, 16  ;;  %v2181_v3 = vshll.u32 %v2177_v21, 16 }
 0x11e   : > { %v2158_v37 = vsel %vm2154_vm12, %v2138_v10, %v2141_v46  ;;  %v2160_v36 = vsel %vm2156_vm14, %v2144_v52, %v2159_v54  ;;  %v11360_v32 = vand.u32 2147483647, %v8579_v15  ;;  %v1208_v59 = vadd.s32 1, %v7188_v35 }
 0x11f   : > { %vm2183_vm2 = vc.u32 %v2175_v2, %v2179_v11  ;;  %v2185_v50 = vadd.s32 %v2179_v11, %v2175_v2  ;;  %v2203_v13 = vshll.u32 %v2199_v14, 16  ;;  %vm2205_vm3 = vc.u32 %v2197_v18, %v2201_v19 }
 0x120   : > { %v8642_v20 = vsel %vm7181_vm1, 0, %v7180_v23  ;;  %v2180_v27 = vshrl.u32 %v2176_v12, 16  ;;  %v2184_v34 = vsel %vm2183_vm2, 1, %v11491_v24  ;;  %v2206_v42 = vsel %vm2205_vm3, 1, %v11491_v24 }
 0x121   : > { %v2186_v5 = vadd.s32 %v2184_v34, %v2178_v49  ;;  %vm2187_vm4 = vc.u32 %v2185_v50, %v2181_v3  ;;  %v2207_v46 = vadd.s32 %v2201_v19, %v2197_v18  ;;  %v2208_v10 = vadd.s32 %v2206_v42, %v2200_v16 }
 0x122   : > { %v2188_v52 = vsel %vm2187_vm4, 1, %v11491_v24  ;;  %v2202_v54 = vshrl.u32 %v2198_v57, 16  ;;  %v1205_v35 = vand.u32 8388607, %v11360_v32  ;;  %vm1209_vm5 = vcmp.gt.s32.totalorder %v1208_v59, 0 }
 0x123   : > { %v2182_v2 = vshrl.u32 %v2177_v21, 16  ;;  %v2190_v11 = vadd.s32 %v2188_v52, %v2186_v5  ;;  %vm2209_vm6 = vc.u32 %v2207_v46, %v2203_v13  ;;  %v1210_v23 = vsel %vm1209_vm5, %v1208_v59, 0 }
 0x124   : > { %v1155_v12 = vshll.u32 %v8510_v47, %v8606_v1  ;;  %v850_v6 = vsub.s32 4294967266, %v8642_v20  ;;  %v2161_v3 = vsel %vm2155_vm13, %v2158_v37, %v2160_v36  ;;  %v2210_v18 = vsel %vm2209_vm6, 1, %v11491_v24 }
 0x125   : > { %v2191_v16 = vadd.s32 %v2190_v11, %v2180_v27  ;;  %v2204_v57 = vshrl.u32 %v2199_v14, 16  ;;  %v2212_v19 = vadd.s32 %v2210_v18, %v2208_v10  ;;  %v1212_v49 = vand.u32 31, %v1210_v23 }
 0x126   : > { %v1156_v50 = vshrl.u32 %v8571_v41, %v1154_v55  ;;  %v1160_v5 = vshll.u32 %v8635_v63, 23  ;;  %v8657_v21 = vadd.s32 %v2207_v46, %v2203_v13  ;;  %v1206_v59 = vor.u32 8388608, %v1205_v35 }
 0x127   : > { %v8659_v34 = vadd.s32 %v2191_v16, %v2182_v2  ;;  %v2213_v42 = vadd.s32 %v2212_v19, %v2202_v54  ;;  %v2215_v52 = vmul.u32 %v8591_v53, %v2161_v3  ;;  %v8662_v58 = vsub.s32 32, %v1212_v49 }
 0x128   : > { %v8664_v37 = vshrl.u32 %v1210_v23, 5  ;;  %v1215_v14 = vshll.u32 %v11490_v62, %v1212_v49  ;;  %v1218_v36 = vshll.u32 %v11484_v56, %v1212_v49  ;;  %v1221_v41 = vshll.u32 %v11485_v4, %v1212_v49 }
 0x129   : > { %v846_v63 = vsub.s32 32, %v8642_v20  ;;  %v851_v55 = vadd.s32 127, %v850_v6  ;;  %v2214_v13 = vadd.s32 %v2213_v42, %v2204_v57  ;;  %v1224_v27 = vshll.u32 %v11486_v60, %v1212_v49 }
 0x12a   : > { %vm2217_vm7 = vc.u32 %v8659_v34, %v8657_v21  ;;  %v1216_v53 = vshrl.u32 %v11484_v56, %v8662_v58  ;;  %v1219_v46 = vshrl.u32 %v11485_v4, %v8662_v58  ;;  %v1222_v10 = vshrl.u32 %v11486_v60, %v8662_v58 }
 0x12b   : > { %v2218_v54 = vadd.s32 1, %v2214_v13  ;;  %v1225_v35 = vshrl.u32 %v11487_v28, %v8662_v58  ;;  %v1227_v6 = vshll.u32 %v11487_v28, %v1212_v49  ;;  %v1228_v2 = vshrl.u32 %v11482_v29, %v8662_v58 }
 0x12c   : > { %v8684_v11 = vor.u32 %v1216_v53, %v1215_v14  ;;  %v8686_v23 = vor.u32 %v1219_v46, %v1218_v36  ;;  %v1223_v3 = vor.u32 %v1222_v10, %v1221_v41  ;;  %vm1230_vm9 = vcmp.lt.s32.totalorder %v8664_v37, 1  ;;  %v367_v10 = vpop.permute.xlu0 %366 }
 0x12d   : > { %v2219_v18 = vsel %vm2217_vm7, %v2218_v54, %v2214_v13  ;;  %v1226_v16 = vor.u32 %v1225_v35, %v1224_v27  ;;  %v1229_v57 = vor.u32 %v1228_v2, %v1227_v6  ;;  %vm1232_vm10 = vcmp.lt.s32.totalorder %v8664_v37, 3 }
 0x12e   : > { %v2220_v19 = vadd.s32 %v2219_v18, %v2215_v52  ;;  %vm1231_vm11 = vcmp.lt.s32.totalorder %v8664_v37, 2  ;;  %vm1233_vm12 = vcmp.lt.s32.totalorder %v8664_v37, 4  ;;  %v8692_v49 = vshll.u32 %v1206_v59, 8 }
 0x12f   : > { %v830_v42 = vadd.s32 %v8548_v51, %v8546_v43  ;;  %v1238_v14 = vsel %vm1230_vm9, %v8684_v11, %v8686_v23  ;;  %v1239_v36 = vsel %vm1233_vm12, %v1226_v16, 920167782  ;;  %v1242_v52 = vsel %vm1230_vm9, %v8686_v23, %v1223_v3 }
 0x130   : > { %v847_v41 = vshll.u32 %v8601_v45, %v8642_v20  ;;  %v2221_v59 = vadd.s32 536870912, %v2220_v19  ;;  %v1240_v13 = vsel %vm1232_vm10, %v1223_v3, %v1239_v36  ;;  %v1243_v43 = vsel %vm1233_vm12, %v1229_v57, 1326507024 }
 0x131   : > { %v848_v51 = vshrl.u32 %v830_v42, %v846_v63  ;;  %v852_v27 = vshll.u32 %v851_v55, 23  ;;  %v1241_v53 = vsel %vm1231_vm11, %v1238_v14, %v1240_v13  ;;  %v1244_v46 = vsel %vm1232_vm10, %v1226_v16, %v1243_v43 }
 0x132   : > { %v8715_v54 = vshrl.u32 %v2221_v59, 30  ;;  %v1245_v45 = vsel %vm1231_vm11, %v1242_v52, %v1244_v46  ;;  %v1247_v20 = vand.u32 65535, %v8692_v49  ;;  %v1271_v35 = vand.u32 65535, %v1241_v53 }
 0x133   : > { %v1248_v6 = vshrl.u32 %v8692_v49, 16  ;;  %v1249_v2 = vand.u32 65535, %v1245_v45  ;;  %v1250_v63 = vshrl.u32 %v1245_v45, 16  ;;  %v1272_v55 = vshrl.u32 %v1241_v53, 16 }
 0x134   : > { %11495 = vst [vmem:[#allocation24_spill] sm:$0xff] %v8715_v54  ;;  %v11496_v18 = vand.u32 2147483647, %v8566_v9  ;;  %v11497_v57 = vcvt.s32.f32 %v8552_v61  ;;  %v8730_v16 = vor.u32 %v1156_v50, %v1155_v12  ;;  %v2223_v14 = vshll.u32 %v8715_v54, 30 }
 0x135   : > { %v8734_v36 = vmul.f32 %v8576_v25, %v367_v10  ;;  %v8736_v52 = vor.u32 4788187, %v1160_v5  ;;  %v8738_v59 = vor.u32 %v848_v51, %v847_v41  ;;  %v1252_v13 = vmul.u32 %v1250_v63, %v1247_v20 }
 0x136   : > { %v8725_v42 = vmul.f32 %v11497_v57, %v11496_v18  ;;  %v1253_v9 = vmul.u32 %v1249_v2, %v1248_v6  ;;  %v8740_v43 = vor.u32 4788187, %v852_v27  ;;  %v8742_v61 = vsub.s32 %v2220_v19, %v2223_v14 }
 0x137   : > { %v1274_v53 = vmul.u32 %v1272_v55, %v1247_v20  ;;  %v1275_v46 = vmul.u32 %v1271_v35, %v1248_v6  ;;  %vm11403_vm13 = vcmp.lt.s32.totalorder %v8126_v30, 0  ;;  %v1214_v47 = vshrl.u32 %v11490_v62, %v8662_v58 }
 0x138   : > { %v1251_v1 = vmul.u32 %v1249_v2, %v1247_v20  ;;  %v1255_v12 = vshll.u32 %v1252_v13, 16  ;;  %v1273_v50 = vmul.u32 %v1271_v35, %v1247_v20  ;;  %v2226_v5 = vsub.s32 0, %v8742_v61 }
 0x139   : > { %v1254_v41 = vmul.u32 %v1250_v63, %v1248_v6  ;;  %v1276_v51 = vmul.u32 %v1272_v55, %v1248_v6  ;;  %v1277_v10 = vshll.u32 %v1274_v53, 16  ;;  %vm2225_vm14 = vcmp.lt.s32.totalorder %v8742_v61, 0 }
 0x13a   : > { %v1257_v27 = vshll.u32 %v1253_v9, 16  ;;  %vm1259_vm15 = vc.u32 %v1251_v1, %v1255_v12  ;;  %v1261_v19 = vadd.s32 %v1255_v12, %v1251_v1  ;;  %v1279_v18 = vshll.u32 %v1275_v46, 16 }
 0x13b   : > { %v1260_v45 = vsel %vm1259_vm15, 1, %v11491_v24  ;;  %vm1281_vm0 = vc.u32 %v1273_v50, %v1277_v10  ;;  %v1283_v57 = vadd.s32 %v1277_v10, %v1273_v50  ;;  %v11498_v58 = vand.u32 2147483647, %v8119_v22 }
 0x13c   : > { %v11499_v2 = vmov 0  ;;  %v1235_v20 = vsel %vm1233_vm12, %v1223_v3, 2102212464  ;;  %v1262_v35 = vadd.s32 %v1260_v45, %v1254_v41  ;;  %vm1263_vm2 = vc.u32 %v1261_v19, %v1257_v27 }
 0x13d   : > { %vm8752_vm1 = vcmp.le.f32.partialorder %v11498_v58, 0.7853982  ;;  %v1282_v6 = vsel %vm1281_vm0, 1, %v11491_v24  ;;  %v11502_v63 = vand.u32 2147483647, %v8126_v30  ;;  %v11503_v55 = vmov 0 }
 0x13e   : > { %v11500_v2 = vsel %vm8752_vm1, 4294967295, %v11499_v2  ;;  %v2227_v14 = vsel %vm2225_vm14, %v2226_v5, %v8742_v61  ;;  %v1264_v1 = vsel %vm1263_vm2, 1, %v11491_v24  ;;  %v1284_v12 = vadd.s32 %v1282_v6, %v1276_v51 }
 0x13f   : > { %11501 = vst [vmem:[#allocation25_spill] sm:$0xff] %v11500_v2  ;;  %vm8761_vm3 = vcmp.le.f32.partialorder %v11502_v63, 0.7853982  ;;  %vm1285_vm4 = vc.u32 %v1283_v57, %v1279_v18  ;;  %v1256_v50 = vshrl.u32 %v1252_v13, 16  ;;  %v1266_v10 = vadd.s32 %v1264_v1, %v1262_v35 }
 0x140   : > { %v11504_v55 = vsel %vm8761_vm3, 4294967295, %v11503_v55  ;;  %v1286_v3 = vsel %vm1285_vm4, 1, %v11491_v24  ;;  %v893_v41 = vand.u32 2139095040, %v8734_v36  ;;  %v1234_v27 = vsel %vm1230_vm9, %v1214_v47, %v8684_v11 }
 0x141   : > { %11505 = vst [vmem:[#allocation26_spill] sm:$0xff] %v11504_v55  ;;  %v1236_v19 = vsel %vm1232_vm10, %v8686_v23, %v1235_v20  ;;  %v1278_v45 = vshrl.u32 %v1274_v53, 16  ;;  %v1288_v5 = vadd.s32 %v1286_v3, %v1284_v12  ;;  %v2228_v58 = vclz %v2227_v14 }
 0x142   : > { %v1258_v63 = vshrl.u32 %v1253_v9, 16  ;;  %v1267_v51 = vadd.s32 %v1266_v10, %v1256_v50  ;;  %v894_v6 = vshrl.u32 %v893_v41, 23  ;;  %v11506_v13 = vxor.u32 2147483648, %v8540_v31 }
 0x143   : > { %v1782_v1 = vxor.u32 2147483648, %v8725_v42  ;;  %v1280_v32 = vshrl.u32 %v1275_v46, 16  ;;  %v1289_v11 = vadd.s32 %v1288_v5, %v1278_v45  ;;  %v1162_v47 = vand.u32 2147483647, %v8736_v52  ;;  %v387_v5 = vpop.permute.xlu1 %386 }
 0x144   : > { %v705_v35 = vsel %vm11403_vm13, %v11506_v13, %v8540_v31  ;;  %v854_v23 = vand.u32 2147483647, %v8740_v43  ;;  %v8783_v53 = vadd.s32 %v1267_v51, %v1258_v63  ;;  %v8785_v20 = vadd.s32 %v1283_v57, %v1279_v18 }
 0x145   : > { %v1237_v9 = vsel %vm1231_vm11, %v1234_v27, %v1236_v19  ;;  %v1290_v14 = vadd.s32 %v1289_v11, %v1280_v32  ;;  %v11361_v12 = vand.u32 2147483647, %v8734_v36  ;;  %v7182_v50 = vadd.s32 4294967169, %v894_v6 }
 0x146   : > { %v1164_v31 = vcvt.s32.f32 %v8730_v16  ;;  %v856_v46 = vcvt.s32.f32 %v8738_v59  ;;  %v7207_v10 = vadd.s32 4294967294, %v2228_v58  ;;  %vm1293_vm5 = vc.u32 %v8783_v53, %v8785_v20 }
 0x147   : > { %v8798_v52 = vsel %vm8752_vm1, %v8119_v22, %v8563_v44  ;;  %vm11388_vm6 = vcmp.lt.s32.totalorder %v8224_v48, 0  ;;  %v1294_v32 = vadd.s32 1, %v1290_v14  ;;  %v900_v37 = vadd.s32 1, %v7182_v50 }
 0x148   : > { %11507 = vst [vmem:[#allocation27_spill] sm:$0xff] %v8798_v52  ;;  %v8804_v16 = vsel %vm8761_vm3, %v8126_v30, %v705_v35  ;;  %v1165_v59 = vmul.f32 %v1164_v31, %v1162_v47  ;;  %v857_v43 = vmul.f32 %v856_v46, %v854_v23  ;;  %v1291_v18 = vmul.u32 %v8692_v49, %v1237_v9 }
 0x149   : > { %11508 = vst [vmem:[#allocation28_spill] sm:$0xff] %v8804_v16  ;;  %v1783_v57 = vsel %vm11388_vm6, %v1782_v1, %v8725_v42  ;;  %v1295_v3 = vsel %vm1293_vm5, %v1294_v32, %v1290_v14  ;;  %v897_v44 = vand.u32 8388607, %v11361_v12  ;;  %vm901_vm7 = vcmp.gt.s32.totalorder %v900_v37, 0 }
 0x14a   : > { %v11509_v41 = vand.u32 2147483647, %v8224_v48  ;;  %v11510_v27 = vmov 0  ;;  %vm7208_vm10 = vcmp.lt.s32.totalorder %v7207_v10, 0  ;;  %v1296_v19 = vadd.s32 %v1295_v3, %v1291_v18 }
 0x14b   : > { %v902_v45 = vsel %vm901_vm7, %v900_v37, 0  ;;  %v8820_v49 = vmul.f32 %v8798_v52, %v8798_v52  ;;  %v8824_v42 = vmul.f32 %v8804_v16, %v8804_v16  ;;  %vm11400_vm11 = vcmp.lt.s32.totalorder %v8267_v33, 0 }
 0x14c   : > { %vm8814_vm9 = vcmp.le.f32.partialorder %v11509_v41, 0.7853982  ;;  %v904_v58 = vand.u32 31, %v902_v45  ;;  %v1166_v51 = vxor.u32 2147483648, %v1165_v59  ;;  %v858_v6 = vxor.u32 2147483648, %v857_v43 }
 0x14d   : > { %v11511_v27 = vsel %vm8814_vm9, 4294967295, %v11510_v27  ;;  %11513 = vst [vmem:[#allocation30_spill] sm:$0xff] %v8824_v42  ;;  %v8830_v63 = vsel %vm8814_vm9, %v8224_v48, %v1783_v57  ;;  %v1297_v13 = vadd.s32 536870912, %v1296_v19  ;;  %v8832_v35 = vsel %vm7208_vm10, 0, %v7207_v10 }
 0x14e   : > { %11512 = vst [vmem:[#allocation29_spill] sm:$0xff] %v11511_v27  ;;  %v898_v1 = vor.u32 8388608, %v897_v44  ;;  %v8834_v11 = vsub.s32 32, %v904_v58  ;;  %v8837_v47 = vmul.f32 %v8576_v25, %v387_v5  ;;  %v8841_v9 = vshrl.u32 %v902_v45, 5 }
 0x14f   : > { %11514 = vst [vmem:[#allocation31_spill] sm:$0xff] %v8830_v63  ;;  %v8839_v23 = vshrl.u32 %v1297_v13, 30  ;;  %v907_v14 = vshll.u32 %v11490_v62, %v904_v58  ;;  %v910_v50 = vshll.u32 %v11484_v56, %v904_v58  ;;  %v913_v10 = vshll.u32 %v11485_v4, %v904_v58 }
 0x150   : > { %11515 = vst [vmem:[#allocation32_spill] sm:$0xff] %v8837_v47  ;;  %v908_v31 = vshrl.u32 %v11484_v56, %v8834_v11  ;;  %v911_v46 = vshrl.u32 %v11485_v4, %v8834_v11  ;;  %v914_v32 = vshrl.u32 %v11486_v60, %v8834_v11  ;;  %v916_v37 = vshll.u32 %v11486_v60, %v904_v58 }
 0x151   : > { %11516 = vst [vmem:[#allocation33_spill] sm:$0xff] %v8839_v23  ;;  %v917_v18 = vshrl.u32 %v11487_v28, %v8834_v11  ;;  %v919_v57 = vshll.u32 %v11487_v28, %v904_v58  ;;  %v920_v3 = vshrl.u32 %v11482_v29, %v8834_v11  ;;  %vm11402_vm12 = vcmp.lt.s32.totalorder %v8331_v8, 0 }
 0x152   : > { %v8859_v44 = vor.u32 %v908_v31, %v907_v14  ;;  %v8861_v41 = vor.u32 %v911_v46, %v910_v50  ;;  %v915_v45 = vor.u32 %v914_v32, %v913_v10  ;;  %v8865_v5 = vmul.f32 %v8830_v63, %v8830_v63  ;;  %v382_v10 = vpop.permute.xlu0 %381 }
 0x153   : > { %v1299_v13 = vshll.u32 %v8839_v23, 30  ;;  %v918_v12 = vor.u32 %v917_v18, %v916_v37  ;;  %v921_v7 = vor.u32 %v920_v3, %v919_v57  ;;  %v8870_v58 = vsel %vm11400_vm11, %v1166_v51, %v1165_v59 }
 0x154   : > { %11517 = vst [vmem:[#allocation34_spill] sm:$0xff] %v8865_v5  ;;  %v8874_v27 = vsel %vm11402_vm12, %v858_v6, %v857_v43  ;;  %v2216_v14 = vadd.s32 %v8657_v21, %v8659_v34  ;;  %v2232_v50 = vsub.s32 32, %v8832_v35  ;;  %vm922_vm14 = vcmp.lt.s32.totalorder %v8841_v9, 1 }
 0x155   : > { %vm925_vm15 = vcmp.lt.s32.totalorder %v8841_v9, 4  ;;  %v8881_v31 = vshll.u32 %v898_v1, 8  ;;  %v1509_v46 = vand.u32 2139095040, %v8837_v47  ;;  %vm924_vm0 = vcmp.lt.s32.totalorder %v8841_v9, 3 }
 0x156   : > { %v930_v59 = vsel %vm922_vm14, %v8859_v44, %v8861_v41  ;;  %v931_v21 = vsel %vm925_vm15, %v918_v12, 920167782  ;;  %v934_v34 = vsel %vm922_vm14, %v8861_v41, %v915_v45  ;;  %v8894_v43 = vsub.s32 %v1296_v19, %v1299_v13 }
 0x157   : > { %vm923_vm2 = vcmp.lt.s32.totalorder %v8841_v9, 2  ;;  %v932_v51 = vsel %vm924_vm0, %v915_v45, %v931_v21  ;;  %v935_v6 = vsel %vm925_vm15, %v921_v7, 1326507024  ;;  %v2236_v1 = vsub.s32 4294967266, %v8832_v35 }
 0x158   : > { %v933_v32 = vsel %vm923_vm2, %v930_v59, %v932_v51  ;;  %v936_v37 = vsel %vm924_vm0, %v918_v12, %v935_v6  ;;  %v8907_v18 = vmul.f32 %v8576_v25, %v382_v10  ;;  %v939_v57 = vand.u32 65535, %v8881_v31 }
 0x159   : > { %v937_v19 = vsel %vm923_vm2, %v934_v34, %v936_v37  ;;  %v963_v3 = vand.u32 65535, %v933_v32  ;;  %v964_v13 = vshrl.u32 %v933_v32, 16  ;;  %v2234_v21 = vshrl.u32 %v2216_v14, %v2232_v50 }
 0x15a   : > { %11518 = vst [vmem:[#allocation35_spill] sm:$0xff] %v8907_v18  ;;  %v940_v7 = vshrl.u32 %v8881_v31, 16  ;;  %v941_v63 = vand.u32 65535, %v937_v19  ;;  %v942_v48 = vshrl.u32 %v937_v19, 16  ;;  %v1302_v59 = vsub.s32 0, %v8894_v43 }
 0x15b   : > { %v966_v51 = vmul.u32 %v964_v13, %v939_v57  ;;  %v1510_v6 = vshrl.u32 %v1509_v46, 23  ;;  %v2233_v25 = vshll.u32 %v8742_v61, %v8832_v35  ;;  %vm1301_vm4 = vcmp.lt.s32.totalorder %v8894_v43, 0 }
 0x15c   : > { %v944_v10 = vmul.u32 %v942_v48, %v939_v57  ;;  %v945_v34 = vmul.u32 %v941_v63, %v940_v7  ;;  %v2237_v37 = vadd.s32 127, %v2236_v1  ;;  %v8920_v14 = vadd.s32 %v8785_v20, %v8783_v53 }
 0x15d   : > { %v967_v50 = vmul.u32 %v963_v3, %v940_v7  ;;  %v969_v32 = vshll.u32 %v966_v51, 16  ;;  %v8922_v19 = vor.u32 %v2234_v21, %v2233_v25  ;;  %v906_v12 = vshrl.u32 %v11490_v62, %v8834_v11 }
 0x15e   : > { %v943_v46 = vmul.u32 %v941_v63, %v939_v57  ;;  %v947_v5 = vshll.u32 %v944_v10, 16  ;;  %v1303_v61 = vsel %vm1301_vm4, %v1302_v59, %v8894_v43  ;;  %v927_v35 = vsel %vm925_vm15, %v915_v45, 2102212464 }
 0x15f   : > { %v965_v17 = vmul.u32 %v963_v3, %v939_v57  ;;  %v7194_v1 = vadd.s32 4294967169, %v1510_v6  ;;  %v946_v54 = vmul.u32 %v942_v48, %v940_v7  ;;  %v949_v23 = vshll.u32 %v945_v34, 16 }
 0x160   : > { %vm951_vm5 = vc.u32 %v943_v46, %v947_v5  ;;  %v953_v53 = vadd.s32 %v947_v5, %v943_v46  ;;  %v971_v21 = vshll.u32 %v967_v50, 16  ;;  %v926_v63 = vsel %vm922_vm14, %v906_v12, %v8859_v44 }
 0x161   : > { %v952_v20 = vsel %vm951_vm5, 1, %v11491_v24  ;;  %vm973_vm7 = vc.u32 %v965_v17, %v969_v32  ;;  %v975_v25 = vadd.s32 %v969_v32, %v965_v17  ;;  %v968_v59 = vmul.u32 %v964_v13, %v940_v7 }
 0x162   : > { %v954_v11 = vadd.s32 %v952_v20, %v946_v54  ;;  %vm955_vm10 = vc.u32 %v953_v53, %v949_v23  ;;  %v1304_v0 = vclz %v1303_v61  ;;  %v974_v48 = vsel %vm973_vm7, 1, %v11491_v24 }
 0x163   : > { %v956_v45 = vsel %vm955_vm10, 1, %v11491_v24  ;;  %vm977_vm15 = vc.u32 %v975_v25, %v971_v21  ;;  %v928_v5 = vsel %vm924_vm0, %v8861_v41, %v927_v35  ;;  %v948_v57 = vshrl.u32 %v944_v10, 16 }
 0x164   : > { %v958_v3 = vadd.s32 %v956_v45, %v954_v11  ;;  %v976_v17 = vadd.s32 %v974_v48, %v968_v59  ;;  %v2238_v6 = vshll.u32 %v2237_v37, 23  ;;  %v978_v32 = vsel %vm977_vm15, 1, %v11491_v24 }
 0x165   : > { %v11519_v54 = vand.u32 2147483647, %v8837_v47  ;;  %v1516_v44 = vadd.s32 1, %v7194_v1  ;;  %v950_v13 = vshrl.u32 %v945_v34, 16  ;;  %v970_v12 = vshrl.u32 %v966_v51, 16 }
 0x166   : > { %v959_v7 = vadd.s32 %v958_v3, %v948_v57  ;;  %v980_v46 = vadd.s32 %v978_v32, %v976_v17  ;;  %v7189_v61 = vadd.s32 4294967294, %v1304_v0  ;;  %v929_v53 = vsel %vm923_vm2, %v926_v63, %v928_v5 }
 0x167   : > { %v1513_v23 = vand.u32 8388607, %v11519_v54  ;;  %vm1517_vm14 = vcmp.gt.s32.totalorder %v1516_v44, 0  ;;  %v1355_v41 = vand.u32 2139095040, %v8907_v18  ;;  %v972_v37 = vshrl.u32 %v967_v50, 16 }
 0x168   : > { %v8944_v10 = vadd.s32 %v959_v7, %v950_v13  ;;  %v981_v35 = vadd.s32 %v980_v46, %v970_v12  ;;  %v1518_v20 = vsel %vm1517_vm14, %v1516_v44, 0  ;;  %v8946_v11 = vor.u32 4788187, %v2238_v6 }
 0x169   : > { %v8948_v59 = vadd.s32 %v975_v25, %v971_v21  ;;  %v1520_v34 = vand.u32 31, %v1518_v20  ;;  %v983_v9 = vmul.u32 %v8881_v31, %v929_v53  ;;  %v1514_v63 = vor.u32 8388608, %v1513_v23 }
 0x16a   : > { %v982_v1 = vadd.s32 %v981_v35, %v972_v37  ;;  %vm7190_vm0 = vcmp.lt.s32.totalorder %v7189_v61, 0  ;;  %v1356_v45 = vshrl.u32 %v1355_v41, 23  ;;  %v8955_v5 = vshrl.u32 %v1518_v20, 5 }
 0x16b   : > { %vm985_vm2 = vc.u32 %v8944_v10, %v8948_v59  ;;  %v1521_v50 = vsub.s32 32, %v1520_v34  ;;  %v1523_v21 = vshll.u32 %v11490_v62, %v1520_v34  ;;  %v1526_v25 = vshll.u32 %v11484_v56, %v1520_v34 }
 0x16c   : > { %v986_v48 = vadd.s32 1, %v982_v1  ;;  %v1529_v31 = vshll.u32 %v11485_v4, %v1520_v34  ;;  %v1532_v17 = vshll.u32 %v11486_v60, %v1520_v34  ;;  %v1535_v23 = vshll.u32 %v11487_v28, %v1520_v34 }
 0x16d   : > { %v1524_v57 = vshrl.u32 %v11484_v56, %v1521_v50  ;;  %v1527_v3 = vshrl.u32 %v11485_v4, %v1521_v50  ;;  %v1530_v32 = vshrl.u32 %v11486_v60, %v1521_v50  ;;  %v1533_v54 = vshrl.u32 %v11487_v28, %v1521_v50 }
 0x16e   : > { %v987_v6 = vsel %vm985_vm2, %v986_v48, %v982_v1  ;;  %v1536_v12 = vshrl.u32 %v11482_v29, %v1521_v50  ;;  %v8968_v46 = vsel %vm7190_vm0, 0, %v7189_v61  ;;  %v8970_v37 = vshll.u32 %v1514_v63, 8 }
 0x16f   : > { %v988_v44 = vadd.s32 %v987_v6, %v983_v9  ;;  %v1525_v13 = vor.u32 %v1524_v57, %v1523_v21  ;;  %v1528_v7 = vor.u32 %v1527_v3, %v1526_v25  ;;  %v1531_v53 = vor.u32 %v1530_v32, %v1529_v31 }
 0x170   : > { %v1534_v41 = vor.u32 %v1533_v54, %v1532_v17  ;;  %v1537_v20 = vor.u32 %v1536_v12, %v1535_v23  ;;  %vm1538_vm4 = vcmp.lt.s32.totalorder %v8955_v5, 1  ;;  %vm1541_vm5 = vcmp.lt.s32.totalorder %v8955_v5, 4 }
 0x171   : > { %v989_v35 = vadd.s32 536870912, %v988_v44  ;;  %vm1540_vm7 = vcmp.lt.s32.totalorder %v8955_v5, 3  ;;  %v1546_v34 = vsel %vm1538_vm4, %v1525_v13, %v1528_v7  ;;  %v7191_v61 = vadd.s32 4294967169, %v1356_v45 }
 0x172   : > { %v1547_v1 = vsel %vm1541_vm5, %v1534_v41, 920167782  ;;  %vm1539_vm10 = vcmp.lt.s32.totalorder %v8955_v5, 2  ;;  %v1550_v48 = vsel %vm1538_vm4, %v1528_v7, %v1531_v53  ;;  %v2240_v21 = vand.u32 2147483647, %v8946_v11 }
 0x173   : > { %v8979_v9 = vshrl.u32 %v989_v35, 30  ;;  %v1548_v63 = vsel %vm1540_vm7, %v1531_v53, %v1547_v1  ;;  %v1312_v25 = vsub.s32 4294967266, %v8968_v46  ;;  %v1551_v45 = vsel %vm1541_vm5, %v1537_v20, 1326507024 }
 0x174   : > { %v1549_v57 = vsel %vm1539_vm10, %v1546_v34, %v1548_v63  ;;  %v1552_v31 = vsel %vm1540_vm7, %v1534_v41, %v1551_v45  ;;  %v1555_v11 = vand.u32 65535, %v8970_v37  ;;  %v1556_v54 = vshrl.u32 %v8970_v37, 16 }
 0x175   : > { %11520 = vst [vmem:[#allocation36_spill] sm:$0xff] %v8979_v9  ;;  %v991_v3 = vshll.u32 %v8979_v9, 30  ;;  %v1579_v17 = vand.u32 65535, %v1549_v57  ;;  %v1580_v6 = vshrl.u32 %v1549_v57, 16  ;;  %v1553_v32 = vsel %vm1539_vm10, %v1550_v48, %v1552_v31 }
 0x176   : > { %v1362_v23 = vadd.s32 1, %v7191_v61  ;;  %v1522_v35 = vshrl.u32 %v11490_v62, %v1521_v50  ;;  %v1557_v20 = vand.u32 65535, %v1553_v32  ;;  %v1558_v34 = vshrl.u32 %v1553_v32, 16 }
 0x177   : > { %v8999_v12 = vsub.s32 %v988_v44, %v991_v3  ;;  %v1308_v1 = vsub.s32 32, %v8968_v46  ;;  %v9003_v63 = vadd.s32 127, %v1312_v25  ;;  %v1582_v41 = vmul.u32 %v1580_v6, %v1555_v11 }
 0x178   : > { %v1583_v57 = vmul.u32 %v1579_v17, %v1556_v54  ;;  %v1542_v45 = vsel %vm1538_vm4, %v1522_v35, %v1525_v13  ;;  %v1560_v61 = vmul.u32 %v1558_v34, %v1555_v11  ;;  %v1543_v44 = vsel %vm1541_vm5, %v1531_v53, 2102212464 }
 0x179   : > { %vm993_vm15 = vcmp.lt.s32.totalorder %v8999_v12, 0  ;;  %v994_v48 = vsub.s32 0, %v8999_v12  ;;  %v1561_v50 = vmul.u32 %v1557_v20, %v1556_v54  ;;  %v1585_v3 = vshll.u32 %v1582_v41, 16 }
 0x17a   : > { %vm1363_vm14 = vcmp.gt.s32.totalorder %v1362_v23, 0  ;;  %v1559_v31 = vmul.u32 %v1557_v20, %v1555_v11  ;;  %v1563_v32 = vshll.u32 %v1560_v61, 16  ;;  %v1581_v25 = vmul.u32 %v1579_v17, %v1555_v11 }
 0x17b   : > { %v1584_v51 = vmul.u32 %v1580_v6, %v1556_v54  ;;  %v995_v0 = vsel %vm993_vm15, %v994_v48, %v8999_v12  ;;  %v1562_v9 = vmul.u32 %v1558_v34, %v1556_v54  ;;  %v1565_v39 = vshll.u32 %v1561_v50, 16 }
 0x17c   : > { %v1587_v16 = vshll.u32 %v1583_v57, 16  ;;  %vm1567_vm0 = vc.u32 %v1559_v31, %v1563_v32  ;;  %v1569_v52 = vadd.s32 %v1563_v32, %v1559_v31  ;;  %vm1589_vm2 = vc.u32 %v1581_v25, %v1585_v3 }
 0x17d   : > { %v1591_v13 = vadd.s32 %v1585_v3, %v1581_v25  ;;  %v1544_v35 = vsel %vm1540_vm7, %v1528_v7, %v1543_v44  ;;  %v1568_v53 = vsel %vm1567_vm0, 1, %v11491_v24  ;;  %v1590_v55 = vsel %vm1589_vm2, 1, %v11491_v24 }
 0x17e   : > { %v1364_v20 = vsel %vm1363_vm14, %v1362_v23, 0  ;;  %v1570_v17 = vadd.s32 %v1568_v53, %v1562_v9  ;;  %vm1571_vm4 = vc.u32 %v1569_v52, %v1565_v39  ;;  %v1592_v6 = vadd.s32 %v1590_v55, %v1584_v51 }
 0x17f   : > { %vm1593_vm5 = vc.u32 %v1591_v13, %v1587_v16  ;;  %v996_v11 = vclz %v995_v0  ;;  %v1572_v54 = vsel %vm1571_vm4, 1, %v11491_v24  ;;  %v1586_v34 = vshrl.u32 %v1582_v41, 16 }
 0x180   : > { %v1594_v48 = vsel %vm1593_vm5, 1, %v11491_v24  ;;  %v1564_v3 = vshrl.u32 %v1560_v61, 16  ;;  %v1574_v31 = vadd.s32 %v1572_v54, %v1570_v17  ;;  %v1366_v7 = vand.u32 31, %v1364_v20 }
 0x181   : > { %v1596_v32 = vadd.s32 %v1594_v48, %v1592_v6  ;;  %v11521_v44 = vcvt.s32.f32 %v8922_v19  ;;  %v1309_v9 = vshll.u32 %v8894_v43, %v8968_v46  ;;  %v1566_v39 = vshrl.u32 %v1561_v50, 16 }
 0x182   : > { %v11522_v55 = vand.u32 2147483647, %v8907_v18  ;;  %v1575_v51 = vadd.s32 %v1574_v31, %v1564_v3  ;;  %v1588_v0 = vshrl.u32 %v1583_v57, 16  ;;  %v1367_v41 = vsub.s32 32, %v1366_v7 }
 0x183   : > { %v9021_v25 = vmul.f32 %v11521_v44, %v2240_v21  ;;  %v1597_v23 = vadd.s32 %v1596_v32, %v1586_v34  ;;  %v1310_v61 = vshrl.u32 %v8920_v14, %v1308_v1  ;;  %v1314_v53 = vshll.u32 %v9003_v63, 23 }
 0x184   : > { %v1359_v52 = vand.u32 8388607, %v11522_v55  ;;  %v7183_v17 = vadd.s32 4294967294, %v996_v11  ;;  %v1545_v19 = vsel %vm1539_vm10, %v1542_v45, %v1544_v35  ;;  %v9031_v21 = vadd.s32 %v1575_v51, %v1566_v39 }
 0x185   : > { %v9033_v6 = vadd.s32 %v1591_v13, %v1587_v16  ;;  %v1598_v43 = vadd.s32 %v1597_v23, %v1588_v0  ;;  %v1370_v46 = vshrl.u32 %v11484_v56, %v1367_v41  ;;  %v1369_v57 = vshll.u32 %v11490_v62, %v1366_v7 }
 0x186   : > { %v1360_v50 = vor.u32 8388608, %v1359_v52  ;;  %v1373_v54 = vshrl.u32 %v11485_v4, %v1367_v41  ;;  %v1376_v14 = vshrl.u32 %v11486_v60, %v1367_v41  ;;  %v1599_v1 = vmul.u32 %v8970_v37, %v1545_v19 }
 0x187   : > { %vm1601_vm7 = vc.u32 %v9031_v21, %v9033_v6  ;;  %v1602_v5 = vadd.s32 1, %v1598_v43  ;;  %v1372_v63 = vshll.u32 %v11484_v56, %v1366_v7  ;;  %vm7184_vm10 = vcmp.lt.s32.totalorder %v7183_v17, 0 }
 0x188   : > { %v9043_v16 = vshrl.u32 %v1364_v20, 5  ;;  %v1371_v45 = vor.u32 %v1370_v46, %v1369_v57  ;;  %v1375_v13 = vshll.u32 %v11485_v4, %v1366_v7  ;;  %v1378_v34 = vshll.u32 %v11486_v60, %v1366_v7 }
 0x189   : > { %v1603_v35 = vsel %vm1601_vm7, %v1602_v5, %v1598_v43  ;;  %v9046_v11 = vor.u32 %v1373_v54, %v1372_v63  ;;  %v1379_v48 = vshrl.u32 %v11487_v28, %v1367_v41  ;;  %v1381_v31 = vshll.u32 %v11487_v28, %v1366_v7 }
 0x18a   : > { %v1604_v37 = vadd.s32 %v1603_v35, %v1599_v1  ;;  %v1377_v3 = vor.u32 %v1376_v14, %v1375_v13  ;;  %v1382_v32 = vshrl.u32 %v11482_v29, %v1367_v41  ;;  %v9052_v44 = vor.u32 %v1310_v61, %v1309_v9 }
 0x18b   : > { %v9054_v20 = vor.u32 4788187, %v1314_v53  ;;  %v9056_v39 = vsel %vm7184_vm10, 0, %v7183_v17  ;;  %v1380_v55 = vor.u32 %v1379_v48, %v1378_v34  ;;  %vm1384_vm15 = vcmp.lt.s32.totalorder %v9043_v16, 1 }
 0x18c   : > { %v1605_v52 = vadd.s32 536870912, %v1604_v37  ;;  %v1383_v51 = vor.u32 %v1382_v32, %v1381_v31  ;;  %vm1387_vm14 = vcmp.lt.s32.totalorder %v9043_v16, 4  ;;  %vm1386_vm0 = vcmp.lt.s32.totalorder %v9043_v16, 3 }
 0x18d   : > { %v1392_v7 = vsel %vm1384_vm15, %v1371_v45, %v9046_v11  ;;  %v1393_v9 = vsel %vm1387_vm14, %v1380_v55, 920167782  ;;  %v9066_v0 = vshll.u32 %v1360_v50, 8  ;;  %vm1385_vm2 = vcmp.lt.s32.totalorder %v9043_v16, 2  ;;  %v397_v16 = vpop.permute.xlu0 %396 }
 0x18e   : > { %v9068_v23 = vshrl.u32 %v1605_v52, 30  ;;  %v1394_v61 = vsel %vm1386_vm0, %v1377_v3, %v1393_v9  ;;  %v1396_v53 = vsel %vm1384_vm15, %v9046_v11, %v1377_v3  ;;  %v1318_v17 = vcvt.s32.f32 %v9052_v44 }
 0x18f   : > { %v1004_v19 = vsub.s32 4294967266, %v9056_v39  ;;  %v1395_v43 = vsel %vm1385_vm2, %v1392_v7, %v1394_v61  ;;  %v1397_v46 = vsel %vm1387_vm14, %v1383_v51, 1326507024  ;;  %v1316_v50 = vand.u32 2147483647, %v9054_v20 }
 0x190   : > { %11523 = vst [vmem:[#allocation37_spill] sm:$0xff] %v9068_v23  ;;  %v1607_v57 = vshll.u32 %v9068_v23, 30  ;;  %v1398_v54 = vsel %vm1386_vm0, %v1380_v55, %v1397_v46  ;;  %v1425_v14 = vand.u32 65535, %v1395_v43  ;;  %v1401_v5 = vand.u32 65535, %v9066_v0 }
 0x191   : > { %v1399_v1 = vsel %vm1385_vm2, %v1396_v53, %v1398_v54  ;;  %v1402_v63 = vshrl.u32 %v9066_v0, 16  ;;  %v1426_v13 = vshrl.u32 %v1395_v43, 16  ;;  %v1368_v34 = vshrl.u32 %v11490_v62, %v1367_v41 }
 0x192   : > { %v9090_v35 = vsub.s32 %v1604_v37, %v1607_v57  ;;  %v1403_v48 = vand.u32 65535, %v1399_v1  ;;  %v1404_v31 = vshrl.u32 %v1399_v1, 16  ;;  %v1000_v32 = vsub.s32 32, %v9056_v39  ;;  %v402_v57 = vpop.permute.xlu1 %401 }
 0x193   : > { %v9094_v44 = vadd.s32 127, %v1004_v19  ;;  %v1428_v20 = vmul.u32 %v1426_v13, %v1401_v5  ;;  %v1429_v55 = vmul.u32 %v1425_v14, %v1402_v63  ;;  %v1388_v51 = vsel %vm1384_vm15, %v1368_v34, %v1371_v45 }
 0x194   : > { %vm1609_vm4 = vcmp.lt.s32.totalorder %v9090_v35, 0  ;;  %v1610_v52 = vsub.s32 0, %v9090_v35  ;;  %v1406_v7 = vmul.u32 %v1404_v31, %v1401_v5  ;;  %v1389_v37 = vsel %vm1387_vm14, %v1377_v3, 2102212464 }
 0x195   : > { %v1407_v41 = vmul.u32 %v1403_v48, %v1402_v63  ;;  %v1427_v9 = vmul.u32 %v1425_v14, %v1401_v5  ;;  %v1431_v61 = vshll.u32 %v1428_v20, 16  ;;  %v1405_v19 = vmul.u32 %v1403_v48, %v1401_v5  ;;  %v9108_v5 = vld [vmem:[%s11328_s8] ss:$0 sm:$0xff] }
 0x196   : > { %v1611_v53 = vsel %vm1609_vm4, %v1610_v52, %v9090_v35  ;;  %v1409_v43 = vshll.u32 %v1406_v7, 16  ;;  %v1430_v46 = vmul.u32 %v1426_v13, %v1402_v63  ;;  %v1408_v1 = vmul.u32 %v1404_v31, %v1402_v63 }
 0x197   : > { %v1612_v54 = vclz %v1611_v53  ;;  %v1411_v23 = vshll.u32 %v1407_v41, 16  ;;  %v1433_v42 = vshll.u32 %v1429_v55, 16  ;;  %vm1435_vm7 = vc.u32 %v1427_v9, %v1431_v61 }
 0x198   : > { %vm1413_vm5 = vc.u32 %v1405_v19, %v1409_v43  ;;  %v1415_v30 = vadd.s32 %v1409_v43, %v1405_v19  ;;  %v1437_v45 = vadd.s32 %v1431_v61, %v1427_v9  ;;  %v1436_v14 = vsel %vm1435_vm7, 1, %v11491_v24 }
 0x199   : > { %v7195_v34 = vadd.s32 4294967294, %v1612_v54  ;;  %v1414_v3 = vsel %vm1413_vm5, 1, %v11491_v24  ;;  %v9111_v13 = vmul.f32 %v9108_v5, %v402_v57  ;;  %v11525_v63 = vand.u32 2147483647, %v8267_v33 }
 0x19a   : > { %v1416_v31 = vadd.s32 %v1414_v3, %v1408_v1  ;;  %vm1417_vm15 = vc.u32 %v1415_v30, %v1411_v23  ;;  %v1438_v52 = vadd.s32 %v1436_v14, %v1430_v46  ;;  %vm1439_vm14 = vc.u32 %v1437_v45, %v1433_v42 }
 0x19b   : > { %11524 = vst [vmem:[#allocation38_spill] sm:$0xff] %v9111_v13  ;;  %vm9115_vm10 = vcmp.le.f32.partialorder %v11525_v63, 0.7853982  ;;  %v11528_v9 = vand.u32 2147483647, %v8331_v8  ;;  %v1390_v53 = vsel %vm1386_vm0, %v9046_v11, %v1389_v37  ;;  %v1418_v19 = vsel %vm1417_vm15, 1, %v11491_v24 }
 0x19c   : > { %v1432_v43 = vshrl.u32 %v1428_v20, 16  ;;  %v1440_v57 = vsel %vm1439_vm14, 1, %v11491_v24  ;;  %vm11392_vm5 = vcmp.lt.s32.totalorder %v8519_v38, 0  ;;  %vm11393_vm7 = vcmp.lt.s32.totalorder %v8579_v15, 0 }
 0x19d   : > { %vm9121_vm4 = vcmp.le.f32.partialorder %v11528_v9, 0.7853982  ;;  %vm7196_vm6 = vcmp.lt.s32.totalorder %v7195_v34, 0  ;;  %v1410_v30 = vshrl.u32 %v1406_v7, 16  ;;  %v1420_v23 = vadd.s32 %v1418_v19, %v1416_v31 }
 0x19e   : > { %v1442_v46 = vadd.s32 %v1440_v57, %v1438_v52  ;;  %v1319_v54 = vmul.f32 %v1318_v17, %v1316_v50  ;;  %v984_v1 = vadd.s32 %v8948_v59, %v8944_v10  ;;  %v1006_v3 = vshll.u32 %v9094_v44, 23 }
 0x19f   : > { %v1412_v11 = vshrl.u32 %v1407_v41, 16  ;;  %v1421_v37 = vadd.s32 %v1420_v23, %v1410_v30  ;;  %v1434_v14 = vshrl.u32 %v1429_v55, 16  ;;  %v1971_v63 = vand.u32 2139095040, %v9111_v13 }
 0x1a0   : > { %v1443_v20 = vadd.s32 %v1442_v46, %v1432_v43  ;;  %v2244_v9 = vxor.u32 2147483648, %v9021_v25  ;;  %v1002_v26 = vshrl.u32 %v984_v1, %v1000_v32  ;;  %v1615_v2 = vsel %vm7196_vm6, 0, %v7195_v34 }
 0x1a1   : > { %v1391_v7 = vsel %vm1385_vm2, %v1388_v51, %v1390_v53  ;;  %v11531_v17 = vand.u32 2147483647, %v8519_v38  ;;  %v11532_v50 = vmov 0  ;;  %v11535_v10 = vand.u32 2147483647, %v8579_v15 }
 0x1a2   : > { %v11536_v59 = vmov 0  ;;  %v9151_v44 = vadd.s32 %v1421_v37, %v1412_v11  ;;  %v9153_v55 = vadd.s32 %v1437_v45, %v1433_v42  ;;  %v1444_v32 = vadd.s32 %v1443_v20, %v1434_v14 }
 0x1a3   : > { %vm9141_vm0 = vcmp.le.f32.partialorder %v11531_v17, 0.7853982  ;;  %vm9147_vm15 = vcmp.le.f32.partialorder %v11535_v10, 0.7853982  ;;  %v1972_v41 = vshrl.u32 %v1971_v63, 23  ;;  %v1320_v51 = vxor.u32 2147483648, %v1319_v54 }
 0x1a4   : > { %v11533_v50 = vsel %vm9141_vm0, 4294967295, %v11532_v50  ;;  %v11537_v59 = vsel %vm9147_vm15, 4294967295, %v11536_v59  ;;  %v1001_v34 = vshll.u32 %v8999_v12, %v9056_v39  ;;  %v1007_v31 = vor.u32 4788187, %v1006_v3 }
 0x1a5   : > { %11534 = vst [vmem:[#allocation39_spill] sm:$0xff] %v11533_v50  ;;  %v11395_v52 = vand.u32 2147483647, %v9111_v13  ;;  %v1616_v53 = vsub.s32 32, %v1615_v2  ;;  %vm1447_vm6 = vc.u32 %v9151_v44, %v9153_v55  ;;  %v1448_v19 = vadd.s32 1, %v1444_v32 }
 0x1a6   : > { %11538 = vst [vmem:[#allocation40_spill] sm:$0xff] %v11537_v59  ;;  %v7203_v43 = vadd.s32 4294967169, %v1972_v41  ;;  %v9164_v42 = vsel %vm9115_vm10, %v8267_v33, %v8870_v58  ;;  %v1003_v45 = vor.u32 %v1002_v26, %v1001_v34  ;;  %v1445_v57 = vmul.u32 %v9066_v0, %v1391_v7 }
 0x1a7   : > { %11539 = vst [vmem:[#allocation41_spill] sm:$0xff] %v9164_v42  ;;  %v9168_v12 = vmul.f32 %v9108_v5, %v397_v16  ;;  %v9174_v39 = vsel %vm9121_vm4, %v8331_v8, %v8874_v27  ;;  %v1600_v30 = vadd.s32 %v9033_v6, %v9031_v21  ;;  %v1449_v23 = vsel %vm1447_vm6, %v1448_v19, %v1444_v32 }
 0x1a8   : > { %v1978_v46 = vadd.s32 1, %v7203_v43  ;;  %v2245_v26 = vsel %vm11392_vm5, %v2244_v9, %v9021_v25  ;;  %v1321_v58 = vsel %vm11393_vm7, %v1320_v51, %v1319_v54  ;;  %v1008_v0 = vand.u32 2147483647, %v1007_v31 }
 0x1a9   : > { %v1450_v1 = vadd.s32 %v1449_v23, %v1445_v57  ;;  %v1618_v3 = vshrl.u32 %v1600_v30, %v1616_v53  ;;  %v1620_v11 = vsub.s32 4294967266, %v1615_v2  ;;  %v1975_v27 = vand.u32 8388607, %v11395_v52 }
 0x1aa   : > { %vm1979_vm2 = vcmp.gt.s32.totalorder %v1978_v46, 0  ;;  %v1010_v37 = vcvt.s32.f32 %v1003_v45  ;;  %v1817_v6 = vand.u32 2139095040, %v9168_v12  ;;  %v9188_v20 = vmul.f32 %v9164_v42, %v9164_v42 }
 0x1ab   : > { %v1451_v14 = vadd.s32 536870912, %v1450_v1  ;;  %v1980_v21 = vsel %vm1979_vm2, %v1978_v46, 0  ;;  %v9192_v25 = vmul.f32 %v9174_v39, %v9174_v39  ;;  %v1617_v54 = vshll.u32 %v9090_v35, %v1615_v2 }
 0x1ac   : > { %v1982_v63 = vand.u32 31, %v1980_v21  ;;  %v9198_v9 = vsel %vm9141_vm0, %v8519_v38, %v2245_v26  ;;  %v9203_v7 = vsel %vm9147_vm15, %v8579_v15, %v1321_v58  ;;  %v9205_v17 = vmul.f32 %v1010_v37, %v1008_v0 }
 0x1ad   : > { %v9207_v10 = vshrl.u32 %v1451_v14, 30  ;;  %v9209_v32 = vor.u32 %v1618_v3, %v1617_v54  ;;  %v1621_v41 = vadd.s32 127, %v1620_v11  ;;  %v1976_v16 = vor.u32 8388608, %v1975_v27 }
 0x1ae   : > { %v1983_v2 = vsub.s32 32, %v1982_v63  ;;  %v9212_v51 = vshrl.u32 %v1980_v21, 5  ;;  %v1985_v34 = vshll.u32 %v11490_v62, %v1982_v63  ;;  %v1818_v31 = vshrl.u32 %v1817_v6, 23 }
 0x1af   : > { %v1453_v35 = vshll.u32 %v9207_v10, 30  ;;  %v1988_v19 = vshll.u32 %v11484_v56, %v1982_v63  ;;  %v1991_v45 = vshll.u32 %v11485_v4, %v1982_v63  ;;  %v1994_v23 = vshll.u32 %v11486_v60, %v1982_v63 }
 0x1b0   : > { %v1986_v53 = vshrl.u32 %v11484_v56, %v1983_v2  ;;  %v1989_v43 = vshrl.u32 %v11485_v4, %v1983_v2  ;;  %v1992_v30 = vshrl.u32 %v11486_v60, %v1983_v2  ;;  %v1995_v46 = vshrl.u32 %v11487_v28, %v1983_v2 }
 0x1b1   : > { %v9219_v57 = vsub.s32 %v1450_v1, %v1453_v35  ;;  %v1997_v0 = vshll.u32 %v11487_v28, %v1982_v63  ;;  %v1998_v3 = vshrl.u32 %v11482_v29, %v1983_v2  ;;  %vm2000_vm6 = vcmp.lt.s32.totalorder %v9212_v51, 1 }
 0x1b2   : > { %v1987_v26 = vor.u32 %v1986_v53, %v1985_v34  ;;  %v1990_v58 = vor.u32 %v1989_v43, %v1988_v19  ;;  %v1993_v27 = vor.u32 %v1992_v30, %v1991_v45  ;;  %v1996_v37 = vor.u32 %v1995_v46, %v1994_v23 }
 0x1b3   : > { %vm1455_vm14 = vcmp.lt.s32.totalorder %v9219_v57, 0  ;;  %v1456_v11 = vsub.s32 0, %v9219_v57  ;;  %v1999_v1 = vor.u32 %v1998_v3, %v1997_v0  ;;  %v9229_v14 = vshll.u32 %v1976_v16, 8 }
 0x1b4   : > { %v11394_v21 = vand.u32 2147483647, %v9168_v12  ;;  %vm2003_vm2 = vcmp.lt.s32.totalorder %v9212_v51, 4  ;;  %v2008_v54 = vsel %vm2000_vm6, %v1987_v26, %v1990_v58  ;;  %v7200_v63 = vadd.s32 4294967169, %v1818_v31 }
 0x1b5   : > { %v1457_v6 = vsel %vm1455_vm14, %v1456_v11, %v9219_v57  ;;  %vm2002_vm5 = vcmp.lt.s32.totalorder %v9212_v51, 3  ;;  %v2009_v34 = vsel %vm2003_vm2, %v1996_v37, 920167782  ;;  %v2012_v16 = vsel %vm2000_vm6, %v1990_v58, %v1993_v27 }
 0x1b6   : > { %v1458_v35 = vclz %v1457_v6  ;;  %v1622_v53 = vshll.u32 %v1621_v41, 23  ;;  %vm2001_vm7 = vcmp.lt.s32.totalorder %v9212_v51, 2  ;;  %v2010_v19 = vsel %vm2002_vm5, %v1993_v27, %v2009_v34 }
 0x1b7   : > { %v2013_v43 = vsel %vm2003_vm2, %v1999_v1, 1326507024  ;;  %v2011_v31 = vsel %vm2001_vm7, %v2008_v54, %v2010_v19  ;;  %v2017_v23 = vand.u32 65535, %v9229_v14  ;;  %v9255_v3 = vand.u32 8388607, %v11394_v21 }
 0x1b8   : > { %v7192_v45 = vadd.s32 4294967294, %v1458_v35  ;;  %v2014_v30 = vsel %vm2002_vm5, %v1996_v37, %v2013_v43  ;;  %v2041_v46 = vand.u32 65535, %v2011_v31  ;;  %v2042_v0 = vshrl.u32 %v2011_v31, 16 }
 0x1b9   : > { %v2015_v41 = vsel %vm2001_vm7, %v2012_v16, %v2014_v30  ;;  %v2018_v11 = vshrl.u32 %v9229_v14, 16  ;;  %v1824_v35 = vadd.s32 1, %v7200_v63  ;;  %v9261_v37 = vadd.s32 %v9153_v55, %v9151_v44 }
 0x1ba   : > { %v2019_v1 = vand.u32 65535, %v2015_v41  ;;  %v2020_v6 = vshrl.u32 %v2015_v41, 16  ;;  %v2005_v34 = vsel %vm2003_vm2, %v1993_v27, 2102212464  ;;  %v2044_v16 = vmul.u32 %v2042_v0, %v2017_v23 }
 0x1bb   : > { %v9265_v19 = vor.u32 4788187, %v1622_v53  ;;  %vm7193_vm14 = vcmp.lt.s32.totalorder %v7192_v45, 0  ;;  %v1984_v43 = vshrl.u32 %v11490_v62, %v1983_v2  ;;  %v2045_v31 = vmul.u32 %v2041_v46, %v2018_v11 }
 0x1bc   : > { %v2022_v41 = vmul.u32 %v2020_v6, %v2017_v23  ;;  %v2023_v63 = vmul.u32 %v2019_v1, %v2018_v11  ;;  %v2006_v55 = vsel %vm2002_vm5, %v1990_v58, %v2005_v34  ;;  %v2047_v27 = vshll.u32 %v2044_v16, 16 }
 0x1bd   : > { %v2004_v44 = vsel %vm2000_vm6, %v1984_v43, %v1987_v26  ;;  %vm1825_vm2 = vcmp.gt.s32.totalorder %v1824_v35, 0  ;;  %v9274_v53 = vsel %vm7193_vm14, 0, %v7192_v45  ;;  %v2021_v52 = vmul.u32 %v2019_v1, %v2017_v23 }
 0x1be   : > { %v2025_v54 = vshll.u32 %v2022_v41, 16  ;;  %v2043_v2 = vmul.u32 %v2041_v46, %v2017_v23  ;;  %v2024_v50 = vmul.u32 %v2020_v6, %v2018_v11  ;;  %v2027_v38 = vshll.u32 %v2023_v63, 16 }
 0x1bf   : > { %v2046_v30 = vmul.u32 %v2042_v0, %v2018_v11  ;;  %v2049_v42 = vshll.u32 %v2045_v31, 16  ;;  %v2007_v26 = vsel %vm2001_vm7, %v2004_v44, %v2006_v55  ;;  %v1826_v45 = vsel %vm1825_vm2, %v1824_v35, 0 }
 0x1c0   : > { %vm2029_vm11 = vc.u32 %v2021_v52, %v2025_v54  ;;  %v2031_v59 = vadd.s32 %v2025_v54, %v2021_v52  ;;  %vm2051_vm12 = vc.u32 %v2043_v2, %v2047_v27  ;;  %v2053_v21 = vadd.s32 %v2047_v27, %v2043_v2 }
 0x1c1   : > { %v2030_v58 = vsel %vm2029_vm11, 1, %v11491_v24  ;;  %v2052_v34 = vsel %vm2051_vm12, 1, %v11491_v24  ;;  %v1466_v46 = vsub.s32 4294967266, %v9274_v53  ;;  %v2048_v52 = vshrl.u32 %v2044_v16, 16 }
 0x1c2   : > { %v2032_v1 = vadd.s32 %v2030_v58, %v2024_v50  ;;  %vm2033_vm5 = vc.u32 %v2031_v59, %v2027_v38  ;;  %v2054_v23 = vadd.s32 %v2052_v34, %v2046_v30  ;;  %vm2055_vm6 = vc.u32 %v2053_v21, %v2049_v42 }
 0x1c3   : > { %v2034_v0 = vsel %vm2033_vm5, 1, %v11491_v24  ;;  %v2056_v11 = vsel %vm2055_vm6, 1, %v11491_v24  ;;  %v2026_v6 = vshrl.u32 %v2022_v41, 16  ;;  %v1828_v43 = vand.u32 31, %v1826_v45 }
 0x1c4   : > { %v2036_v51 = vadd.s32 %v2034_v0, %v2032_v1  ;;  %v2058_v54 = vadd.s32 %v2056_v11, %v2054_v23  ;;  %v1462_v44 = vsub.s32 32, %v9274_v53  ;;  %v1463_v35 = vshll.u32 %v9219_v57, %v9274_v53 }
 0x1c5   : > { %v2028_v50 = vshrl.u32 %v2023_v63, 16  ;;  %v2061_v38 = vmul.u32 %v9229_v14, %v2007_v26  ;;  %v2050_v30 = vshrl.u32 %v2045_v31, 16  ;;  %v1829_v27 = vsub.s32 32, %v1828_v43 }
 0x1c6   : > { %v2037_v59 = vadd.s32 %v2036_v51, %v2026_v6  ;;  %v2059_v55 = vadd.s32 %v2058_v54, %v2048_v52  ;;  %v1467_v2 = vadd.s32 127, %v1466_v46  ;;  %v9288_v16 = vadd.s32 %v2053_v21, %v2049_v42 }
 0x1c7   : > { %v9290_v58 = vshrl.u32 %v1826_v45, 5  ;;  %v1831_v41 = vshll.u32 %v11490_v62, %v1828_v43  ;;  %v1832_v23 = vshrl.u32 %v11484_v56, %v1829_v27  ;;  %v1834_v57 = vshll.u32 %v11484_v56, %v1828_v43 }
 0x1c8   : > { %v9293_v34 = vadd.s32 %v2037_v59, %v2028_v50  ;;  %v2060_v1 = vadd.s32 %v2059_v55, %v2050_v30  ;;  %v1835_v14 = vshrl.u32 %v11485_v4, %v1829_v27  ;;  %v1837_v31 = vshll.u32 %v11485_v4, %v1828_v43 }
 0x1c9   : > { %v1838_v63 = vshrl.u32 %v11486_v60, %v1829_v27  ;;  %v1841_v42 = vshrl.u32 %v11487_v28, %v1829_v27  ;;  %v1464_v21 = vshrl.u32 %v9261_v37, %v1462_v44  ;;  %v1840_v26 = vshll.u32 %v11486_v60, %v1828_v43 }
 0x1ca   : > { %vm2063_vm11 = vc.u32 %v9293_v34, %v9288_v16  ;;  %v2064_v53 = vadd.s32 1, %v2060_v1  ;;  %v1468_v45 = vshll.u32 %v1467_v2, 23  ;;  %v9305_v46 = vor.u32 %v1832_v23, %v1831_v41 }
 0x1cb   : > { %v9307_v0 = vor.u32 %v1835_v14, %v1834_v57  ;;  %v9309_v52 = vor.u32 %v1838_v63, %v1837_v31  ;;  %v1842_v6 = vor.u32 %v1841_v42, %v1840_v26  ;;  %v1843_v51 = vshll.u32 %v11487_v28, %v1828_v43 }
 0x1cc   : > { %v2065_v11 = vsel %vm2063_vm11, %v2064_v53, %v2060_v1  ;;  %v1844_v54 = vshrl.u32 %v11482_v29, %v1829_v27  ;;  %v1624_v37 = vand.u32 2147483647, %v9265_v19  ;;  %vm1846_vm12 = vcmp.lt.s32.totalorder %v9290_v58, 1  ;;  %v412_v53 = vpop.permute.xlu0 %411 }
 0x1cd   : > { %v2066_v44 = vadd.s32 %v2065_v11, %v2061_v38  ;;  %v11540_v50 = vor.u32 8388608, %v9255_v3  ;;  %v9319_v30 = vor.u32 %v1464_v21, %v1463_v35  ;;  %vm1849_vm7 = vcmp.lt.s32.totalorder %v9290_v58, 4 }
 0x1ce   : > { %v1845_v55 = vor.u32 %v1844_v54, %v1843_v51  ;;  %v1854_v43 = vsel %vm1846_vm12, %v9305_v46, %v9307_v0  ;;  %vm1848_vm14 = vcmp.lt.s32.totalorder %v9290_v58, 3  ;;  %v1855_v19 = vsel %vm1849_vm7, %v1842_v6, 920167782 }
 0x1cf   : > { %v9317_v59 = vshll.u32 %v11540_v50, 8  ;;  %v2067_v2 = vadd.s32 536870912, %v2066_v44  ;;  %v1858_v3 = vsel %vm1846_vm12, %v9307_v0, %v9309_v52  ;;  %v9333_v35 = vor.u32 4788187, %v1468_v45 }
 0x1d0   : > { %vm1847_vm2 = vcmp.lt.s32.totalorder %v9290_v58, 2  ;;  %v1856_v38 = vsel %vm1848_vm14, %v9309_v52, %v1855_v19  ;;  %v1859_v41 = vsel %vm1849_vm7, %v1845_v55, 1326507024  ;;  %v11542_v26 = vcvt.s32.f32 %v9209_v32 }
 0x1d1   : > { %v9341_v1 = vshrl.u32 %v2067_v2, 30  ;;  %v1857_v23 = vsel %vm1847_vm2, %v1854_v43, %v1856_v38  ;;  %v1860_v57 = vsel %vm1848_vm14, %v1842_v6, %v1859_v41  ;;  %v1863_v14 = vand.u32 65535, %v9317_v59 }
 0x1d2   : > { %v1861_v31 = vsel %vm1847_vm2, %v1858_v3, %v1860_v57  ;;  %v1864_v63 = vshrl.u32 %v9317_v59, 16  ;;  %v1887_v42 = vand.u32 65535, %v1857_v23  ;;  %v1888_v21 = vshrl.u32 %v1857_v23, 16 }
 0x1d3   : > { %11541 = vst [vmem:[#allocation42_spill] sm:$0xff] %v9341_v1  ;;  %v9353_v45 = vmul.f32 %v11542_v26, %v1624_v37  ;;  %v2069_v11 = vshll.u32 %v9341_v1, 30  ;;  %v1865_v51 = vand.u32 65535, %v1861_v31  ;;  %v1866_v54 = vshrl.u32 %v1861_v31, 16 }
 0x1d4   : > { %v1890_v55 = vmul.u32 %v1888_v21, %v1863_v14  ;;  %v1891_v43 = vmul.u32 %v1887_v42, %v1864_v63  ;;  %v9361_v38 = vmul.f32 %v9108_v5, %v412_v53  ;;  %v1830_v32 = vshrl.u32 %v11490_v62, %v1829_v27 }
 0x1d5   : > { %v9358_v2 = vsub.s32 %v2066_v44, %v2069_v11  ;;  %v1868_v19 = vmul.u32 %v1866_v54, %v1863_v14  ;;  %v1869_v3 = vmul.u32 %v1865_v51, %v1864_v63  ;;  %v1889_v37 = vmul.u32 %v1887_v42, %v1863_v14 }
 0x1d6   : > { %11543 = vst [vmem:[#allocation43_spill] sm:$0xff] %v9361_v38  ;;  %v1892_v41 = vmul.u32 %v1888_v21, %v1864_v63  ;;  %v1893_v23 = vshll.u32 %v1890_v55, 16  ;;  %v1867_v31 = vmul.u32 %v1865_v51, %v1863_v14  ;;  %v1870_v50 = vmul.u32 %v1866_v54, %v1864_v63 }
 0x1d7   : > { %vm2071_vm5 = vcmp.lt.s32.totalorder %v9358_v2, 0  ;;  %v2072_v57 = vsub.s32 0, %v9358_v2  ;;  %v1871_v26 = vshll.u32 %v1868_v19, 16  ;;  %v1873_v6 = vshll.u32 %v1869_v3, 16 }
 0x1d8   : > { %v1895_v44 = vshll.u32 %v1891_v43, 16  ;;  %vm1897_vm6 = vc.u32 %v1889_v37, %v1893_v23  ;;  %vm11408_vm13 = vcmp.lt.s32.totalorder %v8734_v36, 0  ;;  %v1899_v21 = vadd.s32 %v1893_v23, %v1889_v37 }
 0x1d9   : > { %v2073_v11 = vsel %vm2071_vm5, %v2072_v57, %v9358_v2  ;;  %vm1875_vm11 = vc.u32 %v1867_v31, %v1871_v26  ;;  %v1877_v5 = vadd.s32 %v1871_v26, %v1867_v31  ;;  %v1898_v53 = vsel %vm1897_vm6, 1, %v11491_v24 }
 0x1da   : > { %v2074_v27 = vclz %v2073_v11  ;;  %v1876_v42 = vsel %vm1875_vm11, 1, %v11491_v24  ;;  %v1900_v1 = vadd.s32 %v1898_v53, %v1892_v41  ;;  %v2062_v14 = vadd.s32 %v9288_v16, %v9293_v34 }
 0x1db   : > { %v1851_v63 = vsel %vm1849_vm7, %v9309_v52, 2102212464  ;;  %v1878_v51 = vadd.s32 %v1876_v42, %v1870_v50  ;;  %vm1879_vm5 = vc.u32 %v1877_v5, %v1873_v6  ;;  %v1850_v57 = vsel %vm1846_vm12, %v1830_v32, %v9305_v46 }
 0x1dc   : > { %v7204_v54 = vadd.s32 4294967294, %v2074_v27  ;;  %v1880_v31 = vsel %vm1879_vm5, 1, %v11491_v24  ;;  %vm1901_vm6 = vc.u32 %v1899_v21, %v1895_v44  ;;  %v1872_v26 = vshrl.u32 %v1868_v19, 16 }
 0x1dd   : > { %v1882_v37 = vadd.s32 %v1880_v31, %v1878_v51  ;;  %v1902_v41 = vsel %vm1901_vm6, 1, %v11491_v24  ;;  %v2279_v16 = vand.u32 2139095040, %v9361_v38  ;;  %v11544_v34 = vand.u32 2147483647, %v8734_v36 }
 0x1de   : > { %vm7205_vm7 = vcmp.lt.s32.totalorder %v7204_v54, 0  ;;  %v1852_v46 = vsel %vm1848_vm14, %v9307_v0, %v1851_v63  ;;  %v1894_v6 = vshrl.u32 %v1890_v55, 16  ;;  %v1904_v50 = vadd.s32 %v1902_v41, %v1900_v1 }
 0x1df   : > { %vm9383_vm11 = vcmp.le.f32.partialorder %v11544_v34, 0.7853982  ;;  %vm11406_vm12 = vcmp.lt.s32.totalorder %v8837_v47, 0  ;;  %v2077_v19 = vsel %vm7205_vm7, 0, %v7204_v54  ;;  %v1874_v32 = vshrl.u32 %v1869_v3, 16 }
 0x1e0   : > { %v1883_v23 = vadd.s32 %v1882_v37, %v1872_v26  ;;  %v2280_v11 = vshrl.u32 %v2279_v16, 23  ;;  %v2078_v5 = vsub.s32 32, %v2077_v19  ;;  %v2082_v53 = vsub.s32 4294967266, %v2077_v19 }
 0x1e1   : > { %v1896_v27 = vshrl.u32 %v1891_v43, 16  ;;  %v1905_v42 = vadd.s32 %v1904_v50, %v1894_v6  ;;  %v1853_v51 = vsel %vm1847_vm2, %v1850_v57, %v1852_v46  ;;  %v9395_v34 = vadd.s32 %v1899_v21, %v1895_v44 }
 0x1e2   : > { %v9393_v31 = vadd.s32 %v1883_v23, %v1874_v32  ;;  %v7209_v0 = vadd.s32 4294967169, %v2280_v11  ;;  %v2079_v1 = vshll.u32 %v9358_v2, %v2077_v19  ;;  %v2080_v55 = vshrl.u32 %v2062_v14, %v2078_v5 }
 0x1e3   : > { %v2083_v63 = vadd.s32 127, %v2082_v53  ;;  %v1906_v54 = vadd.s32 %v1905_v42, %v1896_v27  ;;  %v11547_v3 = vxor.u32 2147483648, %v9205_v17  ;;  %v1628_v26 = vxor.u32 2147483648, %v9353_v45 }
 0x1e4   : > { %vm1909_vm14 = vc.u32 %v9393_v31, %v9395_v34  ;;  %v2286_v58 = vadd.s32 1, %v7209_v0  ;;  %v11548_v44 = vand.u32 2147483647, %v9333_v35  ;;  %v11549_v21 = vcvt.s32.f32 %v9319_v30 }
 0x1e5   : > { %v1013_v43 = vsel %vm11408_vm13, %v11547_v3, %v9205_v17  ;;  %v2081_v14 = vor.u32 %v2080_v55, %v2079_v1  ;;  %v2084_v57 = vshll.u32 %v2083_v63, 23  ;;  %v1910_v37 = vadd.s32 1, %v1906_v54 }
 0x1e6   : > { %v1473_v2 = vmul.f32 %v11549_v21, %v11548_v44  ;;  %vm11407_vm2 = vcmp.lt.s32.totalorder %v8907_v18, 0  ;;  %v1907_v41 = vmul.u32 %v9317_v59, %v1853_v51  ;;  %v11410_v17 = vand.u32 2147483647, %v9361_v38 }
 0x1e7   : > { %vm2287_vm5 = vcmp.gt.s32.totalorder %v2286_v58, 0  ;;  %v9415_v16 = vmul.f32 %v9198_v9, %v9198_v9  ;;  %v11550_v46 = vand.u32 2147483647, %v8837_v47  ;;  %v2085_v30 = vor.u32 4788187, %v2084_v57 }
 0x1e8   : > { %v1911_v6 = vsel %vm1909_vm14, %v1910_v37, %v1906_v54  ;;  %v2288_v50 = vsel %vm2287_vm5, %v2286_v58, 0  ;;  %v9425_v19 = vmul.f32 %v9203_v7, %v9203_v7  ;;  %v9430_v59 = vsel %vm9383_vm11, %v8734_v36, %v1013_v43 }
 0x1e9   : > { %vm9419_vm6 = vcmp.le.f32.partialorder %v11550_v46, 0.7853982  ;;  %v11553_v32 = vand.u32 2147483647, %v8907_v18  ;;  %v1912_v11 = vadd.s32 %v1911_v6, %v1907_v41  ;;  %v2290_v5 = vand.u32 31, %v2288_v50 }
 0x1ea   : > { %v1629_v53 = vsel %vm11406_vm12, %v1628_v26, %v9353_v45  ;;  %v1474_v27 = vxor.u32 2147483648, %v1473_v2  ;;  %v2086_v42 = vand.u32 2147483647, %v2085_v30  ;;  %v2088_v51 = vcvt.s32.f32 %v2081_v14  ;;  %v7506_v45 = vld [vmem:[%s11322_s2 + $0x8] sm:$0xff] }
 0x1eb   : > { %vm9434_vm7 = vcmp.le.f32.partialorder %v11553_v32, 0.7853982  ;;  %v1913_v0 = vadd.s32 536870912, %v1912_v11  ;;  %v2283_v1 = vand.u32 8388607, %v11410_v17  ;;  %v9443_v55 = vsub.s32 32, %v2290_v5  ;;  %4499 = vmatpush.bf16.msra.mxu0 %v7506_v45  ;;  %7538 = vmatpush.bf16.msra.mxu1 %v7506_v45 }
 0x1ec   : > { %v557_v63 = vmul.f32 -0.001358992, %v8820_v49  ;;  %v2089_v54 = vmul.f32 %v2088_v51, %v2086_v42  ;;  %v2293_v3 = vshll.u32 %v11490_v62, %v2290_v5  ;;  %v2296_v43 = vshll.u32 %v11484_v56, %v2290_v5  ;;  %7539 = vmatpush.bf16.msra.mxu2 %v7506_v45  ;;  %7540 = vmatpush.bf16.msra.mxu3 %v7506_v45 }
 0x1ed   : > { %v2302_v58 = vshll.u32 %v11486_v60, %v2290_v5  ;;  %v9452_v26 = vshrl.u32 %v1913_v0, 30  ;;  %v2294_v44 = vshrl.u32 %v11484_v56, %v9443_v55  ;;  %v2297_v21 = vshrl.u32 %v11485_v4, %v9443_v55 }
 0x1ee   : > { %v2305_v14 = vshll.u32 %v11487_v28, %v2290_v5  ;;  %vm11425_vm14 = vcmp.lt.s32.totalorder %v9111_v13, 0  ;;  %v9460_v57 = vshrl.u32 %v2288_v50, 5  ;;  %v2300_v37 = vshrl.u32 %v11486_v60, %v9443_v55 }
 0x1ef   : > { %v2303_v41 = vshrl.u32 %v11487_v28, %v9443_v55  ;;  %v2306_v46 = vshrl.u32 %v11482_v29, %v9443_v55  ;;  %v1475_v56 = vsel %vm11407_vm2, %v1474_v27, %v1473_v2  ;;  %v1915_v30 = vshll.u32 %v9452_v26, 30 }
 0x1f0   : > { %11556 = vst [vmem:[#allocation44_spill] sm:$0xff] %v9460_v57  ;;  %v2299_v6 = vshll.u32 %v11485_v4, %v2290_v5  ;;  %v558_v50 = vadd.f32 0.041655596, %v557_v63  ;;  %v2295_v32 = vor.u32 %v2294_v44, %v2293_v3  ;;  %v9472_v60 = vor.u32 %v2297_v21, %v2296_v43 }
 0x1f1   : > { %v2304_v42 = vor.u32 %v2303_v41, %v2302_v58  ;;  %v2307_v28 = vor.u32 %v2306_v46, %v2305_v14  ;;  %v9477_v29 = vsel %vm9419_vm6, %v8837_v47, %v1629_v53  ;;  %v9479_v51 = vsub.s32 %v1912_v11, %v1915_v30 }
 0x1f2   : > { %11557 = vst [vmem:[#allocation45_spill] sm:$0xff] %v9472_v60  ;;  %v9481_v2 = vor.u32 %v2300_v37, %v2299_v6  ;;  %v552_v27 = vsub.s32 4, %v8221_v40  ;;  %v9487_v4 = vsel %vm9434_vm7, %v8907_v18, %v1475_v56  ;;  %v2090_v5 = vxor.u32 2147483648, %v2089_v54 }
 0x1f3   : > { %v2284_v0 = vor.u32 8388608, %v2283_v1  ;;  %vm11424_vm5 = vcmp.lt.s32.totalorder %v9460_v57, 4  ;;  %vm1917_vm12 = vcmp.lt.s32.totalorder %v9479_v51, 0  ;;  %v1918_v53 = vsub.s32 0, %v9479_v51 }
 0x1f4   : > { %11558 = vst [vmem:[#allocation46_spill] sm:$0xff] %v9481_v2  ;;  %vm2308_vm2 = vcmp.lt.s32.totalorder %v9460_v57, 1  ;;  %v2317_v11 = vsel %vm11424_vm5, %v2304_v42, 920167782  ;;  %vm11409_vm13 = vcmp.lt.s32.totalorder %v9460_v57, 3  ;;  %v559_v3 = vmul.f32 %v558_v50, %v8820_v49 }
 0x1f5   : > { %v2316_v63 = vsel %vm2308_vm2, %v2295_v32, %v9472_v60  ;;  %v2321_v1 = vsel %vm11424_vm5, %v2307_v28, 1326507024  ;;  %v1919_v43 = vsel %vm1917_vm12, %v1918_v53, %v9479_v51  ;;  %v2318_v58 = vsel %vm11409_vm13, %v9481_v2, %v2317_v11 }
 0x1f6   : > { %v2320_v45 = vsel %vm2308_vm2, %v9472_v60, %v9481_v2  ;;  %v2322_v44 = vsel %vm11409_vm13, %v2304_v42, %v2321_v1  ;;  %v1920_v21 = vclz %v1919_v43  ;;  %v9512_v14 = vshll.u32 %v2284_v0, 8 }
 0x1f7   : > { %v553_v37 = vsel %vm430_vm8, %v552_v27, %v8221_v40  ;;  %v564_v41 = vmul.f32 -0.00019511016, %v8820_v49  ;;  %v9520_v46 = vmul.f32 %v9430_v59, %v9430_v59  ;;  %v11560_v56 = vand.u32 2147483647, %v9111_v13 }
 0x1f8   : > { %11559 = vst [vmem:[#allocation47_spill] sm:$0xff] %v9512_v14  ;;  %v2091_v6 = vsel %vm11425_vm14, %v2090_v5, %v2089_v54  ;;  %vm11423_vm13 = vcmp.lt.s32.totalorder %v9460_v57, 2  ;;  %v9533_v40 = vmul.f32 %v9477_v29, %v9477_v29  ;;  %v7201_v50 = vadd.s32 4294967294, %v1920_v21  ;;  %v11573_v57 = vld [vmem:[#allocation30_spill] sm:$0xff] }
 0x1f9   : > { %vm9524_vm12 = vcmp.le.f32.partialorder %v11560_v56, 0.7853982  ;;  %v9537_v42 = vsel %vm11423_vm13, %v2316_v63, %v2318_v58  ;;  %v2323_v28 = vsel %vm11423_vm13, %v2320_v45, %v2322_v44  ;;  %v9543_v27 = vmul.f32 %v9487_v4, %v9487_v4 }
 0x1fa   : > { %11563 = vst [vmem:[#allocation48_spill] sm:$0xff] %v9537_v42  ;;  %v1908_v54 = vadd.s32 %v9395_v34, %v9393_v31  ;;  %v555_v0 = vsel %vm8752_vm1, 0, %v553_v37  ;;  %v560_v53 = vadd.f32 -0.4999988, %v559_v3  ;;  %v9552_v11 = vsel %vm9524_vm12, %v9111_v13, %v2091_v6 }
 0x1fb   : > { %vm7202_vm8 = vcmp.lt.s32.totalorder %v7201_v50, 0  ;;  %v2325_v63 = vand.u32 65535, %v9512_v14  ;;  %v565_v1 = vadd.f32 0.008332121, %v564_v41  ;;  %v2327_v58 = vand.u32 65535, %v2323_v28  ;;  %v11566_v41 = vld [vmem:[#allocation19_spill] sm:$0xff] }
 0x1fc   : > { %v1923_v43 = vsel %vm7202_vm8, 0, %v7201_v50  ;;  %v2292_v3 = vshrl.u32 %v11490_v62, %v9443_v55  ;;  %v2328_v21 = vshrl.u32 %v2323_v28, 16  ;;  %v9560_v37 = vshrl.u32 %v9512_v14, 16 }
 0x1fd   : > { %v1924_v31 = vsub.s32 32, %v1923_v43  ;;  %v1928_v34 = vsub.s32 4294967266, %v1923_v43  ;;  %v561_v56 = vmul.f32 %v560_v53, %v8820_v49  ;;  %v9563_v6 = vand.u32 3, %v555_v0 }
 0x1fe   : > { %11565 = vst [vmem:[#allocation25_spill] sm:$0xff] %v9560_v37  ;;  %v706_v50 = vsub.s32 4, %v11566_v41  ;;  %v9568_v5 = vmul.f32 %v9552_v11, %v9552_v11  ;;  %v9572_v45 = vsel %vm2308_vm2, %v2292_v3, %v2295_v32  ;;  %v9574_v62 = vmul.u32 %v2327_v58, %v2325_v63 }
 0x1ff   : > { %v1926_v17 = vshrl.u32 %v1908_v54, %v1924_v31  ;;  %v1929_v44 = vadd.s32 127, %v1928_v34  ;;  %11567 = vst [vmem:[#allocation19_spill] sm:$0xff] %v9572_v45  ;;  %v11568_v55 = vand.u32 65535, %v9537_v42  ;;  %v11570_v53 = vshrl.u32 %v9537_v42, 16  ;;  %v11571_v45 = vld [vmem:[#allocation17_spill] sm:$0xff] }
 0x200   : > { %v566_v14 = vmul.f32 %v565_v1, %v8820_v49  ;;  %v1925_v60 = vshll.u32 %v9479_v51, %v1923_v43  ;;  %v9586_v31 = vmul.u32 %v2328_v21, %v2325_v63  ;;  %v9589_v32 = vmul.u32 %v2327_v58, %v9560_v37 }
 0x201   : > { %v9578_v28 = vmul.u32 %v11568_v55, %v2325_v63  ;;  %v9582_v38 = vmul.u32 %v11570_v53, %v2325_v63  ;;  %v1930_v54 = vshll.u32 %v1929_v44, 23  ;;  %v562_v34 = vadd.f32 1.0, %v561_v56 }
 0x202   : > { %v567_v3 = vadd.f32 -0.16666654, %v566_v14  ;;  %vm11572_vm1 = vcmp.lt.s32.totalorder %v11571_v45, 0  ;;  %v711_v42 = vmul.f32 -0.001358992, %v11573_v57  ;;  %v1927_v53 = vor.u32 %v1926_v17, %v1925_v60 }
 0x203   : > { %11569 = vst [vmem:[#allocation49_spill] sm:$0xff] %v9578_v28  ;;  %v707_v55 = vsel %vm11572_vm1, %v706_v50, %v11566_v41  ;;  %v1931_v2 = vor.u32 4788187, %v1930_v54  ;;  %v718_v51 = vmul.f32 -0.00019511016, %v11573_v57  ;;  %v9599_v63 = vmul.u32 %v2328_v21, %v9560_v37 }
 0x204   : > { %v709_v1 = vsel %vm8761_vm3, 0, %v707_v55  ;;  %v568_v14 = vmul.f32 %v567_v3, %v8820_v49  ;;  %v712_v58 = vadd.f32 0.041655596, %v711_v42  ;;  %v2574_v17 = vadd.s32 3, %v555_v0  ;;  %v11575_v49 = vld [vmem:[#allocation27_spill] sm:$0xff] }
 0x205   : > { %v1932_v44 = vand.u32 2147483647, %v1931_v2  ;;  %v719_v56 = vadd.f32 0.008332121, %v718_v51  ;;  %v9604_v41 = vand.u32 3, %v709_v1  ;;  %v578_v50 = vxor.u32 2147483648, %v562_v34 }
 0x206   : > { %v569_v60 = vadd.f32 1.0, %v568_v14  ;;  %v713_v28 = vmul.f32 %v712_v58, %v11573_v57  ;;  %v2729_v54 = vadd.s32 3, %v709_v1  ;;  %v1934_v55 = vcvt.s32.f32 %v1927_v53  ;;  %v7505_v58 = vld [vmem:[%s11322_s2] sm:$0xff] }
 0x207   : > { %v11440_v21 = vshll.u32 %v9586_v31, 16  ;;  %v720_v43 = vmul.f32 %v719_v56, %v11573_v57  ;;  %v2575_v37 = vand.u32 3, %v2574_v17  ;;  %vm577_vm1 = vcmp.eq.s32.totalorder %v9563_v6, 2  ;;  %4569 = vmatpush.bf16.msrb.mxu1 %v7505_v58 }
 0x208   : > { %v570_v42 = vmul.f32 %v569_v60, %v11575_v49  ;;  %v714_v2 = vadd.f32 -0.4999988, %v713_v28  ;;  %v1935_v3 = vmul.f32 %v1934_v55, %v1932_v44  ;;  %v2730_v14 = vand.u32 3, %v2729_v54 }
 0x209   : > { %v721_v0 = vadd.f32 -0.16666654, %v720_v43  ;;  %vm2576_vm2 = vcmp.lt.s32.totalorder %v2575_v37, 2  ;;  %vm2577_vm3 = vcmp.eq.s32.totalorder %v2575_v37, 0  ;;  %vm2580_vm8 = vcmp.eq.s32.totalorder %v2575_v37, 2 }
 0x20a   : > { %v575_v1 = vxor.u32 2147483648, %v570_v42  ;;  %v579_v53 = vsel %vm577_vm1, %v578_v50, %v570_v42  ;;  %v715_v51 = vmul.f32 %v714_v2, %v11573_v57  ;;  %vm11576_vm13 = vcmp.eq.s32.totalorder %v9563_v6, 0 }
 0x20b   : > { %v722_v56 = vmul.f32 %v721_v0, %v11573_v57  ;;  %vm725_vm1 = vweird.f32 %v11571_v45  ;;  %v2582_v60 = vsel %vm2580_vm8, %v578_v50, %v570_v42  ;;  %vm11428_vm5 = vcmp.lt.s32.totalorder %v9168_v12, 0  ;;  %v11581_v42 = vld [vmem:[#allocation23_spill] sm:$0xff] }
 0x20c   : > { %v576_v43 = vsel %vm11576_vm13, %v562_v34, %v575_v1  ;;  %v716_v44 = vadd.f32 1.0, %v715_v51  ;;  %v2579_v17 = vsel %vm2577_vm3, %v562_v34, %v575_v1  ;;  %v1936_v28 = vxor.u32 2147483648, %v1935_v3  ;;  %v11580_v34 = vld [vmem:[#allocation28_spill] sm:$0xff] }
 0x20d   : > { %vm11577_vm9 = vcmp.lt.s32.totalorder %v9563_v6, 2  ;;  %v723_v54 = vadd.f32 1.0, %v722_v56  ;;  %v2583_v55 = vsel %vm2576_vm2, %v2579_v17, %v2582_v60  ;;  %vm11461_vm14 = vcmask 130048  }
 0x20e   : > { %v580_v57 = vsel %vm11577_vm9, %v576_v43, %v579_v53  ;;  %vm11578_vm0 = vweird.f32 %v8119_v22  ;;  %v732_v49 = vxor.u32 2147483648, %v716_v44  ;;  %vm2731_vm3 = vcmp.lt.s32.totalorder %v2730_v14, 2  ;;  %v11582_v53 = vld [vmem:[#allocation36_spill] sm:$0xff] }
 0x20f   : > { %v9629_v37 = vsel %vm11578_vm0, nan, %v580_v57  ;;  %vm11579_vm13 = vmmov %vm11578_vm0  ;;  %v724_v50 = vmul.f32 %v723_v54, %v11580_v34  ;;  %vm2732_vm8 = vcmp.eq.s32.totalorder %v2730_v14, 0  ;;  %v860_v0 = vsub.s32 4, %v11581_v42 }
 0x210   : > { %v2584_v2 = vsel %vm11579_vm13, nan, %v2583_v55  ;;  %v865_v6 = vmul.f32 -0.001358992, %v9192_v25  ;;  %vm2735_vm9 = vcmp.eq.s32.totalorder %v2730_v14, 2  ;;  %v872_v1 = vmul.f32 -0.00019511016, %v9192_v25 }
 0x211   : > { %v1014_v51 = vsub.s32 4, %v11582_v53  ;;  %v1019_v58 = vmul.f32 -0.001358992, %v9520_v46  ;;  %v729_v56 = vxor.u32 2147483648, %v724_v50  ;;  %vm11583_vm0 = vcmp.eq.s32.totalorder %v9604_v41, 2 }
 0x212   : > { %v733_v22 = vsel %vm11583_vm0, %v732_v49, %v724_v50  ;;  %v2737_v43 = vsel %vm2735_vm9, %v732_v49, %v724_v50  ;;  %vm11584_vm2 = vcmp.lt.s32.totalorder %v8331_v8, 0  ;;  %v11585_v60 = vand.u32 2147483647, %v9168_v12 }
 0x213   : > { %v861_v17 = vsel %vm11584_vm2, %v860_v0, %v11581_v42  ;;  %v866_v55 = vadd.f32 0.041655596, %v865_v6  ;;  %v873_v34 = vadd.f32 0.008332121, %v872_v1  ;;  %vm11588_vm0 = vcmp.lt.s32.totalorder %v8734_v36, 0 }
 0x214   : > { %vm9646_vm13 = vcmp.le.f32.partialorder %v11585_v60, 0.7853982  ;;  %v9652_v54 = vsel %vm9121_vm4, 0, %v861_v17  ;;  %v1015_v49 = vsel %vm11588_vm0, %v1014_v51, %v11582_v53  ;;  %vm11589_vm9 = vcmp.eq.s32.totalorder %v9604_v41, 0 }
 0x215   : > { %v730_v50 = vsel %vm11589_vm9, %v716_v44, %v729_v56  ;;  %v2734_v42 = vsel %vm2732_vm8, %v716_v44, %v729_v56  ;;  %v9662_v0 = vsel %vm9383_vm11, 0, %v1015_v49  ;;  %v1020_v60 = vadd.f32 0.041655596, %v1019_v58 }
 0x216   : > { %vm11590_vm2 = vcmp.lt.s32.totalorder %v9604_v41, 2  ;;  %v2738_v6 = vsel %vm2731_vm3, %v2734_v42, %v2737_v43  ;;  %v867_v1 = vmul.f32 %v866_v55, %v9192_v25  ;;  %v874_v17 = vmul.f32 %v873_v34, %v9192_v25 }
 0x217   : > { %v734_v61 = vsel %vm11590_vm2, %v730_v50, %v733_v22  ;;  %v2739_v44 = vsel %vm725_vm1, nan, %v2738_v6  ;;  %v1021_v52 = vmul.f32 %v1020_v60, %v9520_v46  ;;  %v1026_v51 = vmul.f32 -0.00019511016, %v9520_v46 }
 0x218   : > { %v9671_v53 = vsel %vm725_vm1, nan, %v734_v61  ;;  %v1937_v41 = vsel %vm11428_vm5, %v1936_v28, %v1935_v3  ;;  %v4457_v14 = vpack.c.bf16 %v2739_v44, %v2584_v2  ;;  %v868_v58 = vadd.f32 -0.4999988, %v867_v1 }
 0x219   : > { %v875_v56 = vadd.f32 -0.16666654, %v874_v17  ;;  %v1022_v22 = vadd.f32 -0.4999988, %v1021_v52  ;;  %v1027_v43 = vadd.f32 0.008332121, %v1026_v51  ;;  %v9699_v44 = vadd.s32 %v11440_v21, %v9574_v62 }
 0x21a   : > { %v2884_v55 = vadd.s32 3, %v9652_v54  ;;  %v3039_v34 = vadd.s32 3, %v9662_v0  ;;  %7257 = vmatmul.msk.bf16.vlgmr.msra.gmra.mxu0 %vm11461_vm14, %v4457_v14  ;;  %v869_v45 = vmul.f32 %v868_v58, %v9192_v25  ;;  %v1476_v50 = vsub.s32 4, %v9207_v10 }
 0x21b   : > { %v876_v49 = vmul.f32 %v875_v56, %v9192_v25  ;;  %v1481_v42 = vmul.f32 -0.001358992, %v9543_v27  ;;  %v1023_v3 = vmul.f32 %v1022_v22, %v9520_v46  ;;  %v1028_v28 = vmul.f32 %v1027_v43, %v9520_v46 }
 0x21c   : > { %v2885_v2 = vand.u32 3, %v2884_v55  ;;  %v3040_v60 = vand.u32 3, %v3039_v34  ;;  %v9689_v6 = vadd.f32 1.0, %v869_v45  ;;  %v9694_v25 = vsel %vm9646_vm13, %v9168_v12, %v1937_v41  ;;  %v11592_v34 = vld [vmem:[#allocation37_spill] sm:$0xff] }
 0x21d   : > { %v877_v1 = vadd.f32 1.0, %v876_v49  ;;  %v1482_v17 = vadd.f32 0.041655596, %v1481_v42  ;;  %v9701_v52 = vadd.f32 1.0, %v1023_v3  ;;  %v1029_v51 = vadd.f32 -0.16666654, %v1028_v28 }
 0x21e   : > { %vm2886_vm4 = vcmp.lt.s32.totalorder %v2885_v2, 2  ;;  %vm2887_vm11 = vcmp.eq.s32.totalorder %v2885_v2, 0  ;;  %vm11591_vm1 = vcmp.lt.s32.totalorder %v8907_v18, 0  ;;  %vm11464_vm3 = vweird.f32 %v8331_v8 }
 0x21f   : > { %v9704_v14 = vmul.f32 %v877_v1, %v9174_v39  ;;  %v1477_v58 = vsel %vm11591_vm1, %v1476_v50, %v9207_v10  ;;  %v11430_v41 = vxor.u32 2147483648, %v9689_v6  ;;  %v1030_v56 = vmul.f32 %v1029_v51, %v9520_v46 }
 0x220   : > { %vm2890_vm8 = vcmp.eq.s32.totalorder %v2885_v2, 2  ;;  %vm3041_vm0 = vcmp.lt.s32.totalorder %v3040_v60, 2  ;;  %vm11433_vm9 = vweird.f32 %v8734_v36  ;;  %v11429_v39 = vxor.u32 2147483648, %v9701_v52 }
 0x221   : > { %v11431_v22 = vxor.u32 2147483648, %v9704_v14  ;;  %vm3042_vm2 = vcmp.eq.s32.totalorder %v3040_v60, 0  ;;  %v1483_v43 = vmul.f32 %v1482_v17, %v9543_v27  ;;  %v1031_v55 = vadd.f32 1.0, %v1030_v56 }
 0x222   : > { %vm3045_vm5 = vcmp.eq.s32.totalorder %v3040_v60, 2  ;;  %v1488_v10 = vmul.f32 -0.00019511016, %v9543_v27  ;;  %v1630_v45 = vsub.s32 4, %v11592_v34  ;;  %v1635_v50 = vmul.f32 -0.001358992, %v9533_v40 }
 0x223   : > { %v2889_v46 = vsel %vm2887_vm11, %v9689_v6, %v11431_v22  ;;  %v1484_v49 = vadd.f32 -0.4999988, %v1483_v43  ;;  %v1642_v42 = vmul.f32 -0.00019511016, %v9533_v40  ;;  %v9725_v3 = vmul.f32 %v1031_v55, %v9430_v59 }
 0x224   : > { %v9729_v28 = vsel %vm9434_vm7, 0, %v1477_v58  ;;  %v1489_v1 = vadd.f32 0.008332121, %v1488_v10  ;;  %vm11593_vm1 = vcmp.lt.s32.totalorder %v8837_v47, 0  ;;  %v2892_v51 = vsel %vm2890_vm8, %v11430_v41, %v9704_v14 }
 0x225   : > { %v1631_v17 = vsel %vm11593_vm1, %v1630_v45, %v11592_v34  ;;  %v1485_v56 = vmul.f32 %v1484_v49, %v9543_v27  ;;  %v1636_v43 = vadd.f32 0.041655596, %v1635_v50  ;;  %v11432_v23 = vxor.u32 2147483648, %v9725_v3 }
 0x226   : > { %v9741_v59 = vsel %vm9419_vm6, 0, %v1631_v17  ;;  %v2893_v58 = vsel %vm2886_vm4, %v2889_v46, %v2892_v51  ;;  %v1490_v55 = vmul.f32 %v1489_v1, %v9543_v27  ;;  %v1643_v10 = vadd.f32 0.008332121, %v1642_v42 }
 0x227   : > { %v3047_v34 = vsel %vm3045_vm5, %v11429_v39, %v9725_v3  ;;  %v9750_v45 = vadd.f32 1.0, %v1485_v56  ;;  %v1637_v49 = vmul.f32 %v1636_v43, %v9533_v40  ;;  %v3504_v35 = vadd.s32 3, %v9729_v28 }
 0x228   : > { %v3044_v2 = vsel %vm3042_vm2, %v9701_v52, %v11432_v23  ;;  %v1491_v46 = vadd.f32 -0.16666654, %v1490_v55  ;;  %v1644_v50 = vmul.f32 %v1643_v10, %v9533_v40  ;;  %v3659_v42 = vadd.s32 3, %v9741_v59 }
 0x229   : > { %v2894_v1 = vsel %vm11464_vm3, nan, %v2893_v58  ;;  %v3048_v17 = vsel %vm3041_vm0, %v3044_v2, %v3047_v34  ;;  %v1638_v51 = vadd.f32 -0.4999988, %v1637_v49  ;;  %v3505_v56 = vand.u32 3, %v3504_v35 }
 0x22a   : > { %v3049_v43 = vsel %vm11433_vm9, nan, %v3048_v17  ;;  %v1492_v39 = vmul.f32 %v1491_v46, %v9543_v27  ;;  %v1645_v41 = vadd.f32 -0.16666654, %v1644_v50  ;;  %v3660_v22 = vand.u32 3, %v3659_v42  ;;  %v11595_v27 = vld [vmem:[#allocation21_spill] sm:$0xff] }
 0x22b   : > { %v4458_v23 = vpack.c.bf16 %v3049_v43, %v2894_v1  ;;  %vm11462_vm6 = vweird.f32 %v8907_v18  ;;  %v11436_v55 = vxor.u32 2147483648, %v9750_v45  ;;  %v1639_v10 = vmul.f32 %v1638_v51, %v9533_v40 }
 0x22c   : > { %v1493_v61 = vadd.f32 1.0, %v1492_v39  ;;  %v1646_v60 = vmul.f32 %v1645_v41, %v9533_v40  ;;  %vm3506_vm7 = vcmp.lt.s32.totalorder %v3505_v56, 2  ;;  %vm3507_vm5 = vcmp.eq.s32.totalorder %v3505_v56, 0 }
 0x22d   : > { %7258 = vmatmul.msk.bf16.vlgmr.msra.gmra.mxu1 %vm11461_vm14, %v4458_v23  ;;  %v9771_v58 = vadd.f32 1.0, %v1639_v10  ;;  %vm11445_vm4 = vweird.f32 %v8837_v47  ;;  %vm3510_vm11 = vcmp.eq.s32.totalorder %v3505_v56, 2  ;;  %vm3661_vm8 = vcmp.lt.s32.totalorder %v3660_v22, 2  ;;  %v11597_v23 = vld [vmem:[#allocation33_spill] sm:$0xff] }
 0x22e   : > { %v1168_v34 = vsub.s32 4, %v11595_v27  ;;  %v9776_v49 = vmul.f32 %v1493_v61, %v9487_v4  ;;  %v1647_v35 = vadd.f32 1.0, %v1646_v60  ;;  %v1173_v39 = vmul.f32 -0.001358992, %v9188_v20 }
 0x22f   : > { %11594 = vst [vmem:[#allocation17_spill] sm:$0xff] %v9771_v58  ;;  %v1180_v40 = vmul.f32 -0.00019511016, %v9188_v20  ;;  %vm3662_vm0 = vcmp.eq.s32.totalorder %v3660_v22, 0  ;;  %vm3665_vm2 = vcmp.eq.s32.totalorder %v3660_v22, 2  ;;  %vm11596_vm1 = vcmp.lt.s32.totalorder %v8267_v33, 0 }
 0x230   : > { %v1169_v41 = vsel %vm11596_vm1, %v1168_v34, %v11595_v27  ;;  %v1322_v2 = vsub.s32 4, %v11597_v23  ;;  %v11437_v46 = vxor.u32 2147483648, %v9776_v49  ;;  %v9786_v50 = vmul.f32 %v1647_v35, %v9477_v29 }
 0x231   : > { %v11435_v4 = vxor.u32 2147483648, %v9771_v58  ;;  %v3512_v61 = vsel %vm3510_vm11, %v11436_v55, %v9776_v49  ;;  %v1174_v42 = vadd.f32 0.041655596, %v1173_v39  ;;  %v1181_v1 = vadd.f32 0.008332121, %v1180_v40 }
 0x232   : > { %11598 = vst [vmem:[#allocation30_spill] sm:$0xff] %v9786_v50  ;;  %vm11599_vm9 = vcmp.lt.s32.totalorder %v8579_v15, 0  ;;  %v1327_v51 = vmul.f32 -0.001358992, %v9425_v19  ;;  %v11434_v43 = vxor.u32 2147483648, %v9786_v50  ;;  %v3509_v29 = vsel %vm3507_vm5, %v9750_v45, %v11437_v46 }
 0x233   : > { %v1323_v17 = vsel %vm11599_vm9, %v1322_v2, %v11597_v23  ;;  %v9803_v10 = vsel %vm9115_vm10, 0, %v1169_v41  ;;  %v3513_v34 = vsel %vm3506_vm7, %v3509_v29, %v3512_v61  ;;  %v1175_v35 = vmul.f32 %v1174_v42, %v9188_v20 }
 0x234   : > { %v9807_v27 = vsel %vm9147_vm15, 0, %v1323_v17  ;;  %v1182_v39 = vmul.f32 %v1181_v1, %v9188_v20  ;;  %v1328_v40 = vadd.f32 0.041655596, %v1327_v51  ;;  %v3514_v23 = vsel %vm11462_vm6, nan, %v3513_v34 }
 0x235   : > { %v3664_v48 = vsel %vm3662_vm0, %v9771_v58, %v11434_v43  ;;  %v3667_v41 = vsel %vm3665_vm2, %v11435_v4, %v9786_v50  ;;  %v1334_v56 = vmul.f32 -0.00019511016, %v9425_v19  ;;  %v1176_v61 = vadd.f32 -0.4999988, %v1175_v35 }
 0x236   : > { %v3668_v2 = vsel %vm3661_vm8, %v3664_v48, %v3667_v41  ;;  %v1183_v42 = vadd.f32 -0.16666654, %v1182_v39  ;;  %v1329_v1 = vmul.f32 %v1328_v40, %v9425_v19  ;;  %v3194_v29 = vadd.s32 3, %v9803_v10 }
 0x237   : > { %v3669_v17 = vsel %vm11445_vm4, nan, %v3668_v2  ;;  %v1335_v51 = vadd.f32 0.008332121, %v1334_v56  ;;  %v3349_v60 = vadd.s32 3, %v9807_v27  ;;  %v1177_v43 = vmul.f32 %v1176_v61, %v9188_v20  ;;  %v11601_v56 = vld [vmem:[#allocation42_spill] sm:$0xff] }
 0x238   : > { %v4460_v34 = vpack.c.bf16 %v3669_v17, %v3514_v23  ;;  %v1184_v4 = vmul.f32 %v1183_v42, %v9188_v20  ;;  %v1330_v55 = vadd.f32 -0.4999988, %v1329_v1  ;;  %v9833_v22 = vmul.f32 %v9694_v25, %v9694_v25  ;;  %v11602_v42 = vld [vmem:[#allocation41_spill] sm:$0xff] }
 0x239   : > { %v1336_v35 = vmul.f32 %v1335_v51, %v9425_v19  ;;  %v3195_v39 = vand.u32 3, %v3194_v29  ;;  %v3350_v40 = vand.u32 3, %v3349_v60  ;;  %v9837_v48 = vadd.f32 1.0, %v1177_v43 }
 0x23a   : > { %7260 = vmatmul.msk.bf16.vlgmr.msra.gmra.mxu2 %vm11461_vm14, %v4460_v34  ;;  %v1185_v41 = vadd.f32 1.0, %v1184_v4  ;;  %v1331_v23 = vmul.f32 %v1330_v55, %v9425_v19  ;;  %v2092_v2 = vsub.s32 4, %v11601_v56  ;;  %vm1187_vm10 = vweird.f32 %v8267_v33 }
 0x23b   : > { %v1337_v20 = vadd.f32 -0.16666654, %v1336_v35  ;;  %vm3196_vm15 = vcmp.lt.s32.totalorder %v3195_v39, 2  ;;  %v2097_v61 = vmul.f32 -0.001358992, %v9568_v5  ;;  %v11438_v17 = vxor.u32 2147483648, %v9837_v48 }
 0x23c   : > { %v9844_v1 = vmul.f32 %v1185_v41, %v11602_v42  ;;  %v9847_v51 = vadd.f32 1.0, %v1331_v23  ;;  %vm3197_vm9 = vcmp.eq.s32.totalorder %v3195_v39, 0  ;;  %vm3200_vm7 = vcmp.eq.s32.totalorder %v3195_v39, 2  ;;  %v11604_v23 = vld [vmem:[#allocation24_spill] sm:$0xff] }
 0x23d   : > { %v1338_v4 = vmul.f32 %v1337_v20, %v9425_v19  ;;  %vm3351_vm5 = vcmp.lt.s32.totalorder %v3350_v40, 2  ;;  %vm3352_vm11 = vcmp.eq.s32.totalorder %v3350_v40, 0  ;;  %vm11463_vm8 = vweird.f32 %v8579_v15 }
 0x23e   : > { %v11439_v55 = vxor.u32 2147483648, %v9844_v1  ;;  %vm3355_vm0 = vcmp.eq.s32.totalorder %v3350_v40, 2  ;;  %vm11603_vm2 = vcmp.lt.s32.totalorder %v9111_v13, 0  ;;  %v3202_v34 = vsel %vm3200_vm7, %v11438_v17, %v9844_v1 }
 0x23f   : > { %v2093_v29 = vsel %vm11603_vm2, %v2092_v2, %v11601_v56  ;;  %v1339_v60 = vadd.f32 1.0, %v1338_v4  ;;  %v2098_v19 = vadd.f32 0.041655596, %v2097_v61  ;;  %v2104_v35 = vmul.f32 -0.00019511016, %v9568_v5 }
 0x240   : > { %v3199_v41 = vsel %vm3197_vm9, %v9837_v48, %v11439_v55  ;;  %v2246_v20 = vsub.s32 4, %v11604_v23  ;;  %v2251_v42 = vmul.f32 -0.001358992, %v9415_v16  ;;  %v2258_v46 = vmul.f32 -0.00019511016, %v9415_v16  ;;  %v11606_v55 = vld [vmem:[#allocation22_spill] sm:$0xff] }
 0x241   : > { %v9867_v56 = vmul.f32 %v1339_v60, %v9203_v7  ;;  %v3203_v2 = vsel %vm3196_vm15, %v3199_v41, %v3202_v34  ;;  %v2099_v4 = vmul.f32 %v2098_v19, %v9568_v5  ;;  %v2105_v61 = vadd.f32 0.008332121, %v2104_v35 }
 0x242   : > { %v9873_v17 = vsel %vm9524_vm12, 0, %v2093_v29  ;;  %vm11607_vm1 = vcmp.lt.s32.totalorder %v11606_v55, 0  ;;  %v2252_v43 = vadd.f32 0.041655596, %v2251_v42  ;;  %v2259_v47 = vadd.f32 0.008332121, %v2258_v46 }
 0x243   : > { %11605 = vst [vmem:[#allocation26_spill] sm:$0xff] %v9873_v17  ;;  %v2247_v21 = vsel %vm11607_vm1, %v2246_v20, %v11604_v23  ;;  %v11444_v58 = vxor.u32 2147483648, %v9867_v56  ;;  %v3204_v7 = vsel %vm1187_vm10, nan, %v3203_v2  ;;  %v2100_v39 = vadd.f32 -0.4999988, %v2099_v4  ;;  %v11609_v29 = vld [vmem:[#allocation39_spill] sm:$0xff] }
 0x244   : > { %v2106_v60 = vmul.f32 %v2105_v61, %v9568_v5  ;;  %v11608_v34 = vxor.u32 2147483648, %v9847_v51  ;;  %vm11610_vm12 = vnez %v11609_v29  ;;  %v2253_v35 = vmul.f32 %v2252_v43, %v9415_v16 }
 0x245   : > { %v9888_v19 = vsel %vm11610_vm12, 0, %v2247_v21  ;;  %v2260_v46 = vmul.f32 %v2259_v47, %v9415_v16  ;;  %v3354_v41 = vsel %vm3352_vm11, %v9847_v51, %v11444_v58  ;;  %v2101_v23 = vmul.f32 %v2100_v39, %v9568_v5  ;;  %v11627_v39 = vld [vmem:[#allocation49_spill] sm:$0xff] }
 0x246   : > { %v3357_v30 = vsel %vm3355_vm0, %v11608_v34, %v9867_v56  ;;  %v2107_v20 = vadd.f32 -0.16666654, %v2106_v60  ;;  %v4124_v42 = vadd.s32 3, %v9873_v17  ;;  %v2254_v4 = vadd.f32 -0.4999988, %v2253_v35 }
 0x247   : > { %v3358_v2 = vsel %vm3351_vm5, %v3354_v41, %v3357_v30  ;;  %v2261_v61 = vadd.f32 -0.16666654, %v2260_v46  ;;  %v4279_v21 = vadd.s32 3, %v9888_v19  ;;  %v9902_v47 = vadd.f32 1.0, %v2101_v23 }
 0x248   : > { %v3359_v43 = vsel %vm11463_vm8, nan, %v3358_v2  ;;  %v2108_v34 = vmul.f32 %v2107_v20, %v9568_v5  ;;  %v4125_v29 = vand.u32 3, %v4124_v42  ;;  %v11612_v58 = vshll.u32 %v9586_v31, 16  ;;  %v11617_v42 = vld [vmem:[#allocation34_spill] sm:$0xff] }
 0x249   : > { %11611 = vst [vmem:[#allocation27_spill] sm:$0xff] %v9902_v47  ;;  %v4459_v40 = vpack.c.bf16 %v3359_v43, %v3204_v7  ;;  %v2255_v60 = vmul.f32 %v2254_v4, %v9415_v16  ;;  %v2262_v30 = vmul.f32 %v2261_v61, %v9415_v16  ;;  %v4280_v35 = vand.u32 3, %v4279_v21  ;;  %v11616_v16 = vld [vmem:[#allocation20_spill] sm:$0xff]  ;;  %v11618_v43 = vld [vmem:[#allocation18_spill] sm:$0xff] }
 0x24a   : > { %vm9908_vm15 = vc.u32 %v9574_v62, %v11612_v58  ;;  %v2109_v46 = vadd.f32 1.0, %v2108_v34  ;;  %vm11459_vm9 = vweird.f32 %v9111_v13  ;;  %v11446_v41 = vxor.u32 2147483648, %v9902_v47 }
 0x24b   : > { %vm2265_vm7 = vweird.f32 %v11606_v55  ;;  %7259 = vmatmul.msk.bf16.gmra.mxu1 %vm11461_vm14, %v4459_v40  ;;  %v9918_v5 = vadd.f32 1.0, %v2255_v60  ;;  %v2263_v62 = vadd.f32 1.0, %v2262_v30  ;;  %vm4126_vm5 = vcmp.lt.s32.totalorder %v4125_v29, 2 }
 0x24c   : > { %vm4127_vm11 = vcmp.eq.s32.totalorder %v4125_v29, 0  ;;  %v9921_v58 = vmul.f32 %v2109_v46, %v9552_v11  ;;  %vm4130_vm0 = vcmp.eq.s32.totalorder %v4125_v29, 2  ;;  %vm4281_vm2 = vcmp.lt.s32.totalorder %v4280_v35, 2 }
 0x24d   : > { %v1784_v7 = vsub.s32 4, %v11616_v16  ;;  %v9925_v23 = vmul.f32 %v2263_v62, %v9198_v9  ;;  %v11447_v20 = vxor.u32 2147483648, %v9918_v5  ;;  %v1789_v2 = vmul.f32 -0.001358992, %v11617_v42 }
 0x24e   : > { %11615 = vst [vmem:[#allocation28_spill] sm:$0xff] %v9921_v58  ;;  %v1796_v4 = vmul.f32 -0.00019511016, %v11617_v42  ;;  %v11449_v61 = vxor.u32 2147483648, %v9921_v58  ;;  %v4132_v11 = vsel %vm4130_vm0, %v11446_v41, %v9921_v58  ;;  %vm4282_vm1 = vcmp.eq.s32.totalorder %v4280_v35, 0 }
 0x24f   : > { %vm4285_vm12 = vcmp.eq.s32.totalorder %v4280_v35, 2  ;;  %v11450_v21 = vxor.u32 2147483648, %v9925_v23  ;;  %vm11619_vm4 = vcmp.lt.s32.totalorder %v11618_v43, 0  ;;  %v1790_v40 = vadd.f32 0.041655596, %v1789_v2 }
 0x250   : > { %v4287_v9 = vsel %vm4285_vm12, %v11447_v20, %v9925_v23  ;;  %v1785_v34 = vsel %vm11619_vm4, %v1784_v7, %v11616_v16  ;;  %v4129_v60 = vsel %vm4127_vm11, %v9902_v47, %v11449_v61  ;;  %v1797_v30 = vadd.f32 0.008332121, %v1796_v4  ;;  %v11620_v4 = vld [vmem:[#allocation29_spill] sm:$0xff] }
 0x251   : > { %v1938_v46 = vsub.s32 4, %v9452_v26  ;;  %v1943_v62 = vmul.f32 -0.001358992, %v9833_v22  ;;  %v4133_v41 = vsel %vm4126_vm5, %v4129_v60, %v4132_v11  ;;  %v4284_v20 = vsel %vm4282_vm1, %v9918_v5, %v11450_v21 }
 0x252   : > { %v1791_v17 = vmul.f32 %v1790_v40, %v11617_v42  ;;  %v1950_v16 = vmul.f32 -0.00019511016, %v9833_v22  ;;  %v4134_v7 = vsel %vm11459_vm9, nan, %v4133_v41  ;;  %v4288_v2 = vsel %vm4281_vm2, %v4284_v20, %v4287_v9 }
 0x253   : > { %vm11621_vm4 = vnez %v11620_v4  ;;  %v1798_v29 = vmul.f32 %v1797_v30, %v11617_v42  ;;  %v4289_v11 = vsel %vm2265_vm7, nan, %v4288_v2  ;;  %vm11622_vm5 = vcmp.lt.s32.totalorder %v9168_v12, 0  ;;  %v11629_v4 = vld [vmem:[#allocation44_spill] sm:$0xff] }
 0x254   : > { %v9958_v61 = vsel %vm11621_vm4, 0, %v1785_v34  ;;  %v1792_v60 = vadd.f32 -0.4999988, %v1791_v17  ;;  %v1939_v40 = vsel %vm11622_vm5, %v1938_v46, %v9452_v26  ;;  %v1944_v21 = vadd.f32 0.041655596, %v1943_v62 }
 0x255   : > { %v2338_v35 = vsel %vm9908_vm15, 1, %v11491_v24  ;;  %v4462_v41 = vpack.c.bf16 %v4289_v11, %v4134_v7  ;;  %v1799_v20 = vadd.f32 -0.16666654, %v1798_v29  ;;  %v1951_v9 = vadd.f32 0.008332121, %v1950_v16  ;;  %v11628_v7 = vld [vmem:[#allocation46_spill] sm:$0xff] }
 0x256   : > { %v11623_v34 = vshll.u32 %v9589_v32, 16  ;;  %v1793_v17 = vmul.f32 %v1792_v60, %v11617_v42  ;;  %v1945_v2 = vmul.f32 %v1944_v21, %v9833_v22  ;;  %v3814_v26 = vadd.s32 3, %v9958_v61  ;;  %v11631_v11 = vld [vmem:[#allocation25_spill] sm:$0xff]  ;;  %v11632_v60 = vld [vmem:[#allocation48_spill] sm:$0xff] }
 0x257   : > { %v11626_v46 = vshll.u32 %v9582_v38, 16  ;;  %7262 = vmatmul.msk.bf16.vlgmr.msra.gmra.mxu3 %vm11461_vm14, %v4462_v41  ;;  %v1800_v62 = vmul.f32 %v1799_v20, %v11617_v42  ;;  %v1952_v16 = vmul.f32 %v1951_v9, %v9833_v22  ;;  %vm11630_vm0 = vcmp.lt.s32.totalorder %v11629_v4, 4 }
 0x258   : > { %vm9972_vm11 = vc.u32 %v9699_v44, %v11623_v34  ;;  %v9986_v44 = vsel %vm9646_vm13, 0, %v1939_v40  ;;  %v2313_v21 = vsel %vm11630_vm0, %v11628_v7, 2102212464  ;;  %v2340_v29 = vadd.s32 %v2338_v35, %v9599_v63  ;;  %v11634_v35 = vld [vmem:[#allocation45_spill] sm:$0xff] }
 0x259   : > { %vm2359_vm15 = vc.u32 %v11627_v39, %v11626_v46  ;;  %v11633_v34 = vand.u32 65535, %v11632_v60  ;;  %v1946_v13 = vadd.f32 -0.4999988, %v1945_v2  ;;  %v9996_v41 = vadd.f32 1.0, %v1793_v17 }
 0x25a   : > { %v1801_v42 = vadd.f32 1.0, %v1800_v62  ;;  %v1953_v20 = vadd.f32 -0.16666654, %v1952_v16  ;;  %v2342_v57 = vsel %vm9972_vm11, 1, %v11491_v24  ;;  %v2360_v40 = vsel %vm2359_vm15, 1, %v11491_v24  ;;  %v11637_v62 = vld [vmem:[#allocation31_spill] sm:$0xff] }
 0x25b   : > { %v2353_v46 = vmul.u32 %v11633_v34, %v11631_v11  ;;  %v1947_v9 = vmul.f32 %v1946_v13, %v9833_v22  ;;  %v3815_v7 = vand.u32 3, %v3814_v26  ;;  %v3969_v63 = vadd.s32 3, %v9986_v44 }
 0x25c   : > { %vm11635_vm13 = vcmp.lt.s32.totalorder %v11629_v4, 3  ;;  %v11636_v17 = vshrl.u32 %v11632_v60, 16  ;;  %v10011_v16 = vmul.f32 %v1801_v42, %v11637_v62  ;;  %v1954_v30 = vmul.f32 %v1953_v20, %v9833_v22 }
 0x25d   : > { %v2314_v34 = vsel %vm11635_vm13, %v11634_v35, %v2313_v21  ;;  %v2334_v47 = vshrl.u32 %v9586_v31, 16  ;;  %v2356_v13 = vshrl.u32 %v9582_v38, 16  ;;  %v10016_v26 = vadd.f32 1.0, %v1947_v9 }
 0x25e   : > { %v2354_v2 = vmul.u32 %v11636_v17, %v11631_v11  ;;  %v2344_v58 = vadd.s32 %v2342_v57, %v2340_v29  ;;  %v1807_v18 = vxor.u32 2147483648, %v10011_v16  ;;  %v1810_v21 = vxor.u32 2147483648, %v9996_v41 }
 0x25f   : > { %v1955_v35 = vadd.f32 1.0, %v1954_v30  ;;  %vm3817_vm2 = vcmp.eq.s32.totalorder %v3815_v7, 0  ;;  %v3970_v11 = vand.u32 3, %v3969_v63  ;;  %v2357_v60 = vshll.u32 %v2353_v46, 16  ;;  %v11639_v30 = vld [vmem:[#allocation19_spill] sm:$0xff] }
 0x260   : > { %v2362_v50 = vadd.s32 %v2360_v40, %v2354_v2  ;;  %v11638_v42 = vshll.u32 %v9582_v38, 16  ;;  %v1964_v20 = vxor.u32 2147483648, %v10016_v26  ;;  %v3819_v29 = vsel %vm3817_vm2, %v9996_v41, %v1807_v18 }
 0x261   : > { %v10024_v31 = vmul.f32 %v1955_v35, %v9694_v25  ;;  %v2345_v57 = vadd.s32 %v2344_v58, %v2334_v47  ;;  %vm1803_vm1 = vweird.f32 %v11618_v43  ;;  %vm3820_vm12 = vcmp.eq.s32.totalorder %v3815_v7, 2 }
 0x262   : > { %v2361_v22 = vadd.s32 %v11638_v42, %v11627_v39  ;;  %v2336_v40 = vshrl.u32 %v9589_v32, 16  ;;  %vm3816_vm5 = vcmp.lt.s32.totalorder %v3815_v7, 2  ;;  %v3822_v38 = vsel %vm3820_vm12, %v1810_v21, %v10011_v16 }
 0x263   : > { %v1961_v9 = vxor.u32 2147483648, %v10024_v31  ;;  %v3823_v25 = vsel %vm3816_vm5, %v3819_v29, %v3822_v38  ;;  %vm3972_vm11 = vcmp.eq.s32.totalorder %v3970_v11, 0  ;;  %vm3975_vm15 = vcmp.eq.s32.totalorder %v3970_v11, 2 }
 0x264   : > { %vm2363_vm4 = vc.u32 %v2361_v22, %v2357_v60  ;;  %vm3971_vm0 = vcmp.lt.s32.totalorder %v3970_v11, 2  ;;  %v3977_v32 = vsel %vm3975_vm15, %v1964_v20, %v10024_v31  ;;  %v2346_v58 = vadd.s32 %v2345_v57, %v2336_v40  ;;  %v11641_v57 = vld [vmem:[#allocation47_spill] sm:$0xff] }
 0x265   : > { %v2364_v39 = vsel %vm2363_vm4, 1, %v11491_v24  ;;  %v3974_v47 = vsel %vm3972_vm11, %v10016_v26, %v1961_v9  ;;  %vm11460_vm13 = vweird.f32 %v9168_v12  ;;  %v2358_v17 = vshrl.u32 %v2353_v46, 16 }
 0x266   : > { %v2366_v63 = vadd.s32 %v2364_v39, %v2362_v50  ;;  %v3978_v7 = vsel %vm3971_vm0, %v3974_v47, %v3977_v32  ;;  %v3824_v24 = vsel %vm1803_vm1, nan, %v3823_v25  ;;  %v2365_v62 = vadd.s32 %v2361_v22, %v2357_v60 }
 0x267   : > { %v3979_v50 = vsel %vm11460_vm13, nan, %v3978_v7  ;;  %vm11640_vm2 = vcmp.lt.s32.totalorder %v11629_v4, 2  ;;  %v1804_v39 = vand.u32 3, %v9958_v61  ;;  %v4447_v60 = vpack.c.bf16 %v9671_v53, %v9629_v37 }
 0x268   : > { %v2367_v2 = vadd.s32 %v2366_v63, %v2356_v13  ;;  %v2315_v35 = vsel %vm11640_vm2, %v11639_v30, %v2314_v34  ;;  %v4461_v11 = vpack.c.bf16 %v3979_v50, %v3824_v24  ;;  %vm2371_vm12 = vc.u32 %v2346_v58, %v2365_v62 }
 0x269   : > { %v2369_v46 = vmul.u32 %v11641_v57, %v2315_v35  ;;  %7268 = vmatmul.msk.bf16.vlgmr.msrb.gmra.mxu1 %vm11461_vm14, %v4447_v60  ;;  %vm1809_vm4 = vcmp.eq.s32.totalorder %v1804_v39, 2  ;;  %vm1806_vm5 = vcmp.eq.s32.totalorder %v1804_v39, 0  ;;  %v880_v63 = vand.u32 3, %v9652_v54 }
 0x26a   : > { %v2368_v42 = vadd.s32 %v2367_v2, %v2358_v17  ;;  %7261 = vmatmul.msk.bf16.gmra.mxu2 %vm11461_vm14, %v4461_v11  ;;  %v1811_v34 = vsel %vm1809_vm4, %v1810_v21, %v10011_v16  ;;  %v1808_v47 = vsel %vm1806_vm5, %v9996_v41, %v1807_v18  ;;  %v1188_v61 = vand.u32 3, %v9803_v10 }
 0x26b   : > { %vm1805_vm11 = vcmp.lt.s32.totalorder %v1804_v39, 2  ;;  %v2266_v32 = vand.u32 3, %v9888_v19  ;;  %v1034_v7 = vand.u32 3, %v9662_v0  ;;  %v2370_v16 = vadd.s32 %v2365_v62, %v2346_v58 }
 0x26c   : > { %v2372_v29 = vadd.s32 1, %v2368_v42  ;;  %v1812_v53 = vsel %vm1805_vm11, %v1808_v47, %v1811_v34  ;;  %vm881_vm0 = vcmp.lt.s32.totalorder %v880_v63, 2  ;;  %v1342_v54 = vand.u32 3, %v9807_v27 }
 0x26d   : > { %v10064_v17 = vsel %vm1803_vm1, nan, %v1812_v53  ;;  %vm882_vm2 = vcmp.eq.s32.totalorder %v880_v63, 0  ;;  %v1496_v10 = vand.u32 3, %v9729_v28  ;;  %vm1189_vm4 = vcmp.lt.s32.totalorder %v1188_v61, 2 }
 0x26e   : > { %v2373_v13 = vsel %vm2371_vm12, %v2372_v29, %v2368_v42  ;;  %vm885_vm12 = vcmp.eq.s32.totalorder %v880_v63, 2  ;;  %vm1193_vm5 = vcmp.eq.s32.totalorder %v1188_v61, 2  ;;  %v10069_v19 = vand.u32 3, %v9741_v59 }
 0x26f   : > { %v2374_v40 = vadd.s32 %v2373_v13, %v2369_v46  ;;  %vm2271_vm11 = vcmp.eq.s32.totalorder %v2266_v32, 2  ;;  %vm1190_vm13 = vcmp.eq.s32.totalorder %v1188_v61, 0  ;;  %v11642_v43 = vxor.u32 2147483648, %v9837_v48 }
 0x270   : > { %v11643_v27 = vxor.u32 2147483648, %v9918_v5  ;;  %v11644_v28 = vxor.u32 2147483648, %v9844_v1  ;;  %vm1343_vm14 = vcmp.lt.s32.totalorder %v1342_v54, 2  ;;  %vm1344_vm6 = vcmp.eq.s32.totalorder %v1342_v54, 0 }
 0x271   : > { %v2375_v38 = vadd.s32 536870912, %v2374_v40  ;;  %v1195_v41 = vsel %vm1193_vm5, %v11642_v43, %v9844_v1  ;;  %vm1347_vm8 = vcmp.eq.s32.totalorder %v1342_v54, 2  ;;  %vm2268_vm3 = vcmp.eq.s32.totalorder %v2266_v32, 0  ;;  %v11659_v54 = vld [vmem:[#allocation35_spill] sm:$0xff]  ;;  %v11663_v43 = vld [vmem:[#allocation17_spill] sm:$0xff] }
 0x272   : > { %v2273_v58 = vsel %vm2271_vm11, %v11643_v27, %v9925_v23  ;;  %v1192_v2 = vsel %vm1190_vm13, %v9837_v48, %v11644_v28  ;;  %vm2267_vm1 = vcmp.lt.s32.totalorder %v2266_v32, 2  ;;  %v11645_v24 = vxor.u32 2147483648, %v9925_v23 }
 0x273   : > { %v10052_v22 = vshrl.u32 %v2375_v38, 30  ;;  %v1196_v59 = vsel %vm1189_vm4, %v1192_v2, %v1195_v41  ;;  %v11646_v30 = vxor.u32 2147483648, %v9704_v14  ;;  %v1958_v29 = vand.u32 3, %v9986_v44  ;;  %v11666_v2 = vld [vmem:[#allocation32_spill] sm:$0xff] }
 0x274   : > { %v2270_v50 = vsel %vm2268_vm3, %v9918_v5, %v11645_v24  ;;  %v10090_v48 = vsel %vm1187_vm10, nan, %v1196_v59  ;;  %v11647_v5 = vxor.u32 2147483648, %v9689_v6  ;;  %vm1497_vm3 = vcmp.lt.s32.totalorder %v1496_v10, 2 }
 0x275   : > { %v2377_v4 = vshll.u32 %v10052_v22, 30  ;;  %v884_v1 = vsel %vm882_vm2, %v9689_v6, %v11646_v30  ;;  %v2274_v35 = vsel %vm2267_vm1, %v2270_v50, %v2273_v58  ;;  %vm1501_vm13 = vcmp.eq.s32.totalorder %v1496_v10, 2  ;;  %v11669_v30 = vld [vmem:[#allocation43_spill] sm:$0xff] }
 0x276   : > { %v10095_v23 = vsel %vm2265_vm7, nan, %v2274_v35  ;;  %v887_v57 = vsel %vm885_vm12, %v11647_v5, %v9704_v14  ;;  %v11648_v44 = vxor.u32 2147483648, %v9847_v51  ;;  %vm1651_vm10 = vcmp.lt.s32.totalorder %v10069_v19, 2  ;;  %v11671_v35 = vld [vmem:[#allocation26_spill] sm:$0xff] }
 0x277   : > { %v2378_v25 = vsub.s32 %v2374_v40, %v2377_v4  ;;  %v888_v40 = vsel %vm881_vm0, %v884_v1, %v887_v57  ;;  %vm1652_vm7 = vcmp.eq.s32.totalorder %v10069_v19, 0  ;;  %vm1655_vm2 = vcmp.eq.s32.totalorder %v10069_v19, 2 }
 0x278   : > { %v1349_v55 = vsel %vm1347_vm8, %v11648_v44, %v9867_v56  ;;  %vm1959_vm12 = vcmp.lt.s32.totalorder %v1958_v29, 2  ;;  %vm1960_vm4 = vcmp.eq.s32.totalorder %v1958_v29, 0  ;;  %vm11649_vm5 = vweird.f32 %v8331_v8  ;;  %v11674_v44 = vld [vmem:[#allocation27_spill] sm:$0xff] }
 0x279   : > { %vm2379_vm15 = vcmp.lt.s32.totalorder %v2378_v25, 0  ;;  %v2380_v37 = vsub.s32 0, %v2378_v25  ;;  %v889_v38 = vsel %vm11649_vm5, nan, %v888_v40  ;;  %v11650_v39 = vxor.u32 2147483648, %v9725_v3 }
 0x27a   : > { %vm11651_vm0 = vcmp.eq.s32.totalorder %v1034_v7, 0  ;;  %v11652_v4 = vxor.u32 2147483648, %v9701_v52  ;;  %vm11653_vm8 = vcmp.eq.s32.totalorder %v1034_v7, 2  ;;  %vm11655_vm11 = vweird.f32 %v8734_v36 }
 0x27b   : > { %v2381_v21 = vsel %vm2379_vm15, %v2380_v37, %v2378_v25  ;;  %vm1035_vm15 = vcmp.lt.s32.totalorder %v1034_v7, 2  ;;  %v1038_v60 = vsel %vm11651_vm0, %v9701_v52, %v11650_v39  ;;  %vm11656_vm1 = vweird.f32 %v8579_v15 }
 0x27c   : > { %v2382_v18 = vclz %v2381_v21  ;;  %v1041_v34 = vsel %vm11653_vm8, %v11652_v4, %v9725_v3  ;;  %v11657_v52 = vxor.u32 2147483648, %v9776_v49  ;;  %v1962_v58 = vsel %vm1960_vm4, %v10016_v26, %v1961_v9 }
 0x27d   : > { %v1042_v8 = vsel %vm1035_vm15, %v1038_v60, %v1041_v34  ;;  %vm11665_vm15 = vcmask 130048   ;;  %v11670_v9 = vand.u32 2147483647, %v11669_v30  ;;  %v2400_v26 = vsub.s32 4, %v10052_v22  ;;  %v11676_v60 = vld [vmem:[#allocation38_spill] sm:$0xff] }
 0x27e   : > { %v7210_v0 = vadd.s32 4294967294, %v2382_v18  ;;  %v1043_v53 = vsel %vm11655_vm11, nan, %v1042_v8  ;;  %v11661_v18 = vld [vmem:[#allocation30_spill] sm:$0xff]  ;;  %vm11677_vm4 = vweird.f32 %v11676_v60  ;;  %vm11678_vm5 = vmmov %vm11665_vm15 }
 0x280   : > { %vm7211_vm9 = vcmp.lt.s32.totalorder %v7210_v0, 0 }
 0x281   : > { %v2385_v62 = vsel %vm7211_vm9, 0, %v7210_v0  ;;  %vm1498_vm9 = vcmp.eq.s32.totalorder %v1496_v10, 0  ;;  %v11662_v0 = vxor.u32 2147483648, %v11661_v18 }
 0x282   : > { %v2386_v11 = vsub.s32 32, %v2385_v62  ;;  %v2390_v42 = vsub.s32 4294967266, %v2385_v62  ;;  %v2387_v33 = vshll.u32 %v2378_v25, %v2385_v62  ;;  %v11654_v25 = vxor.u32 2147483648, %v9867_v56 }
 0x283   : > { %v1500_v3 = vsel %vm1498_vm9, %v9750_v45, %v11657_v52  ;;  %v1654_v41 = vsel %vm1652_vm7, %v11663_v43, %v11662_v0  ;;  %vm11668_vm9 = vweird.f32 %v9168_v12 }
 0x284   : > { %v2388_v46 = vshrl.u32 %v2370_v16, %v2386_v11  ;;  %v2391_v13 = vadd.s32 127, %v2390_v42  ;;  %v1346_v63 = vsel %vm1344_vm6, %v9847_v51, %v11654_v25  ;;  %v11658_v51 = vxor.u32 2147483648, %v9750_v45 }
 0x285   : > { %v1350_v37 = vsel %vm1343_vm14, %v1346_v63, %v1349_v55  ;;  %v4448_v16 = vpack.c.bf16 %v1043_v53, %v889_v38  ;;  %vm11660_vm14 = vweird.f32 %v11659_v54  ;;  %v11664_v45 = vxor.u32 2147483648, %v11663_v43 }
 0x286   : > { %v2389_v6 = vor.u32 %v2388_v46, %v2387_v33  ;;  %v2392_v14 = vshll.u32 %v2391_v13, 23  ;;  %v1351_v32 = vsel %vm11656_vm1, nan, %v1350_v37  ;;  %v1503_v56 = vsel %vm1501_vm13, %v11658_v51, %v9776_v49  ;;  %v11672_v13 = vld [vmem:[#allocation28_spill] sm:$0xff] }
 0x287   : > { %v4449_v21 = vpack.c.bf16 %v1351_v32, %v10090_v48  ;;  %v1504_v36 = vsel %vm1497_vm3, %v1500_v3, %v1503_v56  ;;  %v1657_v49 = vsel %vm1655_vm2, %v11664_v45, %v11661_v18  ;;  %vm1963_vm6 = vcmp.eq.s32.totalorder %v1958_v29, 2  ;;  %7269 = vmatmul.msk.bf16.gmra.mxu1 %vm11665_vm15, %v4448_v16  ;;  %vm11681_vm15 = vmmov %vm11678_vm5 }
 0x288   : > { %v2393_v47 = vor.u32 4788187, %v2392_v14  ;;  %v2396_v61 = vcvt.s32.f32 %v2389_v6  ;;  %v1505_v15 = vsel %vm11660_vm14, nan, %v1504_v36  ;;  %v1658_v10 = vsel %vm1651_vm10, %v1654_v41, %v1657_v49  ;;  %vm11679_vm14 = vmmov %vm11678_vm5 }
 0x289   : > { %v1965_v28 = vsel %vm1963_vm6, %v1964_v20, %v10024_v31  ;;  %vm11667_vm3 = vweird.f32 %v11666_v2  ;;  %vm2278_vm13 = vcmp.lt.s32.totalorder %v11669_v30, 0  ;;  %vm2277_vm10 = vcmp.le.f32.partialorder %v11670_v9, 0.7853982  ;;  %vm11680_vm6 = vmmov %vm11678_vm5 }
 0x28a   : > { %v2394_v7 = vand.u32 2147483647, %v2393_v47  ;;  %v1659_v59 = vsel %vm11667_vm3, nan, %v1658_v10  ;;  %v1966_v24 = vsel %vm1959_vm12, %v1962_v58, %v1965_v28  ;;  %v2112_v11 = vand.u32 3, %v11671_v35  ;;  %vm11682_vm3 = vmmov %vm11678_vm5  ;;  %v10199_v58 = vld [vmem:[%s11328_s8 + $0x1] ss:$0 sm:$0xff] }
 0x28b   : > { %v4450_v62 = vpack.c.bf16 %v1659_v59, %v1505_v15  ;;  %v1967_v19 = vsel %vm11668_vm9, nan, %v1966_v24  ;;  %v2401_v42 = vsel %vm2278_vm13, %v2400_v26, %v10052_v22  ;;  %v11673_v40 = vxor.u32 2147483648, %v11672_v13  ;;  %v7513_v35 = vld [vmem:[%s11324_s4 + $0x10] sm:$0xff] }
 0x28c   : > { %v2397_v27 = vmul.f32 %v2396_v61, %v2394_v7  ;;  %v4451_v1 = vpack.c.bf16 %v1967_v19, %v10064_v17  ;;  %v2403_v33 = vsel %vm2277_vm10, 0, %v2401_v42  ;;  %vm2113_vm7 = vcmp.lt.s32.totalorder %v2112_v11, 2 }
 0x28d   : > { %vm2114_vm2 = vcmp.eq.s32.totalorder %v2112_v11, 0  ;;  %vm2117_vm12 = vcmp.eq.s32.totalorder %v2112_v11, 2  ;;  %v11675_v6 = vxor.u32 2147483648, %v11674_v44  ;;  %v4434_v34 = vadd.s32 3, %v2403_v33  ;;  %v7509_v11 = vld [vmem:[%s11323_s3 + $0x10] sm:$0xff] }
 0x28e   : > { %v2398_v50 = vxor.u32 2147483648, %v2397_v27  ;;  %v2116_v55 = vsel %vm2114_vm2, %v11674_v44, %v11673_v40  ;;  %vm2419_vm1 = vweird.f32 %v11669_v30  ;;  %v7512_v40 = vld [vmem:[%s11324_s4 + $0x8] sm:$0xff] }
 0x28f   : > { %v2119_v14 = vsel %vm2117_vm12, %v11675_v6, %v11672_v13  ;;  %v4435_v37 = vand.u32 3, %v4434_v34  ;;  %v7508_v44 = vld [vmem:[%s11323_s3 + $0x8] sm:$0xff] }
 0x290   : > { %v2399_v48 = vsel %vm2278_vm13, %v2398_v50, %v2397_v27  ;;  %v2120_v38 = vsel %vm2113_vm7, %v2116_v55, %v2119_v14  ;;  %vm11683_vm7 = vmmov %vm11682_vm3 }
 0x291   : > { %v2402_v31 = vsel %vm2277_vm10, %v11669_v30, %v2399_v48  ;;  %v2121_v4 = vsel %vm11677_vm4, nan, %v2120_v38  ;;  %vm4437_vm0 = vcmp.eq.s32.totalorder %v4435_v37, 0  ;;  %vm4440_vm8 = vcmp.eq.s32.totalorder %v4435_v37, 2  ;;  %v7514_v30 = vld [vmem:[%s11324_s4 + $0x18] sm:$0xff] }
 0x292   : > { %v2404_v20 = vmul.f32 %v2402_v31, %v2402_v31  ;;  %v4452_v25 = vpack.c.bf16 %v10095_v23, %v2121_v4  ;;  %vm4436_vm11 = vcmp.lt.s32.totalorder %v4435_v37, 2  ;;  %4960 = vmatpush.bf16.msrb.mxu2 %v7514_v30 }
 0x294   : > { %v2405_v29 = vmul.f32 -0.001358992, %v2404_v20  ;;  %v2412_v12 = vmul.f32 -0.00019511016, %v2404_v20 }
 0x296   : > { %v2406_v5 = vadd.f32 0.041655596, %v2405_v29  ;;  %v2413_v57 = vadd.f32 0.008332121, %v2412_v12  ;;  %4961 = vmatpush.bf16.msrb.mxu2 %v7513_v35 }
 0x297   : > { %7270 = vmatmul.msk.bf16.gmra.mxu1 %vm11678_vm5, %v4449_v21  ;;  %v2420_v21 = vand.u32 3, %v2403_v33  ;;  %v4501_v27 = vpop.f32.mrf.mxu0 }
 0x298   : > { %v2407_v17 = vmul.f32 %v2406_v5, %v2404_v20  ;;  %v2414_v46 = vmul.f32 %v2413_v57, %v2404_v20 }
 0x299   : > { %vm2422_vm9 = vcmp.eq.s32.totalorder %v2420_v21, 0  ;;  %vm2425_vm13 = vcmp.eq.s32.totalorder %v2420_v21, 2  ;;  %vm2421_vm10 = vcmp.lt.s32.totalorder %v2420_v21, 2 }
 0x29a   : > { %v2408_v22 = vadd.f32 -0.4999988, %v2407_v17  ;;  %v2415_v39 = vadd.f32 -0.16666654, %v2414_v46  ;;  %4962 = vmatpush.bf16.msrb.mxu2 %v7512_v40 }
 0x29c   : > { %v2409_v63 = vmul.f32 %v2408_v22, %v2404_v20  ;;  %v2416_v47 = vmul.f32 %v2415_v39, %v2404_v20 }
 0x29e   : > { %v2410_v61 = vadd.f32 1.0, %v2409_v63  ;;  %v2417_v8 = vadd.f32 1.0, %v2416_v47 }
 0x29f   : > { %v4503_v50 = vpop.f32.mrf.mxu0 }
 0x2a0   : > { %v2418_v53 = vmul.f32 %v2417_v8, %v2402_v31  ;;  %v2426_v32 = vxor.u32 2147483648, %v2410_v61 }
 0x2a2   : > { %v2423_v52 = vxor.u32 2147483648, %v2418_v53  ;;  %v4442_v51 = vsel %vm4440_vm8, %v2426_v32, %v2418_v53  ;;  %v2427_v54 = vsel %vm2425_vm13, %v2426_v32, %v2418_v53  ;;  %v7511_v53 = vld [vmem:[%s11324_s4] sm:$0xff] }
 0x2a3   : > { %v7507_v32 = vld [vmem:[%s11323_s3] sm:$0xff]  ;;  %4963 = vmatpush.bf16.msrb.mxu2 %v7511_v53 }
 0x2a4   : > { %v4439_v3 = vsel %vm4437_vm0, %v2410_v61, %v2423_v52  ;;  %v2424_v36 = vsel %vm2422_vm9, %v2410_v61, %v2423_v52  ;;  %vm4934_vm0 = vcmask 523264   ;;  %v11692_v53 = vld [vmem:[#allocation7_spill] sm:$0xff] }
 0x2a5   : > { %v4443_v56 = vsel %vm4436_vm11, %v4439_v3, %v4442_v51  ;;  %v2428_v18 = vsel %vm2421_vm10, %v2424_v36, %v2427_v54 }
 0x2a6   : > { %v4444_v23 = vsel %vm2419_vm1, nan, %v4443_v56  ;;  %v2429_v0 = vsel %vm2419_vm1, nan, %v2428_v18 }
 0x2a7   : > { %v4463_v7 = vpack.c.bf16 %v4444_v23, %v4444_v23  ;;  %7271 = vmatmul.msk.bf16.gmra.mxu1 %vm11680_vm6, %v4450_v62  ;;  %v4453_v43 = vpack.c.bf16 %v2429_v0, %v2429_v0 }
 0x2a9   : > { %7263 = vmatmul.msk.bf16.gmra.mxu3 %vm11679_vm14, %v4463_v7 }
 0x2aa   : > { %v4506_v16 = vpop.f32.mrf.mxu1 }
 0x2b2   : > { %v4508_v15 = vpop.f32.mrf.mxu1 }
 0x2b7   : > { %7272 = vmatmul.msk.bf16.gmra.mxu1 %vm11681_vm15, %v4451_v1  ;;  %v7510_v1 = vld [vmem:[%s11323_s3 + $0x18] sm:$0xff] }
 0x2b8   : > { %5048 = vmatpush.bf16.msrb.mxu3 %v7510_v1 }
 0x2bc   : > { %5049 = vmatpush.bf16.msrb.mxu3 %v7509_v11 }
 0x2bd   : > { %v4516_v1 = vpop.f32.mrf.mxu2 }
 0x2c0   : > { %5050 = vmatpush.bf16.msrb.mxu3 %v7508_v44 }
 0x2c4   : > { %5051 = vmatpush.bf16.msrb.mxu3 %v7507_v32 }
 0x2c7   : > { %7273 = vmatmul.msk.bf16.gmra.mxu1 %vm11682_vm3, %v4452_v25 }
 0x2c8   : > { %v4511_v41 = vpop.f32.mrf.mxu1 }
 0x2d0   : > { %v10194_v45 = vpop.f32.mrf.mxu1 }
 0x2d7   : > { %7274 = vmatmul.msk.bf16.gmra.mxu1 %vm11683_vm7, %v4453_v43  ;;  %v11686_v43 = vld [vmem:[#allocation10_spill] sm:$0xff] }
 0x2da   : > { %v10228_v12 = vpop.f32.mrf.mxu3 }
 0x2e2   : > { %v10241_v39 = vpop.f32.mrf.mxu3 }
 0x2e6   : > { %v4571_v49 = vpop.f32.mrf.mxu1 }
 0x2e7   : > { %v4572_v10 = vadd.f32 %v4571_v49, %v4501_v27 }
 0x2e9   : > { %v10202_v28 = vadd.f32 %v10199_v58, %v4572_v10 }
 0x2eb   : > { %v7275_v2 = vmul.f32 -1.442695, %v10202_v28 }
 0x2ed   : > { %7606 = vpow2.f32 %v7275_v2 }
 0x2ee   : > { %v4573_v62 = vpop.f32.mrf.mxu1 }
 0x2ef   : > { %v4574_v19 = vadd.f32 %v4573_v62, %v4503_v50 }
 0x2f1   : > { %v10215_v9 = vadd.f32 %v10199_v58, %v4574_v19 }
 0x2f3   : > { %v7607_v59 = vpop.eup %7606  ;;  %v7276_v48 = vmul.f32 -1.442695, %v10215_v9 }
 0x2f4   : > { %v10205_v24 = vadd.f32 1.0, %v7607_v59 }
 0x2f6   : > { %7608 = vrcp.f32 %v10205_v24  ;;  %vm4677_vm12 = vweird.f32 %v10205_v24  ;;  %v4683_v25 = vand.u32 2147483648, %v10205_v24  ;;  %v4681_v61 = vand.u32 2147483647, %v10205_v24 }
 0x2f7   : > { %7610 = vpow2.f32 %v7276_v48 }
 0x2f8   : > { %v4684_v7 = vor.u32 1.1754944e-38, %v4683_v25  ;;  %vm4682_vm8 = vcmp.eq.f32.partialorder %v4681_v61, 8.507059e+37 }
 0x2fc   : > { %v7609_v26 = vpop.eup %7608 }
 0x2fd   : > { %v4673_v42 = vmul.f32 %v7609_v26, %v10205_v24  ;;  %v7611_v5 = vpop.eup %7610  ;;  %vm4678_vm2 = vweird.f32 %v7609_v26 }
 0x2fe   : > { %v4660_v17 = vadd.f32 1.0, %v7611_v5  ;;  %vm10248_vm4 = vmor %vm4677_vm12, %vm4678_vm2 }
 0x2ff   : > { %v4674_v33 = vsub.f32 1.0, %v4673_v42 }
 0x300   : > { %v4696_v3 = vand.u32 2147483647, %v4660_v17  ;;  %v4698_v51 = vand.u32 2147483648, %v4660_v17  ;;  %vm4692_vm11 = vweird.f32 %v4660_v17 }
 0x301   : > { %v4675_v55 = vmul.f32 %v7609_v26, %v4674_v33 }
 0x302   : > { %v4699_v18 = vor.u32 1.1754944e-38, %v4698_v51  ;;  %vm4697_vm14 = vcmp.eq.f32.partialorder %v4696_v3, 8.507059e+37 }
 0x303   : > { %v4676_v60 = vadd.f32 %v7609_v26, %v4675_v55 }
 0x304   : > { %v4576_v31 = vpop.f32.mrf.mxu1 }
 0x305   : > { %v4577_v20 = vadd.f32 %v4576_v31, %v4506_v16  ;;  %v4680_v52 = vsel %vm10248_vm4, %v7609_v26, %v4676_v60 }
 0x307   : > { %v10226_v29 = vadd.f32 %v10199_v58, %v4577_v20 }
 0x309   : > { %v7277_v57 = vmul.f32 -1.442695, %v10226_v29 }
 0x30b   : > { %7612 = vpow2.f32 %v7277_v57 }
 0x30c   : > { %7614 = vrcp.f32 %v4660_v17  ;;  %v4578_v46 = vpop.f32.mrf.mxu1 }
 0x30d   : > { %v4579_v13 = vadd.f32 %v4578_v46, %v4508_v15  ;;  %v4685_v15 = vsel %vm4682_vm8, %v4684_v7, %v4680_v52 }
 0x30e   : > { %v4867_v50 = vmul.f32 %v4685_v15, %v10202_v28 }
 0x30f   : > { %v10238_v6 = vadd.f32 %v10199_v58, %v4579_v13 }
 0x311   : > { %v7613_v14 = vpop.eup %7612  ;;  %v7278_v38 = vmul.f32 -1.442695, %v10238_v6 }
 0x312   : > { %v7615_v22 = vpop.eup %7614  ;;  %v10243_v4 = vadd.f32 1.0, %v7613_v14 }
 0x313   : > { %v4688_v34 = vmul.f32 %v7615_v22, %v4660_v17  ;;  %7616 = vpow2.f32 %v7278_v38  ;;  %vm4693_vm5 = vweird.f32 %v7615_v22 }
 0x314   : > { %7618 = vrcp.f32 %v10243_v4  ;;  %v4581_v63 = vpop.f32.mrf.mxu1  ;;  %vm4694_vm1 = vmor %vm4692_vm11, %vm4693_vm5  ;;  %vm4707_vm15 = vweird.f32 %v10243_v4  ;;  %v4711_v33 = vand.u32 2147483647, %v10243_v4 }
 0x315   : > { %v4689_v8 = vsub.f32 1.0, %v4688_v34  ;;  %v4582_v37 = vadd.f32 %v4581_v63, %v4511_v41  ;;  %v11687_v41 = vld [vmem:[#allocation9_spill] sm:$0xff] }
 0x316   : > { %v11688_v49 = vpack.c.bf16 %v11686_v43, %v11687_v41  ;;  %vm4712_vm13 = vcmp.eq.f32.partialorder %v4711_v33, 8.507059e+37  ;;  %v11695_v33 = vld [vmem:[#allocation5_spill] sm:$0xff] }
 0x317   : > { %v4690_v56 = vmul.f32 %v7615_v22, %v4689_v8  ;;  %v10262_v23 = vadd.f32 %v10199_v58, %v4582_v37  ;;  %v11691_v37 = vld [vmem:[#allocation8_spill] sm:$0xff] }
 0x318   : > { %7304 = vmatmul.msk.bf16.vlgmr.msrb.gmra.mxu2 %vm4934_vm0, %v11688_v49  ;;  %v11693_v32 = vpack.c.bf16 %v11691_v37, %v11692_v53 }
 0x319   : > { %v7617_v16 = vpop.eup %7616  ;;  %v4691_v21 = vadd.f32 %v7615_v22, %v4690_v56  ;;  %v7279_v36 = vmul.f32 -1.442695, %v10262_v23 }
 0x31a   : > { %v7619_v54 = vpop.eup %7618  ;;  %v4662_v0 = vadd.f32 1.0, %v7617_v16 }
 0x31b   : > { %v4695_v27 = vsel %vm4694_vm1, %v7615_v22, %v4691_v21  ;;  %v4703_v10 = vmul.f32 %v7619_v54, %v10243_v4  ;;  %7620 = vpow2.f32 %v7279_v36  ;;  %vm4708_vm6 = vweird.f32 %v7619_v54  ;;  %v4518_v22 = vpop.f32.mrf.mxu2 }
 0x31c   : > { %v4700_v59 = vsel %vm4697_vm14, %v4699_v18, %v4695_v27  ;;  %7622 = vrcp.f32 %v4662_v0  ;;  %v4583_v24 = vpop.f32.mrf.mxu1  ;;  %vm10286_vm3 = vmor %vm4707_vm15, %vm4708_vm6  ;;  %v4726_v40 = vand.u32 2147483647, %v4662_v0  ;;  %v4728_v44 = vand.u32 2147483648, %v4662_v0 }
 0x31d   : > { %v4868_v62 = vmul.f32 %v4700_v59, %v10215_v9  ;;  %v4704_v19 = vsub.f32 1.0, %v4703_v10  ;;  %v4584_v30 = vadd.f32 %v4583_v24, %v10194_v45  ;;  %v4713_v45 = vand.u32 2147483648, %v10243_v4 }
 0x31e   : > { %vm4722_vm10 = vweird.f32 %v4662_v0  ;;  %v4729_v61 = vor.u32 1.1754944e-38, %v4728_v44  ;;  %vm4727_vm2 = vcmp.eq.f32.partialorder %v4726_v40, 8.507059e+37 }
 0x31f   : > { %v4705_v48 = vmul.f32 %v7619_v54, %v4704_v19  ;;  %v10276_v26 = vadd.f32 %v10199_v58, %v4584_v30  ;;  %v4888_v31 = vpack.c.bf16 %v4868_v62, %v4867_v50  ;;  %v4714_v60 = vor.u32 1.1754944e-38, %v4713_v45 }
 0x321   : > { %v7621_v20 = vpop.eup %7620  ;;  %v7280_v35 = vmul.f32 -1.442695, %v10276_v26  ;;  %7327 = vmatmul.msk.bf16.vlgmr.msrb.gmra.mxu3 %vm4934_vm0, %v4888_v31  ;;  %v4706_v28 = vadd.f32 %v7619_v54, %v4705_v48 }
 0x322   : > { %v7623_v11 = vpop.eup %7622  ;;  %v10280_v42 = vadd.f32 1.0, %v7621_v20 }
 0x323   : > { %v4718_v9 = vmul.f32 %v7623_v11, %v4662_v0  ;;  %7624 = vpow2.f32 %v7280_v35  ;;  %v4710_v55 = vsel %vm10286_vm3, %v7619_v54, %v4706_v28  ;;  %vm4723_vm9 = vweird.f32 %v7623_v11  ;;  %v4521_v49 = vpop.f32.mrf.mxu2 }
 0x324   : > { %7626 = vrcp.f32 %v10280_v42  ;;  %v4586_v57 = vpop.f32.mrf.mxu1  ;;  %v4715_v47 = vsel %vm4712_vm13, %v4714_v60, %v4710_v55  ;;  %vm4724_vm7 = vmor %vm4722_vm10, %vm4723_vm9  ;;  %vm4737_vm4 = vweird.f32 %v10280_v42  ;;  %v4741_v24 = vand.u32 2147483647, %v10280_v42 }
 0x325   : > { %v4719_v17 = vsub.f32 1.0, %v4718_v9  ;;  %v4587_v46 = vadd.f32 %v4586_v57, %v4516_v1  ;;  %v4869_v7 = vmul.f32 %v4715_v47, %v10226_v29  ;;  %v11694_v57 = vld [vmem:[#allocation6_spill] sm:$0xff] }
 0x326   : > { %vm4742_vm11 = vcmp.eq.f32.partialorder %v4741_v24, 8.507059e+37 }
 0x327   : > { %v4720_v14 = vmul.f32 %v7623_v11, %v4719_v17  ;;  %v10293_v38 = vadd.f32 %v10199_v58, %v4587_v46  ;;  %v11696_v17 = vpack.c.bf16 %v11694_v57, %v11695_v33 }
 0x328   : > { %7305 = vmatmul.msk.bf16.gmra.mxu2 %vm4934_vm0, %v11693_v32 }
 0x329   : > { %v7625_v34 = vpop.eup %7624  ;;  %v4721_v4 = vadd.f32 %v7623_v11, %v4720_v14  ;;  %v7281_v25 = vmul.f32 -1.442695, %v10293_v38 }
 0x32a   : > { %v7627_v63 = vpop.eup %7626  ;;  %v4664_v8 = vadd.f32 1.0, %v7625_v34 }
 0x32b   : > { %v4725_v52 = vsel %vm4724_vm7, %v7623_v11, %v4721_v4  ;;  %v4733_v3 = vmul.f32 %v7627_v63, %v10280_v42  ;;  %7628 = vpow2.f32 %v7281_v25  ;;  %vm4738_vm12 = vweird.f32 %v7627_v63  ;;  %v4523_v40 = vpop.f32.mrf.mxu2 }
 0x32c   : > { %v10270_v2 = vpop.f32.mrf.mxu3  ;;  %v4730_v51 = vsel %vm4727_vm2, %v4729_v61, %v4725_v52  ;;  %7630 = vrcp.f32 %v4664_v8  ;;  %v4588_v56 = vpop.f32.mrf.mxu1  ;;  %vm4739_vm5 = vmor %vm4737_vm4, %vm4738_vm12  ;;  %v4756_v19 = vand.u32 2147483647, %v4664_v8  ;;  %v4758_v30 = vand.u32 2147483648, %v4664_v8 }
 0x32d   : > { %v4870_v16 = vmul.f32 %v4730_v51, %v10238_v6  ;;  %v4734_v21 = vsub.f32 1.0, %v4733_v3  ;;  %v4589_v36 = vadd.f32 %v4588_v56, %v4518_v22  ;;  %v4743_v6 = vand.u32 2147483648, %v10280_v42 }
 0x32e   : > { %vm4752_vm1 = vweird.f32 %v4664_v8  ;;  %vm4757_vm6 = vcmp.eq.f32.partialorder %v4756_v19, 8.507059e+37 }
 0x32f   : > { %v4735_v54 = vmul.f32 %v7627_v63, %v4734_v21  ;;  %v10304_v15 = vadd.f32 %v10199_v58, %v4589_v36  ;;  %v4889_v18 = vpack.c.bf16 %v4870_v16, %v4869_v7  ;;  %v4744_v20 = vor.u32 1.1754944e-38, %v4743_v6 }
 0x331   : > { %v7629_v0 = vpop.eup %7628  ;;  %v7282_v43 = vmul.f32 -1.442695, %v10304_v15  ;;  %7328 = vmatmul.msk.bf16.gmra.mxu3 %vm4934_vm0, %v4889_v18  ;;  %v4736_v10 = vadd.f32 %v7627_v63, %v4735_v54 }
 0x332   : > { %v7631_v41 = vpop.eup %7630  ;;  %v10308_v27 = vadd.f32 1.0, %v7629_v0 }
 0x333   : > { %v4748_v29 = vmul.f32 %v7631_v41, %v4664_v8  ;;  %7632 = vpow2.f32 %v7282_v43  ;;  %v4740_v1 = vsel %vm4739_vm5, %v7627_v63, %v4736_v10  ;;  %vm4753_vm8 = vweird.f32 %v7631_v41  ;;  %v11697_v10 = vld [vmem:[#allocation11_spill] sm:$0xff] }
 0x334   : > { %v4533_v5 = vpop.f32.mrf.mxu3  ;;  %7634 = vrcp.f32 %v10308_v27  ;;  %v4591_v59 = vpop.f32.mrf.mxu1  ;;  %v4745_v42 = vsel %vm4742_vm11, %v4744_v20, %v4740_v1  ;;  %vm4754_vm14 = vmor %vm4752_vm1, %vm4753_vm8  ;;  %vm4767_vm3 = vweird.f32 %v10308_v27  ;;  %v4771_v52 = vand.u32 2147483647, %v10308_v27 }
 0x335   : > { %v4749_v50 = vsub.f32 1.0, %v4748_v29  ;;  %v4592_v62 = vadd.f32 %v4591_v59, %v4521_v49  ;;  %v4759_v5 = vor.u32 1.1754944e-38, %v4758_v30  ;;  %v4871_v14 = vmul.f32 %v4745_v42, %v10262_v23  ;;  %v11698_v29 = vld [vmem:[#allocation12_spill] sm:$0xff] }
 0x336   : > { %vm4772_vm10 = vcmp.eq.f32.partialorder %v4771_v52, 8.507059e+37  ;;  %v11699_v6 = vpack.c.bf16 %v11697_v10, %v11698_v29 }
 0x337   : > { %v4750_v48 = vmul.f32 %v7631_v41, %v4749_v50  ;;  %v10315_v31 = vadd.f32 %v10199_v58, %v4592_v62 }
 0x338   : > { %7306 = vmatmul.msk.bf16.gmra.mxu2 %vm4934_vm0, %v11696_v17 }
 0x339   : > { %v7633_v35 = vpop.eup %7632  ;;  %v4751_v11 = vadd.f32 %v7631_v41, %v4750_v48  ;;  %v7283_v28 = vmul.f32 -1.442695, %v10315_v31 }
 0x33a   : > { %v7635_v9 = vpop.eup %7634  ;;  %v4666_v45 = vadd.f32 1.0, %v7633_v35 }
 0x33b   : > { %v4755_v46 = vsel %vm4754_vm14, %v7631_v41, %v4751_v11  ;;  %v4763_v13 = vmul.f32 %v7635_v9, %v10308_v27  ;;  %7636 = vpow2.f32 %v7283_v28  ;;  %vm4768_vm15 = vweird.f32 %v7635_v9 }
 0x33c   : > { %v4760_v44 = vsel %vm4757_vm6, %v4759_v5, %v4755_v46  ;;  %7638 = vrcp.f32 %v4666_v45  ;;  %v4593_v55 = vpop.f32.mrf.mxu1  ;;  %vm4769_vm9 = vmor %vm4767_vm3, %vm4768_vm15  ;;  %v4786_v56 = vand.u32 2147483647, %v4666_v45  ;;  %v4788_v7 = vand.u32 2147483648, %v4666_v45 }
 0x33d   : > { %v4872_v22 = vmul.f32 %v4760_v44, %v10276_v26  ;;  %v4764_v60 = vsub.f32 1.0, %v4763_v13  ;;  %v4594_v34 = vadd.f32 %v4593_v55, %v4523_v40  ;;  %v4773_v26 = vand.u32 2147483648, %v10308_v27 }
 0x33e   : > { %vm4782_vm7 = vweird.f32 %v4666_v45  ;;  %vm4787_vm12 = vcmp.eq.f32.partialorder %v4786_v56, 8.507059e+37 }
 0x33f   : > { %v4765_v4 = vmul.f32 %v7635_v9, %v4764_v60  ;;  %v10326_v25 = vadd.f32 %v10199_v58, %v4594_v34  ;;  %v4890_v63 = vpack.c.bf16 %v4872_v22, %v4871_v14  ;;  %v4774_v54 = vor.u32 1.1754944e-38, %v4773_v26 }
 0x341   : > { %v7637_v47 = vpop.eup %7636  ;;  %v7284_v61 = vmul.f32 -1.442695, %v10326_v25  ;;  %7329 = vmatmul.msk.bf16.gmra.mxu3 %vm4934_vm0, %v4890_v63  ;;  %v4766_v53 = vadd.f32 %v7635_v9, %v4765_v4 }
 0x342   : > { %v7639_v8 = vpop.eup %7638  ;;  %v10330_v37 = vadd.f32 1.0, %v7637_v47 }
 0x343   : > { %v4778_v23 = vmul.f32 %v7639_v8, %v4666_v45  ;;  %7640 = vpow2.f32 %v7284_v61  ;;  %v4770_v16 = vsel %vm4769_vm9, %v7635_v9, %v4766_v53  ;;  %vm4783_vm13 = vweird.f32 %v7639_v8  ;;  %v11700_v61 = vld [vmem:[#allocation15_spill] sm:$0xff] }
 0x344   : > { %7642 = vrcp.f32 %v10330_v37  ;;  %v4596_v32 = vpop.f32.mrf.mxu1  ;;  %v4775_v49 = vsel %vm4772_vm10, %v4774_v54, %v4770_v16  ;;  %vm4784_vm2 = vmor %vm4782_vm7, %vm4783_vm13  ;;  %vm4797_vm5 = vweird.f32 %v10330_v37  ;;  %v4801_v57 = vand.u32 2147483647, %v10330_v37 }
 0x345   : > { %v4779_v3 = vsub.f32 1.0, %v4778_v23  ;;  %v4597_v51 = vadd.f32 %v4596_v32, %v10228_v12  ;;  %v4789_v12 = vor.u32 1.1754944e-38, %v4788_v7  ;;  %v4873_v19 = vmul.f32 %v4775_v49, %v10293_v38 }
 0x346   : > { %vm4802_vm1 = vcmp.eq.f32.partialorder %v4801_v57, 8.507059e+37 }
 0x347   : > { %v4780_v21 = vmul.f32 %v7639_v8, %v4779_v3  ;;  %v10338_v36 = vadd.f32 %v10199_v58, %v4597_v51 }
 0x348   : > { %7307 = vmatmul.msk.bf16.gmra.mxu2 %vm4934_vm0, %v11699_v6 }
 0x349   : > { %v7641_v18 = vpop.eup %7640  ;;  %v4781_v0 = vadd.f32 %v7639_v8, %v4780_v21  ;;  %v7285_v43 = vmul.f32 -1.442695, %v10338_v36 }
 0x34a   : > { %v7643_v41 = vpop.eup %7642  ;;  %v4668_v27 = vadd.f32 1.0, %v7641_v18 }
 0x34b   : > { %v4785_v59 = vsel %vm4784_vm2, %v7639_v8, %v4781_v0  ;;  %v4793_v24 = vmul.f32 %v7643_v41, %v10330_v37  ;;  %7644 = vpow2.f32 %v7285_v43  ;;  %vm4798_vm4 = vweird.f32 %v7643_v41  ;;  %v11701_v8 = vld [vmem:[#allocation13_spill] sm:$0xff] }
 0x34c   : > { %v4790_v50 = vsel %vm4787_vm12, %v4789_v12, %v4785_v59  ;;  %7646 = vrcp.f32 %v4668_v27  ;;  %v4598_v62 = vpop.f32.mrf.mxu1  ;;  %vm4799_vm8 = vmor %vm4797_vm5, %vm4798_vm4  ;;  %v4816_v46 = vand.u32 2147483647, %v4668_v27  ;;  %v4818_v13 = vand.u32 2147483648, %v4668_v27 }
 0x34d   : > { %v4874_v30 = vmul.f32 %v4790_v50, %v10304_v15  ;;  %v4794_v1 = vsub.f32 1.0, %v4793_v24  ;;  %v4599_v48 = vadd.f32 %v4598_v62, %v10241_v39  ;;  %v4803_v15 = vand.u32 2147483648, %v10330_v37  ;;  %v11703_v24 = vld [vmem:[#allocation16_spill] sm:$0xff]  ;;  %v11704_v50 = vld [vmem:[#allocation14_spill] sm:$0xff] }
 0x34e   : > { %vm4812_vm14 = vweird.f32 %v4668_v27  ;;  %v11702_v37 = vpack.c.bf16 %v11700_v61, %v11701_v8  ;;  %vm4817_vm15 = vcmp.eq.f32.partialorder %v4816_v46, 8.507059e+37  ;;  %v11705_v62 = vpack.c.bf16 %v11703_v24, %v11704_v50  ;;  %v10383_v46 = vld [vmem:[%s11321_s1] ss:$0 sm:$0xff] }
 0x34f   : > { %v4795_v20 = vmul.f32 %v7643_v41, %v4794_v1  ;;  %v10350_v35 = vadd.f32 %v10199_v58, %v4599_v48  ;;  %v4891_v11 = vpack.c.bf16 %v4874_v30, %v4873_v19  ;;  %v4804_v14 = vor.u32 1.1754944e-38, %v4803_v15  ;;  %v7870_v15 = vld [vmem:[%s8050_s25 + $0x60] sm:$0xff]  ;;  %s324_s25 = sand.u32 1, %s7925_s10  }
 0x350   : > { %s7541_s22 = smul.u32 104, %s324_s25  ;;  %s7091_s21 = scalar_lea.sflag [#allocation3], %s324_s25 }
 0x351   : > { %v7645_v28 = vpop.eup %7644  ;;  %v7286_v9 = vmul.f32 -1.442695, %v10350_v35  ;;  %7330 = vmatmul.msk.bf16.gmra.mxu3 %vm4934_vm0, %v4891_v11  ;;  %v4796_v45 = vadd.f32 %v7643_v41, %v4795_v20 }
 0x352   : > { %v7647_v42 = vpop.eup %7646  ;;  %v4669_v5 = vadd.f32 1.0, %v7645_v28  ;;  %s11248_s26 = scalar_lea.vmem [#allocation2], %s7541_s22  ;;  %s7885_s22 = sshra.s32 %s7106_s17, 4  ;;  %s7886_s22 = int_to_ptr.hbm [resolvable:$true] %s7885_s22 }
 0x353   : > { %v4808_v38 = vmul.f32 %v7647_v42, %v4668_v27  ;;  %7648 = vpow2.f32 %v7286_v9  ;;  %v4800_v40 = vsel %vm4799_vm8, %v7643_v41, %v4796_v45  ;;  %vm4813_vm11 = vweird.f32 %v7647_v42  ;;  %s7103_s16 = sshll.u32 %s11248_s26, 4  ;;  %s7887_s23 = scalar_lea.hbm %s7886_s22, 104  ;;  %s7104_s16 = int_to_ptr.vmem [resolvable:$true] %s7103_s16 }
 0x354   : > { %7650 = vrcp.f32 %v4669_v5  ;;  %v4601_v39 = vpop.f32.mrf.mxu1  ;;  %v4805_v63 = vsel %vm4802_vm1, %v4804_v14, %v4800_v40  ;;  %vm4814_vm6 = vmor %vm4812_vm14, %vm4813_vm11  ;;  %v4833_v0 = vand.u32 2147483648, %v4669_v5  ;;  %vm4827_vm9 = vweird.f32 %v4669_v5  ;;  %p7888_p11 = scmp.ne.s32.totalorder %s7886_s22, %s7887_s23  ;;  %p7892_p0 = scmp.lt.s32.totalorder %s7886_s22, %s11329_s9 }
 0x355   : > { %v4809_v33 = vsub.f32 1.0, %v4808_v38  ;;  %v4602_v17 = vadd.f32 %v4601_v39, %v10270_v2  ;;  %v4819_v2 = vor.u32 1.1754944e-38, %v4818_v13  ;;  %v4875_v32 = vmul.f32 %v4805_v63, %v10315_v31  ;;  %p7893_p1 = scmp.lt.s32.totalorder %s7891_s27, %s7887_s23 }
 0x356   : > { %v4831_v43 = vand.u32 2147483647, %v4669_v5  ;;  %v4834_v27 = vor.u32 1.1754944e-38, %v4833_v0  ;;  %v4909_v39 = vpack.c.bf16 %v7870_v15, %v7870_v15  ;;  %vm5104_vm14 = vcmask 261120   ;;  %p7889_p12 = pnand %p7888_p11, %p8033_p5 }
 0x357   : > { %v4810_v44 = vmul.f32 %v7647_v42, %v4809_v33  ;;  %v10359_v55 = vadd.f32 %v10199_v58, %v4602_v17  ;;  %p7894_p2 = por %p7893_p1, %p7892_p0 }
 0x358   : > { %7308 = vmatmul.msk.bf16.gmra.mxu2 %vm4934_vm0, %v11702_v37  ;;  %vm4832_vm7 = vcmp.eq.f32.partialorder %v4831_v43, 8.507059e+37  ;;  %p7890_p13 = pneg %p7889_p12 }
 0x359   : > { %v7649_v22 = vpop.eup %7648  ;;  %v4811_v60 = vadd.f32 %v7647_v42, %v4810_v44  ;;  %v7287_v34 = vmul.f32 -1.442695, %v10359_v55 }
 0x35a   : > { %v7651_v4 = vpop.eup %7650  ;;  %v4670_v47 = vadd.f32 1.0, %v7649_v22  ;;  %p7895_p3 = pnand %p7894_p2, %p7890_p13 }
 0x35b   : > { %v4815_v53 = vsel %vm4814_vm6, %v7647_v42, %v4811_v60  ;;  %v4823_v58 = vmul.f32 %v7651_v4, %v4669_v5  ;;  %7652 = vpow2.f32 %v7287_v34  ;;  %vm4828_vm3 = vweird.f32 %v7651_v4 }
 0x35c   : > { %v4820_v23 = vsel %vm4817_vm15, %v4819_v2, %v4815_v53  ;;  %7654 = vrcp.f32 %v4670_v47  ;;  %v4603_v26 = vpop.f32.mrf.mxu1  ;;  %vm4829_vm13 = vmor %vm4827_vm9, %vm4828_vm3  ;;  %v4848_v31 = vand.u32 2147483648, %v4670_v47  ;;  %v4846_v12 = vand.u32 2147483647, %v4670_v47 }
 0x35d   : > { %v4876_v52 = vmul.f32 %v4820_v23, %v10326_v25  ;;  %v4824_v3 = vsub.f32 1.0, %v4823_v58  ;;  %vm4842_vm2 = vweird.f32 %v4670_v47 }
 0x35e   : > { %v4849_v59 = vor.u32 1.1754944e-38, %v4848_v31  ;;  %vm4847_vm4 = vcmp.eq.f32.partialorder %v4846_v12, 8.507059e+37 }
 0x35f   : > { %v4825_v51 = vmul.f32 %v7651_v4, %v4824_v3  ;;  %v4892_v56 = vpack.c.bf16 %v4876_v52, %v4875_v32 }
 0x361   : > { %v7653_v7 = vpop.eup %7652  ;;  %7331 = vmatmul.msk.bf16.gmra.mxu3 %vm4934_vm0, %v4892_v56  ;;  %v4826_v54 = vadd.f32 %v7651_v4, %v4825_v51 }
 0x362   : > { %v7655_v16 = vpop.eup %7654  ;;  %v4671_v21 = vadd.f32 1.0, %v7653_v7 }
 0x363   : > { %v4838_v18 = vmul.f32 %v7655_v16, %v4670_v47  ;;  %v4830_v49 = vsel %vm4829_vm13, %v7651_v4, %v4826_v54  ;;  %vm4843_vm10 = vweird.f32 %v7655_v16 }
 0x364   : > { %7656 = vrcp.f32 %v4671_v21  ;;  %v4835_v6 = vsel %vm4832_vm7, %v4834_v27, %v4830_v49  ;;  %vm4844_vm12 = vmor %vm4842_vm2, %vm4843_vm10  ;;  %v4863_v5 = vand.u32 2147483648, %v4671_v21  ;;  %vm4857_vm8 = vweird.f32 %v4671_v21 }
 0x365   : > { %v4839_v41 = vsub.f32 1.0, %v4838_v18  ;;  %v4877_v48 = vmul.f32 %v4835_v6, %v10338_v36  ;;  %v4861_v45 = vand.u32 2147483647, %v4671_v21 }
 0x366   : > { %v4864_v57 = vor.u32 1.1754944e-38, %v4863_v5 }
 0x367   : > { %v4840_v25 = vmul.f32 %v7655_v16, %v4839_v41  ;;  %vm4862_vm1 = vcmp.eq.f32.partialorder %v4861_v45, 8.507059e+37 }
 0x368   : > { %7309 = vmatmul.msk.bf16.gmra.mxu2 %vm4934_vm0, %v11705_v62 }
 0x369   : > { %v4841_v10 = vadd.f32 %v7655_v16, %v4840_v25 }
 0x36a   : > { %v7657_v29 = vpop.eup %7656 }
 0x36b   : > { %v4845_v19 = vsel %vm4844_vm12, %v7655_v16, %v4841_v10  ;;  %v4853_v30 = vmul.f32 %v7657_v29, %v4671_v21  ;;  %vm4858_vm5 = vweird.f32 %v7657_v29 }
 0x36c   : > { %v4850_v1 = vsel %vm4847_vm4, %v4849_v59, %v4845_v19  ;;  %vm4859_vm11 = vmor %vm4857_vm8, %vm4858_vm5 }
 0x36d   : > { %v4878_v20 = vmul.f32 %v4850_v1, %v10350_v35  ;;  %v4854_v11 = vsub.f32 1.0, %v4853_v30 }
 0x36f   : > { %v4893_v28 = vpack.c.bf16 %v4878_v20, %v4877_v48  ;;  %v4855_v9 = vmul.f32 %v7657_v29, %v4854_v11 }
 0x371   : > { %7332 = vmatmul.msk.bf16.gmra.mxu3 %vm4934_vm0, %v4893_v28  ;;  %v4856_v42 = vadd.f32 %v7657_v29, %v4855_v9  ;;  %v7942_v28 = vmov 32.0  }
 0x372   : > { %7658 = vrcp.f32 %v7942_v28 }
 0x373   : > { %v4860_v38 = vsel %vm4859_vm11, %v7657_v29, %v4856_v42 }
 0x374   : > { %v4865_v33 = vsel %vm4862_vm1, %v4864_v57, %v4860_v38 }
 0x375   : > { %v4879_v36 = vmul.f32 %v4865_v33, %v10359_v55 }
 0x377   : > { %v4894_v35 = vpack.c.bf16 %v4879_v36, %v4879_v36 }
 0x378   : > { %7310 = vmatmul.msk.bf16.gmra.mxu2 %vm4934_vm0, %v4909_v39  ;;  %v7659_v45 = vpop.eup %7658 }
 0x379   : > { %v5145_v38 = vmul.f32 32.0, %v7659_v45 }
 0x37b   : > { %v5146_v39 = vsub.f32 1.0, %v5145_v38 }
 0x37d   : > { %v5147_v57 = vmul.f32 %v7659_v45, %v5146_v39 }
 0x37f   : > { %v5148_v33 = vadd.f32 %v7659_v45, %v5147_v57 }
 0x381   : > { %7333 = vmatmul.msk.bf16.gmra.mxu3 %vm4934_vm0, %v4894_v35  ;;  %vm5149_vm0 = vweird.f32 %v7659_v45 }
 0x382   : > { %v10422_v36 = vsel %vm5149_vm0, %v7659_v45, %v5148_v33  ;;  %v7516_v45 = vld [vmem:[%s11325_s5 + $0x8] sm:$0xff] }
 0x383   : > { %5480 = vmatpush.bf16.msrb.mxu0 %v7516_v45 }
 0x39b   : > { %v4965_v17 = vpop.f32.mrf.mxu2 }
 0x3a3   : > { %v4967_v40 = vpop.f32.mrf.mxu2 }
 0x3a4   : > { %v5053_v13 = vpop.f32.mrf.mxu3 }
 0x3a5   : > { %v5054_v44 = vadd.f32 %v5053_v13, %v4965_v17 }
 0x3a7   : > { %v10386_v14 = vadd.f32 %v10383_v46, %v5054_v44 }
 0x3a9   : > { %v5105_v22 = vsel %vm5104_vm14, %v10386_v14, 0.0 }
 0x3aa   : > { %5106 = vadd.xlane.f32.xlu1 %v5105_v22 }
 0x3ab   : > { %v4970_v60 = vpop.f32.mrf.mxu2 }
 0x3ac   : > { %v5055_v55 = vpop.f32.mrf.mxu3 }
 0x3ad   : > { %v5056_v34 = vadd.f32 %v5055_v55, %v4967_v40 }
 0x3af   : > { %v10391_v4 = vadd.f32 %v10383_v46, %v5056_v34 }
 0x3b1   : > { %v5108_v63 = vsel %vm5104_vm14, %v10391_v4, 0.0 }
 0x3b2   : > { %5109 = vadd.xlane.f32.xlu2 %v5108_v63 }
 0x3b3   : > { %v4972_v47 = vpop.f32.mrf.mxu2 }
 0x3b4   : > { %v5058_v2 = vpop.f32.mrf.mxu3 }
 0x3b5   : > { %v5059_v61 = vadd.f32 %v5058_v2, %v4970_v60 }
 0x3b7   : > { %v10396_v8 = vadd.f32 %v10383_v46, %v5059_v61 }
 0x3b9   : > { %v5111_v37 = vsel %vm5104_vm14, %v10396_v8, 0.0 }
 0x3ba   : > { %5112 = vadd.xlane.f32.xlu0 %v5111_v37 }
 0x3bb   : > { %v4975_v23 = vpop.f32.mrf.mxu2 }
 0x3bc   : > { %v5060_v53 = vpop.f32.mrf.mxu3 }
 0x3bd   : > { %v5061_v58 = vadd.f32 %v5060_v53, %v4972_v47 }
 0x3bf   : > { %v10401_v26 = vadd.f32 %v10383_v46, %v5061_v58 }
 0x3c1   : > { %v5114_v32 = vsel %vm5104_vm14, %v10401_v26, 0.0 }
 0x3c2   : > { %5115 = vadd.xlane.f32.xlu2 %v5114_v32 }
 0x3c3   : > { %v4977_v51 = vpop.f32.mrf.mxu2 }
 0x3c4   : > { %v5063_v52 = vpop.f32.mrf.mxu3 }
 0x3c5   : > { %v5064_v3 = vadd.f32 %v5063_v52, %v4975_v23 }
 0x3c7   : > { %v10406_v56 = vadd.f32 %v10383_v46, %v5064_v3 }
 0x3c9   : > { %v5117_v7 = vsel %vm5104_vm14, %v10406_v56, 0.0 }
 0x3ca   : > { %5118 = vadd.xlane.f32.xlu1 %v5117_v7 }
 0x3cb   : > { %v4980_v54 = vpop.f32.mrf.mxu2 }
 0x3cc   : > { %v5065_v16 = vpop.f32.mrf.mxu3 }
 0x3cd   : > { %v5066_v21 = vadd.f32 %v5065_v16, %v4977_v51 }
 0x3cf   : > { %v10411_v18 = vadd.f32 %v10383_v46, %v5066_v21 }
 0x3d1   : > { %v5120_v0 = vsel %vm5104_vm14, %v10411_v18, 0.0 }
 0x3d2   : > { %5121 = vadd.xlane.f32.xlu2 %v5120_v0 }
 0x3d3   : > { %v4982_v31 = vpop.f32.mrf.mxu2 }
 0x3d4   : > { %v5068_v43 = vpop.f32.mrf.mxu3 }
 0x3d5   : > { %v5069_v41 = vadd.f32 %v5068_v43, %v4980_v54 }
 0x3d7   : > { %v10416_v49 = vadd.f32 %v10383_v46, %v5069_v41 }
 0x3d9   : > { %v5123_v25 = vsel %vm5104_vm14, %v10416_v49, 0.0 }
 0x3da   : > { %5124 = vadd.xlane.f32.xlu2 %v5123_v25 }
 0x3db   : > { %v4985_v10 = vpop.f32.mrf.mxu2 }
 0x3dc   : > { %v5070_v12 = vpop.f32.mrf.mxu3 }
 0x3dd   : > { %v5071_v27 = vadd.f32 %v5070_v12, %v4982_v31 }
 0x3df   : > { %v10433_v60 = vadd.f32 %v10383_v46, %v5071_v27 }
 0x3e1   : > { %v5126_v47 = vsel %vm5104_vm14, %v10433_v60, 0.0 }
 0x3e3   : > { %v4987_v59 = vpop.f32.mrf.mxu2 }
 0x3e4   : > { %v5073_v29 = vpop.f32.mrf.mxu3 }
 0x3e5   : > { %v5074_v6 = vadd.f32 %v5073_v29, %v4985_v10 }
 0x3e7   : > { %v10445_v53 = vadd.f32 %v10383_v46, %v5074_v6 }
 0x3e9   : > { %v5129_v52 = vsel %vm5104_vm14, %v10445_v53, 0.0 }
 0x3eb   : > { %v4990_v62 = vpop.f32.mrf.mxu2 }
 0x3ec   : > { %v5075_v24 = vpop.f32.mrf.mxu3 }
 0x3ed   : > { %v5076_v50 = vadd.f32 %v5075_v24, %v4987_v59 }
 0x3ef   : > { %v10457_v7 = vadd.f32 %v10383_v46, %v5076_v50 }
 0x3f1   : > { %v5132_v0 = vsel %vm5104_vm14, %v10457_v7, 0.0 }
 0x3f3   : > { %v4992_v1 = vpop.f32.mrf.mxu2 }
 0x3f4   : > { %v5078_v19 = vpop.f32.mrf.mxu3 }
 0x3f5   : > { %v5079_v30 = vadd.f32 %v5078_v19, %v4990_v62 }
 0x3f7   : > { %v10469_v31 = vadd.f32 %v10383_v46, %v5079_v30 }
 0x3f9   : > { %v5135_v10 = vsel %vm5104_vm14, %v10469_v31, 0.0 }
 0x3fb   : > { %v4995_v11 = vpop.f32.mrf.mxu2 }
 0x3fc   : > { %v5080_v48 = vpop.f32.mrf.mxu3 }
 0x3fd   : > { %v5081_v20 = vadd.f32 %v5080_v48, %v4992_v1 }
 0x3ff   : > { %v10481_v59 = vadd.f32 %v10383_v46, %v5081_v20 }
 0x401   : > { %v5138_v19 = vsel %vm5104_vm14, %v10481_v59, 0.0 }
 0x403   : > { %v4997_v5 = vpop.f32.mrf.mxu2 }
 0x404   : > { %v5083_v9 = vpop.f32.mrf.mxu3 }
 0x405   : > { %v10420_v42 = vadd.f32 %v5083_v9, %v4995_v11 }
 0x40c   : > { %v5085_v15 = vpop.f32.mrf.mxu3 }
 0x41d   : > { %v5107_v35 = vpop.xlane.xlu1 %5106 }
 0x41e   : > { %v5151_v17 = vmul.f32 %v10422_v36, %v5107_v35 }
 0x420   : > { %v10426_v13 = vsub.f32 %v10386_v14, %v5151_v17 }
 0x422   : > { %v5177_v40 = vmul.f32 %v10426_v13, %v10426_v13 }
 0x424   : > { %v5190_v44 = vsel %vm5104_vm14, %v5177_v40, 0.0 }
 0x425   : > { %v5110_v22 = vpop.xlane.xlu2 %5109  ;;  %5191 = vadd.xlane.f32.xlu0 %v5190_v44 }
 0x426   : > { %v5152_v55 = vmul.f32 %v10422_v36, %v5110_v22 }
 0x428   : > { %v10436_v34 = vsub.f32 %v10391_v4, %v5152_v55 }
 0x42a   : > { %v5178_v63 = vmul.f32 %v10436_v34, %v10436_v34 }
 0x42c   : > { %v5193_v2 = vsel %vm5104_vm14, %v5178_v63, 0.0  ;;  %v7515_v63 = vld [vmem:[%s11325_s5] sm:$0xff] }
 0x42d   : > { %v5113_v61 = vpop.xlane.xlu0 %5112  ;;  %5194 = vadd.xlane.f32.xlu1 %v5193_v2  ;;  %5127 = vadd.xlane.f32.xlu0 %v5126_v47 }
 0x42e   : > { %v5153_v37 = vmul.f32 %v10422_v36, %v5113_v61  ;;  %5481 = vmatpush.bf16.msrb.mxu0 %v7515_v63 }
 0x430   : > { %v10448_v58 = vsub.f32 %v10396_v8, %v5153_v37 }
 0x432   : > { %v5179_v23 = vmul.f32 %v10448_v58, %v10448_v58 }
 0x434   : > { %v5196_v32 = vsel %vm5104_vm14, %v5179_v23, 0.0 }
 0x435   : > { %v5116_v3 = vpop.xlane.xlu2 %5115  ;;  %5197 = vadd.xlane.f32.xlu1 %v5196_v32  ;;  %5130 = vadd.xlane.f32.xlu0 %v5129_v52 }
 0x436   : > { %v5154_v51 = vmul.f32 %v10422_v36, %v5116_v3 }
 0x438   : > { %v10460_v16 = vsub.f32 %v10401_v26, %v5154_v51 }
 0x43a   : > { %v5180_v21 = vmul.f32 %v10460_v16, %v10460_v16 }
 0x43c   : > { %v5199_v54 = vsel %vm5104_vm14, %v5180_v21, 0.0 }
 0x43d   : > { %v5119_v43 = vpop.xlane.xlu1 %5118  ;;  %5200 = vadd.xlane.f32.xlu2 %v5199_v54  ;;  %5133 = vadd.xlane.f32.xlu1 %v5132_v0 }
 0x43e   : > { %v5155_v41 = vmul.f32 %v10422_v36, %v5119_v43 }
 0x440   : > { %v10472_v25 = vsub.f32 %v10406_v56, %v5155_v41 }
 0x442   : > { %v5181_v12 = vmul.f32 %v10472_v25, %v10472_v25 }
 0x444   : > { %v5202_v27 = vsel %vm5104_vm14, %v5181_v12, 0.0 }
 0x445   : > { %v5122_v29 = vpop.xlane.xlu2 %5121  ;;  %5203 = vadd.xlane.f32.xlu2 %v5202_v27  ;;  %5136 = vadd.xlane.f32.xlu1 %v5135_v10 }
 0x446   : > { %v5156_v6 = vmul.f32 %v10422_v36, %v5122_v29 }
 0x448   : > { %v10484_v24 = vsub.f32 %v10411_v18, %v5156_v6 }
 0x44a   : > { %v5182_v50 = vmul.f32 %v10484_v24, %v10484_v24 }
 0x44c   : > { %v5205_v62 = vsel %vm5104_vm14, %v5182_v50, 0.0 }
 0x44d   : > { %v5125_v30 = vpop.xlane.xlu2 %5124  ;;  %5206 = vadd.xlane.f32.xlu0 %v5205_v62  ;;  %5139 = vadd.xlane.f32.xlu2 %v5138_v19 }
 0x44e   : > { %v5157_v1 = vmul.f32 %v10422_v36, %v5125_v30 }
 0x450   : > { %v10493_v48 = vsub.f32 %v10416_v49, %v5157_v1 }
 0x452   : > { %v5183_v20 = vmul.f32 %v10493_v48, %v10493_v48 }
 0x454   : > { %v5208_v11 = vsel %vm5104_vm14, %v5183_v20, 0.0 }
 0x455   : > { %5209 = vadd.xlane.f32.xlu0 %v5208_v11  ;;  %v10530_v11 = vld [vmem:[%s11328_s8 + $0x2] ss:$0 sm:$0xff] }
 0x498   : > { %v5192_v28 = vpop.xlane.xlu0 %5191 }
 0x499   : > { %v5229_v9 = vmul.f32 %v5192_v28, %v10422_v36 }
 0x49b   : > { %v5242_v5 = vadd.f32 1e-06, %v5229_v9 }
 0x49d   : > { %7660 = vrsqrt.f32 %v5242_v5  ;;  %vm5261_vm15 = vweird.f32 %v5242_v5 }
 0x4a0   : > { %v5195_v38 = vpop.xlane.xlu1 %5194  ;;  %v5128_v15 = vpop.xlane.xlu0 %5127 }
 0x4a1   : > { %v5230_v39 = vmul.f32 %v5195_v38, %v10422_v36  ;;  %v5158_v57 = vmul.f32 %v10422_v36, %v5128_v15 }
 0x4a3   : > { %v7661_v33 = vpop.eup %7660  ;;  %v5243_v35 = vadd.f32 1e-06, %v5230_v39  ;;  %v10505_v17 = vsub.f32 %v10433_v60, %v5158_v57  ;;  %v10540_v57 = vld [vmem:[%s11328_s8 + $0x3] ss:$0 sm:$0xff] }
 0x4a4   : > { %v5256_v40 = vmul.f32 %v7661_v33, %v5242_v5  ;;  %vm5262_vm6 = vweird.f32 %v7661_v33 }
 0x4a5   : > { %7662 = vrsqrt.f32 %v5243_v35  ;;  %v5184_v44 = vmul.f32 %v10505_v17, %v10505_v17  ;;  %vm5263_vm3 = vmor %vm5261_vm15, %vm5262_vm6  ;;  %vm5271_vm13 = vweird.f32 %v5243_v35 }
 0x4a6   : > { %v5257_v22 = vmul.f32 %v7661_v33, %v5256_v40 }
 0x4a7   : > { %v5211_v55 = vsel %vm5104_vm14, %v5184_v44, 0.0 }
 0x4a8   : > { %v5258_v2 = vmul.f32 0.5, %v5257_v22  ;;  %v5198_v47 = vpop.xlane.xlu1 %5197  ;;  %v5131_v61 = vpop.xlane.xlu0 %5130  ;;  %5212 = vadd.xlane.f32.xlu1 %v5211_v55 }
 0x4a9   : > { %v5231_v37 = vmul.f32 %v5198_v47, %v10422_v36  ;;  %v5159_v23 = vmul.f32 %v10422_v36, %v5131_v61 }
 0x4aa   : > { %v5259_v32 = vsub.f32 1.5, %v5258_v2 }
 0x4ab   : > { %v7663_v52 = vpop.eup %7662  ;;  %v5244_v3 = vadd.f32 1e-06, %v5231_v37  ;;  %v10516_v51 = vsub.f32 %v10445_v53, %v5159_v23 }
 0x4ac   : > { %v5260_v21 = vmul.f32 %v7661_v33, %v5259_v32  ;;  %v5266_v54 = vmul.f32 %v7663_v52, %v5243_v35  ;;  %vm5272_vm9 = vweird.f32 %v7663_v52 }
 0x4ad   : > { %7664 = vrsqrt.f32 %v5244_v3  ;;  %v5185_v0 = vmul.f32 %v10516_v51, %v10516_v51  ;;  %vm5273_vm10 = vmor %vm5271_vm13, %vm5272_vm9  ;;  %vm5281_vm2 = vweird.f32 %v5244_v3 }
 0x4ae   : > { %v5267_v43 = vmul.f32 %v7663_v52, %v5266_v54  ;;  %v5264_v12 = vsel %vm5263_vm3, %v7661_v33, %v5260_v21 }
 0x4af   : > { %v5214_v41 = vsel %vm5104_vm14, %v5185_v0, 0.0  ;;  %v5385_v30 = vmul.f32 %v5264_v12, %v10426_v13 }
 0x4b0   : > { %v5268_v27 = vmul.f32 0.5, %v5267_v43  ;;  %v5201_v10 = vpop.xlane.xlu2 %5200  ;;  %v5134_v29 = vpop.xlane.xlu1 %5133  ;;  %5215 = vadd.xlane.f32.xlu2 %v5214_v41  ;;  %v7524_v41 = vld [vmem:[%s11326_s6 + $0x38] sm:$0xff] }
 0x4b1   : > { %v5232_v6 = vmul.f32 %v5201_v10, %v10422_v36  ;;  %v5160_v50 = vmul.f32 %v10422_v36, %v5134_v29  ;;  %v5400_v39 = vmul.f32 %v10530_v11, %v5385_v30  ;;  %5848 = vmatpush.bf16.msra.mxu1 %v7524_v41 }
 0x4b2   : > { %v5269_v62 = vsub.f32 1.5, %v5268_v27 }
 0x4b3   : > { %v7665_v19 = vpop.eup %7664  ;;  %v5245_v1 = vadd.f32 1e-06, %v5232_v6  ;;  %v10525_v20 = vsub.f32 %v10457_v7, %v5160_v50  ;;  %v5415_v37 = vadd.f32 %v10540_v57, %v5400_v39  ;;  %v7523_v50 = vld [vmem:[%s11326_s6 + $0x30] sm:$0xff] }
 0x4b4   : > { %v5270_v28 = vmul.f32 %v7663_v52, %v5269_v62  ;;  %v5276_v9 = vmul.f32 %v7665_v19, %v5244_v3  ;;  %vm5282_vm7 = vweird.f32 %v7665_v19 }
 0x4b5   : > { %7666 = vrsqrt.f32 %v5245_v1  ;;  %v5186_v5 = vmul.f32 %v10525_v20, %v10525_v20  ;;  %vm10556_vm12 = vmor %vm5281_vm2, %vm5282_vm7  ;;  %vm5291_vm5 = vweird.f32 %v5245_v1  ;;  %5849 = vmatpush.bf16.msra.mxu1 %v7523_v50 }
 0x4b6   : > { %v5274_v45 = vsel %vm5273_vm10, %v7663_v52, %v5270_v28  ;;  %v5277_v38 = vmul.f32 %v7665_v19, %v5276_v9 }
 0x4b7   : > { %v5386_v13 = vmul.f32 %v5274_v45, %v10436_v34  ;;  %v5217_v15 = vsel %vm5104_vm14, %v5186_v5, 0.0  ;;  %v10547_v34 = vadd.f32 %v10383_v46, %v10420_v42 }
 0x4b8   : > { %v5278_v33 = vmul.f32 0.5, %v5277_v38  ;;  %v5204_v35 = vpop.xlane.xlu2 %5203  ;;  %5218 = vadd.xlane.f32.xlu0 %v5217_v15  ;;  %v5137_v40 = vpop.xlane.xlu1 %5136 }
 0x4b9   : > { %v5233_v44 = vmul.f32 %v5204_v35, %v10422_v36  ;;  %v5161_v22 = vmul.f32 %v10422_v36, %v5137_v40  ;;  %v5401_v55 = vmul.f32 %v10530_v11, %v5386_v13  ;;  %v5141_v43 = vsel %vm5104_vm14, %v10547_v34, 0.0  ;;  %v7522_v13 = vld [vmem:[%s11326_s6 + $0x28] sm:$0xff] }
 0x4ba   : > { %v5279_v63 = vsub.f32 1.5, %v5278_v33  ;;  %5850 = vmatpush.bf16.msra.mxu1 %v7522_v13 }
 0x4bb   : > { %v7667_v2 = vpop.eup %7666  ;;  %v5246_v47 = vadd.f32 1e-06, %v5233_v44  ;;  %v10550_v61 = vsub.f32 %v10469_v31, %v5161_v22  ;;  %v5416_v23 = vadd.f32 %v10540_v57, %v5401_v55 }
 0x4bc   : > { %v5280_v32 = vmul.f32 %v7665_v19, %v5279_v63  ;;  %v5286_v52 = vmul.f32 %v7667_v2, %v5245_v1  ;;  %vm5292_vm4 = vweird.f32 %v7667_v2 }
 0x4bd   : > { %7668 = vrsqrt.f32 %v5246_v47  ;;  %v5432_v21 = vpack.c.bf16 %v5416_v23, %v5415_v37  ;;  %v5187_v54 = vmul.f32 %v10550_v61, %v10550_v61  ;;  %vm5293_vm8 = vmor %vm5291_vm5, %vm5292_vm4  ;;  %vm5301_vm1 = vweird.f32 %v5246_v47 }
 0x4be   : > { %v5287_v46 = vmul.f32 %v7667_v2, %v5286_v52  ;;  %v5284_v12 = vsel %vm10556_vm12, %v7665_v19, %v5280_v32 }
 0x4bf   : > { %7342 = vmatmul.msk.bf16.vlgmr.msrb.gmra.mxu0 %vm5104_vm14, %v5432_v21  ;;  %v5220_v0 = vsel %vm5104_vm14, %v5187_v54, 0.0  ;;  %v5387_v28 = vmul.f32 %v5284_v12, %v10448_v58 }
 0x4c0   : > { %v5288_v3 = vmul.f32 0.5, %v5287_v46  ;;  %v5207_v27 = vpop.xlane.xlu0 %5206  ;;  %5221 = vadd.xlane.f32.xlu1 %v5220_v0  ;;  %v5140_v10 = vpop.xlane.xlu2 %5139  ;;  %5142 = vadd.xlane.f32.xlu0 %v5141_v43 }
 0x4c1   : > { %v5234_v29 = vmul.f32 %v5207_v27, %v10422_v36  ;;  %v5162_v6 = vmul.f32 %v10422_v36, %v5140_v10  ;;  %v5402_v35 = vmul.f32 %v10530_v11, %v5387_v28 }
 0x4c2   : > { %v5289_v62 = vsub.f32 1.5, %v5288_v3 }
 0x4c3   : > { %v7669_v30 = vpop.eup %7668  ;;  %v5247_v19 = vadd.f32 1e-06, %v5234_v29  ;;  %v10576_v9 = vsub.f32 %v10481_v59, %v5162_v6  ;;  %v5417_v55 = vadd.f32 %v10540_v57, %v5402_v35 }
 0x4c4   : > { %v5290_v5 = vmul.f32 %v7667_v2, %v5289_v62  ;;  %v5296_v45 = vmul.f32 %v7669_v30, %v5246_v47  ;;  %vm5302_vm11 = vweird.f32 %v7669_v30 }
 0x4c5   : > { %7670 = vrsqrt.f32 %v5247_v19  ;;  %v5188_v38 = vmul.f32 %v10576_v9, %v10576_v9  ;;  %vm5303_vm0 = vmor %vm5301_vm1, %vm5302_vm11  ;;  %vm5311_vm15 = vweird.f32 %v5247_v19 }
 0x4c6   : > { %v5294_v15 = vsel %vm5293_vm8, %v7667_v2, %v5290_v5  ;;  %v5297_v39 = vmul.f32 %v7669_v30, %v5296_v45  ;;  %v7520_v45 = vld [vmem:[%s11326_s6 + $0x18] sm:$0xff] }
 0x4c7   : > { %v5388_v58 = vmul.f32 %v5294_v15, %v10460_v16  ;;  %v5223_v33 = vsel %vm5104_vm14, %v5188_v38, 0.0 }
 0x4c8   : > { %v5298_v1 = vmul.f32 0.5, %v5297_v39  ;;  %5224 = vadd.xlane.f32.xlu2 %v5223_v33  ;;  %v5210_v27 = vpop.xlane.xlu0 %5209 }
 0x4c9   : > { %v5403_v40 = vmul.f32 %v10530_v11, %v5388_v58 }
 0x4ca   : > { %v5299_v44 = vsub.f32 1.5, %v5298_v1 }
 0x4cb   : > { %v7671_v22 = vpop.eup %7670  ;;  %v5418_v63 = vadd.f32 %v10540_v57, %v5403_v40 }
 0x4cc   : > { %v5300_v37 = vmul.f32 %v7669_v30, %v5299_v44  ;;  %v5306_v2 = vmul.f32 %v7671_v22, %v5247_v19  ;;  %vm5312_vm6 = vweird.f32 %v7671_v22 }
 0x4cd   : > { %v5433_v23 = vpack.c.bf16 %v5418_v63, %v5417_v55  ;;  %vm5313_vm3 = vmor %vm5311_vm15, %vm5312_vm6 }
 0x4ce   : > { %v5307_v16 = vmul.f32 %v7671_v22, %v5306_v2  ;;  %v5304_v32 = vsel %vm5303_vm0, %v7669_v30, %v5300_v37 }
 0x4cf   : > { %7343 = vmatmul.msk.bf16.gmra.mxu0 %vm5104_vm14, %v5433_v23  ;;  %v5389_v54 = vmul.f32 %v5304_v32, %v10472_v25  ;;  %v5235_v25 = vmul.f32 %v5210_v27, %v10422_v36 }
 0x4d0   : > { %v5308_v52 = vmul.f32 0.5, %v5307_v16 }
 0x4d1   : > { %v5404_v43 = vmul.f32 %v10530_v11, %v5389_v54  ;;  %v5248_v10 = vadd.f32 1e-06, %v5235_v25 }
 0x4d2   : > { %v5309_v21 = vsub.f32 1.5, %v5308_v52 }
 0x4d3   : > { %v5419_v41 = vadd.f32 %v10540_v57, %v5404_v43  ;;  %7672 = vrsqrt.f32 %v5248_v10  ;;  %vm5321_vm13 = vweird.f32 %v5248_v10 }
 0x4d4   : > { %v5310_v46 = vmul.f32 %v7671_v22, %v5309_v21 }
 0x4d6   : > { %v5314_v42 = vsel %vm5313_vm3, %v7671_v22, %v5310_v46 }
 0x4d7   : > { %v5390_v0 = vmul.f32 %v5314_v42, %v10484_v24  ;;  %v7521_v24 = vld [vmem:[%s11326_s6 + $0x20] sm:$0xff] }
 0x4d8   : > { %5851 = vmatpush.bf16.msra.mxu1 %v7521_v24 }
 0x4d9   : > { %v5405_v47 = vmul.f32 %v10530_v11, %v5390_v0  ;;  %v7673_v29 = vpop.eup %7672 }
 0x4da   : > { %v5316_v6 = vmul.f32 %v7673_v29, %v5248_v10  ;;  %vm5322_vm9 = vweird.f32 %v7673_v29 }
 0x4db   : > { %v5420_v12 = vadd.f32 %v10540_v57, %v5405_v47  ;;  %vm5323_vm10 = vmor %vm5321_vm13, %vm5322_vm9 }
 0x4dc   : > { %v5317_v50 = vmul.f32 %v7673_v29, %v5316_v6  ;;  %5852 = vmatpush.bf16.msra.mxu1 %v7520_v45 }
 0x4dd   : > { %v5434_v3 = vpack.c.bf16 %v5420_v12, %v5419_v41 }
 0x4de   : > { %v5318_v28 = vmul.f32 0.5, %v5317_v50  ;;  %v10623_v50 = vld [vmem:[%s11328_s8 + $0x4] ss:$0 sm:$0xff] }
 0x4df   : > { %7344 = vmatmul.msk.bf16.gmra.mxu0 %vm5104_vm14, %v5434_v3 }
 0x4e0   : > { %v5319_v5 = vsub.f32 1.5, %v5318_v28 }
 0x4e2   : > { %v5320_v39 = vmul.f32 %v7673_v29, %v5319_v5  ;;  %v7519_v5 = vld [vmem:[%s11326_s6 + $0x10] sm:$0xff] }
 0x4e3   : > { %5853 = vmatpush.bf16.msra.mxu1 %v7519_v5 }
 0x4e4   : > { %v5324_v1 = vsel %vm5323_vm10, %v7673_v29, %v5320_v39 }
 0x4e5   : > { %v5391_v55 = vmul.f32 %v5324_v1, %v10493_v48 }
 0x4e7   : > { %v5406_v21 = vmul.f32 %v10530_v11, %v5391_v55 }
 0x4e9   : > { %v5421_v41 = vadd.f32 %v10540_v57, %v5406_v21  ;;  %v7518_v21 = vld [vmem:[%s11326_s6 + $0x8] sm:$0xff] }
 0x4ea   : > { %5854 = vmatpush.bf16.msra.mxu1 %v7518_v21 }
 0x51b   : > { %v5213_v62 = vpop.xlane.xlu1 %5212 }
 0x51c   : > { %v5236_v30 = vmul.f32 %v5213_v62, %v10422_v36 }
 0x51e   : > { %v5249_v19 = vadd.f32 1e-06, %v5236_v30 }
 0x520   : > { %7674 = vrsqrt.f32 %v5249_v19  ;;  %vm5331_vm2 = vweird.f32 %v5249_v19 }
 0x523   : > { %v5216_v38 = vpop.xlane.xlu2 %5215 }
 0x524   : > { %v5237_v13 = vmul.f32 %v5216_v38, %v10422_v36 }
 0x526   : > { %v7675_v15 = vpop.eup %7674  ;;  %v5250_v58 = vadd.f32 1e-06, %v5237_v13 }
 0x527   : > { %v5326_v33 = vmul.f32 %v7675_v15, %v5249_v19  ;;  %vm5332_vm7 = vweird.f32 %v7675_v15 }
 0x528   : > { %7676 = vrsqrt.f32 %v5250_v58  ;;  %vm5333_vm12 = vmor %vm5331_vm2, %vm5332_vm7  ;;  %vm5341_vm5 = vweird.f32 %v5250_v58 }
 0x529   : > { %v5327_v35 = vmul.f32 %v7675_v15, %v5326_v33 }
 0x52b   : > { %v5328_v40 = vmul.f32 0.5, %v5327_v35  ;;  %v5219_v44 = vpop.xlane.xlu0 %5218 }
 0x52c   : > { %v5238_v22 = vmul.f32 %v5219_v44, %v10422_v36 }
 0x52d   : > { %v5329_v63 = vsub.f32 1.5, %v5328_v40 }
 0x52e   : > { %v7677_v37 = vpop.eup %7676  ;;  %v5251_v2 = vadd.f32 1e-06, %v5238_v22 }
 0x52f   : > { %v5330_v23 = vmul.f32 %v7675_v15, %v5329_v63  ;;  %v5336_v16 = vmul.f32 %v7677_v37, %v5250_v58  ;;  %vm5342_vm4 = vweird.f32 %v7677_v37 }
 0x530   : > { %7678 = vrsqrt.f32 %v5251_v2  ;;  %vm5343_vm8 = vmor %vm5341_vm5, %vm5342_vm4  ;;  %vm5351_vm1 = vweird.f32 %v5251_v2 }
 0x531   : > { %v5334_v32 = vsel %vm5333_vm12, %v7675_v15, %v5330_v23  ;;  %v5337_v52 = vmul.f32 %v7677_v37, %v5336_v16 }
 0x532   : > { %v5392_v54 = vmul.f32 %v5334_v32, %v10505_v17 }
 0x533   : > { %v5338_v46 = vmul.f32 0.5, %v5337_v52  ;;  %v5222_v42 = vpop.xlane.xlu1 %5221  ;;  %v5143_v0 = vpop.xlane.xlu0 %5142 }
 0x534   : > { %v5239_v48 = vmul.f32 %v5222_v42, %v10422_v36  ;;  %v5163_v43 = vmul.f32 %v10422_v36, %v5143_v0  ;;  %v5407_v47 = vmul.f32 %v10530_v11, %v5392_v54 }
 0x535   : > { %v5339_v3 = vsub.f32 1.5, %v5338_v46 }
 0x536   : > { %v7679_v12 = vpop.eup %7678  ;;  %v5252_v27 = vadd.f32 1e-06, %v5239_v48  ;;  %v10615_v25 = vsub.f32 %v10547_v34, %v5163_v43  ;;  %v5422_v10 = vadd.f32 %v10540_v57, %v5407_v47 }
 0x537   : > { %v5346_v17 = vmul.f32 %v7679_v12, %v5251_v2  ;;  %v5340_v62 = vmul.f32 %v7677_v37, %v5339_v3  ;;  %vm5352_vm11 = vweird.f32 %v7679_v12  ;;  %v7517_v3 = vld [vmem:[%s11326_s6] sm:$0xff] }
 0x538   : > { %7680 = vrsqrt.f32 %v5252_v27  ;;  %v5435_v24 = vpack.c.bf16 %v5422_v10, %v5421_v41  ;;  %v5189_v29 = vmul.f32 %v10615_v25, %v10615_v25  ;;  %vm5353_vm0 = vmor %vm5351_vm1, %vm5352_vm11  ;;  %vm5361_vm15 = vweird.f32 %v5252_v27  ;;  %5855 = vmatpush.bf16.msra.mxu1 %v7517_v3 }
 0x539   : > { %v5347_v6 = vmul.f32 %v7679_v12, %v5346_v17  ;;  %v5344_v33 = vsel %vm5343_vm8, %v7677_v37, %v5340_v62 }
 0x53a   : > { %7345 = vmatmul.msk.bf16.gmra.mxu0 %vm5104_vm14, %v5435_v24  ;;  %v5226_v30 = vsel %vm5104_vm14, %v5189_v29, 0.0  ;;  %v5393_v58 = vmul.f32 %v5344_v33, %v10516_v51 }
 0x53b   : > { %v5348_v28 = vmul.f32 0.5, %v5347_v6  ;;  %v5225_v19 = vpop.xlane.xlu2 %5224  ;;  %5227 = vadd.xlane.f32.xlu1 %v5226_v30 }
 0x53c   : > { %v5240_v45 = vmul.f32 %v5225_v19, %v10422_v36  ;;  %v5483_v38 = vpop.f32.mrf.mxu0  ;;  %v5408_v2 = vmul.f32 %v10530_v11, %v5393_v58 }
 0x53d   : > { %v5349_v13 = vsub.f32 1.5, %v5348_v28  ;;  %v10632_v15 = vadd.f32 %v10623_v50, %v5483_v38 }
 0x53e   : > { %v7681_v39 = vpop.eup %7680  ;;  %v5253_v35 = vadd.f32 1e-06, %v5240_v45  ;;  %v5423_v47 = vadd.f32 %v10540_v57, %v5408_v2 }
 0x53f   : > { %v5350_v1 = vmul.f32 %v7679_v12, %v5349_v13  ;;  %v5356_v40 = vmul.f32 %v7681_v39, %v5252_v27  ;;  %v7349_v44 = vmul.f32 -1.442695, %v10632_v15  ;;  %vm5362_vm6 = vweird.f32 %v7681_v39 }
 0x540   : > { %7682 = vrsqrt.f32 %v5253_v35  ;;  %vm5363_vm3 = vmor %vm5361_vm15, %vm5362_vm6  ;;  %vm5371_vm13 = vweird.f32 %v5253_v35 }
 0x541   : > { %v5354_v22 = vsel %vm5353_vm0, %v7679_v12, %v5350_v1  ;;  %v5357_v55 = vmul.f32 %v7681_v39, %v5356_v40  ;;  %7684 = vpow2.f32 %v7349_v44 }
 0x542   : > { %v5394_v63 = vmul.f32 %v5354_v22, %v10525_v20 }
 0x543   : > { %v5358_v23 = vmul.f32 0.5, %v5357_v55 }
 0x544   : > { %v5485_v16 = vpop.f32.mrf.mxu0  ;;  %v5409_v52 = vmul.f32 %v10530_v11, %v5394_v63 }
 0x545   : > { %v5359_v32 = vsub.f32 1.5, %v5358_v23  ;;  %v10638_v37 = vadd.f32 %v10623_v50, %v5485_v16 }
 0x546   : > { %v7683_v51 = vpop.eup %7682  ;;  %v5424_v48 = vadd.f32 %v10540_v57, %v5409_v52 }
 0x547   : > { %v7685_v54 = vpop.eup %7684  ;;  %v5366_v46 = vmul.f32 %v7683_v51, %v5253_v35  ;;  %v7350_v42 = vmul.f32 -1.442695, %v10638_v37  ;;  %v5360_v20 = vmul.f32 %v7681_v39, %v5359_v32  ;;  %vm5372_vm9 = vweird.f32 %v7683_v51 }
 0x548   : > { %v10646_v0 = vadd.f32 1.0, %v7685_v54  ;;  %v5436_v12 = vpack.c.bf16 %v5424_v48, %v5423_v47  ;;  %vm5373_vm10 = vmor %vm5371_vm13, %vm5372_vm9 }
 0x549   : > { %v5367_v43 = vmul.f32 %v7683_v51, %v5366_v46  ;;  %7686 = vpow2.f32 %v7350_v42  ;;  %v5364_v10 = vsel %vm5363_vm3, %v7681_v39, %v5360_v20 }
 0x54a   : > { %7688 = vrcp.f32 %v10646_v0  ;;  %7346 = vmatmul.msk.bf16.gmra.mxu0 %vm5104_vm14, %v5436_v12  ;;  %v5395_v6 = vmul.f32 %v5364_v10, %v10550_v61  ;;  %v5580_v32 = vand.u32 2147483648, %v10646_v0  ;;  %vm5574_vm2 = vweird.f32 %v10646_v0 }
 0x54b   : > { %v5368_v41 = vmul.f32 0.5, %v5367_v43  ;;  %v5578_v2 = vand.u32 2147483647, %v10646_v0 }
 0x54c   : > { %v5488_v17 = vpop.f32.mrf.mxu0  ;;  %v5410_v39 = vmul.f32 %v10530_v11, %v5395_v6  ;;  %v5581_v43 = vor.u32 1.1754944e-38, %v5580_v32 }
 0x54d   : > { %v5369_v24 = vsub.f32 1.5, %v5368_v41  ;;  %v10656_v29 = vadd.f32 %v10623_v50, %v5488_v17  ;;  %vm5579_vm5 = vcmp.eq.f32.partialorder %v5578_v2, 8.507059e+37 }
 0x54e   : > { %v5425_v22 = vadd.f32 %v10540_v57, %v5410_v39 }
 0x54f   : > { %v7687_v27 = vpop.eup %7686  ;;  %v5370_v62 = vmul.f32 %v7683_v51, %v5369_v24  ;;  %v7351_v30 = vmul.f32 -1.442695, %v10656_v29 }
 0x550   : > { %v7689_v28 = vpop.eup %7688  ;;  %v5557_v19 = vadd.f32 1.0, %v7687_v27 }
 0x551   : > { %v5374_v5 = vsel %vm5373_vm10, %v7683_v51, %v5370_v62  ;;  %v5570_v45 = vmul.f32 %v7689_v28, %v10646_v0  ;;  %7690 = vpow2.f32 %v7351_v30  ;;  %vm5575_vm7 = vweird.f32 %v7689_v28 }
 0x552   : > { %v5396_v38 = vmul.f32 %v5374_v5, %v10576_v9  ;;  %7692 = vrcp.f32 %v5557_v19  ;;  %vm10676_vm12 = vmor %vm5574_vm2, %vm5575_vm7  ;;  %v5593_v51 = vand.u32 2147483647, %v5557_v19  ;;  %v5595_v54 = vand.u32 2147483648, %v5557_v19 }
 0x553   : > { %v5571_v13 = vsub.f32 1.0, %v5570_v45  ;;  %vm5589_vm8 = vweird.f32 %v5557_v19 }
 0x554   : > { %v5490_v33 = vpop.f32.mrf.mxu0  ;;  %v5411_v61 = vmul.f32 %v10530_v11, %v5396_v38  ;;  %v5596_v10 = vor.u32 1.1754944e-38, %v5595_v54  ;;  %vm5594_vm1 = vcmp.eq.f32.partialorder %v5593_v51, 8.507059e+37 }
 0x555   : > { %v5572_v1 = vmul.f32 %v7689_v28, %v5571_v13  ;;  %v10665_v35 = vadd.f32 %v10623_v50, %v5490_v33 }
 0x556   : > { %v5426_v40 = vadd.f32 %v10540_v57, %v5411_v61 }
 0x557   : > { %v7691_v44 = vpop.eup %7690  ;;  %v7352_v58 = vmul.f32 -1.442695, %v10665_v35  ;;  %v5573_v63 = vadd.f32 %v7689_v28, %v5572_v1 }
 0x558   : > { %v7693_v55 = vpop.eup %7692  ;;  %v10670_v9 = vadd.f32 1.0, %v7691_v44  ;;  %v5437_v16 = vpack.c.bf16 %v5426_v40, %v5425_v22 }
 0x559   : > { %v5585_v23 = vmul.f32 %v7693_v55, %v5557_v19  ;;  %7694 = vpow2.f32 %v7352_v58  ;;  %v5577_v42 = vsel %vm10676_vm12, %v7689_v28, %v5573_v63  ;;  %vm5590_vm4 = vweird.f32 %v7693_v55 }
 0x55a   : > { %7696 = vrcp.f32 %v10670_v9  ;;  %7347 = vmatmul.msk.bf16.gmra.mxu0 %vm5104_vm14, %v5437_v16  ;;  %v5582_v3 = vsel %vm5579_vm5, %v5581_v43, %v5577_v42  ;;  %vm5591_vm11 = vmor %vm5589_vm8, %vm5590_vm4  ;;  %vm5604_vm6 = vweird.f32 %v10670_v9  ;;  %v5608_v44 = vand.u32 2147483647, %v10670_v9 }
 0x55b   : > { %v5586_v52 = vsub.f32 1.0, %v5585_v23  ;;  %v5764_v62 = vmul.f32 %v5582_v3, %v10632_v15  ;;  %v5610_v15 = vand.u32 2147483648, %v10670_v9 }
 0x55c   : > { %v5493_v46 = vpop.f32.mrf.mxu0  ;;  %vm5609_vm13 = vcmp.eq.f32.partialorder %v5608_v44, 8.507059e+37 }
 0x55d   : > { %v5587_v20 = vmul.f32 %v7693_v55, %v5586_v52  ;;  %v10684_v48 = vadd.f32 %v10623_v50, %v5493_v46  ;;  %v5611_v16 = vor.u32 1.1754944e-38, %v5610_v15 }
 0x55f   : > { %v7695_v0 = vpop.eup %7694  ;;  %v5588_v47 = vadd.f32 %v7693_v55, %v5587_v20  ;;  %v7353_v41 = vmul.f32 -1.442695, %v10684_v48 }
 0x560   : > { %v7697_v12 = vpop.eup %7696  ;;  %v5559_v17 = vadd.f32 1.0, %v7695_v0 }
 0x561   : > { %v5592_v24 = vsel %vm5591_vm11, %v7693_v55, %v5588_v47  ;;  %v5600_v27 = vmul.f32 %v7697_v12, %v10670_v9  ;;  %7698 = vpow2.f32 %v7353_v41  ;;  %vm5605_vm0 = vweird.f32 %v7697_v12 }
 0x562   : > { %v5597_v6 = vsel %vm5594_vm1, %v5596_v10, %v5592_v24  ;;  %7700 = vrcp.f32 %v5559_v17  ;;  %vm5606_vm15 = vmor %vm5604_vm6, %vm5605_vm0  ;;  %v5625_v22 = vand.u32 2147483648, %v5559_v17  ;;  %v5623_v63 = vand.u32 2147483647, %v5559_v17 }
 0x563   : > { %v5765_v30 = vmul.f32 %v5597_v6, %v10638_v37  ;;  %v5601_v28 = vsub.f32 1.0, %v5600_v27  ;;  %vm5619_vm9 = vweird.f32 %v5559_v17 }
 0x564   : > { %v5495_v19 = vpop.f32.mrf.mxu0  ;;  %v5626_v46 = vor.u32 1.1754944e-38, %v5625_v22  ;;  %vm5624_vm7 = vcmp.eq.f32.partialorder %v5623_v63, 8.507059e+37 }
 0x565   : > { %v5793_v5 = vpack.c.bf16 %v5765_v30, %v5764_v62  ;;  %v10691_v45 = vadd.f32 %v10623_v50, %v5495_v19  ;;  %v5602_v38 = vmul.f32 %v7697_v12, %v5601_v28 }
 0x567   : > { %v7699_v13 = vpop.eup %7698  ;;  %v7354_v39 = vmul.f32 -1.442695, %v10691_v45  ;;  %5856 = vmatmul.bf16.vlgmr.msra.gmra.mxu1 %v5793_v5  ;;  %v5603_v40 = vadd.f32 %v7697_v12, %v5602_v38 }
 0x568   : > { %v7701_v33 = vpop.eup %7700  ;;  %v5560_v61 = vadd.f32 1.0, %v7699_v13 }
 0x569   : > { %7702 = vpow2.f32 %v7354_v39  ;;  %v5615_v1 = vmul.f32 %v7701_v33, %v5559_v17  ;;  %vm5620_vm3 = vweird.f32 %v7701_v33  ;;  %v5607_v55 = vsel %vm5606_vm15, %v7697_v12, %v5603_v40 }
 0x56a   : > { %7704 = vrcp.f32 %v5560_v61  ;;  %vm5621_vm10 = vmor %vm5619_vm9, %vm5620_vm3  ;;  %v5612_v21 = vsel %vm5609_vm13, %v5611_v16, %v5607_v55  ;;  %v5640_v10 = vand.u32 2147483648, %v5560_v61  ;;  %vm5634_vm12 = vweird.f32 %v5560_v61 }
 0x56b   : > { %v5616_v37 = vsub.f32 1.0, %v5615_v1  ;;  %v5766_v20 = vmul.f32 %v5612_v21, %v10656_v29  ;;  %v5638_v17 = vand.u32 2147483647, %v5560_v61 }
 0x56c   : > { %v5641_v29 = vor.u32 1.1754944e-38, %v5640_v10 }
 0x56d   : > { %v5617_v58 = vmul.f32 %v7701_v33, %v5616_v37  ;;  %vm5639_vm8 = vcmp.eq.f32.partialorder %v5638_v17, 8.507059e+37 }
 0x56f   : > { %v7703_v23 = vpop.eup %7702  ;;  %v5618_v32 = vadd.f32 %v7701_v33, %v5617_v58 }
 0x570   : > { %v7705_v2 = vpop.eup %7704  ;;  %v5561_v52 = vadd.f32 1.0, %v7703_v23 }
 0x571   : > { %v5630_v51 = vmul.f32 %v7705_v2, %v5560_v61  ;;  %v5622_v54 = vsel %vm5621_vm10, %v7701_v33, %v5618_v32  ;;  %vm5635_vm2 = vweird.f32 %v7705_v2 }
 0x572   : > { %7706 = vrcp.f32 %v5561_v52  ;;  %v5627_v42 = vsel %vm5624_vm7, %v5626_v46, %v5622_v54  ;;  %vm5636_vm4 = vmor %vm5634_vm12, %vm5635_vm2  ;;  %v5655_v27 = vand.u32 2147483648, %v5561_v52  ;;  %v5653_v30 = vand.u32 2147483647, %v5561_v52 }
 0x573   : > { %v5631_v9 = vsub.f32 1.0, %v5630_v51  ;;  %v5767_v43 = vmul.f32 %v5627_v42, %v10665_v35  ;;  %vm5649_vm11 = vweird.f32 %v5561_v52 }
 0x574   : > { %v5656_v19 = vor.u32 1.1754944e-38, %v5655_v27  ;;  %vm5654_vm0 = vcmp.eq.f32.partialorder %v5653_v30, 8.507059e+37 }
 0x575   : > { %v5632_v0 = vmul.f32 %v7705_v2, %v5631_v9  ;;  %v5794_v47 = vpack.c.bf16 %v5767_v43, %v5766_v20 }
 0x577   : > { %5861 = vmatmul.bf16.gmra.mxu1 %v5794_v47  ;;  %v5633_v12 = vadd.f32 %v7705_v2, %v5632_v0 }
 0x578   : > { %v7707_v41 = vpop.eup %7706 }
 0x579   : > { %v5645_v3 = vmul.f32 %v7707_v41, %v5561_v52  ;;  %v5637_v6 = vsel %vm5636_vm4, %v7705_v2, %v5633_v12  ;;  %vm5650_vm5 = vweird.f32 %v7707_v41 }
 0x57a   : > { %v5642_v28 = vsel %vm5639_vm8, %v5641_v29, %v5637_v6  ;;  %vm5651_vm1 = vmor %vm5649_vm11, %vm5650_vm5 }
 0x57b   : > { %v5646_v24 = vsub.f32 1.0, %v5645_v3  ;;  %v5768_v13 = vmul.f32 %v5642_v28, %v10684_v48 }
 0x57d   : > { %v5647_v62 = vmul.f32 %v7707_v41, %v5646_v24 }
 0x57f   : > { %v5648_v35 = vadd.f32 %v7707_v41, %v5647_v62 }
 0x581   : > { %v5652_v5 = vsel %vm5651_vm1, %v7707_v41, %v5648_v35 }
 0x582   : > { %v5657_v38 = vsel %vm5654_vm0, %v5656_v19, %v5652_v5 }
 0x583   : > { %v5769_v39 = vmul.f32 %v5657_v38, %v10691_v45 }
 0x585   : > { %v5795_v33 = vpack.c.bf16 %v5769_v39, %v5768_v13 }
 0x587   : > { %5866 = vmatmul.bf16.gmra.mxu1 %v5795_v33 }
 0x5ae   : > { %v5228_v61 = vpop.xlane.xlu1 %5227 }
 0x5af   : > { %v5241_v1 = vmul.f32 %v5228_v61, %v10422_v36 }
 0x5b1   : > { %v5254_v40 = vadd.f32 1e-06, %v5241_v1 }
 0x5b3   : > { %7708 = vrsqrt.f32 %v5254_v40  ;;  %vm5381_vm15 = vweird.f32 %v5254_v40 }
 0x5b7   : > { %v5498_v15 = vpop.f32.mrf.mxu0 }
 0x5b8   : > { %v10703_v37 = vadd.f32 %v10623_v50, %v5498_v15 }
 0x5b9   : > { %v7709_v44 = vpop.eup %7708 }
 0x5ba   : > { %v5376_v58 = vmul.f32 %v7709_v44, %v5254_v40  ;;  %v7355_v22 = vmul.f32 -1.442695, %v10703_v37  ;;  %vm5382_vm6 = vweird.f32 %v7709_v44 }
 0x5bb   : > { %vm5383_vm3 = vmor %vm5381_vm15, %vm5382_vm6 }
 0x5bc   : > { %v5377_v55 = vmul.f32 %v7709_v44, %v5376_v58  ;;  %7710 = vpow2.f32 %v7355_v22 }
 0x5be   : > { %v5378_v48 = vmul.f32 0.5, %v5377_v55 }
 0x5bf   : > { %v5500_v63 = vpop.f32.mrf.mxu0 }
 0x5c0   : > { %v5379_v45 = vsub.f32 1.5, %v5378_v48  ;;  %v5501_v23 = vadd.f32 %v10623_v50, %v5500_v63 }
 0x5c2   : > { %v7711_v16 = vpop.eup %7710  ;;  %v7356_v32 = vmul.f32 -1.442695, %v5501_v23  ;;  %v5380_v2 = vmul.f32 %v7709_v44, %v5379_v45 }
 0x5c3   : > { %v5562_v52 = vadd.f32 1.0, %v7711_v16 }
 0x5c4   : > { %7712 = vpow2.f32 %v7356_v32  ;;  %v5384_v21 = vsel %vm5383_vm3, %v7709_v44, %v5380_v2 }
 0x5c5   : > { %7714 = vrcp.f32 %v5562_v52  ;;  %v5397_v46 = vmul.f32 %v5384_v21, %v10615_v25  ;;  %vm5664_vm13 = vweird.f32 %v5562_v52  ;;  %v5670_v30 = vand.u32 2147483648, %v5562_v52 }
 0x5c7   : > { %v5503_v54 = vpop.f32.mrf.mxu0  ;;  %v5412_v0 = vmul.f32 %v10530_v11, %v5397_v46  ;;  %v5671_v13 = vor.u32 1.1754944e-38, %v5670_v30 }
 0x5c8   : > { %v10709_v20 = vadd.f32 %v10623_v50, %v5503_v54 }
 0x5c9   : > { %v5427_v12 = vadd.f32 %v10540_v57, %v5412_v0  ;;  %v5668_v57 = vand.u32 2147483647, %v5562_v52 }
 0x5ca   : > { %v7713_v51 = vpop.eup %7712  ;;  %v7357_v41 = vmul.f32 -1.442695, %v10709_v20 }
 0x5cb   : > { %v7715_v9 = vpop.eup %7714  ;;  %v5563_v42 = vadd.f32 1.0, %v7713_v51  ;;  %v5438_v3 = vpack.c.bf16 %v5427_v12, %v5427_v12  ;;  %vm5669_vm12 = vcmp.eq.f32.partialorder %v5668_v57, 8.507059e+37  ;;  %v10734_v51 = vld [vmem:[%s11328_s8 + $0x5] ss:$0 sm:$0xff] }
 0x5cc   : > { %v5660_v43 = vmul.f32 %v7715_v9, %v5562_v52  ;;  %vm5665_vm9 = vweird.f32 %v7715_v9 }
 0x5cd   : > { %7716 = vrcp.f32 %v5563_v42  ;;  %7348 = vmatmul.msk.bf16.gmra.mxu0 %vm5104_vm14, %v5438_v3  ;;  %v5685_v35 = vand.u32 2147483648, %v5563_v42  ;;  %vm5666_vm10 = vmor %vm5664_vm13, %vm5665_vm9  ;;  %v5683_v5 = vand.u32 2147483647, %v5563_v42  ;;  %vm5679_vm2 = vweird.f32 %v5563_v42 }
 0x5ce   : > { %v5661_v47 = vsub.f32 1.0, %v5660_v43  ;;  %7718 = vpow2.f32 %v7357_v41 }
 0x5cf   : > { %v5505_v25 = vpop.f32.mrf.mxu0  ;;  %v5686_v61 = vor.u32 1.1754944e-38, %v5685_v35  ;;  %vm5684_vm5 = vcmp.eq.f32.partialorder %v5683_v5, 8.507059e+37 }
 0x5d0   : > { %v5662_v10 = vmul.f32 %v7715_v9, %v5661_v47  ;;  %v10716_v24 = vadd.f32 %v10623_v50, %v5505_v25 }
 0x5d2   : > { %v5663_v6 = vadd.f32 %v7715_v9, %v5662_v10  ;;  %v7358_v11 = vmul.f32 -1.442695, %v10716_v24 }
 0x5d3   : > { %v7717_v17 = vpop.eup %7716 }
 0x5d4   : > { %v5675_v27 = vmul.f32 %v7717_v17, %v5563_v42  ;;  %v7719_v62 = vpop.eup %7718  ;;  %7720 = vpow2.f32 %v7358_v11  ;;  %vm5680_vm7 = vweird.f32 %v7717_v17  ;;  %v5667_v38 = vsel %vm5666_vm10, %v7715_v9, %v5663_v6 }
 0x5d5   : > { %v10719_v28 = vadd.f32 1.0, %v7719_v62  ;;  %vm5681_vm4 = vmor %vm5679_vm2, %vm5680_vm7  ;;  %v5672_v40 = vsel %vm5669_vm12, %v5671_v13, %v5667_v38 }
 0x5d6   : > { %v5676_v29 = vsub.f32 1.0, %v5675_v27  ;;  %v5770_v45 = vmul.f32 %v5672_v40, %v10703_v37 }
 0x5d7   : > { %7722 = vrcp.f32 %v10719_v28  ;;  %v5508_v33 = vpop.f32.mrf.mxu0  ;;  %v5700_v12 = vand.u32 2147483648, %v10719_v28  ;;  %vm5694_vm11 = vweird.f32 %v10719_v28  ;;  %v5698_v3 = vand.u32 2147483647, %v10719_v28 }
 0x5d8   : > { %v5677_v19 = vmul.f32 %v7717_v17, %v5676_v29  ;;  %v10723_v1 = vadd.f32 %v10623_v50, %v5508_v33 }
 0x5d9   : > { %v5701_v62 = vor.u32 1.1754944e-38, %v5700_v12  ;;  %vm5699_vm6 = vcmp.eq.f32.partialorder %v5698_v3, 8.507059e+37 }
 0x5da   : > { %v5678_v39 = vadd.f32 %v7717_v17, %v5677_v19  ;;  %v7721_v44 = vpop.eup %7720  ;;  %v7359_v22 = vmul.f32 -1.442695, %v10723_v1 }
 0x5db   : > { %v5565_v48 = vadd.f32 1.0, %v7721_v44 }
 0x5dc   : > { %v5682_v15 = vsel %vm5681_vm4, %v7717_v17, %v5678_v39  ;;  %7724 = vpow2.f32 %v7359_v22 }
 0x5dd   : > { %v5687_v58 = vsel %vm5684_vm5, %v5686_v61, %v5682_v15  ;;  %v7723_v63 = vpop.eup %7722  ;;  %7726 = vrcp.f32 %v5565_v48  ;;  %v5715_v17 = vand.u32 2147483648, %v5565_v48  ;;  %v5713_v11 = vand.u32 2147483647, %v5565_v48 }
 0x5de   : > { %v5771_v55 = vmul.f32 %v5687_v58, %v5501_v23  ;;  %v5690_v16 = vmul.f32 %v7723_v63, %v10719_v28  ;;  %vm5695_vm8 = vweird.f32 %v7723_v63  ;;  %vm5709_vm15 = vweird.f32 %v5565_v48 }
 0x5df   : > { %v5510_v52 = vpop.f32.mrf.mxu0  ;;  %vm10749_vm1 = vmor %vm5694_vm11, %vm5695_vm8  ;;  %v5716_v5 = vor.u32 1.1754944e-38, %v5715_v17  ;;  %vm5714_vm9 = vcmp.eq.f32.partialorder %v5713_v11, 8.507059e+37 }
 0x5e0   : > { %v5796_v32 = vpack.c.bf16 %v5771_v55, %v5770_v45  ;;  %v5691_v2 = vsub.f32 1.0, %v5690_v16  ;;  %v10729_v21 = vadd.f32 %v10623_v50, %v5510_v52 }
 0x5e2   : > { %5871 = vmatmul.bf16.gmra.mxu1 %v5796_v32  ;;  %v5692_v23 = vmul.f32 %v7723_v63, %v5691_v2  ;;  %v7725_v46 = vpop.eup %7724  ;;  %v7360_v37 = vmul.f32 -1.442695, %v10729_v21 }
 0x5e3   : > { %v7727_v42 = vpop.eup %7726  ;;  %v10738_v43 = vadd.f32 1.0, %v7725_v46 }
 0x5e4   : > { %v5857_v54 = vpop.f32.mrf.mxu1  ;;  %v5693_v0 = vadd.f32 %v7723_v63, %v5692_v23  ;;  %v5705_v47 = vmul.f32 %v7727_v42, %v5565_v48  ;;  %7728 = vpow2.f32 %v7360_v37  ;;  %vm5710_vm0 = vweird.f32 %v7727_v42 }
 0x5e5   : > { %v5891_v9 = vadd.f32 %v5857_v54, %v10386_v14  ;;  %7730 = vrcp.f32 %v10738_v43  ;;  %vm5711_vm3 = vmor %vm5709_vm15, %vm5710_vm0  ;;  %v5730_v32 = vand.u32 2147483648, %v10738_v43  ;;  %vm5724_vm10 = vweird.f32 %v10738_v43 }
 0x5e6   : > { %v5706_v10 = vsub.f32 1.0, %v5705_v47  ;;  %v5697_v27 = vsel %vm10749_vm1, %v7723_v63, %v5693_v0 }
 0x5e7   : > { %v10741_v41 = vadd.f32 %v10734_v51, %v5891_v9  ;;  %v5702_v19 = vsel %vm5699_vm6, %v5701_v62, %v5697_v27  ;;  %v5731_v37 = vor.u32 1.1754944e-38, %v5730_v32 }
 0x5e8   : > { %v5707_v6 = vmul.f32 %v7727_v42, %v5706_v10  ;;  %v5772_v40 = vmul.f32 %v5702_v19, %v10709_v20 }
 0x5e9   : > { %v5919_v14 = vsel %vm5104_vm14, %v10741_v41, 0.0 }
 0x5ea   : > { %5920 = vadd.xlane.f32.xlu2 %v5919_v14  ;;  %v7729_v29 = vpop.eup %7728  ;;  %v5708_v57 = vadd.f32 %v7727_v42, %v5707_v6 }
 0x5eb   : > { %v7731_v28 = vpop.eup %7730  ;;  %v5567_v38 = vadd.f32 1.0, %v7729_v29 }
 0x5ec   : > { %v5859_v30 = vpop.f32.mrf.mxu1  ;;  %v5712_v13 = vsel %vm5711_vm3, %v7727_v42, %v5708_v57  ;;  %v5720_v39 = vmul.f32 %v7731_v28, %v10738_v43  ;;  %vm5725_vm13 = vweird.f32 %v7731_v28 }
 0x5ed   : > { %v5892_v35 = vadd.f32 %v5859_v30, %v10391_v4  ;;  %v5717_v61 = vsel %vm5714_vm9, %v5716_v5, %v5712_v13  ;;  %7732 = vrcp.f32 %v5567_v38  ;;  %vm5726_vm7 = vmor %vm5724_vm10, %vm5725_vm13  ;;  %v5745_v52 = vand.u32 2147483648, %v5567_v38 }
 0x5ee   : > { %v5773_v15 = vmul.f32 %v5717_v61, %v10716_v24  ;;  %v5721_v44 = vsub.f32 1.0, %v5720_v39  ;;  %v5728_v24 = vand.u32 2147483647, %v10738_v43  ;;  %v5743_v46 = vand.u32 2147483647, %v5567_v38 }
 0x5ef   : > { %v10758_v33 = vadd.f32 %v10734_v51, %v5892_v35  ;;  %vm5739_vm4 = vweird.f32 %v5567_v38  ;;  %v5746_v47 = vor.u32 1.1754944e-38, %v5745_v52 }
 0x5f0   : > { %v5722_v58 = vmul.f32 %v7731_v28, %v5721_v44  ;;  %v5797_v22 = vpack.c.bf16 %v5773_v15, %v5772_v40  ;;  %vm5729_vm12 = vcmp.eq.f32.partialorder %v5728_v24, 8.507059e+37  ;;  %vm5744_vm8 = vcmp.eq.f32.partialorder %v5743_v46, 8.507059e+37 }
 0x5f1   : > { %v5922_v4 = vsel %vm5104_vm14, %v10758_v33, 0.0 }
 0x5f2   : > { %5923 = vadd.xlane.f32.xlu0 %v5922_v4  ;;  %5876 = vmatmul.bf16.gmra.mxu1 %v5797_v22  ;;  %v5723_v45 = vadd.f32 %v7731_v28, %v5722_v58 }
 0x5f3   : > { %v7733_v48 = vpop.eup %7732 }
 0x5f4   : > { %v5862_v55 = vpop.f32.mrf.mxu1  ;;  %v5735_v16 = vmul.f32 %v7733_v48, %v5567_v38  ;;  %v5727_v54 = vsel %vm5726_vm7, %v7731_v28, %v5723_v45  ;;  %vm5740_vm2 = vweird.f32 %v7733_v48 }
 0x5f5   : > { %v5893_v63 = vadd.f32 %v5862_v55, %v10396_v8  ;;  %v5732_v0 = vsel %vm5729_vm12, %v5731_v37, %v5727_v54  ;;  %vm5741_vm5 = vmor %vm5739_vm4, %vm5740_vm2 }
 0x5f6   : > { %v5736_v2 = vsub.f32 1.0, %v5735_v16  ;;  %v5774_v14 = vmul.f32 %v5732_v0, %v10723_v1 }
 0x5f7   : > { %v10767_v20 = vadd.f32 %v10734_v51, %v5893_v63 }
 0x5f8   : > { %v5737_v8 = vmul.f32 %v7733_v48, %v5736_v2 }
 0x5f9   : > { %v5925_v23 = vsel %vm5104_vm14, %v10767_v20, 0.0 }
 0x5fa   : > { %5926 = vadd.xlane.f32.xlu1 %v5925_v23  ;;  %v5738_v9 = vadd.f32 %v7733_v48, %v5737_v8 }
 0x5fc   : > { %v5864_v42 = vpop.f32.mrf.mxu1  ;;  %v5742_v12 = vsel %vm5741_vm5, %v7733_v48, %v5738_v9 }
 0x5fd   : > { %v5894_v43 = vadd.f32 %v5864_v42, %v10401_v26  ;;  %v5747_v3 = vsel %vm5744_vm8, %v5746_v47, %v5742_v12 }
 0x5fe   : > { %v5775_v25 = vmul.f32 %v5747_v3, %v10729_v21 }
 0x5ff   : > { %v10775_v10 = vadd.f32 %v10734_v51, %v5894_v43 }
 0x600   : > { %v5798_v27 = vpack.c.bf16 %v5775_v25, %v5774_v14 }
 0x601   : > { %v5928_v17 = vsel %vm5104_vm14, %v10775_v10, 0.0 }
 0x602   : > { %5929 = vadd.xlane.f32.xlu2 %v5928_v17  ;;  %5881 = vmatmul.bf16.gmra.mxu1 %v5798_v27 }
 0x604   : > { %v5867_v6 = vpop.f32.mrf.mxu1 }
 0x605   : > { %v5895_v11 = vadd.f32 %v5867_v6, %v10406_v56 }
 0x607   : > { %v10783_v26 = vadd.f32 %v10734_v51, %v5895_v11 }
 0x609   : > { %v5931_v62 = vsel %vm5104_vm14, %v10783_v26, 0.0 }
 0x60a   : > { %5932 = vadd.xlane.f32.xlu0 %v5931_v62 }
 0x60c   : > { %v5869_v30 = vpop.f32.mrf.mxu1 }
 0x60d   : > { %v5896_v1 = vadd.f32 %v5869_v30, %v10411_v18 }
 0x60f   : > { %v10789_v21 = vadd.f32 %v10734_v51, %v5896_v1 }
 0x611   : > { %v5934_v29 = vsel %vm5104_vm14, %v10789_v21, 0.0 }
 0x612   : > { %5935 = vadd.xlane.f32.xlu1 %v5934_v29 }
 0x64a   : > { %v5513_v57 = vpop.f32.mrf.mxu0 }
 0x64b   : > { %v5514_v56 = vadd.f32 %v10623_v50, %v5513_v57 }
 0x64d   : > { %v7361_v35 = vmul.f32 -1.442695, %v5514_v56 }
 0x64f   : > { %7734 = vpow2.f32 %v7361_v35 }
 0x652   : > { %v5515_v28 = vpop.f32.mrf.mxu0 }
 0x655   : > { %v7735_v19 = vpop.eup %7734 }
 0x656   : > { %v5568_v5 = vadd.f32 1.0, %v7735_v19 }
 0x658   : > { %7736 = vrcp.f32 %v5568_v5  ;;  %v5758_v45 = vand.u32 2147483647, %v5568_v5  ;;  %vm5754_vm1 = vweird.f32 %v5568_v5 }
 0x65a   : > { %vm5759_vm6 = vcmp.eq.f32.partialorder %v5758_v45, 8.507059e+37 }
 0x65d   : > { %v5921_v38 = vpop.xlane.xlu2 %5920 }
 0x65e   : > { %v5958_v13 = vmul.f32 %v5921_v38, %v10422_v36  ;;  %v7737_v15 = vpop.eup %7736 }
 0x65f   : > { %v5872_v39 = vpop.f32.mrf.mxu1  ;;  %v5750_v44 = vmul.f32 %v7737_v15, %v5568_v5  ;;  %vm5755_vm11 = vweird.f32 %v7737_v15 }
 0x660   : > { %v10796_v18 = vsub.f32 %v10741_v41, %v5958_v13  ;;  %v5897_v61 = vadd.f32 %v5872_v39, %v10416_v49  ;;  %v5760_v49 = vand.u32 2147483648, %v5568_v5  ;;  %vm5756_vm0 = vmor %vm5754_vm1, %vm5755_vm11 }
 0x661   : > { %v5751_v55 = vsub.f32 1.0, %v5750_v44 }
 0x662   : > { %v5984_v40 = vmul.f32 %v10796_v18, %v10796_v18  ;;  %v10802_v50 = vadd.f32 %v10734_v51, %v5897_v61  ;;  %v5761_v23 = vor.u32 1.1754944e-38, %v5760_v49 }
 0x663   : > { %v5752_v63 = vmul.f32 %v7737_v15, %v5751_v55 }
 0x664   : > { %v5997_v4 = vsel %vm5104_vm14, %v5984_v40, 0.0  ;;  %v5937_v58 = vsel %vm5104_vm14, %v10802_v50, 0.0 }
 0x665   : > { %5998 = vadd.xlane.f32.xlu2 %v5997_v4  ;;  %v5924_v22 = vpop.xlane.xlu0 %5923  ;;  %5938 = vadd.xlane.f32.xlu1 %v5937_v58  ;;  %v5753_v2 = vadd.f32 %v7737_v15, %v5752_v63 }
 0x666   : > { %v5959_v48 = vmul.f32 %v5924_v22, %v10422_v36 }
 0x667   : > { %v5874_v32 = vpop.f32.mrf.mxu1  ;;  %v5757_v8 = vsel %vm5756_vm0, %v7737_v15, %v5753_v2 }
 0x668   : > { %v10809_v16 = vsub.f32 %v10758_v33, %v5959_v48  ;;  %v5898_v24 = vadd.f32 %v5874_v32, %v10433_v60  ;;  %v5762_v37 = vsel %vm5759_vm6, %v5761_v23, %v5757_v8 }
 0x669   : > { %v5776_v60 = vmul.f32 %v5762_v37, %v5514_v56 }
 0x66a   : > { %v5985_v52 = vmul.f32 %v10809_v16, %v10809_v16  ;;  %v10815_v54 = vadd.f32 %v10734_v51, %v5898_v24 }
 0x66b   : > { %v5799_v47 = vpack.c.bf16 %v5776_v60, %v5776_v60 }
 0x66c   : > { %v6000_v46 = vsel %vm5104_vm14, %v5985_v52, 0.0  ;;  %v5940_v9 = vsel %vm5104_vm14, %v10815_v54, 0.0 }
 0x66d   : > { %6001 = vadd.xlane.f32.xlu0 %v6000_v46  ;;  %5941 = vadd.xlane.f32.xlu2 %v5940_v9  ;;  %v5927_v42 = vpop.xlane.xlu1 %5926 }
 0x66e   : > { %v5960_v0 = vmul.f32 %v5927_v42, %v10422_v36  ;;  %5886 = vmatmul.bf16.gmra.mxu1 %v5799_v47 }
 0x66f   : > { %v5877_v12 = vpop.f32.mrf.mxu1 }
 0x670   : > { %v10822_v43 = vsub.f32 %v10767_v20, %v5960_v0  ;;  %v5899_v3 = vadd.f32 %v5877_v12, %v10445_v53 }
 0x672   : > { %v5986_v14 = vmul.f32 %v10822_v43, %v10822_v43  ;;  %v10828_v25 = vadd.f32 %v10734_v51, %v5899_v3 }
 0x674   : > { %v6003_v17 = vsel %vm5104_vm14, %v5986_v14, 0.0  ;;  %v5943_v6 = vsel %vm5104_vm14, %v10828_v25, 0.0 }
 0x675   : > { %v5930_v27 = vpop.xlane.xlu2 %5929  ;;  %6004 = vadd.xlane.f32.xlu0 %v6003_v17  ;;  %5944 = vadd.xlane.f32.xlu2 %v5943_v6  ;;  %v7526_v17 = vld [vmem:[%s11325_s5 + $0x18] sm:$0xff] }
 0x676   : > { %v5961_v11 = vmul.f32 %v5930_v27, %v10422_v36  ;;  %6288 = vmatpush.bf16.msra.mxu2 %v7526_v17 }
 0x677   : > { %v5879_v53 = vpop.f32.mrf.mxu1 }
 0x678   : > { %v10835_v62 = vsub.f32 %v10775_v10, %v5961_v11  ;;  %v5900_v30 = vadd.f32 %v5879_v53, %v10457_v7 }
 0x67a   : > { %v5987_v1 = vmul.f32 %v10835_v62, %v10835_v62  ;;  %v10841_v29 = vadd.f32 %v10734_v51, %v5900_v30 }
 0x67c   : > { %v6006_v57 = vsel %vm5104_vm14, %v5987_v1, 0.0  ;;  %v5946_v35 = vsel %vm5104_vm14, %v10841_v29, 0.0 }
 0x67d   : > { %6007 = vadd.xlane.f32.xlu1 %v6006_v57  ;;  %v5933_v56 = vpop.xlane.xlu0 %5932  ;;  %5947 = vadd.xlane.f32.xlu0 %v5946_v35 }
 0x67e   : > { %v5962_v28 = vmul.f32 %v5933_v56, %v10422_v36 }
 0x67f   : > { %v5882_v7 = vpop.f32.mrf.mxu1 }
 0x680   : > { %v10848_v19 = vsub.f32 %v10783_v26, %v5962_v28  ;;  %v5901_v5 = vadd.f32 %v5882_v7, %v10469_v31 }
 0x682   : > { %v5988_v38 = vmul.f32 %v10848_v19, %v10848_v19  ;;  %v10854_v13 = vadd.f32 %v10734_v51, %v5901_v5 }
 0x684   : > { %v6009_v39 = vsel %vm5104_vm14, %v5988_v38, 0.0  ;;  %v5949_v15 = vsel %vm5104_vm14, %v10854_v13, 0.0 }
 0x685   : > { %v5936_v61 = vpop.xlane.xlu1 %5935  ;;  %6010 = vadd.xlane.f32.xlu1 %v6009_v39  ;;  %5950 = vadd.xlane.f32.xlu0 %v5949_v15 }
 0x686   : > { %v5963_v40 = vmul.f32 %v5936_v61, %v10422_v36 }
 0x687   : > { %v5884_v31 = vpop.f32.mrf.mxu1 }
 0x688   : > { %v10861_v44 = vsub.f32 %v10789_v21, %v5963_v40  ;;  %v5902_v4 = vadd.f32 %v5884_v31, %v10481_v59  ;;  %v7525_v31 = vld [vmem:[%s11325_s5 + $0x10] sm:$0xff] }
 0x689   : > { %6289 = vmatpush.bf16.msra.mxu2 %v7525_v31 }
 0x68a   : > { %v5989_v58 = vmul.f32 %v10861_v44, %v10861_v44  ;;  %v10867_v22 = vadd.f32 %v10734_v51, %v5902_v4 }
 0x68c   : > { %v6012_v55 = vsel %vm5104_vm14, %v5989_v58, 0.0  ;;  %v5952_v48 = vsel %vm5104_vm14, %v10867_v22, 0.0 }
 0x68d   : > { %6013 = vadd.xlane.f32.xlu2 %v6012_v55  ;;  %5953 = vadd.xlane.f32.xlu1 %v5952_v48 }
 0x6d8   : > { %v5999_v49 = vpop.xlane.xlu2 %5998  ;;  %v5939_v45 = vpop.xlane.xlu1 %5938 }
 0x6d9   : > { %v6036_v63 = vmul.f32 %v5999_v49, %v10422_v36  ;;  %v5964_v32 = vmul.f32 %v5939_v45, %v10422_v36 }
 0x6db   : > { %v6049_v59 = vadd.f32 1e-06, %v6036_v63  ;;  %v10875_v24 = vsub.f32 %v10802_v50, %v5964_v32 }
 0x6dd   : > { %7738 = vrsqrt.f32 %v6049_v59  ;;  %v5990_v2 = vmul.f32 %v10875_v24, %v10875_v24  ;;  %vm6068_vm3 = vweird.f32 %v6049_v59 }
 0x6df   : > { %v6015_v52 = vsel %vm5104_vm14, %v5990_v2, 0.0 }
 0x6e0   : > { %v6002_v23 = vpop.xlane.xlu0 %6001  ;;  %v5942_v8 = vpop.xlane.xlu2 %5941  ;;  %6016 = vadd.xlane.f32.xlu2 %v6015_v52 }
 0x6e1   : > { %v6037_v46 = vmul.f32 %v6002_v23, %v10422_v36  ;;  %v5965_v37 = vmul.f32 %v5942_v8, %v10422_v36 }
 0x6e3   : > { %v7739_v9 = vpop.eup %7738  ;;  %v6050_v60 = vadd.f32 1e-06, %v6037_v46  ;;  %v10883_v0 = vsub.f32 %v10815_v54, %v5965_v37 }
 0x6e4   : > { %v6063_v42 = vmul.f32 %v7739_v9, %v6049_v59  ;;  %vm6069_vm15 = vweird.f32 %v7739_v9 }
 0x6e5   : > { %7740 = vrsqrt.f32 %v6050_v60  ;;  %v5991_v12 = vmul.f32 %v10883_v0, %v10883_v0  ;;  %vm10898_vm9 = vmor %vm6068_vm3, %vm6069_vm15  ;;  %vm6078_vm10 = vweird.f32 %v6050_v60 }
 0x6e6   : > { %v6064_v47 = vmul.f32 %v7739_v9, %v6063_v42 }
 0x6e7   : > { %v6018_v14 = vsel %vm5104_vm14, %v5991_v12, 0.0 }
 0x6e8   : > { %v6065_v3 = vmul.f32 0.5, %v6064_v47  ;;  %6019 = vadd.xlane.f32.xlu0 %v6018_v14  ;;  %v6005_v27 = vpop.xlane.xlu0 %6004  ;;  %v5945_v30 = vpop.xlane.xlu2 %5944 }
 0x6e9   : > { %v6038_v11 = vmul.f32 %v6005_v27, %v10422_v36  ;;  %v5966_v56 = vmul.f32 %v5945_v30, %v10422_v36 }
 0x6ea   : > { %v6066_v6 = vsub.f32 1.5, %v6065_v3 }
 0x6eb   : > { %v7741_v53 = vpop.eup %7740  ;;  %v10893_v35 = vadd.f32 1e-06, %v6038_v11  ;;  %v10896_v7 = vsub.f32 %v10828_v25, %v5966_v56  ;;  %v5887_v38 = vpop.f32.mrf.mxu1 }
 0x6ec   : > { %v6067_v1 = vmul.f32 %v7739_v9, %v6066_v6  ;;  %v6073_v57 = vmul.f32 %v7741_v53, %v6050_v60  ;;  %v5903_v40 = vadd.f32 %v5887_v38, %v10547_v34  ;;  %vm6079_vm13 = vweird.f32 %v7741_v53  ;;  %v10919_v34 = vld [vmem:[%s11328_s8 + $0x6] ss:$0 sm:$0xff] }
 0x6ed   : > { %7742 = vrsqrt.f32 %v10893_v35  ;;  %v5992_v15 = vmul.f32 %v10896_v7, %v10896_v7  ;;  %vm6080_vm7 = vmor %vm6078_vm10, %vm6079_vm13  ;;  %vm6088_vm12 = vweird.f32 %v10893_v35 }
 0x6ee   : > { %v6074_v28 = vmul.f32 %v7741_v53, %v6073_v57  ;;  %v6071_v39 = vsel %vm10898_vm9, %v7739_v9, %v6067_v1  ;;  %v10912_v55 = vadd.f32 %v10734_v51, %v5903_v40 }
 0x6ef   : > { %v6021_v49 = vsel %vm5104_vm14, %v5992_v15, 0.0  ;;  %v6192_v63 = vmul.f32 %v6071_v39, %v10796_v18  ;;  %v10930_v18 = vld [vmem:[%s11328_s8 + $0x7] ss:$0 sm:$0xff] }
 0x6f0   : > { %v6075_v61 = vmul.f32 0.5, %v6074_v28  ;;  %v6008_v4 = vpop.xlane.xlu1 %6007  ;;  %6022 = vadd.xlane.f32.xlu1 %v6021_v49  ;;  %v5948_v45 = vpop.xlane.xlu0 %5947  ;;  %v5955_v51 = vsel %vm5104_vm14, %v10912_v55, 0.0 }
 0x6f1   : > { %v6039_v48 = vmul.f32 %v6008_v4, %v10422_v36  ;;  %v5967_v2 = vmul.f32 %v5948_v45, %v10422_v36  ;;  %5956 = vadd.xlane.f32.xlu0 %v5955_v51  ;;  %v6207_v46 = vmul.f32 %v10919_v34, %v6192_v63 }
 0x6f2   : > { %v6076_v58 = vsub.f32 1.5, %v6075_v61 }
 0x6f3   : > { %v6052_v59 = vadd.f32 1e-06, %v6039_v48  ;;  %v7743_v52 = vpop.eup %7742  ;;  %v10935_v9 = vsub.f32 %v10841_v29, %v5967_v2  ;;  %v5889_v60 = vpop.f32.mrf.mxu1  ;;  %v6222_v27 = vadd.f32 %v10930_v18, %v6207_v46 }
 0x6f4   : > { %v6077_v32 = vmul.f32 %v7741_v53, %v6076_v58  ;;  %v6083_v8 = vmul.f32 %v7743_v52, %v10893_v35  ;;  %vm6089_vm2 = vweird.f32 %v7743_v52 }
 0x6f5   : > { %7744 = vrsqrt.f32 %v6052_v59  ;;  %v5993_v3 = vmul.f32 %v10935_v9, %v10935_v9  ;;  %vm6090_vm4 = vmor %vm6088_vm12, %vm6089_vm2  ;;  %vm6098_vm8 = vweird.f32 %v6052_v59 }
 0x6f6   : > { %v6081_v23 = vsel %vm6080_vm7, %v7741_v53, %v6077_v32  ;;  %v6084_v42 = vmul.f32 %v7743_v52, %v6083_v8 }
 0x6f7   : > { %v6193_v37 = vmul.f32 %v6081_v23, %v10809_v16  ;;  %v6024_v16 = vsel %vm5104_vm14, %v5993_v3, 0.0 }
 0x6f8   : > { %v6011_v12 = vpop.xlane.xlu1 %6010  ;;  %v6085_v14 = vmul.f32 0.5, %v6084_v42  ;;  %v5951_v11 = vpop.xlane.xlu0 %5950  ;;  %6025 = vadd.xlane.f32.xlu2 %v6024_v16 }
 0x6f9   : > { %v6208_v47 = vmul.f32 %v10919_v34, %v6193_v37  ;;  %v6040_v17 = vmul.f32 %v6011_v12, %v10422_v36  ;;  %v5968_v57 = vmul.f32 %v5951_v11, %v10422_v36 }
 0x6fa   : > { %v6086_v30 = vsub.f32 1.5, %v6085_v14 }
 0x6fb   : > { %v6223_v6 = vadd.f32 %v10930_v18, %v6208_v47  ;;  %v7745_v53 = vpop.eup %7744  ;;  %v6053_v1 = vadd.f32 1e-06, %v6040_v17  ;;  %v10946_v38 = vsub.f32 %v10854_v13, %v5968_v57 }
 0x6fc   : > { %v6093_v56 = vmul.f32 %v7745_v53, %v6052_v59  ;;  %v6087_v5 = vmul.f32 %v7743_v52, %v6086_v30  ;;  %vm6099_vm5 = vweird.f32 %v7745_v53 }
 0x6fd   : > { %v6240_v28 = vpack.c.bf16 %v6223_v6, %v6222_v27  ;;  %7746 = vrsqrt.f32 %v6053_v1  ;;  %v5994_v61 = vmul.f32 %v10946_v38, %v10946_v38  ;;  %vm6100_vm11 = vmor %vm6098_vm8, %vm6099_vm5  ;;  %vm6108_vm0 = vweird.f32 %v6053_v1 }
 0x6fe   : > { %v6094_v39 = vmul.f32 %v7745_v53, %v6093_v56  ;;  %v6091_v40 = vsel %vm6090_vm4, %v7743_v52, %v6087_v5 }
 0x6ff   : > { %7406 = vmatmul.msk.bf16.vlgmr.msra.gmra.mxu2 %vm5104_vm14, %v6240_v28  ;;  %v6027_v58 = vsel %vm5104_vm14, %v5994_v61, 0.0  ;;  %v6194_v35 = vmul.f32 %v6091_v40, %v10822_v43 }
 0x700   : > { %v6095_v15 = vmul.f32 0.5, %v6094_v39  ;;  %v6014_v31 = vpop.xlane.xlu2 %6013  ;;  %v5954_v49 = vpop.xlane.xlu1 %5953  ;;  %6028 = vadd.xlane.f32.xlu1 %v6027_v58 }
 0x701   : > { %v6041_v4 = vmul.f32 %v6014_v31, %v10422_v36  ;;  %v5969_v32 = vmul.f32 %v5954_v49, %v10422_v36  ;;  %v6209_v43 = vmul.f32 %v10919_v34, %v6194_v35 }
 0x702   : > { %v6096_v48 = vsub.f32 1.5, %v6095_v15 }
 0x703   : > { %v7747_v63 = vpop.eup %7746  ;;  %v6054_v45 = vadd.f32 1e-06, %v6041_v4  ;;  %v10957_v52 = vsub.f32 %v10867_v22, %v5969_v32  ;;  %v6224_v3 = vadd.f32 %v10930_v18, %v6209_v43 }
 0x704   : > { %v6097_v51 = vmul.f32 %v7745_v53, %v6096_v48  ;;  %v6103_v2 = vmul.f32 %v7747_v63, %v6053_v1  ;;  %vm6109_vm1 = vweird.f32 %v7747_v63 }
 0x705   : > { %7748 = vrsqrt.f32 %v6054_v45  ;;  %v5995_v37 = vmul.f32 %v10957_v52, %v10957_v52  ;;  %vm6110_vm6 = vmor %vm6108_vm0, %vm6109_vm1  ;;  %vm6118_vm3 = vweird.f32 %v6054_v45 }
 0x706   : > { %v6101_v23 = vsel %vm6100_vm11, %v7745_v53, %v6097_v51  ;;  %v6104_v8 = vmul.f32 %v7747_v63, %v6103_v2 }
 0x707   : > { %v6195_v46 = vmul.f32 %v6101_v23, %v10835_v62  ;;  %v6030_v42 = vsel %vm5104_vm14, %v5995_v37, 0.0 }
 0x708   : > { %v6105_v60 = vmul.f32 0.5, %v6104_v8  ;;  %6031 = vadd.xlane.f32.xlu2 %v6030_v42 }
 0x709   : > { %v6210_v59 = vmul.f32 %v10919_v34, %v6195_v46 }
 0x70a   : > { %v6106_v47 = vsub.f32 1.5, %v6105_v60 }
 0x70b   : > { %v7749_v12 = vpop.eup %7748  ;;  %v6225_v14 = vadd.f32 %v10930_v18, %v6210_v59 }
 0x70c   : > { %v6107_v17 = vmul.f32 %v7747_v63, %v6106_v47  ;;  %v6113_v62 = vmul.f32 %v7749_v12, %v6054_v45  ;;  %vm6119_vm15 = vweird.f32 %v7749_v12 }
 0x70d   : > { %v6241_v27 = vpack.c.bf16 %v6225_v14, %v6224_v3  ;;  %vm6120_vm9 = vmor %vm6118_vm3, %vm6119_vm15 }
 0x70e   : > { %v6114_v6 = vmul.f32 %v7749_v12, %v6113_v62  ;;  %v6111_v16 = vsel %vm6110_vm6, %v7747_v63, %v6107_v17 }
 0x70f   : > { %7407 = vmatmul.msk.bf16.gmra.mxu2 %vm5104_vm14, %v6241_v27  ;;  %v6196_v30 = vmul.f32 %v6111_v16, %v10848_v19 }
 0x710   : > { %v6115_v11 = vmul.f32 0.5, %v6114_v6 }
 0x711   : > { %v6211_v5 = vmul.f32 %v10919_v34, %v6196_v30 }
 0x712   : > { %v6116_v53 = vsub.f32 1.5, %v6115_v11 }
 0x713   : > { %v6226_v39 = vadd.f32 %v10930_v18, %v6211_v5 }
 0x714   : > { %v6117_v57 = vmul.f32 %v7749_v12, %v6116_v53 }
 0x716   : > { %v6121_v56 = vsel %vm6120_vm9, %v7749_v12, %v6117_v57 }
 0x717   : > { %v6197_v28 = vmul.f32 %v6121_v56, %v10861_v44 }
 0x719   : > { %v6212_v1 = vmul.f32 %v10919_v34, %v6197_v28 }
 0x71b   : > { %v6227_v61 = vadd.f32 %v10930_v18, %v6212_v1 }
 0x71d   : > { %v6242_v40 = vpack.c.bf16 %v6227_v61, %v6226_v39 }
 0x71f   : > { %7408 = vmatmul.msk.bf16.gmra.mxu2 %vm5104_vm14, %v6242_v40 }
 0x753   : > { %v6017_v15 = vpop.xlane.xlu2 %6016 }
 0x754   : > { %v6042_v19 = vmul.f32 %v6017_v15, %v10422_v36 }
 0x756   : > { %v6055_v31 = vadd.f32 1e-06, %v6042_v19 }
 0x758   : > { %7750 = vrsqrt.f32 %v6055_v31  ;;  %vm6128_vm10 = vweird.f32 %v6055_v31 }
 0x75b   : > { %v6020_v4 = vpop.xlane.xlu0 %6019 }
 0x75c   : > { %v6043_v58 = vmul.f32 %v6020_v4, %v10422_v36 }
 0x75e   : > { %v7751_v44 = vpop.eup %7750  ;;  %v6056_v48 = vadd.f32 1e-06, %v6043_v58 }
 0x75f   : > { %v6123_v49 = vmul.f32 %v7751_v44, %v6055_v31  ;;  %vm6129_vm13 = vweird.f32 %v7751_v44 }
 0x760   : > { %7752 = vrsqrt.f32 %v6056_v48  ;;  %vm6130_vm7 = vmor %vm6128_vm10, %vm6129_vm13  ;;  %vm6138_vm12 = vweird.f32 %v6056_v48 }
 0x761   : > { %v6124_v63 = vmul.f32 %v7751_v44, %v6123_v49 }
 0x763   : > { %v6125_v35 = vmul.f32 0.5, %v6124_v63  ;;  %v6023_v32 = vpop.xlane.xlu1 %6022  ;;  %v10998_v63 = vld [vmem:[%s11328_s8 + $0x8] ss:$0 sm:$0xff] }
 0x764   : > { %v6044_v2 = vmul.f32 %v6023_v32, %v10422_v36  ;;  %v5957_v46 = vpop.xlane.xlu0 %5956 }
 0x765   : > { %v6126_v45 = vsub.f32 1.5, %v6125_v35  ;;  %v5970_v43 = vmul.f32 %v5957_v46, %v10422_v36 }
 0x766   : > { %v7753_v51 = vpop.eup %7752  ;;  %v6057_v37 = vadd.f32 1e-06, %v6044_v2 }
 0x767   : > { %v6127_v23 = vmul.f32 %v7751_v44, %v6126_v45  ;;  %v6133_v8 = vmul.f32 %v7753_v51, %v6056_v48  ;;  %v10980_v42 = vsub.f32 %v10912_v55, %v5970_v43  ;;  %vm6139_vm2 = vweird.f32 %v7753_v51 }
 0x768   : > { %7754 = vrsqrt.f32 %v6057_v37  ;;  %vm6140_vm4 = vmor %vm6138_vm12, %vm6139_vm2  ;;  %vm6148_vm11 = vweird.f32 %v6057_v37 }
 0x769   : > { %v6134_v60 = vmul.f32 %v7753_v51, %v6133_v8  ;;  %v6131_v59 = vsel %vm6130_vm7, %v7751_v44, %v6127_v23  ;;  %v5996_v12 = vmul.f32 %v10980_v42, %v10980_v42 }
 0x76a   : > { %v6198_v14 = vmul.f32 %v6131_v59, %v10875_v24 }
 0x76b   : > { %v6135_v47 = vmul.f32 0.5, %v6134_v60  ;;  %v6026_v17 = vpop.xlane.xlu2 %6025  ;;  %v6033_v62 = vsel %vm5104_vm14, %v5996_v12, 0.0 }
 0x76c   : > { %v6045_v6 = vmul.f32 %v6026_v17, %v10422_v36  ;;  %6034 = vadd.xlane.f32.xlu0 %v6033_v62  ;;  %v6213_v56 = vmul.f32 %v10919_v34, %v6198_v14 }
 0x76d   : > { %v6136_v3 = vsub.f32 1.5, %v6135_v47 }
 0x76e   : > { %v7755_v16 = vpop.eup %7754  ;;  %v6058_v30 = vadd.f32 1e-06, %v6045_v6  ;;  %v6228_v39 = vadd.f32 %v10930_v18, %v6213_v56 }
 0x76f   : > { %v6137_v27 = vmul.f32 %v7753_v51, %v6136_v3  ;;  %v6143_v53 = vmul.f32 %v7755_v16, %v6057_v37  ;;  %vm6149_vm5 = vweird.f32 %v7755_v16 }
 0x770   : > { %7756 = vrsqrt.f32 %v6058_v30  ;;  %vm6150_vm1 = vmor %vm6148_vm11, %vm6149_vm5  ;;  %vm6158_vm0 = vweird.f32 %v6058_v30 }
 0x771   : > { %v6141_v11 = vsel %vm6140_vm4, %v7753_v51, %v6137_v27  ;;  %v6144_v28 = vmul.f32 %v7755_v16, %v6143_v53  ;;  %v7534_v53 = vld [vmem:[%s11326_s6 + $0x78] sm:$0xff] }
 0x772   : > { %v6199_v57 = vmul.f32 %v6141_v11, %v10883_v0  ;;  %6657 = vmatpush.bf16.msra.mxu3 %v7534_v53 }
 0x773   : > { %v6029_v5 = vpop.xlane.xlu1 %6028  ;;  %v6145_v40 = vmul.f32 0.5, %v6144_v28 }
 0x774   : > { %v6214_v24 = vmul.f32 %v10919_v34, %v6199_v57  ;;  %v6046_v1 = vmul.f32 %v6029_v5, %v10422_v36 }
 0x775   : > { %v6146_v0 = vsub.f32 1.5, %v6145_v40 }
 0x776   : > { %v6229_v61 = vadd.f32 %v10930_v18, %v6214_v24  ;;  %v6059_v15 = vadd.f32 1e-06, %v6046_v1  ;;  %v7757_v31 = vpop.eup %7756 }
 0x777   : > { %v6153_v4 = vmul.f32 %v7757_v31, %v6058_v30  ;;  %v6147_v35 = vmul.f32 %v7755_v16, %v6146_v0  ;;  %vm6159_vm8 = vweird.f32 %v7757_v31 }
 0x778   : > { %v6243_v19 = vpack.c.bf16 %v6229_v61, %v6228_v39  ;;  %7758 = vrsqrt.f32 %v6059_v15  ;;  %vm6160_vm6 = vmor %vm6158_vm0, %vm6159_vm8  ;;  %vm6168_vm9 = vweird.f32 %v6059_v15 }
 0x779   : > { %v6154_v58 = vmul.f32 %v7757_v31, %v6153_v4  ;;  %v6151_v43 = vsel %vm6150_vm1, %v7755_v16, %v6147_v35 }
 0x77a   : > { %7409 = vmatmul.msk.bf16.gmra.mxu2 %vm5104_vm14, %v6243_v19  ;;  %v6200_v12 = vmul.f32 %v6151_v43, %v10896_v7 }
 0x77b   : > { %v6032_v44 = vpop.xlane.xlu2 %6031  ;;  %v6155_v48 = vmul.f32 0.5, %v6154_v58 }
 0x77c   : > { %v6047_v49 = vmul.f32 %v6032_v44, %v10422_v36  ;;  %v6215_v16 = vmul.f32 %v10919_v34, %v6200_v12 }
 0x77d   : > { %v6156_v32 = vsub.f32 1.5, %v6155_v48 }
 0x77e   : > { %v7759_v45 = vpop.eup %7758  ;;  %v6060_v51 = vadd.f32 1e-06, %v6047_v49  ;;  %v6230_v57 = vadd.f32 %v10930_v18, %v6215_v16 }
 0x77f   : > { %v6163_v2 = vmul.f32 %v7759_v45, %v6059_v15  ;;  %v6157_v8 = vmul.f32 %v7757_v31, %v6156_v32  ;;  %vm6169_vm15 = vweird.f32 %v7759_v45  ;;  %v7532_v15 = vld [vmem:[%s11326_s6 + $0x68] sm:$0xff] }
 0x780   : > { %7760 = vrsqrt.f32 %v6060_v51  ;;  %vm6170_vm13 = vmor %vm6168_vm9, %vm6169_vm15  ;;  %vm6178_vm10 = vweird.f32 %v6060_v51 }
 0x781   : > { %v6164_v60 = vmul.f32 %v7759_v45, %v6163_v2  ;;  %v6161_v59 = vsel %vm6160_vm6, %v7757_v31, %v6157_v8  ;;  %v7533_v31 = vld [vmem:[%s11326_s6 + $0x70] sm:$0xff]  ;;  %v7531_v8 = vld [vmem:[%s11326_s6 + $0x60] sm:$0xff] }
 0x782   : > { %v6291_v23 = vpop.f32.mrf.mxu2  ;;  %v6201_v3 = vmul.f32 %v6161_v59, %v10935_v9  ;;  %6658 = vmatpush.bf16.msra.mxu3 %v7533_v31 }
 0x783   : > { %v11001_v46 = vadd.f32 %v10998_v63, %v6291_v23  ;;  %v6165_v37 = vmul.f32 0.5, %v6164_v60 }
 0x784   : > { %v6216_v11 = vmul.f32 %v10919_v34, %v6201_v3 }
 0x785   : > { %v7413_v47 = vmul.f32 -1.442695, %v11001_v46  ;;  %v6166_v27 = vsub.f32 1.5, %v6165_v37 }
 0x786   : > { %v7761_v14 = vpop.eup %7760  ;;  %v6231_v56 = vadd.f32 %v10930_v18, %v6216_v11  ;;  %6659 = vmatpush.bf16.msra.mxu3 %v7532_v15 }
 0x787   : > { %7762 = vpow2.f32 %v7413_v47  ;;  %v6173_v17 = vmul.f32 %v7761_v14, %v6060_v51  ;;  %v6167_v5 = vmul.f32 %v7759_v45, %v6166_v27  ;;  %vm6179_vm3 = vweird.f32 %v7761_v14  ;;  %v7530_v47 = vld [vmem:[%s11326_s6 + $0x58] sm:$0xff] }
 0x788   : > { %v6244_v1 = vpack.c.bf16 %v6231_v56, %v6230_v57  ;;  %vm6180_vm7 = vmor %vm6178_vm10, %vm6179_vm3 }
 0x789   : > { %v6174_v7 = vmul.f32 %v7761_v14, %v6173_v17  ;;  %v6171_v40 = vsel %vm6170_vm13, %v7759_v45, %v6167_v5 }
 0x78a   : > { %v6293_v62 = vpop.f32.mrf.mxu2  ;;  %7410 = vmatmul.msk.bf16.gmra.mxu2 %vm5104_vm14, %v6244_v1  ;;  %v6202_v48 = vmul.f32 %v6171_v40, %v10946_v38  ;;  %6660 = vmatpush.bf16.msra.mxu3 %v7531_v8 }
 0x78b   : > { %v11007_v6 = vadd.f32 %v10998_v63, %v6293_v62  ;;  %v6175_v28 = vmul.f32 0.5, %v6174_v7 }
 0x78c   : > { %v6217_v2 = vmul.f32 %v10919_v34, %v6202_v48 }
 0x78d   : > { %v7763_v30 = vpop.eup %7762  ;;  %v7414_v9 = vmul.f32 -1.442695, %v11007_v6  ;;  %v6176_v39 = vsub.f32 1.5, %v6175_v28 }
 0x78e   : > { %v11017_v24 = vadd.f32 1.0, %v7763_v30  ;;  %v6232_v60 = vadd.f32 %v10930_v18, %v6217_v2  ;;  %6661 = vmatpush.bf16.msra.mxu3 %v7530_v47  ;;  %v7529_v30 = vld [vmem:[%s11326_s6 + $0x50] sm:$0xff] }
 0x78f   : > { %7764 = vpow2.f32 %v7414_v9  ;;  %v6177_v61 = vmul.f32 %v7761_v14, %v6176_v39 }
 0x790   : > { %7766 = vrcp.f32 %v11017_v24  ;;  %v6388_v16 = vand.u32 2147483648, %v11017_v24  ;;  %vm6382_vm12 = vweird.f32 %v11017_v24  ;;  %v6386_v53 = vand.u32 2147483647, %v11017_v24 }
 0x791   : > { %v6181_v4 = vsel %vm6180_vm7, %v7761_v14, %v6177_v61  ;;  %v7528_v61 = vld [vmem:[%s11326_s6 + $0x48] sm:$0xff] }
 0x792   : > { %v6296_v19 = vpop.f32.mrf.mxu2  ;;  %v6203_v49 = vmul.f32 %v6181_v4, %v10957_v52  ;;  %v6389_v1 = vor.u32 1.1754944e-38, %v6388_v16  ;;  %6662 = vmatpush.bf16.msra.mxu3 %v7529_v30  ;;  %vm6387_vm11 = vcmp.eq.f32.partialorder %v6386_v53, 8.507059e+37 }
 0x793   : > { %v11025_v0 = vadd.f32 %v10998_v63, %v6296_v19 }
 0x794   : > { %v6218_v23 = vmul.f32 %v10919_v34, %v6203_v49 }
 0x795   : > { %v7765_v58 = vpop.eup %7764  ;;  %v7415_v45 = vmul.f32 -1.442695, %v11025_v0 }
 0x796   : > { %v7767_v44 = vpop.eup %7766  ;;  %v6365_v35 = vadd.f32 1.0, %v7765_v58  ;;  %v6233_v59 = vadd.f32 %v10930_v18, %v6218_v23  ;;  %6663 = vmatpush.bf16.msra.mxu3 %v7528_v61 }
 0x797   : > { %v6378_v32 = vmul.f32 %v7767_v44, %v11017_v24  ;;  %vm6383_vm2 = vweird.f32 %v7767_v44 }
 0x798   : > { %7768 = vrcp.f32 %v6365_v35  ;;  %v6245_v37 = vpack.c.bf16 %v6233_v59, %v6232_v60  ;;  %v6403_v7 = vand.u32 2147483648, %v6365_v35  ;;  %vm11058_vm4 = vmor %vm6382_vm12, %vm6383_vm2  ;;  %v6401_v56 = vand.u32 2147483647, %v6365_v35 }
 0x799   : > { %v6379_v51 = vsub.f32 1.0, %v6378_v32  ;;  %7770 = vpow2.f32 %v7415_v45  ;;  %vm6397_vm8 = vweird.f32 %v6365_v35  ;;  %v7527_v32 = vld [vmem:[%s11326_s6 + $0x40] sm:$0xff] }
 0x79a   : > { %v6298_v38 = vpop.f32.mrf.mxu2  ;;  %7411 = vmatmul.msk.bf16.gmra.mxu2 %vm5104_vm14, %v6245_v37  ;;  %v6404_v19 = vor.u32 1.1754944e-38, %v6403_v7  ;;  %vm6402_vm0 = vcmp.eq.f32.partialorder %v6401_v56, 8.507059e+37  ;;  %6664 = vmatpush.bf16.msra.mxu3 %v7527_v32 }
 0x79b   : > { %v6380_v43 = vmul.f32 %v7767_v44, %v6379_v51  ;;  %v11040_v52 = vadd.f32 %v10998_v63, %v6298_v38 }
 0x79d   : > { %v7416_v3 = vmul.f32 -1.442695, %v11040_v52  ;;  %v6381_v62 = vadd.f32 %v7767_v44, %v6380_v43 }
 0x79e   : > { %v7769_v12 = vpop.eup %7768 }
 0x79f   : > { %v7771_v14 = vpop.eup %7770  ;;  %v6393_v17 = vmul.f32 %v7769_v12, %v6365_v35  ;;  %7772 = vpow2.f32 %v7416_v3  ;;  %vm6398_vm5 = vweird.f32 %v7769_v12  ;;  %v6385_v5 = vsel %vm11058_vm4, %v7767_v44, %v6381_v62 }
 0x7a0   : > { %v11048_v27 = vadd.f32 1.0, %v7771_v14  ;;  %vm6399_vm1 = vmor %vm6397_vm8, %vm6398_vm5  ;;  %v6390_v4 = vsel %vm6387_vm11, %v6389_v1, %v6385_v5 }
 0x7a1   : > { %v6394_v11 = vsub.f32 1.0, %v6393_v17  ;;  %v6572_v45 = vmul.f32 %v6390_v4, %v11001_v46 }
 0x7a2   : > { %7774 = vrcp.f32 %v11048_v27  ;;  %v6301_v28 = vpop.f32.mrf.mxu2  ;;  %vm6412_vm15 = vweird.f32 %v11048_v27  ;;  %v6416_v3 = vand.u32 2147483647, %v11048_v27 }
 0x7a3   : > { %v6395_v57 = vmul.f32 %v7769_v12, %v6394_v11  ;;  %v11065_v24 = vadd.f32 %v10998_v63, %v6301_v28 }
 0x7a4   : > { %vm6417_vm13 = vcmp.eq.f32.partialorder %v6416_v3, 8.507059e+37 }
 0x7a5   : > { %v6396_v39 = vadd.f32 %v7769_v12, %v6395_v57  ;;  %v7773_v40 = vpop.eup %7772  ;;  %v7417_v31 = vmul.f32 -1.442695, %v11065_v24 }
 0x7a6   : > { %v6367_v15 = vadd.f32 1.0, %v7773_v40 }
 0x7a7   : > { %v6400_v58 = vsel %vm6399_vm1, %v7769_v12, %v6396_v39  ;;  %7776 = vpow2.f32 %v7417_v31  ;;  %v6418_v12 = vand.u32 2147483648, %v11048_v27 }
 0x7a8   : > { %v7775_v44 = vpop.eup %7774  ;;  %v6405_v48 = vsel %vm6402_vm0, %v6404_v19, %v6400_v58  ;;  %7778 = vrcp.f32 %v6367_v15  ;;  %v6433_v14 = vand.u32 2147483648, %v6367_v15  ;;  %v6431_v16 = vand.u32 2147483647, %v6367_v15 }
 0x7a9   : > { %v6573_v49 = vmul.f32 %v6405_v48, %v11007_v6  ;;  %v6408_v35 = vmul.f32 %v7775_v44, %v11048_v27  ;;  %vm6413_vm6 = vweird.f32 %v7775_v44  ;;  %v6419_v11 = vor.u32 1.1754944e-38, %v6418_v12 }
 0x7aa   : > { %v6303_v2 = vpop.f32.mrf.mxu2  ;;  %vm6414_vm3 = vmor %vm6412_vm15, %vm6413_vm6  ;;  %vm6427_vm10 = vweird.f32 %v6367_v15  ;;  %v6434_v57 = vor.u32 1.1754944e-38, %v6433_v14  ;;  %vm6432_vm2 = vcmp.eq.f32.partialorder %v6431_v16, 8.507059e+37 }
 0x7ab   : > { %v6409_v51 = vsub.f32 1.0, %v6408_v35  ;;  %v6602_v23 = vpack.c.bf16 %v6573_v49, %v6572_v45  ;;  %v11078_v8 = vadd.f32 %v10998_v63, %v6303_v2 }
 0x7ad   : > { %v6410_v38 = vmul.f32 %v7775_v44, %v6409_v51  ;;  %v7777_v43 = vpop.eup %7776  ;;  %v7418_v6 = vmul.f32 -1.442695, %v11078_v8  ;;  %6665 = vmatmul.bf16.vlgmr.msra.gmra.mxu3 %v6602_v23 }
 0x7ae   : > { %v7779_v60 = vpop.eup %7778  ;;  %v6368_v59 = vadd.f32 1.0, %v7777_v43 }
 0x7af   : > { %v6411_v47 = vadd.f32 %v7775_v44, %v6410_v38  ;;  %v6423_v46 = vmul.f32 %v7779_v60, %v6367_v15  ;;  %7780 = vpow2.f32 %v7418_v6  ;;  %vm6428_vm9 = vweird.f32 %v7779_v60 }
 0x7b0   : > { %7782 = vrcp.f32 %v6368_v59  ;;  %vm6429_vm7 = vmor %vm6427_vm10, %vm6428_vm9  ;;  %v6448_v15 = vand.u32 2147483648, %v6368_v59  ;;  %vm6442_vm4 = vweird.f32 %v6368_v59 }
 0x7b1   : > { %v6424_v37 = vsub.f32 1.0, %v6423_v46  ;;  %v6415_v17 = vsel %vm6414_vm3, %v7775_v44, %v6411_v47  ;;  %v6446_v44 = vand.u32 2147483647, %v6368_v59 }
 0x7b2   : > { %v6420_v9 = vsel %vm6417_vm13, %v6419_v11, %v6415_v17  ;;  %v6449_v32 = vor.u32 1.1754944e-38, %v6448_v15 }
 0x7b3   : > { %v6425_v62 = vmul.f32 %v7779_v60, %v6424_v37  ;;  %v6574_v1 = vmul.f32 %v6420_v9, %v11025_v0  ;;  %vm6447_vm11 = vcmp.eq.f32.partialorder %v6446_v44, 8.507059e+37 }
 0x7b5   : > { %v7781_v53 = vpop.eup %7780  ;;  %v6426_v7 = vadd.f32 %v7779_v60, %v6425_v62 }
 0x7b6   : > { %v7783_v30 = vpop.eup %7782  ;;  %v6369_v56 = vadd.f32 1.0, %v7781_v53 }
 0x7b7   : > { %v6430_v28 = vsel %vm6429_vm7, %v7779_v60, %v6426_v7  ;;  %v6438_v27 = vmul.f32 %v7783_v30, %v6368_v59  ;;  %vm6443_vm12 = vweird.f32 %v7783_v30 }
 0x7b8   : > { %v6435_v5 = vsel %vm6432_vm2, %v6434_v57, %v6430_v28  ;;  %7784 = vrcp.f32 %v6369_v56  ;;  %vm6444_vm5 = vmor %vm6442_vm4, %vm6443_vm12  ;;  %v6463_v49 = vand.u32 2147483648, %v6369_v56  ;;  %v6461_v0 = vand.u32 2147483647, %v6369_v56 }
 0x7b9   : > { %v6575_v39 = vmul.f32 %v6435_v5, %v11040_v52  ;;  %v6439_v61 = vsub.f32 1.0, %v6438_v27  ;;  %vm6457_vm1 = vweird.f32 %v6369_v56 }
 0x7ba   : > { %v6464_v2 = vor.u32 1.1754944e-38, %v6463_v49  ;;  %vm6462_vm6 = vcmp.eq.f32.partialorder %v6461_v0, 8.507059e+37 }
 0x7bb   : > { %v6440_v40 = vmul.f32 %v7783_v30, %v6439_v61  ;;  %v6603_v19 = vpack.c.bf16 %v6575_v39, %v6574_v1 }
 0x7bd   : > { %v6441_v4 = vadd.f32 %v7783_v30, %v6440_v40  ;;  %6670 = vmatmul.bf16.gmra.mxu3 %v6603_v19 }
 0x7be   : > { %v7785_v31 = vpop.eup %7784 }
 0x7bf   : > { %v6453_v58 = vmul.f32 %v7785_v31, %v6369_v56  ;;  %v6445_v35 = vsel %vm6444_vm5, %v7783_v30, %v6441_v4  ;;  %vm6458_vm8 = vweird.f32 %v7785_v31 }
 0x7c0   : > { %v6450_v51 = vsel %vm6447_vm11, %v6449_v32, %v6445_v35  ;;  %vm6459_vm0 = vmor %vm6457_vm1, %vm6458_vm8 }
 0x7c1   : > { %v6454_v48 = vsub.f32 1.0, %v6453_v58  ;;  %v6576_v43 = vmul.f32 %v6450_v51, %v11065_v24 }
 0x7c3   : > { %v6455_v45 = vmul.f32 %v7785_v31, %v6454_v48 }
 0x7c5   : > { %v6456_v52 = vadd.f32 %v7785_v31, %v6455_v45 }
 0x7c7   : > { %v6460_v23 = vsel %vm6459_vm0, %v7785_v31, %v6456_v52 }
 0x7c8   : > { %v6465_v38 = vsel %vm6462_vm6, %v6464_v2, %v6460_v23 }
 0x7c9   : > { %v6577_v6 = vmul.f32 %v6465_v38, %v11078_v8 }
 0x7cb   : > { %v6604_v60 = vpack.c.bf16 %v6577_v6, %v6576_v43 }
 0x7cd   : > { %6675 = vmatmul.bf16.gmra.mxu3 %v6604_v60 }
 0x7df   : > { %v6035_v59 = vpop.xlane.xlu0 %6034 }
 0x7e0   : > { %v6048_v47 = vmul.f32 %v6035_v59, %v10422_v36 }
 0x7e2   : > { %v6061_v46 = vadd.f32 1e-06, %v6048_v47 }
 0x7e4   : > { %7786 = vrsqrt.f32 %v6061_v46  ;;  %vm6188_vm3 = vweird.f32 %v6061_v46 }
 0x7ea   : > { %v7787_v12 = vpop.eup %7786 }
 0x7eb   : > { %v6183_v3 = vmul.f32 %v7787_v12, %v6061_v46  ;;  %vm6189_vm15 = vweird.f32 %v7787_v12 }
 0x7ec   : > { %vm6190_vm9 = vmor %vm6188_vm3, %vm6189_vm15 }
 0x7ed   : > { %v6184_v37 = vmul.f32 %v7787_v12, %v6183_v3 }
 0x7ef   : > { %v6185_v14 = vmul.f32 0.5, %v6184_v37 }
 0x7f1   : > { %v6186_v17 = vsub.f32 1.5, %v6185_v14 }
 0x7f3   : > { %v6187_v62 = vmul.f32 %v7787_v12, %v6186_v17 }
 0x7f5   : > { %v6191_v16 = vsel %vm6190_vm9, %v7787_v12, %v6187_v62 }
 0x7f6   : > { %v6204_v24 = vmul.f32 %v6191_v16, %v10980_v42 }
 0x7f8   : > { %v6219_v8 = vmul.f32 %v10919_v34, %v6204_v24 }
 0x7fa   : > { %v6234_v36 = vadd.f32 %v10930_v18, %v6219_v8 }
 0x7fc   : > { %v6246_v30 = vpack.c.bf16 %v6234_v36, %v6234_v36 }
 0x7fd   : > { %v6306_v11 = vpop.f32.mrf.mxu2 }
 0x7fe   : > { %v6307_v53 = vadd.f32 %v10998_v63, %v6306_v11  ;;  %7412 = vmatmul.msk.bf16.gmra.mxu2 %vm5104_vm14, %v6246_v30 }
 0x800   : > { %v7419_v7 = vmul.f32 -1.442695, %v6307_v53 }
 0x802   : > { %7788 = vpow2.f32 %v7419_v7 }
 0x805   : > { %v6308_v9 = vpop.f32.mrf.mxu2 }
 0x806   : > { %v6309_v57 = vadd.f32 %v10998_v63, %v6308_v9 }
 0x808   : > { %v7789_v56 = vpop.eup %7788  ;;  %v7420_v28 = vmul.f32 -1.442695, %v6309_v57 }
 0x809   : > { %v6370_v27 = vadd.f32 1.0, %v7789_v56 }
 0x80a   : > { %7790 = vpow2.f32 %v7420_v28 }
 0x80b   : > { %7792 = vrcp.f32 %v6370_v27  ;;  %vm6472_vm7 = vweird.f32 %v6370_v27  ;;  %v6478_v52 = vand.u32 2147483648, %v6370_v27  ;;  %v6476_v23 = vand.u32 2147483647, %v6370_v27 }
 0x80d   : > { %v6311_v39 = vpop.f32.mrf.mxu2  ;;  %v6479_v59 = vor.u32 1.1754944e-38, %v6478_v52  ;;  %vm6477_vm8 = vcmp.eq.f32.partialorder %v6476_v23, 8.507059e+37 }
 0x80e   : > { %v11096_v18 = vadd.f32 %v10998_v63, %v6311_v39 }
 0x810   : > { %v7791_v42 = vpop.eup %7790  ;;  %v7421_v40 = vmul.f32 -1.442695, %v11096_v18 }
 0x811   : > { %v7793_v34 = vpop.eup %7792  ;;  %v6371_v5 = vadd.f32 1.0, %v7791_v42 }
 0x812   : > { %v6468_v1 = vmul.f32 %v7793_v34, %v6370_v27  ;;  %vm6473_vm13 = vweird.f32 %v7793_v34 }
 0x813   : > { %7794 = vrcp.f32 %v6371_v5  ;;  %v6491_v48 = vand.u32 2147483647, %v6371_v5  ;;  %v6493_v49 = vand.u32 2147483648, %v6371_v5  ;;  %vm11103_vm2 = vmor %vm6472_vm7, %vm6473_vm13  ;;  %vm6487_vm12 = vweird.f32 %v6371_v5 }
 0x814   : > { %v6469_v61 = vsub.f32 1.0, %v6468_v1  ;;  %7796 = vpow2.f32 %v7421_v40 }
 0x815   : > { %v6313_v58 = vpop.f32.mrf.mxu2  ;;  %v6494_v43 = vor.u32 1.1754944e-38, %v6493_v49  ;;  %vm6492_vm5 = vcmp.eq.f32.partialorder %v6491_v48, 8.507059e+37 }
 0x816   : > { %v6470_v31 = vmul.f32 %v7793_v34, %v6469_v61  ;;  %v11100_v44 = vadd.f32 %v10998_v63, %v6313_v58 }
 0x818   : > { %v6471_v45 = vadd.f32 %v7793_v34, %v6470_v31  ;;  %v7422_v32 = vmul.f32 -1.442695, %v11100_v44 }
 0x819   : > { %v7795_v19 = vpop.eup %7794 }
 0x81a   : > { %v6483_v4 = vmul.f32 %v7795_v19, %v6371_v5  ;;  %v7797_v35 = vpop.eup %7796  ;;  %vm6488_vm10 = vweird.f32 %v7795_v19  ;;  %7798 = vpow2.f32 %v7422_v32  ;;  %v6475_v6 = vsel %vm11103_vm2, %v7793_v34, %v6471_v45  ;;  %v11123_v34 = vld [vmem:[%s11328_s8 + $0x9] ss:$0 sm:$0xff] }
 0x81b   : > { %v6372_v51 = vadd.f32 1.0, %v7797_v35  ;;  %vm6489_vm4 = vmor %vm6487_vm12, %vm6488_vm10  ;;  %v6480_v3 = vsel %vm6477_vm8, %v6479_v59, %v6475_v6 }
 0x81c   : > { %v6484_v15 = vsub.f32 1.0, %v6483_v4  ;;  %v6578_v24 = vmul.f32 %v6480_v3, %v6307_v53 }
 0x81d   : > { %7800 = vrcp.f32 %v6372_v51  ;;  %v6316_v46 = vpop.f32.mrf.mxu2  ;;  %v6508_v5 = vand.u32 2147483648, %v6372_v51  ;;  %vm6502_vm1 = vweird.f32 %v6372_v51  ;;  %v6506_v61 = vand.u32 2147483647, %v6372_v51 }
 0x81e   : > { %v6485_v0 = vmul.f32 %v7795_v19, %v6484_v15  ;;  %v11110_v12 = vadd.f32 %v10998_v63, %v6316_v46 }
 0x81f   : > { %v6509_v35 = vor.u32 1.1754944e-38, %v6508_v5  ;;  %vm6507_vm3 = vcmp.eq.f32.partialorder %v6506_v61, 8.507059e+37 }
 0x820   : > { %v6486_v38 = vadd.f32 %v7795_v19, %v6485_v0  ;;  %v7799_v37 = vpop.eup %7798  ;;  %v7423_v17 = vmul.f32 -1.442695, %v11110_v12 }
 0x821   : > { %v6373_v16 = vadd.f32 1.0, %v7799_v37 }
 0x822   : > { %v6490_v60 = vsel %vm6489_vm4, %v7795_v19, %v6486_v38  ;;  %7802 = vpow2.f32 %v7423_v17 }
 0x823   : > { %v6495_v47 = vsel %vm6492_vm5, %v6494_v43, %v6490_v60  ;;  %v7801_v62 = vpop.eup %7800  ;;  %7804 = vrcp.f32 %v6373_v16  ;;  %v6523_v40 = vand.u32 2147483648, %v6373_v16  ;;  %v6521_v58 = vand.u32 2147483647, %v6373_v16 }
 0x824   : > { %v6579_v14 = vmul.f32 %v6495_v47, %v6309_v57  ;;  %v6498_v8 = vmul.f32 %v7801_v62, %v6372_v51  ;;  %vm6503_vm11 = vweird.f32 %v7801_v62  ;;  %vm6517_vm15 = vweird.f32 %v6373_v16 }
 0x825   : > { %v6318_v7 = vpop.f32.mrf.mxu2  ;;  %vm11126_vm0 = vmor %vm6502_vm1, %vm6503_vm11  ;;  %vm6522_vm13 = vcmp.eq.f32.partialorder %v6521_v58, 8.507059e+37 }
 0x826   : > { %v6499_v11 = vsub.f32 1.0, %v6498_v8  ;;  %v6605_v36 = vpack.c.bf16 %v6579_v14, %v6578_v24  ;;  %v11114_v30 = vadd.f32 %v10998_v63, %v6318_v7 }
 0x828   : > { %6680 = vmatmul.bf16.gmra.mxu3 %v6605_v36  ;;  %v6500_v9 = vmul.f32 %v7801_v62, %v6499_v11  ;;  %v7803_v56 = vpop.eup %7802  ;;  %v7424_v28 = vmul.f32 -1.442695, %v11114_v30 }
 0x829   : > { %v7805_v57 = vpop.eup %7804  ;;  %v11117_v27 = vadd.f32 1.0, %v7803_v56 }
 0x82a   : > { %v6513_v42 = vmul.f32 %v7805_v57, %v6373_v16  ;;  %7806 = vpow2.f32 %v7424_v28  ;;  %v6501_v53 = vadd.f32 %v7801_v62, %v6500_v9  ;;  %vm6518_vm6 = vweird.f32 %v7805_v57 }
 0x82b   : > { %7808 = vrcp.f32 %v11117_v27  ;;  %vm6519_vm9 = vmor %vm6517_vm15, %vm6518_vm6  ;;  %v6538_v24 = vand.u32 2147483648, %v11117_v27  ;;  %vm6532_vm7 = vweird.f32 %v11117_v27 }
 0x82c   : > { %v6514_v1 = vsub.f32 1.0, %v6513_v42  ;;  %v6505_v15 = vsel %vm11126_vm0, %v7801_v62, %v6501_v53 }
 0x82d   : > { %v6510_v51 = vsel %vm6507_vm3, %v6509_v35, %v6505_v15 }
 0x82e   : > { %v6515_v4 = vmul.f32 %v7805_v57, %v6514_v1  ;;  %v6580_v59 = vmul.f32 %v6510_v51, %v11096_v18 }
 0x830   : > { %v6666_v39 = vpop.f32.mrf.mxu3  ;;  %v7807_v49 = vpop.eup %7806  ;;  %v6516_v45 = vadd.f32 %v7805_v57, %v6515_v4 }
 0x831   : > { %v6700_v19 = vadd.f32 %v6666_v39, %v10741_v41  ;;  %v7809_v0 = vpop.eup %7808  ;;  %v6524_v41 = vor.u32 1.1754944e-38, %v6523_v40  ;;  %v6375_v32 = vadd.f32 1.0, %v7807_v49 }
 0x832   : > { %v6520_v2 = vsel %vm6519_vm9, %v7805_v57, %v6516_v45  ;;  %v6528_v23 = vmul.f32 %v7809_v0, %v11117_v27  ;;  %vm6533_vm10 = vweird.f32 %v7809_v0  ;;  %v6539_v57 = vor.u32 1.1754944e-38, %v6538_v24 }
 0x833   : > { %v11133_v48 = vadd.f32 %v11123_v34, %v6700_v19  ;;  %v6525_v38 = vsel %vm6522_vm13, %v6524_v41, %v6520_v2  ;;  %7810 = vrcp.f32 %v6375_v32  ;;  %vm6534_vm2 = vmor %vm6532_vm7, %vm6533_vm10  ;;  %v6551_v36 = vand.u32 2147483647, %v6375_v32 }
 0x834   : > { %v6581_v43 = vmul.f32 %v6525_v38, %v11100_v44  ;;  %v6529_v6 = vsub.f32 1.0, %v6528_v23  ;;  %v6553_v7 = vand.u32 2147483648, %v6375_v32  ;;  %vm6547_vm5 = vweird.f32 %v6375_v32 }
 0x835   : > { %v7474_v52 = vmul.f32 -1.442695, %v11133_v48  ;;  %vm6552_vm11 = vcmp.eq.f32.partialorder %v6551_v36, 8.507059e+37 }
 0x836   : > { %v6530_v46 = vmul.f32 %v7809_v0, %v6529_v6  ;;  %v6606_v37 = vpack.c.bf16 %v6581_v43, %v6580_v59  ;;  %v6554_v1 = vor.u32 1.1754944e-38, %v6553_v7  ;;  %v7536_v6 = vld [vmem:[%s11327_s7 + $0x8] sm:$0xff] }
 0x837   : > { %7812 = vpow2.f32 %v7474_v52  ;;  %7040 = vmatpush.bf16.msra.mxu0 %v7536_v6 }
 0x838   : > { %v6668_v60 = vpop.f32.mrf.mxu3  ;;  %6685 = vmatmul.bf16.gmra.mxu3 %v6606_v37  ;;  %v6531_v16 = vadd.f32 %v7809_v0, %v6530_v46 }
 0x839   : > { %v6701_v47 = vadd.f32 %v6668_v60, %v10758_v33  ;;  %v7811_v14 = vpop.eup %7810  ;;  %v6536_v33 = vand.u32 2147483647, %v11117_v27 }
 0x83a   : > { %v6543_v44 = vmul.f32 %v7811_v14, %v6375_v32  ;;  %v6535_v9 = vsel %vm6534_vm2, %v7809_v0, %v6531_v16  ;;  %vm6548_vm12 = vweird.f32 %v7811_v14 }
 0x83b   : > { %v11141_v3 = vadd.f32 %v11123_v34, %v6701_v47  ;;  %vm6537_vm4 = vcmp.eq.f32.partialorder %v6536_v33, 8.507059e+37  ;;  %vm6549_vm8 = vmor %vm6547_vm5, %vm6548_vm12 }
 0x83c   : > { %v6544_v18 = vsub.f32 1.0, %v6543_v44  ;;  %v6540_v5 = vsel %vm6537_vm4, %v6539_v57, %v6535_v9 }
 0x83d   : > { %v7475_v17 = vmul.f32 -1.442695, %v11141_v3  ;;  %v7813_v62 = vpop.eup %7812 }
 0x83e   : > { %v11145_v8 = vadd.f32 1.0, %v7813_v62  ;;  %v6545_v56 = vmul.f32 %v7811_v14, %v6544_v18 }
 0x83f   : > { %7814 = vpow2.f32 %v7475_v17 }
 0x840   : > { %v6671_v11 = vpop.f32.mrf.mxu3  ;;  %7816 = vrcp.f32 %v11145_v8  ;;  %v6546_v42 = vadd.f32 %v7811_v14, %v6545_v56  ;;  %vm6785_vm0 = vweird.f32 %v11145_v8  ;;  %v6789_v60 = vand.u32 2147483647, %v11145_v8 }
 0x841   : > { %v6702_v28 = vadd.f32 %v6671_v11, %v10767_v20  ;;  %v6582_v20 = vmul.f32 %v6540_v5, %v11110_v12 }
 0x842   : > { %v6550_v39 = vsel %vm6549_vm8, %v7811_v14, %v6546_v42  ;;  %vm6790_vm9 = vcmp.eq.f32.partialorder %v6789_v60, 8.507059e+37 }
 0x843   : > { %v11152_v53 = vadd.f32 %v11123_v34, %v6702_v28  ;;  %v6555_v31 = vsel %vm6552_vm11, %v6554_v1, %v6550_v39 }
 0x844   : > { %v6583_v4 = vmul.f32 %v6555_v31, %v11114_v30 }
 0x845   : > { %v7815_v27 = vpop.eup %7814  ;;  %v7476_v40 = vmul.f32 -1.442695, %v11152_v53 }
 0x846   : > { %v6768_v61 = vadd.f32 1.0, %v7815_v27  ;;  %v7817_v19 = vpop.eup %7816  ;;  %v6607_v45 = vpack.c.bf16 %v6583_v4, %v6582_v20  ;;  %v7535_v27 = vld [vmem:[%s11327_s7] sm:$0xff] }
 0x847   : > { %v6781_v58 = vmul.f32 %v7817_v19, %v11145_v8  ;;  %vm6786_vm1 = vweird.f32 %v7817_v19  ;;  %7041 = vmatpush.bf16.msra.mxu0 %v7535_v27 }
 0x848   : > { %7818 = vrcp.f32 %v6768_v61  ;;  %v6673_v15 = vpop.f32.mrf.mxu3  ;;  %6690 = vmatmul.bf16.gmra.mxu3 %v6607_v45  ;;  %v6804_v59 = vand.u32 2147483647, %v6768_v61  ;;  %v6806_v47 = vand.u32 2147483648, %v6768_v61  ;;  %vm11173_vm6 = vmor %vm6785_vm0, %vm6786_vm1  ;;  %vm6800_vm3 = vweird.f32 %v6768_v61 }
 0x849   : > { %7820 = vpow2.f32 %v7476_v40  ;;  %v6782_v49 = vsub.f32 1.0, %v6781_v58  ;;  %v6703_v35 = vadd.f32 %v6673_v15, %v10775_v10  ;;  %v6791_v10 = vand.u32 2147483648, %v11145_v8 }
 0x84a   : > { %vm6805_vm10 = vcmp.eq.f32.partialorder %v6804_v59, 8.507059e+37  ;;  %v6807_v24 = vor.u32 1.1754944e-38, %v6806_v47 }
 0x84b   : > { %v6783_v0 = vmul.f32 %v7817_v19, %v6782_v49  ;;  %v11160_v41 = vadd.f32 %v11123_v34, %v6703_v35  ;;  %v6792_v17 = vor.u32 1.1754944e-38, %v6791_v10 }
 0x84d   : > { %v7477_v52 = vmul.f32 -1.442695, %v11160_v41  ;;  %v6784_v30 = vadd.f32 %v7817_v19, %v6783_v0 }
 0x84e   : > { %v7819_v32 = vpop.eup %7818 }
 0x84f   : > { %v7821_v12 = vpop.eup %7820  ;;  %v6796_v51 = vmul.f32 %v7819_v32, %v6768_v61  ;;  %7822 = vpow2.f32 %v7477_v52  ;;  %vm6801_vm15 = vweird.f32 %v7819_v32 }
 0x850   : > { %v11163_v2 = vadd.f32 1.0, %v7821_v12  ;;  %v6676_v23 = vpop.f32.mrf.mxu3  ;;  %vm6802_vm13 = vmor %vm6800_vm3, %vm6801_vm15 }
 0x851   : > { %v6797_v38 = vsub.f32 1.0, %v6796_v51  ;;  %v6704_v43 = vadd.f32 %v6676_v23, %v10783_v26  ;;  %v6788_v26 = vsel %vm11173_vm6, %v7817_v19, %v6784_v30 }
 0x852   : > { %7824 = vrcp.f32 %v11163_v2  ;;  %v6793_v8 = vsel %vm6790_vm9, %v6792_v17, %v6788_v26  ;;  %vm6815_vm2 = vweird.f32 %v11163_v2  ;;  %v6819_v20 = vand.u32 2147483647, %v11163_v2 }
 0x853   : > { %v6798_v37 = vmul.f32 %v7819_v32, %v6797_v38  ;;  %v11178_v14 = vadd.f32 %v11123_v34, %v6704_v43  ;;  %v6975_v28 = vmul.f32 %v6793_v8, %v11133_v48 }
 0x854   : > { %vm6820_vm5 = vcmp.eq.f32.partialorder %v6819_v20, 8.507059e+37 }
 0x855   : > { %v6799_v62 = vadd.f32 %v7819_v32, %v6798_v37  ;;  %v7478_v16 = vmul.f32 -1.442695, %v11178_v14  ;;  %v7823_v44 = vpop.eup %7822 }
 0x856   : > { %v6770_v18 = vadd.f32 1.0, %v7823_v44 }
 0x857   : > { %v6803_v33 = vsel %vm6802_vm13, %v7819_v32, %v6799_v62  ;;  %7826 = vpow2.f32 %v7478_v16 }
 0x858   : > { %v7825_v11 = vpop.eup %7824  ;;  %v6808_v36 = vsel %vm6805_vm10, %v6807_v24, %v6803_v33  ;;  %v6678_v7 = vpop.f32.mrf.mxu3  ;;  %7828 = vrcp.f32 %v6770_v18  ;;  %v6836_v58 = vand.u32 2147483648, %v6770_v18  ;;  %v6834_v35 = vand.u32 2147483647, %v6770_v18 }
 0x859   : > { %v6976_v9 = vmul.f32 %v6808_v36, %v11141_v3  ;;  %v6811_v56 = vmul.f32 %v7825_v11, %v11163_v2  ;;  %v6705_v57 = vadd.f32 %v6678_v7, %v10789_v21  ;;  %vm6816_vm7 = vweird.f32 %v7825_v11 }
 0x85a   : > { %v6821_v21 = vand.u32 2147483648, %v11163_v2  ;;  %vm6817_vm12 = vmor %vm6815_vm2, %vm6816_vm7  ;;  %vm6830_vm8 = vweird.f32 %v6770_v18  ;;  %v6837_v51 = vor.u32 1.1754944e-38, %v6836_v58  ;;  %vm6835_vm1 = vcmp.eq.f32.partialorder %v6834_v35, 8.507059e+37 }
 0x85b   : > { %v6812_v42 = vsub.f32 1.0, %v6811_v56  ;;  %v6992_v5 = vpack.c.bf16 %v6976_v9, %v6975_v28  ;;  %v11191_v1 = vadd.f32 %v11123_v34, %v6705_v57 }
 0x85c   : > { %v6822_v45 = vor.u32 1.1754944e-38, %v6821_v21 }
 0x85d   : > { %v7827_v39 = vpop.eup %7826  ;;  %v6813_v61 = vmul.f32 %v7825_v11, %v6812_v42  ;;  %v7479_v40 = vmul.f32 -1.442695, %v11191_v1  ;;  %7495 = vmatmul.msk.bf16.vlgmr.msra.gmra.mxu0 %vm5104_vm14, %v6992_v5 }
 0x85e   : > { %v6771_v3 = vadd.f32 1.0, %v7827_v39  ;;  %v7829_v19 = vpop.eup %7828 }
 0x85f   : > { %v6814_v31 = vadd.f32 %v7825_v11, %v6813_v61  ;;  %v6826_v48 = vmul.f32 %v7829_v19, %v6770_v18  ;;  %vm6831_vm4 = vweird.f32 %v7829_v19 }
 0x860   : > { %7830 = vrcp.f32 %v6771_v3  ;;  %vm6832_vm11 = vmor %vm6830_vm8, %vm6831_vm4  ;;  %v6851_v26 = vand.u32 2147483648, %v6771_v3  ;;  %vm6845_vm6 = vweird.f32 %v6771_v3  ;;  %v6849_v17 = vand.u32 2147483647, %v6771_v3 }
 0x861   : > { %7832 = vpow2.f32 %v7479_v40  ;;  %v6827_v4 = vsub.f32 1.0, %v6826_v48  ;;  %v6818_v15 = vsel %vm6817_vm12, %v7825_v11, %v6814_v31 }
 0x862   : > { %v6823_v12 = vsel %vm6820_vm5, %v6822_v45, %v6818_v15  ;;  %vm6850_vm9 = vcmp.eq.f32.partialorder %v6849_v17, 8.507059e+37 }
 0x863   : > { %v6828_v49 = vmul.f32 %v7829_v19, %v6827_v4  ;;  %v6977_v43 = vmul.f32 %v6823_v12, %v11152_v53 }
 0x865   : > { %v6829_v32 = vadd.f32 %v7829_v19, %v6828_v49 }
 0x866   : > { %v7831_v0 = vpop.eup %7830 }
 0x867   : > { %v7833_v52 = vpop.eup %7832  ;;  %v6841_v30 = vmul.f32 %v7831_v0, %v6771_v3  ;;  %v6833_v23 = vsel %vm6832_vm11, %v7829_v19, %v6829_v32  ;;  %vm6846_vm0 = vweird.f32 %v7831_v0 }
 0x868   : > { %v6772_v2 = vadd.f32 1.0, %v7833_v52  ;;  %v6838_v10 = vsel %vm6835_vm1, %v6837_v51, %v6833_v23  ;;  %vm6847_vm15 = vmor %vm6845_vm6, %vm6846_vm0 }
 0x869   : > { %v6842_v38 = vsub.f32 1.0, %v6841_v30  ;;  %v6978_v6 = vmul.f32 %v6838_v10, %v11160_v41  ;;  %v6852_v41 = vor.u32 1.1754944e-38, %v6851_v26 }
 0x86a   : > { %7834 = vrcp.f32 %v6772_v2  ;;  %v6866_v16 = vand.u32 2147483648, %v6772_v2  ;;  %v6864_v53 = vand.u32 2147483647, %v6772_v2  ;;  %vm6860_vm13 = vweird.f32 %v6772_v2 }
 0x86b   : > { %v6993_v60 = vpack.c.bf16 %v6978_v6, %v6977_v43  ;;  %v6843_v59 = vmul.f32 %v7831_v0, %v6842_v38 }
 0x86c   : > { %v6867_v18 = vor.u32 1.1754944e-38, %v6866_v16  ;;  %vm6865_vm7 = vcmp.eq.f32.partialorder %v6864_v53, 8.507059e+37 }
 0x86d   : > { %7496 = vmatmul.msk.bf16.gmra.mxu0 %vm5104_vm14, %v6993_v60  ;;  %v6844_v46 = vadd.f32 %v7831_v0, %v6843_v59 }
 0x86f   : > { %v6848_v44 = vsel %vm6847_vm15, %v7831_v0, %v6844_v46 }
 0x870   : > { %v7835_v47 = vpop.eup %7834  ;;  %v6853_v33 = vsel %vm6850_vm9, %v6852_v41, %v6848_v44 }
 0x871   : > { %v6856_v37 = vmul.f32 %v7835_v47, %v6772_v2  ;;  %vm6861_vm3 = vweird.f32 %v7835_v47  ;;  %v6979_v7 = vmul.f32 %v6853_v33, %v11178_v14 }
 0x872   : > { %vm6862_vm10 = vmor %vm6860_vm13, %vm6861_vm3 }
 0x873   : > { %v6857_v62 = vsub.f32 1.0, %v6856_v37 }
 0x875   : > { %v6858_v24 = vmul.f32 %v7835_v47, %v6857_v62 }
 0x877   : > { %v6859_v8 = vadd.f32 %v7835_v47, %v6858_v24 }
 0x879   : > { %v6863_v11 = vsel %vm6862_vm10, %v7835_v47, %v6859_v8 }
 0x87a   : > { %v6868_v36 = vsel %vm6865_vm7, %v6867_v18, %v6863_v11 }
 0x87b   : > { %v6980_v9 = vmul.f32 %v6868_v36, %v11191_v1 }
 0x87d   : > { %v6994_v56 = vpack.c.bf16 %v6980_v9, %v6979_v7 }
 0x87f   : > { %7497 = vmatmul.msk.bf16.gmra.mxu0 %vm5104_vm14, %v6994_v56 }
 0x881   : > { %v6321_v28 = vpop.f32.mrf.mxu2 }
 0x882   : > { %v6322_v57 = vadd.f32 %v10998_v63, %v6321_v28 }
 0x884   : > { %v7425_v42 = vmul.f32 -1.442695, %v6322_v57 }
 0x886   : > { %7836 = vpow2.f32 %v7425_v42 }
 0x889   : > { %v6323_v27 = vpop.f32.mrf.mxu2 }
 0x88c   : > { %v7837_v5 = vpop.eup %7836 }
 0x88d   : > { %v6376_v39 = vadd.f32 1.0, %v7837_v5 }
 0x88f   : > { %7838 = vrcp.f32 %v6376_v39  ;;  %v6568_v19 = vand.u32 2147483648, %v6376_v39  ;;  %v6566_v14 = vand.u32 2147483647, %v6376_v39  ;;  %vm6562_vm12 = vweird.f32 %v6376_v39 }
 0x891   : > { %v6569_v48 = vor.u32 1.1754944e-38, %v6568_v19  ;;  %vm6567_vm5 = vcmp.eq.f32.partialorder %v6566_v14, 8.507059e+37 }
 0x895   : > { %v7839_v61 = vpop.eup %7838 }
 0x896   : > { %v6558_v3 = vmul.f32 %v7839_v61, %v6376_v39  ;;  %vm6563_vm2 = vweird.f32 %v7839_v61 }
 0x897   : > { %vm6564_vm4 = vmor %vm6562_vm12, %vm6563_vm2 }
 0x898   : > { %v6559_v40 = vsub.f32 1.0, %v6558_v3 }
 0x89a   : > { %v6560_v31 = vmul.f32 %v7839_v61, %v6559_v40 }
 0x89c   : > { %v6561_v1 = vadd.f32 %v7839_v61, %v6560_v31 }
 0x89e   : > { %v6565_v21 = vsel %vm6564_vm4, %v7839_v61, %v6561_v1 }
 0x89f   : > { %v6570_v63 = vsel %vm6567_vm5, %v6569_v48, %v6565_v21  ;;  %v11242_v21 = vld [vmem:[%s11328_s8 + $0xa] ss:$0 sm:$0xff] }
 0x8a0   : > { %v6584_v20 = vmul.f32 %v6570_v63, %v6322_v57 }
 0x8a2   : > { %v6608_v4 = vpack.c.bf16 %v6584_v20, %v6584_v20 }
 0x8a4   : > { %6695 = vmatmul.bf16.gmra.mxu3 %v6608_v4 }
 0x8ab   : > { %v6681_v58 = vpop.f32.mrf.mxu3 }
 0x8ac   : > { %v6706_v15 = vadd.f32 %v6681_v58, %v10802_v50 }
 0x8ae   : > { %v11207_v49 = vadd.f32 %v11123_v34, %v6706_v15 }
 0x8b0   : > { %v7480_v35 = vmul.f32 -1.442695, %v11207_v49 }
 0x8b2   : > { %7840 = vpow2.f32 %v7480_v35 }
 0x8b3   : > { %v6683_v45 = vpop.f32.mrf.mxu3 }
 0x8b4   : > { %v6707_v0 = vadd.f32 %v6683_v45, %v10815_v54 }
 0x8b6   : > { %v6722_v32 = vadd.f32 %v11123_v34, %v6707_v0 }
 0x8b8   : > { %v7841_v52 = vpop.eup %7840  ;;  %v7481_v12 = vmul.f32 -1.442695, %v6722_v32 }
 0x8b9   : > { %v6773_v51 = vadd.f32 1.0, %v7841_v52 }
 0x8ba   : > { %7842 = vpow2.f32 %v7481_v12 }
 0x8bb   : > { %7844 = vrcp.f32 %v6773_v51  ;;  %v6686_v30 = vpop.f32.mrf.mxu3  ;;  %v6881_v53 = vand.u32 2147483648, %v6773_v51  ;;  %vm6875_vm1 = vweird.f32 %v6773_v51  ;;  %v6879_v33 = vand.u32 2147483647, %v6773_v51 }
 0x8bc   : > { %v6708_v23 = vadd.f32 %v6686_v30, %v10828_v25 }
 0x8bd   : > { %v6882_v9 = vor.u32 1.1754944e-38, %v6881_v53  ;;  %vm6880_vm9 = vcmp.eq.f32.partialorder %v6879_v33, 8.507059e+37 }
 0x8be   : > { %v11214_v38 = vadd.f32 %v11123_v34, %v6708_v23 }
 0x8c0   : > { %v7843_v50 = vpop.eup %7842  ;;  %v7482_v54 = vmul.f32 -1.442695, %v11214_v38 }
 0x8c1   : > { %v7845_v2 = vpop.eup %7844  ;;  %v6774_v10 = vadd.f32 1.0, %v7843_v50 }
 0x8c2   : > { %v6871_v43 = vmul.f32 %v7845_v2, %v6773_v51  ;;  %vm6876_vm8 = vweird.f32 %v7845_v2 }
 0x8c3   : > { %7846 = vrcp.f32 %v6774_v10  ;;  %v6688_v60 = vpop.f32.mrf.mxu3  ;;  %v6896_v44 = vand.u32 2147483648, %v6774_v10  ;;  %vm6877_vm0 = vmor %vm6875_vm1, %vm6876_vm8  ;;  %vm6890_vm6 = vweird.f32 %v6774_v10 }
 0x8c4   : > { %v6872_v6 = vsub.f32 1.0, %v6871_v43  ;;  %7848 = vpow2.f32 %v7482_v54  ;;  %v6709_v59 = vadd.f32 %v6688_v60, %v10841_v29  ;;  %v6894_v29 = vand.u32 2147483647, %v6774_v10 }
 0x8c5   : > { %v6897_v7 = vor.u32 1.1754944e-38, %v6896_v44 }
 0x8c6   : > { %v6873_v46 = vmul.f32 %v7845_v2, %v6872_v6  ;;  %v11219_v37 = vadd.f32 %v11123_v34, %v6709_v59  ;;  %vm6895_vm3 = vcmp.eq.f32.partialorder %v6894_v29, 8.507059e+37 }
 0x8c8   : > { %v7483_v26 = vmul.f32 -1.442695, %v11219_v37  ;;  %v6874_v16 = vadd.f32 %v7845_v2, %v6873_v46 }
 0x8c9   : > { %v7847_v47 = vpop.eup %7846 }
 0x8ca   : > { %v6886_v25 = vmul.f32 %v7847_v47, %v6774_v10  ;;  %v7849_v17 = vpop.eup %7848  ;;  %7850 = vpow2.f32 %v7483_v26  ;;  %vm6891_vm11 = vweird.f32 %v7847_v47  ;;  %v6878_v36 = vsel %vm6877_vm0, %v7845_v2, %v6874_v16 }
 0x8cb   : > { %v11222_v24 = vadd.f32 1.0, %v7849_v17  ;;  %v6691_v8 = vpop.f32.mrf.mxu3  ;;  %vm6892_vm15 = vmor %vm6890_vm6, %vm6891_vm11  ;;  %v6883_v27 = vsel %vm6880_vm9, %v6882_v9, %v6878_v36 }
 0x8cc   : > { %v6887_v62 = vsub.f32 1.0, %v6886_v25  ;;  %v6710_v11 = vadd.f32 %v6691_v8, %v10854_v13  ;;  %v6981_v19 = vmul.f32 %v6883_v27, %v11207_v49 }
 0x8cd   : > { %7852 = vrcp.f32 %v11222_v24  ;;  %v6911_v45 = vand.u32 2147483648, %v11222_v24  ;;  %vm6905_vm10 = vweird.f32 %v11222_v24 }
 0x8ce   : > { %v6888_v41 = vmul.f32 %v7847_v47, %v6887_v62  ;;  %v11227_v28 = vadd.f32 %v11123_v34, %v6710_v11 }
 0x8cf   : > { %v6912_v50 = vor.u32 1.1754944e-38, %v6911_v45 }
 0x8d0   : > { %v6889_v18 = vadd.f32 %v7847_v47, %v6888_v41  ;;  %v7851_v57 = vpop.eup %7850  ;;  %v7484_v39 = vmul.f32 -1.442695, %v11227_v28 }
 0x8d1   : > { %v6776_v5 = vadd.f32 1.0, %v7851_v57 }
 0x8d2   : > { %v6893_v56 = vsel %vm6892_vm15, %v7847_v47, %v6889_v18 }
 0x8d3   : > { %v6898_v42 = vsel %vm6895_vm3, %v6897_v7, %v6893_v56  ;;  %v7853_v61 = vpop.eup %7852  ;;  %7854 = vrcp.f32 %v6776_v5  ;;  %v6693_v40 = vpop.f32.mrf.mxu3  ;;  %v6926_v12 = vand.u32 2147483648, %v6776_v5  ;;  %v6924_v23 = vand.u32 2147483647, %v6776_v5 }
 0x8d4   : > { %v6982_v13 = vmul.f32 %v6898_v42, %v6722_v32  ;;  %v6901_v3 = vmul.f32 %v7853_v61, %v11222_v24  ;;  %7856 = vpow2.f32 %v7484_v39  ;;  %v6711_v31 = vadd.f32 %v6693_v40, %v10867_v22 }
 0x8d5   : > { %vm6906_vm13 = vweird.f32 %v7853_v61  ;;  %v6909_v32 = vand.u32 2147483647, %v11222_v24  ;;  %vm6920_vm4 = vweird.f32 %v6776_v5  ;;  %v6927_v6 = vor.u32 1.1754944e-38, %v6926_v12 }
 0x8d6   : > { %v6902_v14 = vsub.f32 1.0, %v6901_v3  ;;  %v11237_v1 = vadd.f32 %v11123_v34, %v6711_v31  ;;  %v6995_v48 = vpack.c.bf16 %v6982_v13, %v6981_v19  ;;  %vm6907_vm7 = vmor %vm6905_vm10, %vm6906_vm13  ;;  %vm6925_vm8 = vcmp.eq.f32.partialorder %v6924_v23, 8.507059e+37 }
 0x8d7   : > { %vm6910_vm12 = vcmp.eq.f32.partialorder %v6909_v32, 8.507059e+37 }
 0x8d8   : > { %v6903_v63 = vmul.f32 %v7853_v61, %v6902_v14  ;;  %v7485_v20 = vmul.f32 -1.442695, %v11237_v1  ;;  %7498 = vmatmul.msk.bf16.gmra.mxu0 %vm5104_vm14, %v6995_v48 }
 0x8d9   : > { %v7855_v58 = vpop.eup %7854 }
 0x8da   : > { %v7043_v4 = vpop.f32.mrf.mxu0  ;;  %v7857_v15 = vpop.eup %7856  ;;  %v6904_v49 = vadd.f32 %v7853_v61, %v6903_v63  ;;  %v6916_v35 = vmul.f32 %v7855_v58, %v6776_v5  ;;  %7858 = vpow2.f32 %v7485_v20  ;;  %vm6921_vm2 = vweird.f32 %v7855_v58 }
 0x8db   : > { %v7044_v22 = vadd.f32 %v11242_v21, %v7043_v4  ;;  %v6777_v0 = vadd.f32 1.0, %v7857_v15  ;;  %vm6922_vm5 = vmor %vm6920_vm4, %vm6921_vm2 }
 0x8dc   : > { %v6917_v52 = vsub.f32 1.0, %v6916_v35  ;;  %v6908_v51 = vsel %vm6907_vm7, %v7853_v61, %v6904_v49 }
 0x8dd   : > { %7077 = vst [vmem:[%s11248_s26] sm:$0xff] %v7044_v22  ;;  %7860 = vrcp.f32 %v6777_v0  ;;  %v6913_v54 = vsel %vm6910_vm12, %v6912_v50, %v6908_v51  ;;  %v6941_v18 = vand.u32 2147483648, %v6777_v0  ;;  %vm6935_vm1 = vweird.f32 %v6777_v0 }
 0x8de   : > { %v6918_v30 = vmul.f32 %v7855_v58, %v6917_v52  ;;  %v6983_v26 = vmul.f32 %v6913_v54, %v11214_v38  ;;  %v6939_v11 = vand.u32 2147483647, %v6777_v0 }
 0x8df   : > { %v6942_v56 = vor.u32 1.1754944e-38, %v6941_v18 }
 0x8e0   : > { %v7859_v2 = vpop.eup %7858  ;;  %v6919_v10 = vadd.f32 %v7855_v58, %v6918_v30  ;;  %vm6940_vm15 = vcmp.eq.f32.partialorder %v6939_v11, 8.507059e+37 }
 0x8e1   : > { %v6778_v60 = vadd.f32 1.0, %v7859_v2 }
 0x8e2   : > { %v7045_v43 = vpop.f32.mrf.mxu0  ;;  %v6923_v47 = vsel %vm6922_vm5, %v7855_v58, %v6919_v10 }
 0x8e3   : > { %v7046_v59 = vadd.f32 %v11242_v21, %v7045_v43  ;;  %v7861_v46 = vpop.eup %7860  ;;  %v6928_v25 = vsel %vm6925_vm8, %v6927_v6, %v6923_v47  ;;  %7862 = vrcp.f32 %v6778_v60  ;;  %v6954_v9 = vand.u32 2147483647, %v6778_v60 }
 0x8e4   : > { %v6984_v17 = vmul.f32 %v6928_v25, %v11219_v37  ;;  %v6931_v62 = vmul.f32 %v7861_v46, %v6777_v0  ;;  %vm6936_vm11 = vweird.f32 %v7861_v46  ;;  %v6956_v37 = vand.u32 2147483648, %v6778_v60 }
 0x8e5   : > { %7078 = vst [vmem:[%s11248_s26 + $0x8] sm:$0xff] %v7046_v59  ;;  %vm6937_vm0 = vmor %vm6935_vm1, %vm6936_vm11  ;;  %vm6950_vm3 = vweird.f32 %v6778_v60  ;;  %vm6955_vm13 = vcmp.eq.f32.partialorder %v6954_v9, 8.507059e+37 }
 0x8e6   : > { %v6996_v16 = vpack.c.bf16 %v6984_v17, %v6983_v26  ;;  %v6932_v44 = vsub.f32 1.0, %v6931_v62  ;;  %v6957_v5 = vor.u32 1.1754944e-38, %v6956_v37 }
 0x8e8   : > { %v6933_v24 = vmul.f32 %v7861_v46, %v6932_v44  ;;  %7499 = vmatmul.msk.bf16.gmra.mxu0 %vm5104_vm14, %v6996_v16 }
 0x8e9   : > { %v7863_v41 = vpop.eup %7862 }
 0x8ea   : > { %v7048_v53 = vpop.f32.mrf.mxu0  ;;  %v6934_v8 = vadd.f32 %v7861_v46, %v6933_v24  ;;  %v6946_v33 = vmul.f32 %v7863_v41, %v6778_v60  ;;  %vm6951_vm6 = vweird.f32 %v7863_v41 }
 0x8eb   : > { %v7049_v29 = vadd.f32 %v11242_v21, %v7048_v53  ;;  %vm6952_vm9 = vmor %vm6950_vm3, %vm6951_vm6 }
 0x8ec   : > { %v6947_v38 = vsub.f32 1.0, %v6946_v33  ;;  %v6938_v36 = vsel %vm6937_vm0, %v7861_v46, %v6934_v8 }
 0x8ed   : > { %7079 = vst [vmem:[%s11248_s26 + $0x10] sm:$0xff] %v7049_v29  ;;  %v6943_v27 = vsel %vm6940_vm15, %v6942_v56, %v6938_v36 }
 0x8ee   : > { %v6948_v7 = vmul.f32 %v7863_v41, %v6947_v38  ;;  %v6985_v3 = vmul.f32 %v6943_v27, %v11227_v28 }
 0x8f0   : > { %v6949_v57 = vadd.f32 %v7863_v41, %v6948_v7 }
 0x8f2   : > { %v7050_v42 = vpop.f32.mrf.mxu0  ;;  %v6953_v61 = vsel %vm6952_vm9, %v7863_v41, %v6949_v57 }
 0x8f3   : > { %v7051_v39 = vadd.f32 %v11242_v21, %v7050_v42  ;;  %v6958_v13 = vsel %vm6955_vm13, %v6957_v5, %v6953_v61 }
 0x8f4   : > { %v6986_v40 = vmul.f32 %v6958_v13, %v11237_v1 }
 0x8f5   : > { %7080 = vst [vmem:[%s11248_s26 + $0x18] sm:$0xff] %v7051_v39 }
 0x8f6   : > { %v6997_v19 = vpack.c.bf16 %v6986_v40, %v6985_v3 }
 0x8f8   : > { %7500 = vmatmul.msk.bf16.gmra.mxu0 %vm5104_vm14, %v6997_v19 }
 0x8fc   : > { %v7053_v31 = vpop.f32.mrf.mxu0 }
 0x8fd   : > { %v7054_v14 = vadd.f32 %v11242_v21, %v7053_v31 }
 0x8ff   : > { %7081 = vst [vmem:[%s11248_s26 + $0x20] sm:$0xff] %v7054_v14 }
 0x904   : > { %v7055_v48 = vpop.f32.mrf.mxu0 }
 0x905   : > { %v7056_v63 = vadd.f32 %v11242_v21, %v7055_v48 }
 0x907   : > { %7082 = vst [vmem:[%s11248_s26 + $0x28] sm:$0xff] %v7056_v63 }
 0x927   : > { %v6696_v20 = vpop.f32.mrf.mxu3 }
 0x928   : > { %v6712_v4 = vadd.f32 %v6696_v20, %v10912_v55 }
 0x92a   : > { %v6727_v58 = vadd.f32 %v11123_v34, %v6712_v4 }
 0x92c   : > { %v7486_v22 = vmul.f32 -1.442695, %v6727_v58 }
 0x92e   : > { %7864 = vpow2.f32 %v7486_v22 }
 0x92f   : > { %v6698_v28 = vpop.f32.mrf.mxu3 }
 0x934   : > { %v7865_v1 = vpop.eup %7864 }
 0x935   : > { %v6779_v15 = vadd.f32 1.0, %v7865_v1 }
 0x937   : > { %7866 = vrcp.f32 %v6779_v15  ;;  %v6971_v0 = vand.u32 2147483648, %v6779_v15  ;;  %v6969_v52 = vand.u32 2147483647, %v6779_v15  ;;  %vm6965_vm7 = vweird.f32 %v6779_v15 }
 0x939   : > { %v6972_v55 = vor.u32 1.1754944e-38, %v6971_v0  ;;  %vm6970_vm12 = vcmp.eq.f32.partialorder %v6969_v52, 8.507059e+37 }
 0x93d   : > { %v7867_v49 = vpop.eup %7866 }
 0x93e   : > { %v6961_v35 = vmul.f32 %v7867_v49, %v6779_v15  ;;  %vm6966_vm10 = vweird.f32 %v7867_v49 }
 0x93f   : > { %vm6967_vm2 = vmor %vm6965_vm7, %vm6966_vm10 }
 0x940   : > { %v6962_v45 = vsub.f32 1.0, %v6961_v35 }
 0x942   : > { %v6963_v32 = vmul.f32 %v7867_v49, %v6962_v45 }
 0x944   : > { %v6964_v12 = vadd.f32 %v7867_v49, %v6963_v32 }
 0x946   : > { %v6968_v34 = vsel %vm6967_vm2, %v7867_v49, %v6964_v12 }
 0x947   : > { %v6973_v51 = vsel %vm6970_vm12, %v6972_v55, %v6968_v34 }
 0x948   : > { %v6987_v30 = vmul.f32 %v6973_v51, %v6727_v58 }
 0x94a   : > { %v6998_v23 = vpack.c.bf16 %v6987_v30, %v6987_v30 }
 0x94c   : > { %7501 = vmatmul.msk.bf16.gmra.mxu0 %vm5104_vm14, %v6998_v23 }
 0x955   : > { %v7058_v50 = vpop.f32.mrf.mxu0 }
 0x956   : > { %v7059_v2 = vadd.f32 %v11242_v21, %v7058_v50 }
 0x958   : > { %7083 = vst [vmem:[%s11248_s26 + $0x30] sm:$0xff] %v7059_v2 }
 0x95d   : > { %v7060_v10 = vpop.f32.mrf.mxu0 }
 0x95e   : > { %v7061_v43 = vadd.f32 %v11242_v21, %v7060_v10 }
 0x960   : > { %7084 = vst [vmem:[%s11248_s26 + $0x38] sm:$0xff] %v7061_v43 }
 0x965   : > { %v7063_v54 = vpop.f32.mrf.mxu0 }
 0x966   : > { %v7064_v6 = vadd.f32 %v11242_v21, %v7063_v54 }
 0x968   : > { %7085 = vst [vmem:[%s11248_s26 + $0x40] sm:$0xff] %v7064_v6 }
 0x96d   : > { %v7065_v60 = vpop.f32.mrf.mxu0 }
 0x96e   : > { %v7066_v59 = vadd.f32 %v11242_v21, %v7065_v60 }
 0x970   : > { %7086 = vst [vmem:[%s11248_s26 + $0x48] sm:$0xff] %v7066_v59 }
 0x975   : > { %v7068_v47 = vpop.f32.mrf.mxu0 }
 0x976   : > { %v7069_v46 = vadd.f32 %v11242_v21, %v7068_v47 }
 0x978   : > { %7087 = vst [vmem:[%s11248_s26 + $0x50] sm:$0xff] %v7069_v46 }
 0x97d   : > { %v7070_v25 = vpop.f32.mrf.mxu0 }
 0x97e   : > { %v7071_v26 = vadd.f32 %v11242_v21, %v7070_v25 }
 0x980   : > { %7088 = vst [vmem:[%s11248_s26 + $0x58] sm:$0xff] %v7071_v26 }
 0x9c9   : > { %v7073_v17 = vpop.f32.mrf.mxu0 }
 0x9ca   : > { %v7074_v62 = vadd.f32 %v11242_v21, %v7073_v17 }
 0x9cc   : > { %7089 = vst [vmem:[%s11248_s26 + $0x60] sm:$0xff] %v7074_v62 }
 0x9cd   : > { %7898 = shalt.err (!%p7895_p3)
}
 0x9ce   : > { %s7943_s25 = smov 128   ;;  %s7944_s26 = smov 8  }
 0x9cf   : > { %7542 = dma.vmem_to_hbm [thread:$0]  (%p8033_p5), %s7104_s16, 1664, %s7106_s17, %s7091_s21, %s7943_s25, %s7943_s25, %s7944_s26  }
 0x9d1   : > { %v7075_v21 = vpop.f32.mrf.mxu0 }
 0x9d2 PF: > { %p7548_p4 = scmp.ge.s32.totalorder %s7933_s12, 2  ;;  %s7120_s14 = sand.u32 1, %s7921_s30  }
 0x9d3   : > { %s7121_s22 = scalar_lea.sflag [#allocation3], %s7120_s14 }
 0x9d4   : > { %p7545_p7 = pnand %p7548_p4, %p8037_p6 }
 0x9d6   : > { %p7546_p8 = pneg %p7545_p7 }
 0x9d8   : > { %7916 = dma.done.wait (%p7546_p8), %s7121_s22, 1664  }
 0x9d9   : > { %7918 = vsyncadd (%p7546_p8), %s7121_s22, 4294965632  ;;  %p19_p9 = scmp.ge.s32.totalorder %s8020_s15, 4   ;;  %s11722_s30 = smov %s7925_s10 }
 0x9da   : > { %s11723_s10 = smov %s7929_s11  ;;  %s11724_s11 = smov %s8031_s18 }
 0x9db   : > { %s11725_s12 = smov %s8020_s15  ;;  %21 = sbr.rel (!%p19_p9) target bundleno = 3 (0x3), region = 94 }
 0x9e0   :  { %7127 = vsyncpa [#allocation3], 1 }
 0x9e1   :  { %7129 = vsyncpa [#allocation3 + $0x1], 1 }

</bundles_post_ra>
